<compile_context>
chip_gen: v7x
topology: tpu7x:2x2x1
jax: 0.10.0
libtpu: 0.0.40
codegen_flags: <defaults>
</compile_context>

<pallas_src>
import functools

import jax
import jax.numpy as jnp
from jax.experimental import pallas as pl
from jax.experimental.pallas import tpu as pltpu


def _dir_gat_kernel(adj_row_ref, adj_col_ref,
                    s1_ref, d1_ref, h1_ref,
                    s2_ref, d2_ref, h2_ref,
                    bias_ref, o_ref,
                    *, alpha, negative_slope, heads, out_per_head):
    # Edge masks for this block of query (output) nodes.
    # rows of adj   -> incoming edges  (conv_src_to_dst)
    # cols of adj^T -> outgoing edges  (conv_dst_to_src), flipped in-kernel.
    m_fwd = adj_row_ref[...].astype(jnp.float32) > 0.0            # [TM, N]
    m_rev = adj_col_ref[...].astype(jnp.float32).T > 0.0          # [TM, N]

    s1 = s1_ref[...]        # [H, N]  per-source attention term (src->dst conv)
    d1 = d1_ref[...]        # [TM, H] per-target attention term
    s2 = s2_ref[...]        # [H, N]  (dst->src conv)
    d2 = d2_ref[...]        # [TM, H]
    bias = bias_ref[...]    # [1, H*C] combined ((1-a)*b1 + a*b2)

    neg = jnp.float32(-1e30)

    def attend(s_t, d_t, h_ref, mask, h):
        # Attention logits for head h over all source nodes: [TM, N].
        logits = d_t[:, h:h + 1] + s_t[h:h + 1, :]
        logits = jnp.where(logits > 0, logits, negative_slope * logits)
        logits = jnp.where(mask, logits, neg)
        mx = jnp.max(logits, axis=-1, keepdims=True)
        p = jnp.exp(logits - mx)
        p = p * pl.reciprocal(jnp.sum(p, axis=-1, keepdims=True), approx=True)
        # Weighted sum of projected source features (bf16 operands, f32 acc).
        return jnp.dot(p.astype(h_ref.dtype), h_ref[h],
                       preferred_element_type=jnp.float32)        # [TM, C]

    c = out_per_head
    for h in range(heads):                                        # static unroll
        o_fwd = attend(s1, d1, h1_ref, m_fwd, h)   # conv_src_to_dst, head h
        o_rev = attend(s2, d2, h2_ref, m_rev, h)   # conv_dst_to_src, head h
        blended = ((1.0 - alpha) * o_fwd + alpha * o_rev
                   + bias[:, h * c:(h + 1) * c])
        o_ref[:, h * c:(h + 1) * c] = blended.astype(o_ref.dtype)


def _build_in_adjacency(edge_index, num_nodes):
    """Dense in-adjacency with self loops: adj[t, s] = 1 iff edge s->t or s==t."""
    src, dst = edge_index[0], edge_index[1]
    adj = jnp.zeros((num_nodes, num_nodes), jnp.float32).at[dst, src].set(1.0)
    return jnp.maximum(adj, jnp.eye(num_nodes, dtype=jnp.float32))


def dir_gat_forward(x, edge_index, params, *, alpha, heads, out_per_head,
                    block_rows=128, negative_slope=0.2):
    """DirGATConv forward (PyG GATConv defaults: concat heads, add_self_loops,
    LeakyReLU(0.2), no attention dropout).  Returns [N, heads*out_per_head]."""
    w1, a_src1, a_dst1, b1, w2, a_src2, a_dst2, b2 = params
    n, _ = x.shape
    hc = heads * out_per_head

    tm = min(block_rows, n)
    assert n % tm == 0 and tm % 8 == 0
    # Lane-dim tiling constraint for the column block of the adjacency.
    assert tm % 128 == 0 or tm == n

    # Single dense adjacency, bf16 (0/1 exact; halves N^2 HBM traffic).
    adj = _build_in_adjacency(edge_index, n).astype(jnp.bfloat16)

    # Project once; precompute per-node attention score halves (f32).
    def prep(w, a_src, a_dst):
        hfeat = (x @ w.T).reshape(n, heads, out_per_head)                  # [N,H,C]
        s = jnp.einsum('nhc,hc->hn', hfeat, a_src.reshape(heads, out_per_head))
        d = jnp.einsum('nhc,hc->nh', hfeat, a_dst.reshape(heads, out_per_head))
        hk = jnp.transpose(hfeat, (1, 0, 2)).astype(jnp.bfloat16)          # [H,N,C]
        return s.astype(jnp.float32), d.astype(jnp.float32), hk

    s1, d1, h1 = prep(w1, a_src1, a_dst1)
    s2, d2, h2 = prep(w2, a_src2, a_dst2)

    # Fold the direction blend into one bias.
    bias = ((1.0 - alpha) * b1 + alpha * b2).reshape(1, hc).astype(jnp.float32)

    kernel = functools.partial(
        _dir_gat_kernel, alpha=float(alpha), negative_slope=float(negative_slope),
        heads=heads, out_per_head=out_per_head)

    block_bytes = (2 * tm * n * 2                      # adj row + col blocks (bf16)
                   + 2 * heads * n * 4                 # s1, s2
                   + 2 * tm * heads * 4                # d1, d2 blocks
                   + 2 * heads * n * out_per_head * 2  # h1, h2 (bf16)
                   + hc * 4 + tm * hc * 4)             # bias + output block
    vmem_limit = int(min(48 * 1024 * 1024, max(8 * 1024 * 1024, 4 * block_bytes)))

    return pl.pallas_call(
        kernel,
        out_shape=jax.ShapeDtypeStruct((n, hc), jnp.float32),
        grid=(n // tm,),
        in_specs=[
            pl.BlockSpec((tm, n), lambda i: (i, 0)),                       # adj rows
            pl.BlockSpec((n, tm), lambda i: (0, i)),                       # adj cols
            pl.BlockSpec((heads, n), lambda i: (0, 0)),                    # s1
            pl.BlockSpec((tm, heads), lambda i: (i, 0)),                   # d1
            pl.BlockSpec((heads, n, out_per_head), lambda i: (0, 0, 0)),   # h1
            pl.BlockSpec((heads, n), lambda i: (0, 0)),                    # s2
            pl.BlockSpec((tm, heads), lambda i: (i, 0)),                   # d2
            pl.BlockSpec((heads, n, out_per_head), lambda i: (0, 0, 0)),   # h2
            pl.BlockSpec((1, hc), lambda i: (0, 0)),                       # bias
        ],
        out_specs=pl.BlockSpec((tm, hc), lambda i: (i, 0)),
        compiler_params=pltpu.CompilerParams(
            dimension_semantics=("parallel",),
            vmem_limit_bytes=vmem_limit),
    )(adj, adj, s1, d1, h1, s2, d2, h2, bias)


# ----------------------------- pure-JAX reference -----------------------------

def _dense_gat_reference(x, mask, w, a_src, a_dst, bias, heads, c, slope):
    n = x.shape[0]
    hfeat = (x @ w.T).reshape(n, heads, c)
    s = jnp.einsum('nhc,hc->nh', hfeat, a_src.reshape(heads, c))   # per-source
    d = jnp.einsum('nhc,hc->nh', hfeat, a_dst.reshape(heads, c))   # per-target
    logits = s[None, :, :] + d[:, None, :]                         # [t, s, h]
    logits = jnp.where(logits > 0, logits, slope * logits)
    logits = jnp.where(mask[:, :, None] > 0, logits, -1e30)
    attn = jax.nn.softmax(logits, axis=1)
    out = jnp.einsum('tsh,shc->thc', attn, hfeat).reshape(n, heads * c)
    return out + bias


def dir_gat_reference(x, edge_index, params, *, alpha, heads, out_per_head,
                      negative_slope=0.2):
    w1, a_src1, a_dst1, b1, w2, a_src2, a_dst2, b2 = params
    n = x.shape[0]
    adj = _build_in_adjacency(edge_index, n)
    out_fwd = _dense_gat_reference(x, adj, w1, a_src1, a_dst1, b1,
                                   heads, out_per_head, negative_slope)
    out_rev = _dense_gat_reference(x, adj.T, w2, a_src2, a_dst2, b2,
                                   heads, out_per_head, negative_slope)
    return (1.0 - alpha) * out_fwd + alpha * out_rev


if __name__ == "__main__":
    num_nodes = 256
    input_dim = 64
    heads = 4
    out_per_head = 32          # heads * out_per_head = 128 -> lane-dense output
    num_edges = 2048
    alpha = 0.6

    key = jax.random.PRNGKey(0)
    kx, ks, kd, kp = jax.random.split(key, 4)
    x = jax.random.normal(kx, (num_nodes, input_dim), jnp.float32)
    src = jax.random.randint(ks, (num_edges,), 0, num_nodes)
    dst = jax.random.randint(kd, (num_edges,), 0, num_nodes)
    edge_index = jnp.stack([src, dst], axis=0)

    hc = heads * out_per_head
    kws = jax.random.split(kp, 8)

    def glorot(k, shape, fan_in, fan_out):
        lim = (6.0 / (fan_in + fan_out)) ** 0.5
        return jax.random.uniform(k, shape, jnp.float32, -lim, lim)

    params = (
        glorot(kws[0], (hc, input_dim), input_dim, hc),                 # W (src->dst)
        glorot(kws[1], (1, heads, out_per_head), out_per_head, 1),      # att_src1
        glorot(kws[2], (1, heads, out_per_head), out_per_head, 1),      # att_dst1
        jax.random.uniform(kws[3], (hc,), jnp.float32, -0.1, 0.1),      # b1
        glorot(kws[4], (hc, input_dim), input_dim, hc),                 # W (dst->src)
        glorot(kws[5], (1, heads, out_per_head), out_per_head, 1),      # att_src2
        glorot(kws[6], (1, heads, out_per_head), out_per_head, 1),      # att_dst2
        jax.random.uniform(kws[7], (hc,), jnp.float32, -0.1, 0.1),      # b2
    )

    out = dir_gat_forward(x, edge_index, params, alpha=alpha, heads=heads,
                          out_per_head=out_per_head, block_rows=128)
    out = jax.block_until_ready(out)

    ref = dir_gat_reference(x, edge_index, params, alpha=alpha, heads=heads,
                            out_per_head=out_per_head)

    assert out.shape == (num_nodes, hc)
    max_err = float(jnp.max(jnp.abs(out - ref)))
    # bf16 value / attention-weight path -> loosened tolerance (f32 accumulation).
    assert jnp.allclose(out, ref, atol=2e-2, rtol=2e-2), (
        f"mismatch vs reference, max abs err = {max_err}")
    print("KERNEL_OK")
</pallas_src>

<mosaic_0001>
module attributes {stable_mosaic.version = 11 : i64} {
  func.func @_dir_gat_kernel(%arg0: i32, %arg1: memref<128x256xbf16, #tpu.memory_space<vmem>>, %arg2: memref<256x128xbf16, #tpu.memory_space<vmem>>, %arg3: memref<4x256xf32, #tpu.memory_space<vmem>>, %arg4: memref<128x4xf32, #tpu.memory_space<vmem>>, %arg5: memref<4x256x32xbf16, #tpu.memory_space<vmem>>, %arg6: memref<4x256xf32, #tpu.memory_space<vmem>>, %arg7: memref<128x4xf32, #tpu.memory_space<vmem>>, %arg8: memref<4x256x32xbf16, #tpu.memory_space<vmem>>, %arg9: memref<1x128xf32, #tpu.memory_space<vmem>>, %arg10: memref<128x128xf32, #tpu.memory_space<vmem>>) attributes {dimension_semantics = [#tpu.dimension_semantics<parallel>], iteration_bounds = array<i64: 2>, scalar_prefetch = 0 : i64, scratch_operands = 0 : i64, tpu.core_type = #tpu.core_type<tc>, window_params = [{transform_indices = @transform_0, window_bounds = array<i64: 128, 256>}, {transform_indices = @transform_1, window_bounds = array<i64: 256, 128>}, {pipeline_mode = #tpu.pipeline_mode<synchronous>, transform_indices = @transform_2, window_bounds = array<i64: 4, 256>}, {transform_indices = @transform_3, window_bounds = array<i64: 128, 4>}, {pipeline_mode = #tpu.pipeline_mode<synchronous>, transform_indices = @transform_4, window_bounds = array<i64: 4, 256, 32>}, {pipeline_mode = #tpu.pipeline_mode<synchronous>, transform_indices = @transform_5, window_bounds = array<i64: 4, 256>}, {transform_indices = @transform_6, window_bounds = array<i64: 128, 4>}, {pipeline_mode = #tpu.pipeline_mode<synchronous>, transform_indices = @transform_7, window_bounds = array<i64: 4, 256, 32>}, {pipeline_mode = #tpu.pipeline_mode<synchronous>, transform_indices = @transform_8, window_bounds = array<i64: 1, 128>}, {transform_indices = @transform_9, window_bounds = array<i64: 128, 128>}]} {
    %c0 = arith.constant 0 : index
    %c0_0 = arith.constant 0 : index
    %0 = vector.load %arg1[%c0, %c0_0] : memref<128x256xbf16, #tpu.memory_space<vmem>>, vector<128x256xbf16>
    %1 = arith.extf %0 : vector<128x256xbf16> to vector<128x256xf32>
    %cst = arith.constant 0.000000e+00 : f32
    %2 = vector.broadcast %cst : f32 to vector<128x256xf32>
    %3 = arith.cmpf ogt, %1, %2 : vector<128x256xf32>
    %c0_1 = arith.constant 0 : index
    %c0_2 = arith.constant 0 : index
    %4 = vector.load %arg2[%c0_1, %c0_2] : memref<256x128xbf16, #tpu.memory_space<vmem>>, vector<256x128xbf16>
    %5 = arith.extf %4 : vector<256x128xbf16> to vector<256x128xf32>
    %6 = tpu.transpose %5, [1, 0] : vector<256x128xf32> -> vector<128x256xf32>
    %cst_3 = arith.constant 0.000000e+00 : f32
    %7 = vector.broadcast %cst_3 : f32 to vector<128x256xf32>
    %8 = arith.cmpf ogt, %6, %7 : vector<128x256xf32>
    %c0_4 = arith.constant 0 : index
    %c0_5 = arith.constant 0 : index
    %9 = vector.load %arg3[%c0_4, %c0_5] : memref<4x256xf32, #tpu.memory_space<vmem>>, vector<4x256xf32>
    %c0_6 = arith.constant 0 : index
    %c0_7 = arith.constant 0 : index
    %10 = vector.load %arg4[%c0_6, %c0_7] : memref<128x4xf32, #tpu.memory_space<vmem>>, vector<128x4xf32>
    %c0_8 = arith.constant 0 : index
    %c0_9 = arith.constant 0 : index
    %11 = vector.load %arg6[%c0_8, %c0_9] : memref<4x256xf32, #tpu.memory_space<vmem>>, vector<4x256xf32>
    %c0_10 = arith.constant 0 : index
    %c0_11 = arith.constant 0 : index
    %12 = vector.load %arg7[%c0_10, %c0_11] : memref<128x4xf32, #tpu.memory_space<vmem>>, vector<128x4xf32>
    %c0_12 = arith.constant 0 : index
    %c0_13 = arith.constant 0 : index
    %13 = vector.load %arg9[%c0_12, %c0_13] : memref<1x128xf32, #tpu.memory_space<vmem>>, vector<1x128xf32>
    %14 = vector.extract_strided_slice %10 {offsets = [0, 0], sizes = [128, 1], strides = [1, 1]} : vector<128x4xf32> to vector<128x1xf32>
    %15 = vector.extract_strided_slice %9 {offsets = [0, 0], sizes = [1, 256], strides = [1, 1]} : vector<4x256xf32> to vector<1x256xf32>
    %16 = vector.broadcast %14 : vector<128x1xf32> to vector<128x256xf32>
    %17 = vector.broadcast %15 : vector<1x256xf32> to vector<128x256xf32>
    %18 = arith.addf %16, %17 : vector<128x256xf32>
    %cst_14 = arith.constant 0.000000e+00 : f32
    %19 = vector.broadcast %cst_14 : f32 to vector<128x256xf32>
    %20 = arith.cmpf ogt, %18, %19 : vector<128x256xf32>
    %cst_15 = arith.constant 2.000000e-01 : f32
    %21 = vector.broadcast %cst_15 : f32 to vector<128x256xf32>
    %22 = arith.mulf %21, %18 : vector<128x256xf32>
    %23 = arith.select %20, %18, %22 : vector<128x256xi1>, vector<128x256xf32>
    %cst_16 = arith.constant -1.000000e+30 : f32
    %24 = vector.broadcast %cst_16 : f32 to vector<128x256xf32>
    %25 = arith.select %3, %23, %24 : vector<128x256xi1>, vector<128x256xf32>
    %cst_17 = arith.constant dense<0xFF800000> : vector<128xf32>
    %26 = vector.multi_reduction <maximumf>, %25, %cst_17 [1] : vector<128x256xf32> to vector<128xf32>
    %27 = vector.shape_cast %26 : vector<128xf32> to vector<128x1xf32>
    %28 = vector.broadcast %27 : vector<128x1xf32> to vector<128x256xf32>
    %29 = arith.subf %25, %28 : vector<128x256xf32>
    %30 = math.exp %29 : vector<128x256xf32>
    %cst_18 = arith.constant dense<0.000000e+00> : vector<128xf32>
    %31 = vector.multi_reduction <add>, %30, %cst_18 [1] : vector<128x256xf32> to vector<128xf32>
    %32 = vector.shape_cast %31 : vector<128xf32> to vector<128x1xf32>
    %33 = tpu.reciprocal %32 {approx = true} : vector<128x1xf32> -> vector<128x1xf32>
    %34 = vector.broadcast %33 : vector<128x1xf32> to vector<128x256xf32>
    %35 = arith.mulf %30, %34 : vector<128x256xf32>
    %36 = arith.truncf %35 : vector<128x256xf32> to vector<128x256xbf16>
    %c0_19 = arith.constant 0 : index
    %c0_20 = arith.constant 0 : index
    %c0_21 = arith.constant 0 : index
    %37 = vector.load %arg5[%c0_19, %c0_20, %c0_21] : memref<4x256x32xbf16, #tpu.memory_space<vmem>>, vector<1x256x32xbf16>
    %38 = vector.shape_cast %37 : vector<1x256x32xbf16> to vector<256x32xbf16>
    %cst_22 = arith.constant dense<0.000000e+00> : vector<128x32xf32>
    %39 = tpu.matmul %36, %38, %cst_22 {dimension_numbers = #tpu.dot_dimension_numbers<[1], [0], [0], [1], [0, 0, 1, 1], [], []>} : vector<128x256xbf16>, vector<256x32xbf16>, vector<128x32xf32> -> vector<128x32xf32>
    %40 = vector.extract_strided_slice %12 {offsets = [0, 0], sizes = [128, 1], strides = [1, 1]} : vector<128x4xf32> to vector<128x1xf32>
    %41 = vector.extract_strided_slice %11 {offsets = [0, 0], sizes = [1, 256], strides = [1, 1]} : vector<4x256xf32> to vector<1x256xf32>
    %42 = vector.broadcast %40 : vector<128x1xf32> to vector<128x256xf32>
    %43 = vector.broadcast %41 : vector<1x256xf32> to vector<128x256xf32>
    %44 = arith.addf %42, %43 : vector<128x256xf32>
    %cst_23 = arith.constant 0.000000e+00 : f32
    %45 = vector.broadcast %cst_23 : f32 to vector<128x256xf32>
    %46 = arith.cmpf ogt, %44, %45 : vector<128x256xf32>
    %cst_24 = arith.constant 2.000000e-01 : f32
    %47 = vector.broadcast %cst_24 : f32 to vector<128x256xf32>
    %48 = arith.mulf %47, %44 : vector<128x256xf32>
    %49 = arith.select %46, %44, %48 : vector<128x256xi1>, vector<128x256xf32>
    %cst_25 = arith.constant -1.000000e+30 : f32
    %50 = vector.broadcast %cst_25 : f32 to vector<128x256xf32>
    %51 = arith.select %8, %49, %50 : vector<128x256xi1>, vector<128x256xf32>
    %cst_26 = arith.constant dense<0xFF800000> : vector<128xf32>
    %52 = vector.multi_reduction <maximumf>, %51, %cst_26 [1] : vector<128x256xf32> to vector<128xf32>
    %53 = vector.shape_cast %52 : vector<128xf32> to vector<128x1xf32>
    %54 = vector.broadcast %53 : vector<128x1xf32> to vector<128x256xf32>
    %55 = arith.subf %51, %54 : vector<128x256xf32>
    %56 = math.exp %55 : vector<128x256xf32>
    %cst_27 = arith.constant dense<0.000000e+00> : vector<128xf32>
    %57 = vector.multi_reduction <add>, %56, %cst_27 [1] : vector<128x256xf32> to vector<128xf32>
    %58 = vector.shape_cast %57 : vector<128xf32> to vector<128x1xf32>
    %59 = tpu.reciprocal %58 {approx = true} : vector<128x1xf32> -> vector<128x1xf32>
    %60 = vector.broadcast %59 : vector<128x1xf32> to vector<128x256xf32>
    %61 = arith.mulf %56, %60 : vector<128x256xf32>
    %62 = arith.truncf %61 : vector<128x256xf32> to vector<128x256xbf16>
    %c0_28 = arith.constant 0 : index
    %c0_29 = arith.constant 0 : index
    %c0_30 = arith.constant 0 : index
    %63 = vector.load %arg8[%c0_28, %c0_29, %c0_30] : memref<4x256x32xbf16, #tpu.memory_space<vmem>>, vector<1x256x32xbf16>
    %64 = vector.shape_cast %63 : vector<1x256x32xbf16> to vector<256x32xbf16>
    %cst_31 = arith.constant dense<0.000000e+00> : vector<128x32xf32>
    %65 = tpu.matmul %62, %64, %cst_31 {dimension_numbers = #tpu.dot_dimension_numbers<[1], [0], [0], [1], [0, 0, 1, 1], [], []>} : vector<128x256xbf16>, vector<256x32xbf16>, vector<128x32xf32> -> vector<128x32xf32>
    %cst_32 = arith.constant 4.000000e-01 : f32
    %66 = vector.broadcast %cst_32 : f32 to vector<128x32xf32>
    %67 = arith.mulf %66, %39 : vector<128x32xf32>
    %cst_33 = arith.constant 6.000000e-01 : f32
    %68 = vector.broadcast %cst_33 : f32 to vector<128x32xf32>
    %69 = arith.mulf %68, %65 : vector<128x32xf32>
    %70 = arith.addf %67, %69 : vector<128x32xf32>
    %71 = vector.extract_strided_slice %13 {offsets = [0, 0], sizes = [1, 32], strides = [1, 1]} : vector<1x128xf32> to vector<1x32xf32>
    %72 = vector.broadcast %71 : vector<1x32xf32> to vector<128x32xf32>
    %73 = arith.addf %70, %72 : vector<128x32xf32>
    %c0_34 = arith.constant 0 : index
    %c0_35 = arith.constant 0 : index
    %74 = vector.load %arg10[%c0_34, %c0_35] : memref<128x128xf32, #tpu.memory_space<vmem>>, vector<128x32xf32>
    tpu.vector_store %arg10[%c0_34, %c0_35], %73 {strides = array<i32>} : memref<128x128xf32, #tpu.memory_space<vmem>>, vector<128x32xf32>,
    %75 = vector.extract_strided_slice %10 {offsets = [0, 1], sizes = [128, 1], strides = [1, 1]} : vector<128x4xf32> to vector<128x1xf32>
    %76 = vector.extract_strided_slice %9 {offsets = [1, 0], sizes = [1, 256], strides = [1, 1]} : vector<4x256xf32> to vector<1x256xf32>
    %77 = vector.broadcast %75 : vector<128x1xf32> to vector<128x256xf32>
    %78 = vector.broadcast %76 : vector<1x256xf32> to vector<128x256xf32>
    %79 = arith.addf %77, %78 : vector<128x256xf32>
    %cst_36 = arith.constant 0.000000e+00 : f32
    %80 = vector.broadcast %cst_36 : f32 to vector<128x256xf32>
    %81 = arith.cmpf ogt, %79, %80 : vector<128x256xf32>
    %cst_37 = arith.constant 2.000000e-01 : f32
    %82 = vector.broadcast %cst_37 : f32 to vector<128x256xf32>
    %83 = arith.mulf %82, %79 : vector<128x256xf32>
    %84 = arith.select %81, %79, %83 : vector<128x256xi1>, vector<128x256xf32>
    %cst_38 = arith.constant -1.000000e+30 : f32
    %85 = vector.broadcast %cst_38 : f32 to vector<128x256xf32>
    %86 = arith.select %3, %84, %85 : vector<128x256xi1>, vector<128x256xf32>
    %cst_39 = arith.constant dense<0xFF800000> : vector<128xf32>
    %87 = vector.multi_reduction <maximumf>, %86, %cst_39 [1] : vector<128x256xf32> to vector<128xf32>
    %88 = vector.shape_cast %87 : vector<128xf32> to vector<128x1xf32>
    %89 = vector.broadcast %88 : vector<128x1xf32> to vector<128x256xf32>
    %90 = arith.subf %86, %89 : vector<128x256xf32>
    %91 = math.exp %90 : vector<128x256xf32>
    %cst_40 = arith.constant dense<0.000000e+00> : vector<128xf32>
    %92 = vector.multi_reduction <add>, %91, %cst_40 [1] : vector<128x256xf32> to vector<128xf32>
    %93 = vector.shape_cast %92 : vector<128xf32> to vector<128x1xf32>
    %94 = tpu.reciprocal %93 {approx = true} : vector<128x1xf32> -> vector<128x1xf32>
    %95 = vector.broadcast %94 : vector<128x1xf32> to vector<128x256xf32>
    %96 = arith.mulf %91, %95 : vector<128x256xf32>
    %97 = arith.truncf %96 : vector<128x256xf32> to vector<128x256xbf16>
    %c1 = arith.constant 1 : index
    %c0_41 = arith.constant 0 : index
    %c0_42 = arith.constant 0 : index
    %98 = vector.load %arg5[%c1, %c0_41, %c0_42] : memref<4x256x32xbf16, #tpu.memory_space<vmem>>, vector<1x256x32xbf16>
    %99 = vector.shape_cast %98 : vector<1x256x32xbf16> to vector<256x32xbf16>
    %cst_43 = arith.constant dense<0.000000e+00> : vector<128x32xf32>
    %100 = tpu.matmul %97, %99, %cst_43 {dimension_numbers = #tpu.dot_dimension_numbers<[1], [0], [0], [1], [0, 0, 1, 1], [], []>} : vector<128x256xbf16>, vector<256x32xbf16>, vector<128x32xf32> -> vector<128x32xf32>
    %101 = vector.extract_strided_slice %12 {offsets = [0, 1], sizes = [128, 1], strides = [1, 1]} : vector<128x4xf32> to vector<128x1xf32>
    %102 = vector.extract_strided_slice %11 {offsets = [1, 0], sizes = [1, 256], strides = [1, 1]} : vector<4x256xf32> to vector<1x256xf32>
    %103 = vector.broadcast %101 : vector<128x1xf32> to vector<128x256xf32>
    %104 = vector.broadcast %102 : vector<1x256xf32> to vector<128x256xf32>
    %105 = arith.addf %103, %104 : vector<128x256xf32>
    %cst_44 = arith.constant 0.000000e+00 : f32
    %106 = vector.broadcast %cst_44 : f32 to vector<128x256xf32>
    %107 = arith.cmpf ogt, %105, %106 : vector<128x256xf32>
    %cst_45 = arith.constant 2.000000e-01 : f32
    %108 = vector.broadcast %cst_45 : f32 to vector<128x256xf32>
    %109 = arith.mulf %108, %105 : vector<128x256xf32>
    %110 = arith.select %107, %105, %109 : vector<128x256xi1>, vector<128x256xf32>
    %cst_46 = arith.constant -1.000000e+30 : f32
    %111 = vector.broadcast %cst_46 : f32 to vector<128x256xf32>
    %112 = arith.select %8, %110, %111 : vector<128x256xi1>, vector<128x256xf32>
    %cst_47 = arith.constant dense<0xFF800000> : vector<128xf32>
    %113 = vector.multi_reduction <maximumf>, %112, %cst_47 [1] : vector<128x256xf32> to vector<128xf32>
    %114 = vector.shape_cast %113 : vector<128xf32> to vector<128x1xf32>
    %115 = vector.broadcast %114 : vector<128x1xf32> to vector<128x256xf32>
    %116 = arith.subf %112, %115 : vector<128x256xf32>
    %117 = math.exp %116 : vector<128x256xf32>
    %cst_48 = arith.constant dense<0.000000e+00> : vector<128xf32>
    %118 = vector.multi_reduction <add>, %117, %cst_48 [1] : vector<128x256xf32> to vector<128xf32>
    %119 = vector.shape_cast %118 : vector<128xf32> to vector<128x1xf32>
    %120 = tpu.reciprocal %119 {approx = true} : vector<128x1xf32> -> vector<128x1xf32>
    %121 = vector.broadcast %120 : vector<128x1xf32> to vector<128x256xf32>
    %122 = arith.mulf %117, %121 : vector<128x256xf32>
    %123 = arith.truncf %122 : vector<128x256xf32> to vector<128x256xbf16>
    %c1_49 = arith.constant 1 : index
    %c0_50 = arith.constant 0 : index
    %c0_51 = arith.constant 0 : index
    %124 = vector.load %arg8[%c1_49, %c0_50, %c0_51] : memref<4x256x32xbf16, #tpu.memory_space<vmem>>, vector<1x256x32xbf16>
    %125 = vector.shape_cast %124 : vector<1x256x32xbf16> to vector<256x32xbf16>
    %cst_52 = arith.constant dense<0.000000e+00> : vector<128x32xf32>
    %126 = tpu.matmul %123, %125, %cst_52 {dimension_numbers = #tpu.dot_dimension_numbers<[1], [0], [0], [1], [0, 0, 1, 1], [], []>} : vector<128x256xbf16>, vector<256x32xbf16>, vector<128x32xf32> -> vector<128x32xf32>
    %cst_53 = arith.constant 4.000000e-01 : f32
    %127 = vector.broadcast %cst_53 : f32 to vector<128x32xf32>
    %128 = arith.mulf %127, %100 : vector<128x32xf32>
    %cst_54 = arith.constant 6.000000e-01 : f32
    %129 = vector.broadcast %cst_54 : f32 to vector<128x32xf32>
    %130 = arith.mulf %129, %126 : vector<128x32xf32>
    %131 = arith.addf %128, %130 : vector<128x32xf32>
    %132 = vector.extract_strided_slice %13 {offsets = [0, 32], sizes = [1, 32], strides = [1, 1]} : vector<1x128xf32> to vector<1x32xf32>
    %133 = vector.broadcast %132 : vector<1x32xf32> to vector<128x32xf32>
    %134 = arith.addf %131, %133 : vector<128x32xf32>
    %c0_55 = arith.constant 0 : index
    %c32 = arith.constant 32 : index
    %135 = vector.load %arg10[%c0_55, %c32] : memref<128x128xf32, #tpu.memory_space<vmem>>, vector<128x32xf32>
    tpu.vector_store %arg10[%c0_55, %c32], %134 {strides = array<i32>} : memref<128x128xf32, #tpu.memory_space<vmem>>, vector<128x32xf32>,
    %136 = vector.extract_strided_slice %10 {offsets = [0, 2], sizes = [128, 1], strides = [1, 1]} : vector<128x4xf32> to vector<128x1xf32>
    %137 = vector.extract_strided_slice %9 {offsets = [2, 0], sizes = [1, 256], strides = [1, 1]} : vector<4x256xf32> to vector<1x256xf32>
    %138 = vector.broadcast %136 : vector<128x1xf32> to vector<128x256xf32>
    %139 = vector.broadcast %137 : vector<1x256xf32> to vector<128x256xf32>
    %140 = arith.addf %138, %139 : vector<128x256xf32>
    %cst_56 = arith.constant 0.000000e+00 : f32
    %141 = vector.broadcast %cst_56 : f32 to vector<128x256xf32>
    %142 = arith.cmpf ogt, %140, %141 : vector<128x256xf32>
    %cst_57 = arith.constant 2.000000e-01 : f32
    %143 = vector.broadcast %cst_57 : f32 to vector<128x256xf32>
    %144 = arith.mulf %143, %140 : vector<128x256xf32>
    %145 = arith.select %142, %140, %144 : vector<128x256xi1>, vector<128x256xf32>
    %cst_58 = arith.constant -1.000000e+30 : f32
    %146 = vector.broadcast %cst_58 : f32 to vector<128x256xf32>
    %147 = arith.select %3, %145, %146 : vector<128x256xi1>, vector<128x256xf32>
    %cst_59 = arith.constant dense<0xFF800000> : vector<128xf32>
    %148 = vector.multi_reduction <maximumf>, %147, %cst_59 [1] : vector<128x256xf32> to vector<128xf32>
    %149 = vector.shape_cast %148 : vector<128xf32> to vector<128x1xf32>
    %150 = vector.broadcast %149 : vector<128x1xf32> to vector<128x256xf32>
    %151 = arith.subf %147, %150 : vector<128x256xf32>
    %152 = math.exp %151 : vector<128x256xf32>
    %cst_60 = arith.constant dense<0.000000e+00> : vector<128xf32>
    %153 = vector.multi_reduction <add>, %152, %cst_60 [1] : vector<128x256xf32> to vector<128xf32>
    %154 = vector.shape_cast %153 : vector<128xf32> to vector<128x1xf32>
    %155 = tpu.reciprocal %154 {approx = true} : vector<128x1xf32> -> vector<128x1xf32>
    %156 = vector.broadcast %155 : vector<128x1xf32> to vector<128x256xf32>
    %157 = arith.mulf %152, %156 : vector<128x256xf32>
    %158 = arith.truncf %157 : vector<128x256xf32> to vector<128x256xbf16>
    %c2 = arith.constant 2 : index
    %c0_61 = arith.constant 0 : index
    %c0_62 = arith.constant 0 : index
    %159 = vector.load %arg5[%c2, %c0_61, %c0_62] : memref<4x256x32xbf16, #tpu.memory_space<vmem>>, vector<1x256x32xbf16>
    %160 = vector.shape_cast %159 : vector<1x256x32xbf16> to vector<256x32xbf16>
    %cst_63 = arith.constant dense<0.000000e+00> : vector<128x32xf32>
    %161 = tpu.matmul %158, %160, %cst_63 {dimension_numbers = #tpu.dot_dimension_numbers<[1], [0], [0], [1], [0, 0, 1, 1], [], []>} : vector<128x256xbf16>, vector<256x32xbf16>, vector<128x32xf32> -> vector<128x32xf32>
    %162 = vector.extract_strided_slice %12 {offsets = [0, 2], sizes = [128, 1], strides = [1, 1]} : vector<128x4xf32> to vector<128x1xf32>
    %163 = vector.extract_strided_slice %11 {offsets = [2, 0], sizes = [1, 256], strides = [1, 1]} : vector<4x256xf32> to vector<1x256xf32>
    %164 = vector.broadcast %162 : vector<128x1xf32> to vector<128x256xf32>
    %165 = vector.broadcast %163 : vector<1x256xf32> to vector<128x256xf32>
    %166 = arith.addf %164, %165 : vector<128x256xf32>
    %cst_64 = arith.constant 0.000000e+00 : f32
    %167 = vector.broadcast %cst_64 : f32 to vector<128x256xf32>
    %168 = arith.cmpf ogt, %166, %167 : vector<128x256xf32>
    %cst_65 = arith.constant 2.000000e-01 : f32
    %169 = vector.broadcast %cst_65 : f32 to vector<128x256xf32>
    %170 = arith.mulf %169, %166 : vector<128x256xf32>
    %171 = arith.select %168, %166, %170 : vector<128x256xi1>, vector<128x256xf32>
    %cst_66 = arith.constant -1.000000e+30 : f32
    %172 = vector.broadcast %cst_66 : f32 to vector<128x256xf32>
    %173 = arith.select %8, %171, %172 : vector<128x256xi1>, vector<128x256xf32>
    %cst_67 = arith.constant dense<0xFF800000> : vector<128xf32>
    %174 = vector.multi_reduction <maximumf>, %173, %cst_67 [1] : vector<128x256xf32> to vector<128xf32>
    %175 = vector.shape_cast %174 : vector<128xf32> to vector<128x1xf32>
    %176 = vector.broadcast %175 : vector<128x1xf32> to vector<128x256xf32>
    %177 = arith.subf %173, %176 : vector<128x256xf32>
    %178 = math.exp %177 : vector<128x256xf32>
    %cst_68 = arith.constant dense<0.000000e+00> : vector<128xf32>
    %179 = vector.multi_reduction <add>, %178, %cst_68 [1] : vector<128x256xf32> to vector<128xf32>
    %180 = vector.shape_cast %179 : vector<128xf32> to vector<128x1xf32>
    %181 = tpu.reciprocal %180 {approx = true} : vector<128x1xf32> -> vector<128x1xf32>
    %182 = vector.broadcast %181 : vector<128x1xf32> to vector<128x256xf32>
    %183 = arith.mulf %178, %182 : vector<128x256xf32>
    %184 = arith.truncf %183 : vector<128x256xf32> to vector<128x256xbf16>
    %c2_69 = arith.constant 2 : index
    %c0_70 = arith.constant 0 : index
    %c0_71 = arith.constant 0 : index
    %185 = vector.load %arg8[%c2_69, %c0_70, %c0_71] : memref<4x256x32xbf16, #tpu.memory_space<vmem>>, vector<1x256x32xbf16>
    %186 = vector.shape_cast %185 : vector<1x256x32xbf16> to vector<256x32xbf16>
    %cst_72 = arith.constant dense<0.000000e+00> : vector<128x32xf32>
    %187 = tpu.matmul %184, %186, %cst_72 {dimension_numbers = #tpu.dot_dimension_numbers<[1], [0], [0], [1], [0, 0, 1, 1], [], []>} : vector<128x256xbf16>, vector<256x32xbf16>, vector<128x32xf32> -> vector<128x32xf32>
    %cst_73 = arith.constant 4.000000e-01 : f32
    %188 = vector.broadcast %cst_73 : f32 to vector<128x32xf32>
    %189 = arith.mulf %188, %161 : vector<128x32xf32>
    %cst_74 = arith.constant 6.000000e-01 : f32
    %190 = vector.broadcast %cst_74 : f32 to vector<128x32xf32>
    %191 = arith.mulf %190, %187 : vector<128x32xf32>
    %192 = arith.addf %189, %191 : vector<128x32xf32>
    %193 = vector.extract_strided_slice %13 {offsets = [0, 64], sizes = [1, 32], strides = [1, 1]} : vector<1x128xf32> to vector<1x32xf32>
    %194 = vector.broadcast %193 : vector<1x32xf32> to vector<128x32xf32>
    %195 = arith.addf %192, %194 : vector<128x32xf32>
    %c0_75 = arith.constant 0 : index
    %c64 = arith.constant 64 : index
    %196 = vector.load %arg10[%c0_75, %c64] : memref<128x128xf32, #tpu.memory_space<vmem>>, vector<128x32xf32>
    tpu.vector_store %arg10[%c0_75, %c64], %195 {strides = array<i32>} : memref<128x128xf32, #tpu.memory_space<vmem>>, vector<128x32xf32>,
    %197 = vector.extract_strided_slice %10 {offsets = [0, 3], sizes = [128, 1], strides = [1, 1]} : vector<128x4xf32> to vector<128x1xf32>
    %198 = vector.extract_strided_slice %9 {offsets = [3, 0], sizes = [1, 256], strides = [1, 1]} : vector<4x256xf32> to vector<1x256xf32>
    %199 = vector.broadcast %197 : vector<128x1xf32> to vector<128x256xf32>
    %200 = vector.broadcast %198 : vector<1x256xf32> to vector<128x256xf32>
    %201 = arith.addf %199, %200 : vector<128x256xf32>
    %cst_76 = arith.constant 0.000000e+00 : f32
    %202 = vector.broadcast %cst_76 : f32 to vector<128x256xf32>
    %203 = arith.cmpf ogt, %201, %202 : vector<128x256xf32>
    %cst_77 = arith.constant 2.000000e-01 : f32
    %204 = vector.broadcast %cst_77 : f32 to vector<128x256xf32>
    %205 = arith.mulf %204, %201 : vector<128x256xf32>
    %206 = arith.select %203, %201, %205 : vector<128x256xi1>, vector<128x256xf32>
    %cst_78 = arith.constant -1.000000e+30 : f32
    %207 = vector.broadcast %cst_78 : f32 to vector<128x256xf32>
    %208 = arith.select %3, %206, %207 : vector<128x256xi1>, vector<128x256xf32>
    %cst_79 = arith.constant dense<0xFF800000> : vector<128xf32>
    %209 = vector.multi_reduction <maximumf>, %208, %cst_79 [1] : vector<128x256xf32> to vector<128xf32>
    %210 = vector.shape_cast %209 : vector<128xf32> to vector<128x1xf32>
    %211 = vector.broadcast %210 : vector<128x1xf32> to vector<128x256xf32>
    %212 = arith.subf %208, %211 : vector<128x256xf32>
    %213 = math.exp %212 : vector<128x256xf32>
    %cst_80 = arith.constant dense<0.000000e+00> : vector<128xf32>
    %214 = vector.multi_reduction <add>, %213, %cst_80 [1] : vector<128x256xf32> to vector<128xf32>
    %215 = vector.shape_cast %214 : vector<128xf32> to vector<128x1xf32>
    %216 = tpu.reciprocal %215 {approx = true} : vector<128x1xf32> -> vector<128x1xf32>
    %217 = vector.broadcast %216 : vector<128x1xf32> to vector<128x256xf32>
    %218 = arith.mulf %213, %217 : vector<128x256xf32>
    %219 = arith.truncf %218 : vector<128x256xf32> to vector<128x256xbf16>
    %c3 = arith.constant 3 : index
    %c0_81 = arith.constant 0 : index
    %c0_82 = arith.constant 0 : index
    %220 = vector.load %arg5[%c3, %c0_81, %c0_82] : memref<4x256x32xbf16, #tpu.memory_space<vmem>>, vector<1x256x32xbf16>
    %221 = vector.shape_cast %220 : vector<1x256x32xbf16> to vector<256x32xbf16>
    %cst_83 = arith.constant dense<0.000000e+00> : vector<128x32xf32>
    %222 = tpu.matmul %219, %221, %cst_83 {dimension_numbers = #tpu.dot_dimension_numbers<[1], [0], [0], [1], [0, 0, 1, 1], [], []>} : vector<128x256xbf16>, vector<256x32xbf16>, vector<128x32xf32> -> vector<128x32xf32>
    %223 = vector.extract_strided_slice %12 {offsets = [0, 3], sizes = [128, 1], strides = [1, 1]} : vector<128x4xf32> to vector<128x1xf32>
    %224 = vector.extract_strided_slice %11 {offsets = [3, 0], sizes = [1, 256], strides = [1, 1]} : vector<4x256xf32> to vector<1x256xf32>
    %225 = vector.broadcast %223 : vector<128x1xf32> to vector<128x256xf32>
    %226 = vector.broadcast %224 : vector<1x256xf32> to vector<128x256xf32>
    %227 = arith.addf %225, %226 : vector<128x256xf32>
    %cst_84 = arith.constant 0.000000e+00 : f32
    %228 = vector.broadcast %cst_84 : f32 to vector<128x256xf32>
    %229 = arith.cmpf ogt, %227, %228 : vector<128x256xf32>
    %cst_85 = arith.constant 2.000000e-01 : f32
    %230 = vector.broadcast %cst_85 : f32 to vector<128x256xf32>
    %231 = arith.mulf %230, %227 : vector<128x256xf32>
    %232 = arith.select %229, %227, %231 : vector<128x256xi1>, vector<128x256xf32>
    %cst_86 = arith.constant -1.000000e+30 : f32
    %233 = vector.broadcast %cst_86 : f32 to vector<128x256xf32>
    %234 = arith.select %8, %232, %233 : vector<128x256xi1>, vector<128x256xf32>
    %cst_87 = arith.constant dense<0xFF800000> : vector<128xf32>
    %235 = vector.multi_reduction <maximumf>, %234, %cst_87 [1] : vector<128x256xf32> to vector<128xf32>
    %236 = vector.shape_cast %235 : vector<128xf32> to vector<128x1xf32>
    %237 = vector.broadcast %236 : vector<128x1xf32> to vector<128x256xf32>
    %238 = arith.subf %234, %237 : vector<128x256xf32>
    %239 = math.exp %238 : vector<128x256xf32>
    %cst_88 = arith.constant dense<0.000000e+00> : vector<128xf32>
    %240 = vector.multi_reduction <add>, %239, %cst_88 [1] : vector<128x256xf32> to vector<128xf32>
    %241 = vector.shape_cast %240 : vector<128xf32> to vector<128x1xf32>
    %242 = tpu.reciprocal %241 {approx = true} : vector<128x1xf32> -> vector<128x1xf32>
    %243 = vector.broadcast %242 : vector<128x1xf32> to vector<128x256xf32>
    %244 = arith.mulf %239, %243 : vector<128x256xf32>
    %245 = arith.truncf %244 : vector<128x256xf32> to vector<128x256xbf16>
    %c3_89 = arith.constant 3 : index
    %c0_90 = arith.constant 0 : index
    %c0_91 = arith.constant 0 : index
    %246 = vector.load %arg8[%c3_89, %c0_90, %c0_91] : memref<4x256x32xbf16, #tpu.memory_space<vmem>>, vector<1x256x32xbf16>
    %247 = vector.shape_cast %246 : vector<1x256x32xbf16> to vector<256x32xbf16>
    %cst_92 = arith.constant dense<0.000000e+00> : vector<128x32xf32>
    %248 = tpu.matmul %245, %247, %cst_92 {dimension_numbers = #tpu.dot_dimension_numbers<[1], [0], [0], [1], [0, 0, 1, 1], [], []>} : vector<128x256xbf16>, vector<256x32xbf16>, vector<128x32xf32> -> vector<128x32xf32>
    %cst_93 = arith.constant 4.000000e-01 : f32
    %249 = vector.broadcast %cst_93 : f32 to vector<128x32xf32>
    %250 = arith.mulf %249, %222 : vector<128x32xf32>
    %cst_94 = arith.constant 6.000000e-01 : f32
    %251 = vector.broadcast %cst_94 : f32 to vector<128x32xf32>
    %252 = arith.mulf %251, %248 : vector<128x32xf32>
    %253 = arith.addf %250, %252 : vector<128x32xf32>
    %254 = vector.extract_strided_slice %13 {offsets = [0, 96], sizes = [1, 32], strides = [1, 1]} : vector<1x128xf32> to vector<1x32xf32>
    %255 = vector.broadcast %254 : vector<1x32xf32> to vector<128x32xf32>
    %256 = arith.addf %253, %255 : vector<128x32xf32>
    %c0_95 = arith.constant 0 : index
    %c96 = arith.constant 96 : index
    %257 = vector.load %arg10[%c0_95, %c96] : memref<128x128xf32, #tpu.memory_space<vmem>>, vector<128x32xf32>
    tpu.vector_store %arg10[%c0_95, %c96], %256 {strides = array<i32>} : memref<128x128xf32, #tpu.memory_space<vmem>>, vector<128x32xf32>,
    return
  }
  func.func @transform_0(%arg0: i32) -> (i32, i32) {
    %c0_i32 = arith.constant 0 : i32
    %c0_i32_0 = arith.constant 0 : i32
    return %arg0, %c0_i32 : i32, i32
  }
  func.func @transform_1(%arg0: i32) -> (i32, i32) {
    %c0_i32 = arith.constant 0 : i32
    %c0_i32_0 = arith.constant 0 : i32
    return %c0_i32, %arg0 : i32, i32
  }
  func.func @transform_2(%arg0: i32) -> (i32, i32) {
    %c0_i32 = arith.constant 0 : i32
    %c0_i32_0 = arith.constant 0 : i32
    %c0_i32_1 = arith.constant 0 : i32
    return %c0_i32, %c0_i32_0 : i32, i32
  }
  func.func @transform_3(%arg0: i32) -> (i32, i32) {
    %c0_i32 = arith.constant 0 : i32
    %c0_i32_0 = arith.constant 0 : i32
    return %arg0, %c0_i32 : i32, i32
  }
  func.func @transform_4(%arg0: i32) -> (i32, i32, i32) {
    %c0_i32 = arith.constant 0 : i32
    %c0_i32_0 = arith.constant 0 : i32
    %c0_i32_1 = arith.constant 0 : i32
    %c0_i32_2 = arith.constant 0 : i32
    return %c0_i32, %c0_i32_0, %c0_i32_1 : i32, i32, i32
  }
  func.func @transform_5(%arg0: i32) -> (i32, i32) {
    %c0_i32 = arith.constant 0 : i32
    %c0_i32_0 = arith.constant 0 : i32
    %c0_i32_1 = arith.constant 0 : i32
    return %c0_i32, %c0_i32_0 : i32, i32
  }
  func.func @transform_6(%arg0: i32) -> (i32, i32) {
    %c0_i32 = arith.constant 0 : i32
    %c0_i32_0 = arith.constant 0 : i32
    return %arg0, %c0_i32 : i32, i32
  }
  func.func @transform_7(%arg0: i32) -> (i32, i32, i32) {
    %c0_i32 = arith.constant 0 : i32
    %c0_i32_0 = arith.constant 0 : i32
    %c0_i32_1 = arith.constant 0 : i32
    %c0_i32_2 = arith.constant 0 : i32
    return %c0_i32, %c0_i32_0, %c0_i32_1 : i32, i32, i32
  }
  func.func @transform_8(%arg0: i32) -> (i32, i32) {
    %c0_i32 = arith.constant 0 : i32
    %c0_i32_0 = arith.constant 0 : i32
    %c0_i32_1 = arith.constant 0 : i32
    return %c0_i32, %c0_i32_0 : i32, i32
  }
  func.func @transform_9(%arg0: i32) -> (i32, i32) {
    %c0_i32 = arith.constant 0 : i32
    %c0_i32_0 = arith.constant 0 : i32
    return %arg0, %c0_i32 : i32, i32
  }
}

</mosaic_0001>

<bundles_post_ra>
// kernel: tpu_custom_call.1
= control target key start
LH: loop header
LB: loop body
LE: loop exit
PB: predicated region body
PF: predicated region fallthrough
CT: control target
= control target key end

     0   :  { %14 = vsyncpa [#allocation4], 0  ;;  %s14645_s0 = inlined_call_operand.vmem [shape: bf16[256,256], index: 0, kind: input, shape index: {}]   ;;  %s14646_s1 = inlined_call_operand.vmem [shape: bf16[256,256], index: 1, kind: input, shape index: {}]   ;;  %s14647_s2 = inlined_call_operand.vmem [shape: f32[4,256], index: 2, kind: input, shape index: {}]   ;;  %s14648_s3 = inlined_call_operand.vmem [shape: f32[256,4], index: 3, kind: input, shape index: {}]   ;;  %s14649_s4 = inlined_call_operand.vmem [shape: bf16[4,256,32], index: 4, kind: input, shape index: {}]   ;;  %s14650_s5 = inlined_call_operand.vmem [shape: f32[4,256], index: 5, kind: input, shape index: {}]   ;;  %s14651_s6 = inlined_call_operand.vmem [shape: f32[256,4], index: 6, kind: input, shape index: {}]   ;;  %s14652_s7 = inlined_call_operand.vmem [shape: bf16[4,256,32], index: 7, kind: input, shape index: {}]   ;;  %s14653_s8 = inlined_call_operand.vmem [shape: f32[1,128], index: 8, kind: input, shape index: {}]   ;;  %s14654_s9 = inlined_call_operand.hbm [shape: f32[256,128], index: 9, kind: output, shape index: {}]  }
   0x1   :  { %16 = vsyncpa [#allocation4 + $0x1], 0  ;;  %s9525_s30 = smov 0   ;;  %s9527_s10 = smov 0  }
   0x2   :  { %s9529_s11 = smov 0   ;;  %s9531_s12 = smov 0  }
   0x3 LB: > { %s9546_s13 = sadd.s32 4294967295, %s9463_s12   ;;  %s7315_s14 = sadd.s32 4294967294, %s9463_s12   ;;  %s9463_s12 = sphi %s9531_s12, %s16279_s12   ;;  %s9459_s11 = sphi %s9529_s11, %s16278_s11   ;;  %s9455_s10 = sphi %s9527_s10, %s16277_s10   ;;  %s9451_s30 = sphi %s9525_s30, %s16276_s30  }
   0x4   : > { %s9550_s15 = sadd.s32 1, %s9463_s12   ;;  %s55_s16 = sadd.s32 1, %s9459_s11 }
   0x5   : > { %s52_s17 = ssub.s32 %s9463_s12, %s9550_s15  ;;  %p62_p0 = scmp.ne.s32.totalorder %s9459_s11, %s9455_s10 }
   0x6   : > { %p53_p1 = scmp.eq.s32.totalorder %s52_s17, 0  ;;  %p63_p2 = scmp.eq.s32.totalorder %s9463_s12, 0 }
   0x7   : > { %p249_p3 = scmp.eq.s32.totalorder %s9546_s13, 1  ;;  %p254_p4 = scmp.ne.s32.totalorder %s9455_s10, %s9451_s30 }
   0x8   : > { %s9562_s18 = scalar_select %p53_p1, %s9459_s11, %s55_s16  }
   0x9   : > { %p64_p5 = por %p63_p2, %p62_p0  ;;  %p9564_p6 = por %p249_p3, %p62_p0 }
   0xa   : > { %p255_p7 = scmp.eq.s32.totalorder %s7315_s14, 1  ;;  %p7317_p9 = scmp.ge.s32.totalorder %s9463_s12, 2 }
   0xc   : > { %p9568_p8 = por %p255_p7, %p254_p4  ;;  %286 = sbr.rel (%p7317_p9) target bundleno = 44 (0x2c), region = 36 }
  0x13   : > { %299 = sbr.rel (!%p64_p5) target bundleno = 44 (0x2c), region = 44  ;;  %s301_s21 = sand.u32 (%p64_p5), 1, %s9459_s11  }
  0x14   : > { %s7319_s22 = sshll.u32 (%p64_p5), %s9463_s12, 2  ;;  %s7318_s23 = sshll.u32 (%p64_p5), %s301_s21, 7 }
  0x15   : > { %s9580_s26 = scalar_lea.vmem (%p64_p5), %s14646_s1, %s7319_s22  ;;  %s9584_s27 = scalar_lea.vmem (%p64_p5), [#allocation2], %s7318_s23 }
  0x16   : > { %v321_v0 = vld [vmem:[%s9580_s26] sm:$0xf] (%p64_p5)  ;;  %v323_v1 = vld [vmem:[%s9580_s26 + $0x8] sm:$0xf] (%p64_p5)  ;;  %v325_v2 = vld [vmem:[%s9580_s26 + $0x10] sm:$0xf] (%p64_p5) }
  0x17   : > { %322 = vst [vmem:[%s9584_s27] sm:$0xf] (%p64_p5), %v321_v0  ;;  %324 = vst [vmem:[%s9584_s27 + $0x4] sm:$0xf] (%p64_p5), %v323_v1  ;;  %v327_v3 = vld [vmem:[%s9580_s26 + $0x18] sm:$0xf] (%p64_p5) }
  0x18   : > { %v329_v4 = vld [vmem:[%s9580_s26 + $0x20] sm:$0xf] (%p64_p5)  ;;  %326 = vst [vmem:[%s9584_s27 + $0x8] sm:$0xf] (%p64_p5), %v325_v2  ;;  %328 = vst [vmem:[%s9584_s27 + $0xc] sm:$0xf] (%p64_p5), %v327_v3 }
  0x19   : > { %330 = vst [vmem:[%s9584_s27 + $0x10] sm:$0xf] (%p64_p5), %v329_v4  ;;  %v331_v5 = vld [vmem:[%s9580_s26 + $0x28] sm:$0xf] (%p64_p5)  ;;  %v333_v6 = vld [vmem:[%s9580_s26 + $0x30] sm:$0xf] (%p64_p5) }
  0x1a   : > { %v335_v7 = vld [vmem:[%s9580_s26 + $0x38] sm:$0xf]  ;;  %332 = vst [vmem:[%s9584_s27 + $0x14] sm:$0xf] %v331_v5  ;;  %334 = vst [vmem:[%s9584_s27 + $0x18] sm:$0xf] %v333_v6 }
  0x1b   : > { %336 = vst [vmem:[%s9584_s27 + $0x1c] sm:$0xf] %v335_v7  ;;  %v337_v8 = vld [vmem:[%s9580_s26 + $0x40] sm:$0xf]  ;;  %v339_v9 = vld [vmem:[%s9580_s26 + $0x48] sm:$0xf] }
  0x1c   : > { %v341_v10 = vld [vmem:[%s9580_s26 + $0x50] sm:$0xf]  ;;  %338 = vst [vmem:[%s9584_s27 + $0x20] sm:$0xf] %v337_v8  ;;  %340 = vst [vmem:[%s9584_s27 + $0x24] sm:$0xf] %v339_v9 }
  0x1d   : > { %342 = vst [vmem:[%s9584_s27 + $0x28] sm:$0xf] %v341_v10  ;;  %v343_v11 = vld [vmem:[%s9580_s26 + $0x58] sm:$0xf]  ;;  %v345_v12 = vld [vmem:[%s9580_s26 + $0x60] sm:$0xf] }
  0x1e   : > { %v347_v13 = vld [vmem:[%s9580_s26 + $0x68] sm:$0xf]  ;;  %344 = vst [vmem:[%s9584_s27 + $0x2c] sm:$0xf] %v343_v11  ;;  %346 = vst [vmem:[%s9584_s27 + $0x30] sm:$0xf] %v345_v12 }
  0x1f   : > { %348 = vst [vmem:[%s9584_s27 + $0x34] sm:$0xf] %v347_v13  ;;  %v349_v14 = vld [vmem:[%s9580_s26 + $0x70] sm:$0xf]  ;;  %v351_v15 = vld [vmem:[%s9580_s26 + $0x78] sm:$0xf] }
  0x20   : > { %v353_v16 = vld [vmem:[%s9580_s26 + $0x80] sm:$0xf]  ;;  %350 = vst [vmem:[%s9584_s27 + $0x38] sm:$0xf] %v349_v14  ;;  %352 = vst [vmem:[%s9584_s27 + $0x3c] sm:$0xf] %v351_v15 }
  0x21   : > { %354 = vst [vmem:[%s9584_s27 + $0x40] sm:$0xf] %v353_v16  ;;  %v355_v17 = vld [vmem:[%s9580_s26 + $0x88] sm:$0xf]  ;;  %v357_v18 = vld [vmem:[%s9580_s26 + $0x90] sm:$0xf] }
  0x22   : > { %v359_v19 = vld [vmem:[%s9580_s26 + $0x98] sm:$0xf]  ;;  %356 = vst [vmem:[%s9584_s27 + $0x44] sm:$0xf] %v355_v17  ;;  %358 = vst [vmem:[%s9584_s27 + $0x48] sm:$0xf] %v357_v18 }
  0x23   : > { %360 = vst [vmem:[%s9584_s27 + $0x4c] sm:$0xf] %v359_v19  ;;  %v361_v20 = vld [vmem:[%s9580_s26 + $0xa0] sm:$0xf]  ;;  %v363_v21 = vld [vmem:[%s9580_s26 + $0xa8] sm:$0xf] }
  0x24   : > { %v365_v22 = vld [vmem:[%s9580_s26 + $0xb0] sm:$0xf]  ;;  %362 = vst [vmem:[%s9584_s27 + $0x50] sm:$0xf] %v361_v20  ;;  %364 = vst [vmem:[%s9584_s27 + $0x54] sm:$0xf] %v363_v21 }
  0x25   : > { %366 = vst [vmem:[%s9584_s27 + $0x58] sm:$0xf] %v365_v22  ;;  %v367_v23 = vld [vmem:[%s9580_s26 + $0xb8] sm:$0xf]  ;;  %v369_v24 = vld [vmem:[%s9580_s26 + $0xc0] sm:$0xf] }
  0x26   : > { %v371_v25 = vld [vmem:[%s9580_s26 + $0xc8] sm:$0xf]  ;;  %368 = vst [vmem:[%s9584_s27 + $0x5c] sm:$0xf] %v367_v23  ;;  %370 = vst [vmem:[%s9584_s27 + $0x60] sm:$0xf] %v369_v24 }
  0x27   : > { %372 = vst [vmem:[%s9584_s27 + $0x64] sm:$0xf] %v371_v25  ;;  %v373_v26 = vld [vmem:[%s9580_s26 + $0xd0] sm:$0xf]  ;;  %v375_v27 = vld [vmem:[%s9580_s26 + $0xd8] sm:$0xf] }
  0x28   : > { %v377_v28 = vld [vmem:[%s9580_s26 + $0xe0] sm:$0xf]  ;;  %374 = vst [vmem:[%s9584_s27 + $0x68] sm:$0xf] %v373_v26  ;;  %376 = vst [vmem:[%s9584_s27 + $0x6c] sm:$0xf] %v375_v27 }
  0x29   : > { %378 = vst [vmem:[%s9584_s27 + $0x70] sm:$0xf] %v377_v28  ;;  %v379_v29 = vld [vmem:[%s9580_s26 + $0xe8] sm:$0xf]  ;;  %v381_v30 = vld [vmem:[%s9580_s26 + $0xf0] sm:$0xf] }
  0x2a   : > { %v383_v31 = vld [vmem:[%s9580_s26 + $0xf8] sm:$0xf]  ;;  %380 = vst [vmem:[%s9584_s27 + $0x74] sm:$0xf] %v379_v29  ;;  %382 = vst [vmem:[%s9584_s27 + $0x78] sm:$0xf] %v381_v30 }
  0x2b   : > { %384 = vst [vmem:[%s9584_s27 + $0x7c] sm:$0xf] %v383_v31 }
  0x2c PF: > { %p7320_p10 = scmp.ge.s32.totalorder %s9463_s12, 1  ;;  %p488_p11 = scmp.lt.s32.totalorder %s9463_s12, 3 }
  0x2e   : > { %p489_p12 = pnand %p7320_p10, %p488_p11 }
  0x30   : > { %492 = sbr.rel (%p489_p12) target bundleno = 2940 (0xb7c), region = 93 }
  0x37   : > { %s7323_s28 = sshll.u32 %s9546_s13, 4  ;;  %s495_s29 = sand.u32 1, %s9455_s10   ;;  %v9465_v32 = vmov 0  }
  0x38   : > { %8297 = vset.pattern.permute.xlu1 %v9465_v32  ;;  %p547_p13 = scmp.lt.s32.totalorder %s7323_s28, 31  ;;  %s9655_s14 = sshll.u32 %s495_s29, 7 }
  0x39   : > { %s9658_s16 = scalar_lea.vmem [#allocation2], %s9655_s14  ;;  %s11550_s27 = scalar_lea.vmem [#allocation3], %s9655_s14 }
  0x3a   : > { %s16281_s28 = smov (!%p547_p13, %s7323_s28), 31  ;;  %v7659_v33 = vld [vmem:[%s9658_s16] sm:$0xff]   ;;  %v7722_v39 = vld [vmem:[%s9658_s16 + $0x8] sm:$0xff]   ;;  %v7723_v51 = vld [vmem:[%s9658_s16 + $0x10] sm:$0xff]   ;;  %s9468_s25 = smov 96  }
  0x3b   : > { %v7729_v34 = vld [vmem:[%s9658_s16 + $0x40] sm:$0xff]   ;;  %v7660_v35 = vunpack.c.l.bf16 %v7659_v33  ;;  %v7661_v37 = vunpack.c.h.bf16 %v7659_v33  ;;  %s9662_s17 = sshll.u32 %s16281_s28, 3  ;;  %v7730_v40 = vld [vmem:[%s9658_s16 + $0x48] sm:$0xff]   ;;  %v7664_v44 = vunpack.c.l.bf16 %v7722_v39  ;;  %v7665_v48 = vunpack.c.h.bf16 %v7722_v39  ;;  %v7731_v52 = vld [vmem:[%s9658_s16 + $0x50] sm:$0xff]   ;;  %s9469_s21 = smov 32  }
  0x3c   : > { %v7692_v36 = vunpack.c.l.bf16 %v7729_v34  ;;  %v7693_v38 = vunpack.c.h.bf16 %v7729_v34  ;;  %s9670_s23 = scalar_lea.vmem %s14648_s3, %s9662_s17  ;;  %v7696_v45 = vunpack.c.l.bf16 %v7730_v40  ;;  %v7697_v49 = vunpack.c.h.bf16 %v7730_v40  ;;  %v7724_v57 = vld [vmem:[%s9658_s16 + $0x18] sm:$0xff]   ;;  %v7725_v3 = vld [vmem:[%s9658_s16 + $0x20] sm:$0xff]   ;;  %v7726_v13 = vld [vmem:[%s9658_s16 + $0x28] sm:$0xff]   ;;  %s9714_s28 = scalar_lea.vmem %s14645_s0, %s9662_s17 }
  0x3d   : > { %v808_v42 = vld [vmem:[%s9670_s23] sm:$0xff]  ;;  %v809_v46 = vld [vmem:[%s9670_s23 + $0x8] sm:$0xff]  ;;  %v810_v50 = vld [vmem:[%s9670_s23 + $0x10] sm:$0xff]  ;;  %v7668_v55 = vunpack.c.l.bf16 %v7723_v51  ;;  %v7700_v56 = vunpack.c.l.bf16 %v7731_v52  ;;  %v7669_v59 = vunpack.c.h.bf16 %v7723_v51  ;;  %v7701_v60 = vunpack.c.h.bf16 %v7731_v52  ;;  %s10097_s22 = scalar_lea.vmem %s14651_s6, %s9662_s17  ;;  %s14603_s26 = scalar_lea.sflag [#allocation4], %s495_s29 }
  0x3e   : > { %v8298_v41 = vpack.i.bf16 %v7692_v36, %v7660_v35  ;;  %844 = vperm.xlu1 %8297, %v808_v42   ;;  %v8300_v43 = vpack.i.bf16 %v7693_v38, %v7661_v37  ;;  %v8302_v47 = vpack.i.bf16 %v7696_v45, %v7664_v44  ;;  %v811_v53 = vld [vmem:[%s9670_s23 + $0x18] sm:$0xff]  ;;  %v8304_v54 = vpack.i.bf16 %v7697_v49, %v7665_v48  ;;  %v812_v62 = vld [vmem:[%s9670_s23 + $0x20] sm:$0xff]  ;;  %v813_v2 = vld [vmem:[%s9670_s23 + $0x28] sm:$0xff]  ;;  %s9472_s14 = smov [#allocation3]  }
  0x3f   : > { %v8306_v58 = vpack.i.bf16 %v7700_v56, %v7668_v55  ;;  %v7732_v61 = vld [vmem:[%s9658_s16 + $0x58] sm:$0xff]   ;;  %v8308_v63 = vpack.i.bf16 %v7701_v60, %v7669_v59  ;;  %v7672_v0 = vunpack.c.l.bf16 %v7724_v57  ;;  %v7733_v4 = vld [vmem:[%s9658_s16 + $0x60] sm:$0xff]   ;;  %v7673_v6 = vunpack.c.h.bf16 %v7724_v57  ;;  %v814_v8 = vld [vmem:[%s9670_s23 + $0x30] sm:$0xff] }
  0x40   : > { %8299 = vxpose.xlu0.b32.start [1/16] %v8298_v41, 128  ;;  %v7704_v1 = vunpack.c.l.bf16 %v7732_v61  ;;  %v7705_v7 = vunpack.c.h.bf16 %v7732_v61  ;;  %v7676_v10 = vunpack.c.l.bf16 %v7725_v3  ;;  %v7708_v11 = vunpack.c.l.bf16 %v7733_v4  ;;  %v815_v12 = vld [vmem:[%s9670_s23 + $0x38] sm:$0xff]  ;;  %v7734_v14 = vld [vmem:[%s9658_s16 + $0x68] sm:$0xff]   ;;  %v816_v18 = vld [vmem:[%s9670_s23 + $0x40] sm:$0xff] }
  0x41   : > { %v7677_v16 = vunpack.c.h.bf16 %v7725_v3  ;;  %v7709_v17 = vunpack.c.h.bf16 %v7733_v4  ;;  %v7680_v20 = vunpack.c.l.bf16 %v7726_v13  ;;  %v7712_v21 = vunpack.c.l.bf16 %v7734_v14  ;;  %v817_v22 = vld [vmem:[%s9670_s23 + $0x48] sm:$0xff]  ;;  %v818_v23 = vld [vmem:[%s9670_s23 + $0x50] sm:$0xff]  ;;  %v819_v33 = vld [vmem:[%s9670_s23 + $0x58] sm:$0xff] }
  0x42   : > { %849 = vperm.xlu1 %8297, %v809_v46   ;;  %v8310_v5 = vpack.i.bf16 %v7704_v1, %v7672_v0  ;;  %v8312_v9 = vpack.i.bf16 %v7705_v7, %v7673_v6  ;;  %v8314_v15 = vpack.i.bf16 %v7708_v11, %v7676_v10  ;;  %v7727_v24 = vld [vmem:[%s9658_s16 + $0x30] sm:$0xff]   ;;  %v7681_v26 = vunpack.c.h.bf16 %v7726_v13  ;;  %v820_v34 = vld [vmem:[%s9670_s23 + $0x60] sm:$0xff]  ;;  %v7728_v35 = vld [vmem:[%s9658_s16 + $0x38] sm:$0xff]  }
  0x43   : > { %v8316_v19 = vpack.i.bf16 %v7709_v17, %v7677_v16  ;;  %v8318_v25 = vpack.i.bf16 %v7712_v21, %v7680_v20  ;;  %v7713_v27 = vunpack.c.h.bf16 %v7734_v14  ;;  %v7735_v28 = vld [vmem:[%s9658_s16 + $0x70] sm:$0xff]   ;;  %v7684_v30 = vunpack.c.l.bf16 %v7727_v24  ;;  %v7736_v39 = vld [vmem:[%s9658_s16 + $0x78] sm:$0xff]   ;;  %v567_v56 = vld [vmem:[%s9714_s28] sm:$0xff] }
  0x44   : > { %8301 = vxpose.xlu0.b32.cont [2/16] %v8300_v43, 128  ;;  %v7716_v31 = vunpack.c.l.bf16 %v7735_v28  ;;  %v7685_v37 = vunpack.c.h.bf16 %v7727_v24  ;;  %v7717_v38 = vunpack.c.h.bf16 %v7735_v28  ;;  %v7688_v41 = vunpack.c.l.bf16 %v7728_v35  ;;  %v821_v43 = vld [vmem:[%s9670_s23 + $0x68] sm:$0xff]  ;;  %v823_v49 = vld [vmem:[%s9670_s23 + $0x78] sm:$0xff] }
  0x45   : > { %v8320_v29 = vpack.i.bf16 %v7713_v27, %v7681_v26  ;;  %v7720_v42 = vunpack.c.l.bf16 %v7736_v39  ;;  %v7689_v45 = vunpack.c.h.bf16 %v7728_v35  ;;  %v7721_v46 = vunpack.c.h.bf16 %v7736_v39  ;;  %v568_v57 = vld [vmem:[%s9714_s28 + $0x8] sm:$0xff]  ;;  %v570_v0 = vld [vmem:[%s9714_s28 + $0x18] sm:$0xff] }
  0x46   : > { %854 = vperm.xlu1 %8297, %v810_v50   ;;  %v8322_v36 = vpack.i.bf16 %v7716_v31, %v7684_v30  ;;  %v8324_v40 = vpack.i.bf16 %v7717_v38, %v7685_v37  ;;  %v923_v50 = vlaneseq  ;;  %v583_v60 = vunpack.c.l.bf16 %v567_v56  ;;  %v572_v27 = vld [vmem:[%s9714_s28 + $0x28] sm:$0xff] }
  0x47   : > { %v8326_v44 = vpack.i.bf16 %v7720_v42, %v7688_v41  ;;  %v8328_v48 = vpack.i.bf16 %v7721_v46, %v7689_v45  ;;  %v584_v61 = vunpack.c.h.bf16 %v567_v56  ;;  %v15170_v7 = vmov 0 }
  0x48   : > { %8303 = vxpose.xlu0.b32.cont [3/16] %v8302_v47, 128  ;;  %v822_v47 = vld [vmem:[%s9670_s23 + $0x70] sm:$0xff]  ;;  %v9701_v51 = vshrl.u32 %v923_v50, 7  ;;  %vm9731_vm0 = vcmp.gt.f32.partialorder %v583_v60, 0.0  ;;  %v15176_v10 = vmov 0  ;;  %v589_v11 = vunpack.c.l.bf16 %v570_v0 }
  0x49   : > { %v15171_v7 = vsel %vm9731_vm0, 4294967295, %v15170_v7  ;;  %vm9735_vm1 = vcmp.gt.f32.partialorder %v584_v61, 0.0  ;;  %v15182_v16 = vmov 0  ;;  %v15185_v17 = vmov 0 }
  0x4a   : > { %859 = vperm.xlu1 %8297, %v811_v53   ;;  %15169 = vst [vmem:[#allocation6_spill] sm:$0xff] %v9701_v51  ;;  %v9704_v52 = vsub.s32 0, %v9701_v51  ;;  %v14671_v53 = vsub.s32 4, %v9701_v51  ;;  %15172 = vst [vmem:[#allocation7_spill] sm:$0xff] %v15171_v7  ;;  %vm9773_vm10 = vcmp.gt.f32.partialorder %v589_v11, 0.0  ;;  %v15188_v30 = vmov 0 }
  0x4b   : > { %v15189_v30 = vsel %vm9773_vm10, 4294967295, %v15188_v30  ;;  %v594_v50 = vunpack.c.h.bf16 %v572_v27  ;;  %v15197_v56 = vmov 0 }
  0x4c   : > { %8305 = vxpose.xlu0.b32.cont [4/16] %v8304_v54, 128  ;;  %v807_v54 = vld [vmem:[%s14647_s2] sm:$0xff]  ;;  %15190 = vst [vmem:[#allocation13_spill] sm:$0xff] %v15189_v30 }
  0x4d   : > { %v930_v55 = vrot.slane %v807_v54, %v14671_v53 }
  0x4e   : > { %864 = vperm.xlu1 %8297, %v812_v62   ;;  %v569_v62 = vld [vmem:[%s9714_s28 + $0x10] sm:$0xff] }
  0x4f   : > { %v9725_v59 = vrot.slane %v930_v55, %v9704_v52  ;;  %v587_v3 = vunpack.c.l.bf16 %v569_v62  ;;  %v588_v4 = vunpack.c.h.bf16 %v569_v62 }
  0x50   : > { %8307 = vxpose.xlu0.b32.cont [5/16] %v8306_v58, 128 }
  0x51   : > { %vm9749_vm6 = vcmp.gt.f32.partialorder %v587_v3, 0.0  ;;  %vm9753_vm7 = vcmp.gt.f32.partialorder %v588_v4, 0.0 }
  0x52   : > { %869 = vperm.xlu1 %8297, %v813_v2   ;;  %v586_v2 = vunpack.c.h.bf16 %v568_v57  ;;  %v15183_v16 = vsel %vm9749_vm6, 4294967295, %v15182_v16  ;;  %v15186_v17 = vsel %vm9753_vm7, 4294967295, %v15185_v17 }
  0x53   : > { %15184 = vst [vmem:[#allocation11_spill] sm:$0xff] %v15183_v16  ;;  %15187 = vst [vmem:[#allocation12_spill] sm:$0xff] %v15186_v17  ;;  %v582_v17 = vld [vmem:[%s9714_s28 + $0x78] sm:$0xff] }
  0x54   : > { %8309 = vxpose.xlu0.b32.cont [6/16] %v8308_v63, 128  ;;  %v585_v63 = vunpack.c.l.bf16 %v568_v57  ;;  %vm9745_vm5 = vcmp.gt.f32.partialorder %v586_v2, 0.0  ;;  %v573_v57 = vld [vmem:[%s9714_s28 + $0x30] sm:$0xff]  ;;  %v15200_v2 = vmov 0 }
  0x55   : > { %v595_v11 = vunpack.c.l.bf16 %v573_v57 }
  0x56   : > { %874 = vperm.xlu1 %8297, %v814_v8   ;;  %v15173_v8 = vmov 0  ;;  %vm9741_vm2 = vcmp.gt.f32.partialorder %v585_v63, 0.0  ;;  %v574_v63 = vld [vmem:[%s9714_s28 + $0x38] sm:$0xff] }
  0x57   : > { %v15174_v8 = vsel %vm9735_vm1, 4294967295, %v15173_v8  ;;  %v15177_v10 = vsel %vm9741_vm2, 4294967295, %v15176_v10 }
  0x58   : > { %8311 = vxpose.xlu0.b32.cont [7/16] %v8310_v5, 128  ;;  %15175 = vst [vmem:[#allocation8_spill] sm:$0xff] %v15174_v8  ;;  %15178 = vst [vmem:[#allocation9_spill] sm:$0xff] %v15177_v10 }
  0x5a   : > { %879 = vperm.xlu1 %8297, %v815_v12  }
  0x5c   : > { %8313 = vxpose.xlu0.b32.cont [8/16] %v8312_v9, 128 }
  0x5e   : > { %884 = vperm.xlu1 %8297, %v816_v18   ;;  %v590_v18 = vunpack.c.h.bf16 %v570_v0 }
  0x60   : > { %8315 = vxpose.xlu0.b32.cont [9/16] %v8314_v15, 128  ;;  %v15179_v15 = vmov 0  ;;  %vm9777_vm11 = vcmp.gt.f32.partialorder %v590_v18, 0.0 }
  0x61   : > { %v15180_v15 = vsel %vm9745_vm5, 4294967295, %v15179_v15 }
  0x62   : > { %889 = vperm.xlu1 %8297, %v817_v22   ;;  %15181 = vst [vmem:[#allocation10_spill] sm:$0xff] %v15180_v15 }
  0x64   : > { %8317 = vxpose.xlu0.b32.cont [10/16] %v8316_v19, 128 }
  0x66   : > { %894 = vperm.xlu1 %8297, %v818_v23   ;;  %v571_v23 = vld [vmem:[%s9714_s28 + $0x20] sm:$0xff] }
  0x67   : > { %v591_v35 = vunpack.c.l.bf16 %v571_v23 }
  0x68   : > { %8319 = vxpose.xlu0.b32.cont [11/16] %v8318_v25, 128 }
  0x69   : > { %vm9795_vm14 = vcmp.gt.f32.partialorder %v591_v35, 0.0  ;;  %v598_v35 = vunpack.c.h.bf16 %v574_v63 }
  0x6a   : > { %899 = vperm.xlu1 %8297, %v819_v33  }
  0x6c   : > { %8321 = vxpose.xlu0.b32.cont [12/16] %v8320_v29, 128 }
  0x6e   : > { %904 = vperm.xlu1 %8297, %v820_v34   ;;  %v15191_v34 = vmov 0 }
  0x6f   : > { %v15192_v34 = vsel %vm9777_vm11, 4294967295, %v15191_v34 }
  0x70   : > { %8323 = vxpose.xlu0.b32.cont [13/16] %v8322_v36, 128  ;;  %15193 = vst [vmem:[#allocation14_spill] sm:$0xff] %v15192_v34  ;;  %v592_v36 = vunpack.c.h.bf16 %v571_v23 }
  0x72   : > { %909 = vperm.xlu1 %8297, %v821_v43   ;;  %vm9801_vm15 = vcmp.gt.f32.partialorder %v592_v36, 0.0 }
  0x73   : > { %v15198_v56 = vsel %vm9801_vm15, 4294967295, %v15197_v56 }
  0x74   : > { %8325 = vxpose.xlu0.b32.cont [14/16] %v8324_v40, 128  ;;  %v593_v40 = vunpack.c.l.bf16 %v572_v27  ;;  %15199 = vst [vmem:[#allocation16_spill] sm:$0xff] %v15198_v56 }
  0x76   : > { %914 = vperm.xlu1 %8297, %v822_v47  }
  0x78   : > { %8327 = vxpose.xlu0.b32.cont [15/16] %v8326_v44, 128 }
  0x7a   : > { %919 = vperm.xlu1 %8297, %v823_v49   ;;  %v15194_v49 = vmov 0 }
  0x7b   : > { %v15195_v49 = vsel %vm9795_vm14, 4294967295, %v15194_v49 }
  0x7c   : > { %8329 = vxpose.xlu0.b32.end [16/16] %v8328_v48, 128  ;;  %15196 = vst [vmem:[#allocation15_spill] sm:$0xff] %v15195_v49 }
  0xa5   : > { %8410 = vset.pattern.permute.xlu0 %v9465_v32  ;;  %v926_v32 = vrot.slane %v807_v54, %v9704_v52 }
  0xa7   : > { %v9722_v58 = vrot.slane %v926_v32, %v9704_v52 }
  0xbd   : > { %v845_v1 = vpop.permute.xlu1 %844 }
  0xbe   : > { %v941_v5 = vadd.f32 %v9722_v58, %v845_v1  ;;  %v942_v6 = vadd.f32 %v9725_v59, %v845_v1 }
  0xc0   : > { %v9739_v9 = vpop.trf.xlu0  ;;  %vm973_vm3 = vcmp.gt.f32.partialorder %v941_v5, 0.0  ;;  %vm974_vm4 = vcmp.gt.f32.partialorder %v942_v6, 0.0  ;;  %v1005_v12 = vmul.f32 0.2, %v941_v5  ;;  %v1006_v13 = vmul.f32 0.2, %v942_v6 }
  0xc1   : > { %v850_v14 = vpop.permute.xlu1 %849 }
  0xc2   : > { %v943_v19 = vadd.f32 %v9722_v58, %v850_v14  ;;  %v944_v20 = vadd.f32 %v9725_v59, %v850_v14  ;;  %v1037_v21 = vsel %vm973_vm3, %v941_v5, %v1005_v12  ;;  %v1038_v22 = vsel %vm974_vm4, %v942_v6, %v1006_v13 }
  0xc3   : > { %v9764_v25 = vsel %vm9731_vm0, %v1037_v21, -1e+30  ;;  %v9768_v26 = vsel %vm9735_vm1, %v1038_v22, -1e+30  ;;  %v15203_v6 = vmov 0  ;;  %v596_v12 = vunpack.c.h.bf16 %v573_v57 }
  0xc4   : > { %v9760_v24 = vpop.trf.xlu0  ;;  %v1101_v28 = vmax.f32 %v9764_v25, %v9768_v26  ;;  %vm975_vm8 = vcmp.gt.f32.partialorder %v943_v19, 0.0  ;;  %vm976_vm9 = vcmp.gt.f32.partialorder %v944_v20, 0.0  ;;  %v1007_v29 = vmul.f32 0.2, %v943_v19 }
  0xc5   : > { %v855_v31 = vpop.permute.xlu1 %854  ;;  %v1008_v33 = vmul.f32 0.2, %v944_v20 }
  0xc6   : > { %v945_v37 = vadd.f32 %v9722_v58, %v855_v31  ;;  %v946_v38 = vadd.f32 %v9725_v59, %v855_v31  ;;  %1102 = vmax.xlane.f32.xlu0 %v1101_v28  ;;  %v1039_v39 = vsel %vm975_vm8, %v943_v19, %v1007_v29  ;;  %vm9817_vm8 = vcmp.gt.f32.partialorder %v593_v40, 0.0  ;;  %v575_v40 = vld [vmem:[%s9714_s28 + $0x40] sm:$0xff] }
  0xc7   : > { %v1040_v42 = vsel %vm976_vm9, %v944_v20, %v1008_v33  ;;  %v9787_v43 = vsel %vm9741_vm2, %v1039_v39, -1e+30  ;;  %v15201_v2 = vsel %vm9817_vm8, 4294967295, %v15200_v2  ;;  %vm9823_vm9 = vcmp.gt.f32.partialorder %v594_v50, 0.0 }
  0xc8   : > { %v9783_v41 = vpop.trf.xlu0  ;;  %v9791_v44 = vsel %vm9745_vm5, %v1040_v42, -1e+30  ;;  %vm977_vm12 = vcmp.gt.f32.partialorder %v945_v37, 0.0  ;;  %vm978_vm13 = vcmp.gt.f32.partialorder %v946_v38, 0.0  ;;  %v1009_v45 = vmul.f32 0.2, %v945_v37 }
  0xc9   : > { %v860_v46 = vpop.permute.xlu1 %859  ;;  %v1104_v47 = vmax.f32 %v9787_v43, %v9791_v44  ;;  %v1010_v48 = vmul.f32 0.2, %v946_v38  ;;  %15202 = vst [vmem:[#allocation17_spill] sm:$0xff] %v15201_v2  ;;  %v15204_v6 = vsel %vm9823_vm9, 4294967295, %v15203_v6  ;;  %v597_v19 = vunpack.c.l.bf16 %v574_v63 }
  0xca   : > { %v947_v54 = vadd.f32 %v9722_v58, %v860_v46  ;;  %v948_v32 = vadd.f32 %v9725_v59, %v860_v46  ;;  %v1041_v55 = vsel %vm977_vm12, %v945_v37, %v1009_v45  ;;  %15205 = vst [vmem:[#allocation18_spill] sm:$0xff] %v15204_v6  ;;  %v15206_v33 = vmov 0 }
  0xcb   : > { %1105 = vmax.xlane.f32.xlu1 %v1104_v47  ;;  %v1042_v61 = vsel %vm978_vm13, %v946_v38, %v1010_v48  ;;  %v9810_v62 = vsel %vm9749_vm6, %v1041_v55, -1e+30  ;;  %v15209_v39 = vmov 0  ;;  %v576_v47 = vld [vmem:[%s9714_s28 + $0x48] sm:$0xff]  ;;  %v599_v63 = vunpack.c.l.bf16 %v575_v40 }
  0xcc   : > { %v9806_v60 = vpop.trf.xlu0  ;;  %v9815_v0 = vsel %vm9753_vm7, %v1042_v61, -1e+30  ;;  %vm979_vm3 = vcmp.gt.f32.partialorder %v947_v54, 0.0  ;;  %vm980_vm4 = vcmp.gt.f32.partialorder %v948_v32, 0.0  ;;  %v1011_v1 = vmul.f32 0.2, %v947_v54 }
  0xcd   : > { %v865_v3 = vpop.permute.xlu1 %864  ;;  %v1107_v4 = vmax.f32 %v9810_v62, %v9815_v0  ;;  %v1012_v5 = vmul.f32 0.2, %v948_v32  ;;  %v15215_v61 = vmov 0 }
  0xce   : > { %v949_v13 = vadd.f32 %v9722_v58, %v865_v3  ;;  %v950_v14 = vadd.f32 %v9725_v59, %v865_v3  ;;  %v1043_v18 = vsel %vm979_vm3, %v947_v54, %v1011_v1  ;;  %vm9841_vm3 = vcmp.gt.f32.partialorder %v595_v11, 0.0 }
  0xcf   : > { %1108 = vmax.xlane.f32.xlu1 %v1107_v4  ;;  %v1044_v21 = vsel %vm980_vm4, %v948_v32, %v1012_v5  ;;  %v9833_v22 = vsel %vm9773_vm10, %v1043_v18, -1e+30  ;;  %v15207_v33 = vsel %vm9841_vm3, 4294967295, %v15206_v33  ;;  %vm9847_vm4 = vcmp.gt.f32.partialorder %v596_v12, 0.0 }
  0xd0   : > { %v9829_v20 = vpop.trf.xlu0  ;;  %v9837_v23 = vsel %vm9777_vm11, %v1044_v21, -1e+30  ;;  %vm981_vm12 = vcmp.gt.f32.partialorder %v949_v13, 0.0  ;;  %vm982_vm13 = vcmp.gt.f32.partialorder %v950_v14, 0.0  ;;  %v1013_v27 = vmul.f32 0.2, %v949_v13 }
  0xd1   : > { %v870_v28 = vpop.permute.xlu1 %869  ;;  %v1110_v29 = vmax.f32 %v9833_v22, %v9837_v23  ;;  %v1014_v31 = vmul.f32 0.2, %v950_v14  ;;  %15208 = vst [vmem:[#allocation19_spill] sm:$0xff] %v15207_v33  ;;  %v15210_v39 = vsel %vm9847_vm4, 4294967295, %v15209_v39  ;;  %vm9863_vm10 = vcmp.gt.f32.partialorder %v597_v19, 0.0 }
  0xd2   : > { %v951_v36 = vadd.f32 %v9722_v58, %v870_v28  ;;  %v952_v37 = vadd.f32 %v9725_v59, %v870_v28  ;;  %v1045_v38 = vsel %vm981_vm12, %v949_v13, %v1013_v27  ;;  %15211 = vst [vmem:[#allocation20_spill] sm:$0xff] %v15210_v39  ;;  %v15212_v54 = vmov 0  ;;  %v579_v39 = vld [vmem:[%s9714_s28 + $0x60] sm:$0xff] }
  0xd3   : > { %1111 = vmax.xlane.f32.xlu1 %v1110_v29  ;;  %v1046_v45 = vsel %vm982_vm13, %v950_v14, %v1014_v31  ;;  %v9856_v46 = vsel %vm9795_vm14, %v1045_v38, -1e+30  ;;  %v15213_v54 = vsel %vm9863_vm10, 4294967295, %v15212_v54  ;;  %vm9869_vm13 = vcmp.gt.f32.partialorder %v598_v35, 0.0 }
  0xd4   : > { %v9852_v42 = vpop.trf.xlu0  ;;  %v9861_v48 = vsel %vm9801_vm15, %v1046_v45, -1e+30  ;;  %vm983_vm11 = vcmp.gt.f32.partialorder %v951_v36, 0.0  ;;  %vm984_vm12 = vcmp.gt.f32.partialorder %v952_v37, 0.0  ;;  %v1015_v50 = vmul.f32 0.2, %v951_v36 }
  0xd5   : > { %15214 = vst [vmem:[#allocation21_spill] sm:$0xff] %v15213_v54  ;;  %v875_v32 = vpop.permute.xlu1 %874  ;;  %v1113_v55 = vmax.f32 %v9856_v46, %v9861_v48  ;;  %v1016_v57 = vmul.f32 0.2, %v952_v37  ;;  %v15216_v61 = vsel %vm9869_vm13, 4294967295, %v15215_v61  ;;  %v600_v1 = vunpack.c.h.bf16 %v575_v40  ;;  %v577_v40 = vld [vmem:[%s9714_s28 + $0x50] sm:$0xff] }
  0xd6   : > { %15217 = vst [vmem:[#allocation22_spill] sm:$0xff] %v15216_v61  ;;  %v953_v3 = vadd.f32 %v9722_v58, %v875_v32  ;;  %v954_v4 = vadd.f32 %v9725_v59, %v875_v32  ;;  %v1047_v5 = vsel %vm983_vm11, %v951_v36, %v1015_v50  ;;  %v601_v11 = vunpack.c.l.bf16 %v576_v47 }
  0xd7   : > { %1114 = vmax.xlane.f32.xlu1 %v1113_v55  ;;  %v1048_v13 = vsel %vm984_vm12, %v952_v37, %v1016_v57  ;;  %v9879_v14 = vsel %vm9817_vm8, %v1047_v5, -1e+30  ;;  %vm9887_vm11 = vcmp.gt.f32.partialorder %v599_v63, 0.0  ;;  %v15218_v29 = vmov 0 }
  0xd8   : > { %v9875_v12 = vpop.trf.xlu0  ;;  %v9883_v18 = vsel %vm9823_vm9, %v1048_v13, -1e+30  ;;  %vm985_vm15 = vcmp.gt.f32.partialorder %v953_v3, 0.0  ;;  %vm986_vm14 = vcmp.gt.f32.partialorder %v954_v4, 0.0  ;;  %v1017_v19 = vmul.f32 0.2, %v953_v3 }
  0xd9   : > { %v880_v21 = vpop.permute.xlu1 %879  ;;  %v1116_v27 = vmax.f32 %v9879_v14, %v9883_v18  ;;  %v1018_v28 = vmul.f32 0.2, %v954_v4  ;;  %v15219_v29 = vsel %vm9887_vm11, 4294967295, %v15218_v29  ;;  %v602_v31 = vunpack.c.h.bf16 %v576_v47 }
  0xda   : > { %15220 = vst [vmem:[#allocation23_spill] sm:$0xff] %v15219_v29  ;;  %v955_v35 = vadd.f32 %v9722_v58, %v880_v21  ;;  %v956_v36 = vadd.f32 %v9725_v59, %v880_v21  ;;  %v1049_v37 = vsel %vm985_vm15, %v953_v3, %v1017_v19  ;;  %vm9893_vm12 = vcmp.gt.f32.partialorder %v600_v1, 0.0 }
  0xdb   : > { %v15221_v38 = vmov 0  ;;  %1117 = vmax.xlane.f32.xlu0 %v1116_v27  ;;  %v1050_v50 = vsel %vm986_vm14, %v954_v4, %v1018_v28  ;;  %v9902_v32 = vsel %vm9841_vm3, %v1049_v37, -1e+30  ;;  %vm9908_vm8 = vcmp.gt.f32.partialorder %v601_v11, 0.0  ;;  %v578_v11 = vld [vmem:[%s9714_s28 + $0x58] sm:$0xff] }
  0xdc   : > { %v15222_v38 = vsel %vm9893_vm12, 4294967295, %v15221_v38  ;;  %v9898_v45 = vpop.trf.xlu0  ;;  %v9906_v47 = vsel %vm9847_vm4, %v1050_v50, -1e+30  ;;  %vm987_vm9 = vcmp.gt.f32.partialorder %v955_v35, 0.0  ;;  %vm988_vm15 = vcmp.gt.f32.partialorder %v956_v36, 0.0 }
  0xdd   : > { %15223 = vst [vmem:[#allocation24_spill] sm:$0xff] %v15222_v38  ;;  %v1019_v55 = vmul.f32 0.2, %v955_v35  ;;  %v15224_v57 = vmov 0  ;;  %v885_v63 = vpop.permute.xlu1 %884  ;;  %v1119_v1 = vmax.f32 %v9902_v32, %v9906_v47  ;;  %v1020_v3 = vmul.f32 0.2, %v956_v36 }
  0xde   : > { %v15225_v57 = vsel %vm9908_vm8, 4294967295, %v15224_v57  ;;  %vm9914_vm14 = vcmp.gt.f32.partialorder %v602_v31, 0.0  ;;  %v15227_v4 = vmov 0  ;;  %v603_v5 = vunpack.c.l.bf16 %v577_v40 }
  0xdf   : > { %15226 = vst [vmem:[#allocation25_spill] sm:$0xff] %v15225_v57  ;;  %v15228_v4 = vsel %vm9914_vm14, 4294967295, %v15227_v4  ;;  %v957_v13 = vadd.f32 %v9722_v58, %v885_v63  ;;  %v958_v19 = vadd.f32 %v9725_v59, %v885_v63  ;;  %v1051_v21 = vsel %vm987_vm9, %v955_v35, %v1019_v55  ;;  %1120 = vmax.xlane.f32.xlu1 %v1119_v1 }
  0xe0   : > { %15229 = vst [vmem:[#allocation26_spill] sm:$0xff] %v15228_v4  ;;  %v604_v27 = vunpack.c.h.bf16 %v577_v40  ;;  %v9921_v28 = vpop.trf.xlu0  ;;  %v1052_v37 = vsel %vm988_vm15, %v956_v36, %v1020_v3  ;;  %v9925_v50 = vsel %vm9863_vm10, %v1051_v21, -1e+30  ;;  %vm9933_vm9 = vcmp.gt.f32.partialorder %v603_v5, 0.0  ;;  %v580_v4 = vld [vmem:[%s9714_s28 + $0x68] sm:$0xff] }
  0xe1   : > { %v9929_v31 = vsel %vm9869_vm13, %v1052_v37, -1e+30  ;;  %vm989_vm4 = vcmp.gt.f32.partialorder %v957_v13, 0.0  ;;  %vm990_vm3 = vcmp.gt.f32.partialorder %v958_v19, 0.0  ;;  %v1021_v53 = vmul.f32 0.2, %v957_v13  ;;  %v890_v63 = vpop.permute.xlu1 %889 }
  0xe2   : > { %v1122_v35 = vmax.f32 %v9925_v50, %v9929_v31  ;;  %v1022_v40 = vmul.f32 0.2, %v958_v19  ;;  %v15230_v55 = vmov 0  ;;  %v605_v36 = vunpack.c.l.bf16 %v578_v11 }
  0xe3   : > { %v15231_v55 = vsel %vm9933_vm9, 4294967295, %v15230_v55  ;;  %v959_v1 = vadd.f32 %v9722_v58, %v890_v63  ;;  %v960_v3 = vadd.f32 %v9725_v59, %v890_v63  ;;  %v1053_v21 = vsel %vm989_vm4, %v957_v13, %v1021_v53 }
  0xe4   : > { %15232 = vst [vmem:[#allocation27_spill] sm:$0xff] %v15231_v55  ;;  %vm9939_vm15 = vcmp.gt.f32.partialorder %v604_v27, 0.0  ;;  %v15233_v37 = vmov 0  ;;  %v9943_v61 = vpop.trf.xlu0  ;;  %1123 = vmax.xlane.f32.xlu0 %v1122_v35  ;;  %v1054_v54 = vsel %vm990_vm3, %v958_v19, %v1022_v40  ;;  %v9947_v5 = vsel %vm9887_vm11, %v1053_v21, -1e+30  ;;  %v581_v55 = vld [vmem:[%s9714_s28 + $0x70] sm:$0xff] }
  0xe5   : > { %v15234_v37 = vsel %vm9939_vm15, 4294967295, %v15233_v37  ;;  %v9952_v33 = vsel %vm9893_vm12, %v1054_v54, -1e+30  ;;  %vm991_vm13 = vcmp.gt.f32.partialorder %v959_v1, 0.0  ;;  %vm992_vm10 = vcmp.gt.f32.partialorder %v960_v3, 0.0  ;;  %v895_v13 = vpop.permute.xlu1 %894  ;;  %s9471_s28 = smov 64  }
  0xe6   : > { %15235 = vst [vmem:[#allocation28_spill] sm:$0xff] %v15234_v37  ;;  %v1023_v53 = vmul.f32 0.2, %v959_v1  ;;  %v1125_v27 = vmax.f32 %v9947_v5, %v9952_v33  ;;  %v1024_v63 = vmul.f32 0.2, %v960_v3  ;;  %v606_v6 = vunpack.c.h.bf16 %v578_v11 }
  0xe7   : > { %vm9956_vm4 = vcmp.gt.f32.partialorder %v605_v36, 0.0  ;;  %v15236_v19 = vmov 0  ;;  %v961_v35 = vadd.f32 %v9722_v58, %v895_v13  ;;  %v962_v40 = vadd.f32 %v9725_v59, %v895_v13 }
  0xe8   : > { %v15237_v19 = vsel %vm9956_vm4, 4294967295, %v15236_v19  ;;  %v1055_v21 = vsel %vm991_vm13, %v959_v1, %v1023_v53  ;;  %v607_v54 = vunpack.c.l.bf16 %v579_v39  ;;  %v9962_v38 = vpop.trf.xlu0  ;;  %1126 = vmax.xlane.f32.xlu1 %v1125_v27  ;;  %v1056_v29 = vsel %vm992_vm10, %v960_v3, %v1024_v63 }
  0xe9   : > { %15238 = vst [vmem:[#allocation29_spill] sm:$0xff] %v15237_v19  ;;  %v9966_v2 = vsel %vm9908_vm8, %v1055_v21, -1e+30  ;;  %v9970_v11 = vsel %vm9914_vm14, %v1056_v29, -1e+30  ;;  %vm993_vm3 = vcmp.gt.f32.partialorder %v961_v35, 0.0  ;;  %v900_v56 = vpop.permute.xlu1 %899  ;;  %v608_v3 = vunpack.c.h.bf16 %v579_v39 }
  0xea   : > { %vm994_vm12 = vcmp.gt.f32.partialorder %v962_v40, 0.0  ;;  %v1025_v36 = vmul.f32 0.2, %v961_v35  ;;  %v1128_v1 = vmax.f32 %v9966_v2, %v9970_v11  ;;  %v1026_v53 = vmul.f32 0.2, %v962_v40 }
  0xeb   : > { %vm9974_vm13 = vcmp.gt.f32.partialorder %v606_v6, 0.0  ;;  %v15239_v13 = vmov 0  ;;  %v963_v27 = vadd.f32 %v9722_v58, %v900_v56  ;;  %v964_v63 = vadd.f32 %v9725_v59, %v900_v56 }
  0xec   : > { %v15240_v13 = vsel %vm9974_vm13, 4294967295, %v15239_v13  ;;  %v1057_v21 = vsel %vm993_vm3, %v961_v35, %v1025_v36  ;;  %vm9980_vm10 = vcmp.gt.f32.partialorder %v607_v54, 0.0  ;;  %v15242_v29 = vmov 0  ;;  %v9985_v57 = vpop.trf.xlu0  ;;  %1129 = vmax.xlane.f32.xlu0 %v1128_v1 }
  0xed   : > { %15241 = vst [vmem:[#allocation30_spill] sm:$0xff] %v15240_v13  ;;  %v15243_v29 = vsel %vm9980_vm10, 4294967295, %v15242_v29  ;;  %v1058_v49 = vsel %vm994_vm12, %v962_v40, %v1026_v53  ;;  %v9989_v6 = vsel %vm9933_vm9, %v1057_v21, -1e+30  ;;  %vm995_vm11 = vcmp.gt.f32.partialorder %v963_v27, 0.0  ;;  %v905_v35 = vpop.permute.xlu1 %904 }
  0xee   : > { %15244 = vst [vmem:[#allocation31_spill] sm:$0xff] %v15243_v29  ;;  %v9993_v39 = vsel %vm9939_vm15, %v1058_v49, -1e+30  ;;  %vm996_vm3 = vcmp.gt.f32.partialorder %v964_v63, 0.0  ;;  %v1027_v56 = vmul.f32 0.2, %v963_v27  ;;  %v609_v40 = vunpack.c.l.bf16 %v580_v4 }
  0xef   : > { %15245 = vst [vmem:[#allocation32_spill] sm:$0xff] %v9993_v39  ;;  %v1131_v54 = vmax.f32 %v9989_v6, %v9993_v39  ;;  %v1028_v36 = vmul.f32 0.2, %v964_v63  ;;  %vm9997_vm14 = vcmp.gt.f32.partialorder %v608_v3, 0.0  ;;  %v15246_v1 = vmov 0 }
  0xf0   : > { %v15247_v1 = vsel %vm9997_vm14, 4294967295, %v15246_v1  ;;  %v965_v53 = vadd.f32 %v9722_v58, %v905_v35  ;;  %v966_v21 = vadd.f32 %v9725_v59, %v905_v35  ;;  %v1059_v37 = vsel %vm995_vm11, %v963_v27, %v1027_v56  ;;  %v10004_v34 = vpop.trf.xlu0 }
  0xf1   : > { %15248 = vst [vmem:[#allocation33_spill] sm:$0xff] %v15247_v1  ;;  %v610_v49 = vunpack.c.h.bf16 %v580_v4  ;;  %1132 = vmax.xlane.f32.xlu1 %v1131_v54  ;;  %v1060_v30 = vsel %vm996_vm3, %v964_v63, %v1028_v36  ;;  %v10008_v8 = vsel %vm9956_vm4, %v1059_v37, -1e+30  ;;  %v910_v35 = vpop.permute.xlu1 %909  ;;  %vm10016_vm11 = vcmp.gt.f32.partialorder %v609_v40, 0.0 }
  0xf2   : > { %v10012_v3 = vsel %vm9974_vm13, %v1060_v30, -1e+30  ;;  %vm997_vm12 = vcmp.gt.f32.partialorder %v965_v53, 0.0  ;;  %vm998_vm15 = vcmp.gt.f32.partialorder %v966_v21, 0.0  ;;  %v1029_v7 = vmul.f32 0.2, %v965_v53 }
  0xf3   : > { %v1134_v4 = vmax.f32 %v10008_v8, %v10012_v3  ;;  %v1030_v27 = vmul.f32 0.2, %v966_v21  ;;  %v15249_v56 = vmov 0  ;;  %v611_v63 = vunpack.c.l.bf16 %v581_v55 }
  0xf4   : > { %v15250_v56 = vsel %vm10016_vm11, 4294967295, %v15249_v56  ;;  %v967_v37 = vadd.f32 %v9722_v58, %v910_v35  ;;  %v968_v54 = vadd.f32 %v9725_v59, %v910_v35  ;;  %v1061_v30 = vsel %vm997_vm12, %v965_v53, %v1029_v7  ;;  %v10026_v13 = vpop.trf.xlu0 }
  0xf5   : > { %15251 = vst [vmem:[#allocation34_spill] sm:$0xff] %v15250_v56  ;;  %vm10022_vm3 = vcmp.gt.f32.partialorder %v610_v49, 0.0  ;;  %v15252_v36 = vmov 0  ;;  %1135 = vmax.xlane.f32.xlu0 %v1134_v4  ;;  %v1062_v19 = vsel %vm998_vm15, %v966_v21, %v1030_v27  ;;  %v10030_v40 = vsel %vm9980_vm10, %v1061_v30, -1e+30  ;;  %v915_v53 = vpop.permute.xlu1 %914 }
  0xf6   : > { %v15253_v36 = vsel %vm10022_vm3, 4294967295, %v15252_v36  ;;  %15255 = vst [vmem:[#allocation36_spill] sm:$0xff] %v10030_v40  ;;  %v10035_v16 = vsel %vm9997_vm14, %v1062_v19, -1e+30  ;;  %vm999_vm9 = vcmp.gt.f32.partialorder %v967_v37, 0.0  ;;  %vm1000_vm13 = vcmp.gt.f32.partialorder %v968_v54, 0.0 }
  0xf7   : > { %15254 = vst [vmem:[#allocation35_spill] sm:$0xff] %v15253_v36  ;;  %15256 = vst [vmem:[#allocation37_spill] sm:$0xff] %v10035_v16  ;;  %v1031_v7 = vmul.f32 0.2, %v967_v37  ;;  %v1137_v49 = vmax.f32 %v10030_v40, %v10035_v16  ;;  %v1032_v35 = vmul.f32 0.2, %v968_v54  ;;  %v612_v15 = vunpack.c.h.bf16 %v581_v55 }
  0xf8   : > { %vm10039_vm12 = vcmp.gt.f32.partialorder %v611_v63, 0.0  ;;  %v15257_v21 = vmov 0  ;;  %v969_v4 = vadd.f32 %v9722_v58, %v915_v53  ;;  %v970_v27 = vadd.f32 %v9725_v59, %v915_v53  ;;  %v10045_v1 = vpop.trf.xlu0 }
  0xf9   : > { %v15258_v21 = vsel %vm10039_vm12, 4294967295, %v15257_v21  ;;  %v1063_v30 = vsel %vm999_vm9, %v967_v37, %v1031_v7  ;;  %v613_v19 = vunpack.c.l.bf16 %v582_v17  ;;  %1138 = vmax.xlane.f32.xlu1 %v1137_v49  ;;  %v1064_v29 = vsel %vm1000_vm13, %v968_v54, %v1032_v35  ;;  %v920_v16 = vpop.permute.xlu1 %919 }
  0xfa   : > { %15259 = vst [vmem:[#allocation38_spill] sm:$0xff] %v15258_v21  ;;  %v10049_v10 = vsel %vm10016_vm11, %v1063_v30, -1e+30  ;;  %v10053_v55 = vsel %vm10022_vm3, %v1064_v29, -1e+30  ;;  %vm1001_vm15 = vcmp.gt.f32.partialorder %v969_v4, 0.0  ;;  %v614_v53 = vunpack.c.h.bf16 %v582_v17 }
  0xfb   : > { %15260 = vst [vmem:[#allocation39_spill] sm:$0xff] %v10049_v10  ;;  %15261 = vst [vmem:[#allocation40_spill] sm:$0xff] %v10053_v55  ;;  %vm1002_vm14 = vcmp.gt.f32.partialorder %v970_v27, 0.0  ;;  %v1033_v63 = vmul.f32 0.2, %v969_v4  ;;  %v1140_v37 = vmax.f32 %v10049_v10, %v10053_v55  ;;  %vm10057_vm9 = vcmp.gt.f32.partialorder %v612_v15, 0.0 }
  0xfc   : > { %v15262_v7 = vmov 0  ;;  %v1034_v54 = vmul.f32 0.2, %v970_v27  ;;  %v971_v49 = vadd.f32 %v9722_v58, %v920_v16  ;;  %v972_v35 = vadd.f32 %v9725_v59, %v920_v16  ;;  %v10067_v36 = vpop.trf.xlu0 }
  0xfd   : > { %v15263_v7 = vsel %vm10057_vm9, 4294967295, %v15262_v7  ;;  %v1065_v30 = vsel %vm1001_vm15, %v969_v4, %v1033_v63  ;;  %vm10063_vm13 = vcmp.gt.f32.partialorder %v613_v19, 0.0  ;;  %v15265_v29 = vmov 0  ;;  %1141 = vmax.xlane.f32.xlu0 %v1140_v37 }
  0xfe   : > { %15264 = vst [vmem:[#allocation41_spill] sm:$0xff] %v15263_v7  ;;  %v15266_v29 = vsel %vm10063_vm13, 4294967295, %v15265_v29  ;;  %v1066_v56 = vsel %vm1002_vm14, %v970_v27, %v1034_v54  ;;  %v10071_v15 = vsel %vm10039_vm12, %v1065_v30, -1e+30  ;;  %vm1003_vm10 = vcmp.gt.f32.partialorder %v971_v49, 0.0  ;;  %v825_v54 = vld [vmem:[%s10097_s22] sm:$0xff] }
  0xff   : > { %15267 = vst [vmem:[#allocation42_spill] sm:$0xff] %v15266_v29  ;;  %15268 = vst [vmem:[#allocation43_spill] sm:$0xff] %v10071_v15  ;;  %v10075_v17 = vsel %vm10057_vm9, %v1066_v56, -1e+30  ;;  %vm1004_vm3 = vcmp.gt.f32.partialorder %v972_v35, 0.0  ;;  %vm10079_vm15 = vcmp.gt.f32.partialorder %v614_v53, 0.0 }
 0x100   : > { %15269 = vst [vmem:[#allocation44_spill] sm:$0xff] %v10075_v17  ;;  %v1035_v58 = vmul.f32 0.2, %v971_v49  ;;  %v1143_v59 = vmax.f32 %v10071_v15, %v10075_v17  ;;  %v15270_v16 = vmov 0  ;;  %v1036_v4 = vmul.f32 0.2, %v972_v35 }
 0x101   : > { %v15271_v16 = vsel %vm10079_vm15, 4294967295, %v15270_v16  ;;  %v827_v53 = vld [vmem:[%s10097_s22 + $0x10] sm:$0xff]  ;;  %v829_v30 = vld [vmem:[%s10097_s22 + $0x20] sm:$0xff] }
 0x102   : > { %15272 = vst [vmem:[#allocation45_spill] sm:$0xff] %v15271_v16  ;;  %v1067_v27 = vsel %vm1003_vm10, %v971_v49, %v1035_v58  ;;  %1144 = vmax.xlane.f32.xlu1 %v1143_v59  ;;  %v1068_v19 = vsel %vm1004_vm3, %v972_v35, %v1036_v4  ;;  %v828_v49 = vld [vmem:[%s10097_s22 + $0x18] sm:$0xff]  ;;  %v826_v35 = vld [vmem:[%s10097_s22 + $0x8] sm:$0xff]  ;;  %v824_v16 = vld [vmem:[%s14650_s5] sm:$0xff] }
 0x103   : > { %v10085_v63 = vsel %vm10063_vm13, %v1067_v27, -1e+30  ;;  %v10089_v56 = vsel %vm10079_vm15, %v1068_v19, -1e+30  ;;  %v834_v58 = vld [vmem:[%s10097_s22 + $0x48] sm:$0xff]  ;;  %v836_v4 = vld [vmem:[%s10097_s22 + $0x58] sm:$0xff] }
 0x104   : > { %15273 = vst [vmem:[#allocation46_spill] sm:$0xff] %v10085_v63  ;;  %15274 = vst [vmem:[#allocation47_spill] sm:$0xff] %v10089_v56  ;;  %v1146_v37 = vmax.f32 %v10085_v63, %v10089_v56  ;;  %v830_v59 = vld [vmem:[%s10097_s22 + $0x28] sm:$0xff]  ;;  %v831_v27 = vld [vmem:[%s10097_s22 + $0x30] sm:$0xff] }
 0x105   : > { %v838_v19 = vld [vmem:[%s10097_s22 + $0x68] sm:$0xff] }
 0x106   : > { %1147 = vmax.xlane.f32.xlu0 %v1146_v37  ;;  %v832_v37 = vld [vmem:[%s10097_s22 + $0x38] sm:$0xff] }
 0x113   : > { %1584 = vperm.xlu1 %8297, %v825_v54   ;;  %v840_v54 = vld [vmem:[%s10097_s22 + $0x78] sm:$0xff] }
 0x117   : > { %1594 = vperm.xlu1 %8297, %v827_v53   ;;  %v833_v53 = vld [vmem:[%s10097_s22 + $0x40] sm:$0xff] }
 0x11b   : > { %1599 = vperm.xlu1 %8297, %v828_v49   ;;  %v835_v49 = vld [vmem:[%s10097_s22 + $0x50] sm:$0xff] }
 0x11c   : > { %1589 = vperm.xlu0 %8410, %v826_v35   ;;  %v837_v35 = vld [vmem:[%s10097_s22 + $0x60] sm:$0xff] }
 0x11f   : > { %1604 = vperm.xlu1 %8297, %v829_v30   ;;  %v839_v30 = vld [vmem:[%s10097_s22 + $0x70] sm:$0xff] }
 0x120   : > { %1629 = vperm.xlu0 %8410, %v834_v58  }
 0x123   : > { %1609 = vperm.xlu1 %8297, %v830_v59  }
 0x124   : > { %1639 = vperm.xlu0 %8410, %v836_v4  }
 0x127   : > { %1614 = vperm.xlu1 %8297, %v831_v27  }
 0x128   : > { %1649 = vperm.xlu0 %8410, %v838_v19  }
 0x12b   : > { %1619 = vperm.xlu1 %8297, %v832_v37  }
 0x12c   : > { %1659 = vperm.xlu0 %8410, %v840_v54   ;;  %v8334_v54 = vunpack.i.h.bf16 %v9739_v9 }
 0x12e   : > { %vm10190_vm10 = vcmp.gt.f32.partialorder %v8334_v54, 0.0 }
 0x12f   : > { %1624 = vperm.xlu1 %8297, %v833_v53   ;;  %v8331_v53 = vunpack.i.l.bf16 %v9739_v9 }
 0x131   : > { %vm10182_vm14 = vcmp.gt.f32.partialorder %v8331_v53, 0.0 }
 0x133   : > { %1634 = vperm.xlu1 %8297, %v835_v49  }
 0x137   : > { %1644 = vperm.xlu1 %8297, %v837_v35  }
 0x13b   : > { %1654 = vperm.xlu1 %8297, %v839_v30  }
 0x153   : > { %v1103_v21 = vpop.xlane.xlu0 %1102 }
 0x154   : > { %v1149_v35 = vsub.f32 %v9764_v25, %v1103_v21  ;;  %v1150_v17 = vsub.f32 %v9768_v26, %v1103_v21 }
 0x156   : > { %v1181_v55 = vmul.f32 1.442695, %v1149_v35  ;;  %v1183_v29 = vmul.f32 1.442695, %v1150_v17 }
 0x158   : > { %v1106_v58 = vpop.xlane.xlu1 %1105  ;;  %8545 = vpow2.f32 %v1181_v55 }
 0x159   : > { %v1151_v25 = vsub.f32 %v9787_v43, %v1106_v58  ;;  %v1152_v30 = vsub.f32 %v9791_v44, %v1106_v58  ;;  %v1666_v44 = vrot.slane %v824_v16, %v9704_v52  ;;  %8547 = vpow2.f32 %v1183_v29 }
 0x15a   : > { %v15278_v29 = vmov 0 }
 0x15b   : > { %v1185_v9 = vmul.f32 1.442695, %v1151_v25  ;;  %v1187_v40 = vmul.f32 1.442695, %v1152_v30  ;;  %v15279_v29 = vsel %vm10182_vm14, 4294967295, %v15278_v29 }
 0x15c   : > { %v1109_v59 = vpop.xlane.xlu1 %1108  ;;  %15280 = vst [vmem:[#allocation50_spill] sm:$0xff] %v15279_v29 }
 0x15d   : > { %v1153_v43 = vsub.f32 %v9810_v62, %v1109_v59  ;;  %v1154_v26 = vsub.f32 %v9815_v0, %v1109_v59  ;;  %v15276_v62 = vsub.s32 4, %v9701_v51  ;;  %8549 = vpow2.f32 %v1185_v9 }
 0x15e   : > { %8551 = vpow2.f32 %v1187_v40  ;;  %v15281_v9 = vmov 0 }
 0x15f   : > { %v1670_v49 = vrot.slane %v824_v16, %v15276_v62  ;;  %v1189_v15 = vmul.f32 1.442695, %v1153_v43  ;;  %v15282_v9 = vsel %vm10190_vm10, 4294967295, %v15281_v9 }
 0x160   : > { %v1112_v7 = vpop.xlane.xlu1 %1111  ;;  %15283 = vst [vmem:[#allocation51_spill] sm:$0xff] %v15282_v9 }
 0x161   : > { %v1155_v35 = vsub.f32 %v9833_v22, %v1112_v7  ;;  %v1156_v17 = vsub.f32 %v9837_v23, %v1112_v7  ;;  %v1191_v22 = vmul.f32 1.442695, %v1154_v26  ;;  %v10175_v23 = vrot.slane %v1666_v44, %v9704_v52 }
 0x162   : > { %v10180_v43 = vrot.slane %v1670_v49, %v9704_v52  ;;  %8553 = vpow2.f32 %v1189_v15  ;;  %v15305_v52 = vunpack.i.h.bf16 %v9783_v41 }
 0x163   : > { %v1193_v7 = vmul.f32 1.442695, %v1155_v35  ;;  %8555 = vpow2.f32 %v1191_v22 }
 0x164   : > { %v10115_v4 = vpop.xlane.xlu1 %1114 }
 0x165   : > { %v1157_v16 = vsub.f32 %v9856_v46, %v10115_v4  ;;  %v1158_v55 = vsub.f32 %v9861_v48, %v10115_v4  ;;  %v1195_v46 = vmul.f32 1.442695, %v1156_v17  ;;  %8557 = vpow2.f32 %v1193_v7 }
 0x166   : > { %v15293_v4 = vmov 0 }
 0x167   : > { %v1197_v40 = vmul.f32 1.442695, %v1157_v16  ;;  %8559 = vpow2.f32 %v1195_v46  ;;  %v15289_v46 = vmov 0 }
 0x168   : > { %v10119_v19 = vpop.xlane.xlu0 %1117 }
 0x169   : > { %v1159_v26 = vsub.f32 %v9879_v14, %v10119_v19  ;;  %v1160_v44 = vsub.f32 %v9883_v18, %v10119_v19  ;;  %v1199_v19 = vmul.f32 1.442695, %v1158_v55  ;;  %8561 = vpow2.f32 %v1197_v40 }
 0x16b   : > { %v1201_v35 = vmul.f32 1.442695, %v1159_v26  ;;  %v1203_v17 = vmul.f32 1.442695, %v1160_v44  ;;  %v10211_v26 = vpop.eup %8545  ;;  %8563 = vpow2.f32 %v1199_v19  ;;  %v15292_v19 = vunpack.i.l.bf16 %v9760_v24 }
 0x16c   : > { %v10117_v27 = vpop.xlane.xlu1 %1120  ;;  %v10215_v48 = vpop.eup %8547 }
 0x16d   : > { %v1161_v22 = vsub.f32 %v9902_v32, %v10117_v27  ;;  %v1162_v7 = vsub.f32 %v9906_v47, %v10117_v27  ;;  %15286 = vst [vmem:[#allocation54_spill] sm:$0xff] %v10215_v48  ;;  %8565 = vpow2.f32 %v1201_v35  ;;  %v15288_v27 = vunpack.i.h.bf16 %v9760_v24 }
 0x16e   : > { %vm10229_vm15 = vcmp.gt.f32.partialorder %v15292_v19, 0.0  ;;  %8567 = vpow2.f32 %v1203_v17  ;;  %v15318_v48 = vmov 0 }
 0x16f   : > { %vm10223_vm12 = vcmp.gt.f32.partialorder %v15288_v27, 0.0  ;;  %v15294_v4 = vsel %vm10229_vm15, 4294967295, %v15293_v4  ;;  %v10242_v35 = vmul.f32 1.442695, %v1161_v22  ;;  %v15310_v27 = vmov 0 }
 0x170   : > { %v15290_v46 = vsel %vm10223_vm12, 4294967295, %v15289_v46  ;;  %15295 = vst [vmem:[#allocation57_spill] sm:$0xff] %v15294_v4  ;;  %v15341_v4 = vmov 0 }
 0x171   : > { %v10131_v56 = vpop.xlane.xlu0 %1123  ;;  %15291 = vst [vmem:[#allocation56_spill] sm:$0xff] %v15290_v46  ;;  %v15340_v46 = vunpack.i.h.bf16 %v9875_v12  ;;  %8569 = vpow2.f32 %v10242_v35 }
 0x175   : > { %v10121_v37 = vpop.xlane.xlu1 %1126 }
 0x179   : > { %v10153_v39 = vpop.xlane.xlu0 %1129 }
 0x17e   : > { %v10133_v63 = vpop.xlane.xlu1 %1132 }
 0x182   : > { %v10170_v62 = vpop.xlane.xlu0 %1135 }
 0x183   : > { %v1172_v35 = vsub.f32 %v10012_v3, %v10170_v62 }
 0x186   : > { %v10155_v21 = vpop.xlane.xlu1 %1138 }
 0x187   : > { %15275 = vst [vmem:[#allocation48_spill] sm:$0xff] %v10155_v21 }
 0x18a   : > { %v10197_v53 = vpop.xlane.xlu0 %1141 }
 0x18b   : > { %15284 = vst [vmem:[#allocation52_spill] sm:$0xff] %v10197_v53  ;;  %v15317_v53 = vunpack.i.h.bf16 %v9829_v20 }
 0x18d   : > { %vm10299_vm7 = vcmp.gt.f32.partialorder %v15317_v53, 0.0  ;;  %v15334_v53 = vmov 0 }
 0x18e   : > { %v15319_v48 = vsel %vm10299_vm7, 4294967295, %v15318_v48 }
 0x18f   : > { %v10172_v30 = vpop.xlane.xlu1 %1144  ;;  %15320 = vst [vmem:[#allocation67_spill] sm:$0xff] %v15319_v48 }
 0x190   : > { %15277 = vst [vmem:[#allocation49_spill] sm:$0xff] %v10172_v30 }
 0x193   : > { %v1585_v49 = vpop.permute.xlu1 %1584  ;;  %v10208_v55 = vpop.xlane.xlu0 %1147 }
 0x194   : > { %v1681_v54 = vadd.f32 %v10175_v23, %v1585_v49  ;;  %v1682_v15 = vadd.f32 %v10180_v43, %v1585_v49  ;;  %15285 = vst [vmem:[#allocation53_spill] sm:$0xff] %v10208_v55 }
 0x196   : > { %vm1713_vm3 = vcmp.gt.f32.partialorder %v1681_v54, 0.0  ;;  %vm1714_vm9 = vcmp.gt.f32.partialorder %v1682_v15, 0.0  ;;  %v1745_v16 = vmul.f32 0.2, %v1681_v54  ;;  %v1746_v14 = vmul.f32 0.2, %v1682_v15 }
 0x197   : > { %v1595_v18 = vpop.permute.xlu1 %1594 }
 0x198   : > { %v1685_v44 = vadd.f32 %v10175_v23, %v1595_v18  ;;  %v1686_v32 = vadd.f32 %v10180_v43, %v1595_v18  ;;  %v1777_v49 = vsel %vm1713_vm3, %v1681_v54, %v1745_v16  ;;  %v1778_v40 = vsel %vm1714_vm9, %v1682_v15, %v1746_v14  ;;  %v10240_v15 = vpop.eup %8549 }
 0x199   : > { %v10219_v47 = vsel %vm10182_vm14, %v1777_v49, -1e+30  ;;  %v15296_v18 = vunpack.i.h.bf16 %v9806_v60  ;;  %v15297_v14 = vmov 0  ;;  %v10246_v24 = vsel %vm10190_vm10, %v1778_v40, -1e+30  ;;  %v10255_v19 = vpop.eup %8551 }
 0x19a   : > { %15287 = vst [vmem:[#allocation55_spill] sm:$0xff] %v10219_v47  ;;  %15300 = vst [vmem:[#allocation59_spill] sm:$0xff] %v10246_v24  ;;  %v15301_v16 = vunpack.i.l.bf16 %v9806_v60  ;;  %v15302_v49 = vmov 0  ;;  %v1841_v22 = vmax.f32 %v10219_v47, %v10246_v24  ;;  %v1749_v25 = vmul.f32 0.2, %v1685_v44 }
 0x19b   : > { %vm10235_vm3 = vcmp.gt.f32.partialorder %v15296_v18, 0.0  ;;  %v10257_v18 = vmul.f32 1.442695, %v1162_v7  ;;  %v1600_v54 = vpop.permute.xlu1 %1599  ;;  %v1590_v17 = vpop.permute.xlu0 %1589  ;;  %v1750_v40 = vmul.f32 0.2, %v1686_v32  ;;  %vm10263_vm10 = vcmp.gt.f32.partialorder %v15305_v52, 0.0 }
 0x19c   : > { %v15298_v14 = vsel %vm10235_vm3, 4294967295, %v15297_v14  ;;  %vm10250_vm9 = vcmp.gt.f32.partialorder %v15301_v16, 0.0  ;;  %v15306_v60 = vmov 0  ;;  %v15309_v16 = vunpack.i.l.bf16 %v9783_v41  ;;  %v10273_v7 = vpop.eup %8553  ;;  %1842 = vmax.xlane.f32.xlu1 %v1841_v22 }
 0x19d   : > { %15299 = vst [vmem:[#allocation58_spill] sm:$0xff] %v15298_v14  ;;  %v15303_v49 = vsel %vm10250_vm9, 4294967295, %v15302_v49  ;;  %v15307_v60 = vsel %vm10263_vm10, 4294967295, %v15306_v60  ;;  %15313 = vst [vmem:[#allocation63_spill] sm:$0xff] %v10273_v7  ;;  %v1687_v21 = vadd.f32 %v10175_v23, %v1600_v54  ;;  %v1688_v59 = vadd.f32 %v10180_v43, %v1600_v54  ;;  %v10279_v52 = vpop.eup %8555 }
 0x19e   : > { %15304 = vst [vmem:[#allocation60_spill] sm:$0xff] %v15303_v49  ;;  %15308 = vst [vmem:[#allocation61_spill] sm:$0xff] %v15307_v60  ;;  %vm10269_vm14 = vcmp.gt.f32.partialorder %v15309_v16, 0.0  ;;  %v1683_v58 = vadd.f32 %v10175_v23, %v1590_v17  ;;  %v1684_v0 = vadd.f32 %v10180_v43, %v1590_v17  ;;  %vm1717_vm13 = vcmp.gt.f32.partialorder %v1685_v44, 0.0  ;;  %v10285_v16 = vpop.eup %8557 }
 0x19f   : > { %v15311_v27 = vsel %vm10269_vm14, 4294967295, %v15310_v27  ;;  %15314 = vst [vmem:[#allocation64_spill] sm:$0xff] %v10279_v52  ;;  %vm1718_vm11 = vcmp.gt.f32.partialorder %v1686_v32, 0.0  ;;  %15315 = vst [vmem:[#allocation65_spill] sm:$0xff] %v10285_v16  ;;  %v10287_v29 = vpop.eup %8559  ;;  %v1605_v17 = vpop.permute.xlu1 %1604  ;;  %vm1719_vm1 = vcmp.gt.f32.partialorder %v1687_v21, 0.0  ;;  %vm1720_vm0 = vcmp.gt.f32.partialorder %v1688_v59, 0.0 }
 0x1a0   : > { %15312 = vst [vmem:[#allocation62_spill] sm:$0xff] %v15311_v27  ;;  %vm1715_vm4 = vcmp.gt.f32.partialorder %v1683_v58, 0.0  ;;  %vm1716_vm8 = vcmp.gt.f32.partialorder %v1684_v0, 0.0  ;;  %v1747_v54 = vmul.f32 0.2, %v1683_v58  ;;  %15316 = vst [vmem:[#allocation66_spill] sm:$0xff] %v10287_v29  ;;  %v1630_v51 = vpop.permute.xlu0 %1629  ;;  %v1689_v47 = vadd.f32 %v10175_v23, %v1605_v17  ;;  %v10293_v52 = vpop.eup %8561 }
 0x1a1   : > { %v1748_v9 = vmul.f32 0.2, %v1684_v0  ;;  %v1751_v24 = vmul.f32 0.2, %v1687_v21  ;;  %v1752_v10 = vmul.f32 0.2, %v1688_v59  ;;  %v1690_v22 = vadd.f32 %v10180_v43, %v1605_v17 }
 0x1a2   : > { %v1781_v41 = vsel %vm1717_vm13, %v1685_v44, %v1749_v25  ;;  %v1782_v55 = vsel %vm1718_vm11, %v1686_v32, %v1750_v40  ;;  %v1779_v7 = vsel %vm1715_vm4, %v1683_v58, %v1747_v54  ;;  %v15321_v17 = vunpack.i.l.bf16 %v9829_v20 }
 0x1a3   : > { %v1780_v30 = vsel %vm1716_vm8, %v1684_v0, %v1748_v9  ;;  %v1783_v29 = vsel %vm1719_vm1, %v1687_v21, %v1751_v24  ;;  %v1784_v16 = vsel %vm1720_vm0, %v1688_v59, %v1752_v10  ;;  %v15322_v25 = vmov 0  ;;  %v10315_v21 = vpop.eup %8563  ;;  %v1610_v40 = vpop.permute.xlu1 %1609 }
 0x1a4   : > { %vm10305_vm6 = vcmp.gt.f32.partialorder %v15321_v17, 0.0  ;;  %v15325_v44 = vunpack.i.h.bf16 %v9852_v42  ;;  %v15326_v58 = vmov 0  ;;  %15329 = vst [vmem:[#allocation70_spill] sm:$0xff] %v10315_v21  ;;  %v10321_v0 = vsel %vm10223_vm12, %v1780_v30, -1e+30  ;;  %v10337_v32 = vpop.eup %8565 }
 0x1a5   : > { %v15323_v25 = vsel %vm10305_vm6, 4294967295, %v15322_v25  ;;  %15330 = vst [vmem:[#allocation71_spill] sm:$0xff] %v10321_v0  ;;  %v10325_v20 = vsel %vm10229_vm15, %v1779_v7, -1e+30  ;;  %v10329_v59 = vsel %vm10235_vm3, %v1784_v16, -1e+30  ;;  %v15333_v9 = vunpack.i.l.bf16 %v9852_v42  ;;  %v1640_v7 = vpop.permute.xlu0 %1639  ;;  %v10351_v54 = vpop.eup %8567 }
 0x1a6   : > { %15324 = vst [vmem:[#allocation68_spill] sm:$0xff] %v15323_v25  ;;  %vm10311_vm11 = vcmp.gt.f32.partialorder %v15325_v44, 0.0  ;;  %15331 = vst [vmem:[#allocation72_spill] sm:$0xff] %v10325_v20  ;;  %v10340_v24 = vadd.f32 %v10175_v23, %v1630_v51  ;;  %v10343_v30 = vadd.f32 %v10180_v43, %v1630_v51  ;;  %v1844_v16 = vmax.f32 %v10325_v20, %v10321_v0 }
 0x1a7   : > { %v15327_v58 = vsel %vm10311_vm11, 4294967295, %v15326_v58  ;;  %15332 = vst [vmem:[#allocation73_spill] sm:$0xff] %v10329_v59  ;;  %vm10333_vm0 = vcmp.gt.f32.partialorder %v15333_v9, 0.0  ;;  %v10349_v42 = vsel %vm10250_vm9, %v1783_v29, -1e+30  ;;  %v1691_v17 = vadd.f32 %v10175_v23, %v1610_v40 }
 0x1a8   : > { %15328 = vst [vmem:[#allocation69_spill] sm:$0xff] %v15327_v58  ;;  %v15335_v53 = vsel %vm10333_vm0, 4294967295, %v15334_v53  ;;  %15337 = vst [vmem:[#allocation75_spill] sm:$0xff] %v10349_v42  ;;  %v1692_v44 = vadd.f32 %v10180_v43, %v1610_v40  ;;  %v10357_v9 = vsel %vm10263_vm10, %v1782_v55, -1e+30  ;;  %v10364_v10 = vadd.f32 %v10175_v23, %v1640_v7  ;;  %1845 = vmax.xlane.f32.xlu0 %v1844_v16  ;;  %v1615_v40 = vpop.permute.xlu1 %1614 }
 0x1a9   : > { %15336 = vst [vmem:[#allocation74_spill] sm:$0xff] %v15335_v53  ;;  %15338 = vst [vmem:[#allocation76_spill] sm:$0xff] %v10357_v9  ;;  %v10361_v51 = vsel %vm10269_vm14, %v1781_v41, -1e+30  ;;  %v1850_v29 = vmax.f32 %v10349_v42, %v10329_v59  ;;  %vm1721_vm1 = vcmp.gt.f32.partialorder %v1689_v47, 0.0  ;;  %v10369_v55 = vadd.f32 %v10180_v43, %v1640_v7  ;;  %v1650_v41 = vpop.permute.xlu0 %1649 }
 0x1aa   : > { %15339 = vst [vmem:[#allocation77_spill] sm:$0xff] %v10361_v51  ;;  %v1753_v14 = vmul.f32 0.2, %v1689_v47  ;;  %v1754_v49 = vmul.f32 0.2, %v1690_v22  ;;  %v1847_v60 = vmax.f32 %v10361_v51, %v10357_v9  ;;  %vm10375_vm3 = vcmp.gt.f32.partialorder %v15340_v46, 0.0 }
 0x1ab   : > { %1851 = vmax.xlane.f32.xlu1 %v1850_v29  ;;  %v1755_v27 = vmul.f32 0.2, %v1691_v17  ;;  %v1756_v16 = vmul.f32 0.2, %v1692_v44  ;;  %v15342_v4 = vsel %vm10375_vm3, 4294967295, %v15341_v4  ;;  %v15344_v59 = vunpack.i.l.bf16 %v9875_v12 }
 0x1ac   : > { %15343 = vst [vmem:[#allocation78_spill] sm:$0xff] %v15342_v4  ;;  %v15345_v42 = vmov 0  ;;  %v1693_v7 = vadd.f32 %v10175_v23, %v1615_v40  ;;  %v1694_v29 = vadd.f32 %v10180_v43, %v1615_v40  ;;  %1848 = vmax.xlane.f32.xlu0 %v1847_v60  ;;  %v1785_v46 = vsel %vm1721_vm1, %v1689_v47, %v1753_v14 }
 0x1ad   : > { %vm10381_vm13 = vcmp.gt.f32.partialorder %v15344_v59, 0.0  ;;  %vm15348_vm9 = vcmp.gt.f32.partialorder %v1690_v22, 0.0  ;;  %vm15349_vm10 = vcmp.gt.f32.partialorder %v1691_v17, 0.0  ;;  %vm15350_vm14 = vcmp.gt.f32.partialorder %v1692_v44, 0.0 }
 0x1ae   : > { %v15346_v42 = vsel %vm10381_vm13, 4294967295, %v15345_v42  ;;  %v1786_v9 = vsel %vm15348_vm9, %v1690_v22, %v1754_v49  ;;  %v1787_v51 = vsel %vm15349_vm10, %v1691_v17, %v1755_v27  ;;  %v1788_v12 = vsel %vm15350_vm14, %v1692_v44, %v1756_v16  ;;  %v1620_v17 = vpop.permute.xlu1 %1619  ;;  %v10429_v44 = vpop.permute.xlu0 %1659 }
 0x1af   : > { %15347 = vst [vmem:[#allocation79_spill] sm:$0xff] %v15346_v42  ;;  %v15351_v59 = vunpack.i.h.bf16 %v9898_v45  ;;  %v15352_v0 = vmov 0  ;;  %v15355_v40 = vunpack.i.l.bf16 %v9898_v45  ;;  %v15356_v20 = vmov 0 }
 0x1b0   : > { %v10406_v47 = vadd.f32 %v10175_v23, %v1650_v41  ;;  %v10410_v14 = vsel %vm10299_vm7, %v1786_v9, -1e+30  ;;  %v10414_v49 = vsel %vm10305_vm6, %v1785_v46, -1e+30  ;;  %v10418_v27 = vsel %vm10311_vm11, %v1788_v12, -1e+30 }
 0x1b1   : > { %vm10395_vm12 = vcmp.gt.f32.partialorder %v15351_v59, 0.0  ;;  %vm10401_vm4 = vcmp.gt.f32.partialorder %v15355_v40, 0.0  ;;  %15359 = vst [vmem:[#allocation82_spill] sm:$0xff] %v10410_v14  ;;  %15360 = vst [vmem:[#allocation83_spill] sm:$0xff] %v10414_v49  ;;  %v15362_v45 = vunpack.i.h.bf16 %v9943_v61  ;;  %v15363_v60 = vmov 0 }
 0x1b2   : > { %v15353_v0 = vsel %vm10395_vm12, 4294967295, %v15352_v0  ;;  %v15357_v20 = vsel %vm10401_vm4, 4294967295, %v15356_v20  ;;  %15361 = vst [vmem:[#allocation84_spill] sm:$0xff] %v10418_v27  ;;  %v10427_v22 = vadd.f32 %v10180_v43, %v1650_v41  ;;  %v1853_v9 = vmax.f32 %v10414_v49, %v10410_v14 }
 0x1b3   : > { %15354 = vst [vmem:[#allocation80_spill] sm:$0xff] %v15353_v0  ;;  %15358 = vst [vmem:[#allocation81_spill] sm:$0xff] %v15357_v20  ;;  %vm10422_vm14 = vcmp.gt.f32.partialorder %v15362_v45, 0.0  ;;  %v10435_v16 = vsel %vm10333_vm0, %v1787_v51, -1e+30  ;;  %v15367_v46 = vunpack.i.l.bf16 %v9943_v61  ;;  %v15368_v12 = vmov 0 }
 0x1b4   : > { %v15364_v60 = vsel %vm10422_vm14, 4294967295, %v15363_v60  ;;  %15366 = vst [vmem:[#allocation86_spill] sm:$0xff] %v10435_v16  ;;  %v1695_v41 = vadd.f32 %v10175_v23, %v1620_v17  ;;  %v1696_v59 = vadd.f32 %v10180_v43, %v1620_v17  ;;  %v10447_v40 = vadd.f32 %v10175_v23, %v10429_v44  ;;  %1854 = vmax.xlane.f32.xlu0 %v1853_v9 }
 0x1b5   : > { %15365 = vst [vmem:[#allocation85_spill] sm:$0xff] %v15364_v60  ;;  %vm10439_vm9 = vcmp.gt.f32.partialorder %v15367_v46, 0.0  ;;  %vm1726_vm1 = vcmp.gt.f32.partialorder %v1694_v29, 0.0  ;;  %v1856_v51 = vmax.f32 %v10435_v16, %v10418_v27  ;;  %v1757_v45 = vmul.f32 0.2, %v1693_v7  ;;  %v1625_v27 = vpop.permute.xlu1 %1624 }
 0x1b6   : > { %v15369_v12 = vsel %vm10439_vm9, 4294967295, %v15368_v12  ;;  %v1758_v58 = vmul.f32 0.2, %v1694_v29  ;;  %v15371_v61 = vunpack.i.h.bf16 %v9921_v28  ;;  %v15372_v46 = vmov 0 }
 0x1b7   : > { %15370 = vst [vmem:[#allocation87_spill] sm:$0xff] %v15369_v12  ;;  %v15375_v53 = vunpack.i.l.bf16 %v9921_v28  ;;  %v15376_v17 = vmov 0  ;;  %v1763_v48 = vmul.f32 0.2, %v10340_v24  ;;  %vm1727_vm11 = vcmp.gt.f32.partialorder %v1695_v41, 0.0  ;;  %1857 = vmax.xlane.f32.xlu1 %v1856_v51 }
 0x1b8   : > { %vm10453_vm8 = vcmp.gt.f32.partialorder %v15371_v61, 0.0  ;;  %vm1728_vm0 = vcmp.gt.f32.partialorder %v1696_v59, 0.0  ;;  %v1759_v9 = vmul.f32 0.2, %v1695_v41  ;;  %v1760_v25 = vmul.f32 0.2, %v1696_v59 }
 0x1b9   : > { %v15373_v46 = vsel %vm10453_vm8, 4294967295, %v15372_v46  ;;  %vm10459_vm10 = vcmp.gt.f32.partialorder %v15375_v53, 0.0  ;;  %vm15379_vm7 = vcmp.gt.f32.partialorder %v1693_v7, 0.0  ;;  %v1790_v61 = vsel %vm1726_vm1, %v1694_v29, %v1758_v58 }
 0x1ba   : > { %15374 = vst [vmem:[#allocation88_spill] sm:$0xff] %v15373_v46  ;;  %v15377_v17 = vsel %vm10459_vm10, 4294967295, %v15376_v17  ;;  %v1789_v16 = vsel %vm15379_vm7, %v1693_v7, %v1757_v45  ;;  %v1764_v14 = vmul.f32 0.2, %v10343_v30  ;;  %vm15380_vm6 = vcmp.gt.f32.partialorder %v10340_v24, 0.0 }
 0x1bb   : > { %15378 = vst [vmem:[#allocation89_spill] sm:$0xff] %v15377_v17  ;;  %v1795_v28 = vsel %vm15380_vm6, %v10340_v24, %v1763_v48  ;;  %v1697_v53 = vadd.f32 %v10175_v23, %v1625_v27  ;;  %v1698_v49 = vadd.f32 %v10180_v43, %v1625_v27  ;;  %v10473_v21 = vsel %vm10375_vm3, %v1790_v61, -1e+30 }
 0x1bc   : > { %v10477_v51 = vsel %vm10381_vm13, %v1789_v16, -1e+30  ;;  %v1791_v7 = vsel %vm1727_vm11, %v1695_v41, %v1759_v9  ;;  %v1792_v29 = vsel %vm1728_vm0, %v1696_v59, %v1760_v25  ;;  %vm15381_vm6 = vcmp.gt.f32.partialorder %v10343_v30, 0.0  ;;  %v1635_v59 = vpop.permute.xlu1 %1634 }
 0x1bd   : > { %v1859_v58 = vmax.f32 %v10477_v51, %v10473_v21  ;;  %v1796_v48 = vsel %vm15381_vm6, %v10343_v30, %v1764_v14  ;;  %v15382_v24 = vunpack.i.h.bf16 %v9962_v38  ;;  %v15383_v27 = vmov 0 }
 0x1be   : > { %v15386_v45 = vunpack.i.l.bf16 %v9962_v38  ;;  %v15387_v16 = vmov 0  ;;  %v15390_v61 = vunpack.i.l.bf16 %v9985_v57  ;;  %v15391_v25 = vmov 0 }
 0x1bf   : > { %vm10486_vm7 = vcmp.gt.f32.partialorder %v15382_v24, 0.0  ;;  %v10504_v30 = vsel %vm10395_vm12, %v1792_v29, -1e+30  ;;  %v10508_v14 = vsel %vm10401_vm4, %v1791_v7, -1e+30  ;;  %vm1729_vm0 = vcmp.gt.f32.partialorder %v1697_v53, 0.0  ;;  %1860 = vmax.xlane.f32.xlu0 %v1859_v58 }
 0x1c0   : > { %v15384_v27 = vsel %vm10486_vm7, 4294967295, %v15383_v27  ;;  %vm10492_vm1 = vcmp.gt.f32.partialorder %v15386_v45, 0.0  ;;  %vm10498_vm11 = vcmp.gt.f32.partialorder %v15390_v61, 0.0  ;;  %vm1730_vm6 = vcmp.gt.f32.partialorder %v1698_v49, 0.0 }
 0x1c1   : > { %15385 = vst [vmem:[#allocation90_spill] sm:$0xff] %v15384_v27  ;;  %v15388_v16 = vsel %vm10492_vm1, 4294967295, %v15387_v16  ;;  %v15392_v25 = vsel %vm10498_vm11, 4294967295, %v15391_v25  ;;  %v15394_v38 = vunpack.i.h.bf16 %v9985_v57  ;;  %v15395_v41 = vmov 0 }
 0x1c2   : > { %15389 = vst [vmem:[#allocation91_spill] sm:$0xff] %v15388_v16  ;;  %15393 = vst [vmem:[#allocation92_spill] sm:$0xff] %v15392_v25  ;;  %v1862_v9 = vmax.f32 %v10508_v14, %v10504_v30  ;;  %v1761_v24 = vmul.f32 0.2, %v1697_v53  ;;  %v1762_v29 = vmul.f32 0.2, %v1698_v49  ;;  %v1701_v7 = vadd.f32 %v10175_v23, %v1635_v59 }
 0x1c3   : > { %vm10512_vm3 = vcmp.gt.f32.partialorder %v15394_v38, 0.0  ;;  %v10520_v45 = vsel %vm10422_vm14, %v1796_v48, -1e+30  ;;  %v1702_v61 = vadd.f32 %v10180_v43, %v1635_v59  ;;  %v10526_v57 = vsel %vm10439_vm9, %v1795_v28, -1e+30 }
 0x1c4   : > { %v15396_v41 = vsel %vm10512_vm3, 4294967295, %v15395_v41  ;;  %1863 = vmax.xlane.f32.xlu1 %v1862_v9  ;;  %v1793_v58 = vsel %vm1729_vm0, %v1697_v53, %v1761_v24  ;;  %v1794_v38 = vsel %vm1730_vm6, %v1698_v49, %v1762_v29  ;;  %v1868_v0 = vmax.f32 %v10526_v57, %v10520_v45  ;;  %v1645_v49 = vpop.permute.xlu1 %1644 }
 0x1c5   : > { %15397 = vst [vmem:[#allocation93_spill] sm:$0xff] %v15396_v41  ;;  %v10534_v48 = vsel %vm10453_vm8, %v1794_v38, -1e+30  ;;  %v10538_v59 = vsel %vm10459_vm10, %v1793_v58, -1e+30  ;;  %v15398_v28 = vunpack.i.l.bf16 %v10004_v34  ;;  %v15399_v53 = vmov 0 }
 0x1c6   : > { %v1865_v9 = vmax.f32 %v10538_v59, %v10534_v48  ;;  %v1765_v24 = vmul.f32 0.2, %v1701_v7  ;;  %v1766_v29 = vmul.f32 0.2, %v1702_v61  ;;  %v1767_v38 = vmul.f32 0.2, %v10364_v10 }
 0x1c7   : > { %vm10542_vm12 = vcmp.gt.f32.partialorder %v15398_v28, 0.0  ;;  %v15402_v60 = vunpack.i.h.bf16 %v10004_v34  ;;  %v15403_v58 = vmov 0  ;;  %v15406_v12 = vunpack.i.h.bf16 %v10026_v13 }
 0x1c8   : > { %v15400_v53 = vsel %vm10542_vm12, 4294967295, %v15399_v53  ;;  %v15407_v28 = vmov 0  ;;  %v15410_v20 = vunpack.i.l.bf16 %v10026_v13  ;;  %v15411_v46 = vmov 0  ;;  %1866 = vmax.xlane.f32.xlu0 %v1865_v9  ;;  %1869 = vmax.xlane.f32.xlu1 %v1868_v0 }
 0x1c9   : > { %15401 = vst [vmem:[#allocation94_spill] sm:$0xff] %v15400_v53  ;;  %vm10551_vm0 = vcmp.gt.f32.partialorder %v15402_v60, 0.0  ;;  %vm10557_vm6 = vcmp.gt.f32.partialorder %v15406_v12, 0.0  ;;  %v1705_v17 = vadd.f32 %v10175_v23, %v1645_v49  ;;  %v1706_v34 = vadd.f32 %v10180_v43, %v1645_v49  ;;  %v15468_v53 = vld [vmem:[#allocation59_spill] sm:$0xff] }
 0x1ca   : > { %v15404_v58 = vsel %vm10551_vm0, 4294967295, %v15403_v58  ;;  %v15408_v28 = vsel %vm10557_vm6, 4294967295, %v15407_v28  ;;  %vm10563_vm4 = vcmp.gt.f32.partialorder %v15410_v20, 0.0  ;;  %v1768_v60 = vmul.f32 0.2, %v10369_v55 }
 0x1cb   : > { %15405 = vst [vmem:[#allocation95_spill] sm:$0xff] %v15404_v58  ;;  %15409 = vst [vmem:[#allocation96_spill] sm:$0xff] %v15408_v28  ;;  %v15412_v46 = vsel %vm10563_vm4, 4294967295, %v15411_v46  ;;  %v15414_v4 = vunpack.i.l.bf16 %v10045_v1  ;;  %v15415_v12 = vmov 0  ;;  %vm15418_vm8 = vcmp.gt.f32.partialorder %v1701_v7, 0.0 }
 0x1cc   : > { %15413 = vst [vmem:[#allocation97_spill] sm:$0xff] %v15412_v46  ;;  %v1797_v13 = vsel %vm15418_vm8, %v1701_v7, %v1765_v24  ;;  %vm15419_vm10 = vcmp.gt.f32.partialorder %v1702_v61, 0.0  ;;  %vm15420_vm13 = vcmp.gt.f32.partialorder %v10364_v10, 0.0  ;;  %vm15421_vm9 = vcmp.gt.f32.partialorder %v10369_v55, 0.0 }
 0x1cd   : > { %vm10573_vm14 = vcmp.gt.f32.partialorder %v15414_v4, 0.0  ;;  %v1798_v20 = vsel %vm15419_vm10, %v1702_v61, %v1766_v29  ;;  %v1799_v49 = vsel %vm15420_vm13, %v10364_v10, %v1767_v38  ;;  %v10589_v4 = vsel %vm10492_vm1, %v1797_v13, -1e+30  ;;  %v1655_v61 = vpop.permute.xlu1 %1654 }
 0x1ce   : > { %v15416_v12 = vsel %vm10573_vm14, 4294967295, %v15415_v12  ;;  %v10585_v42 = vsel %vm10486_vm7, %v1798_v20, -1e+30  ;;  %v1800_v0 = vsel %vm15421_vm9, %v10369_v55, %v1768_v60  ;;  %v10596_v7 = vsel %vm10498_vm11, %v1799_v49, -1e+30 }
 0x1cf   : > { %15417 = vst [vmem:[#allocation98_spill] sm:$0xff] %v15416_v12  ;;  %v1871_v10 = vmax.f32 %v10589_v4, %v10585_v42  ;;  %v10602_v9 = vsel %vm10512_vm3, %v1800_v0, -1e+30  ;;  %vm1737_vm8 = vcmp.gt.f32.partialorder %v1705_v17, 0.0  ;;  %v15422_v24 = vunpack.i.h.bf16 %v10045_v1 }
 0x1d0   : > { %v15423_v29 = vmov 0  ;;  %v1709_v55 = vadd.f32 %v10175_v23, %v1655_v61  ;;  %v1710_v38 = vadd.f32 %v10180_v43, %v1655_v61  ;;  %v1874_v60 = vmax.f32 %v10596_v7, %v10602_v9 }
 0x1d1   : > { %vm10606_vm10 = vcmp.gt.f32.partialorder %v15422_v24, 0.0  ;;  %v1769_v13 = vmul.f32 0.2, %v1705_v17  ;;  %v15426_v20 = vunpack.i.h.bf16 %v10067_v36  ;;  %v15427_v49 = vmov 0  ;;  %1872 = vmax.xlane.f32.xlu0 %v1871_v10 }
 0x1d2   : > { %v15424_v29 = vsel %vm10606_vm10, 4294967295, %v15423_v29  ;;  %v15430_v1 = vunpack.i.l.bf16 %v10067_v36  ;;  %v15431_v0 = vmov 0  ;;  %v1712_v23 = vadd.f32 %v10180_v43, %v10429_v44  ;;  %1875 = vmax.xlane.f32.xlu1 %v1874_v60 }
 0x1d3   : > { %15425 = vst [vmem:[#allocation99_spill] sm:$0xff] %v15424_v29  ;;  %vm10616_vm9 = vcmp.gt.f32.partialorder %v15426_v20, 0.0  ;;  %v1770_v61 = vmul.f32 0.2, %v1706_v34  ;;  %v1771_v24 = vmul.f32 0.2, %v10406_v47  ;;  %v1801_v20 = vsel %vm1737_vm8, %v1705_v17, %v1769_v13 }
 0x1d4   : > { %v15428_v49 = vsel %vm10616_vm9, 4294967295, %v15427_v49  ;;  %vm10622_vm15 = vcmp.gt.f32.partialorder %v15430_v1, 0.0  ;;  %v1772_v41 = vmul.f32 0.2, %v10427_v22  ;;  %vm1741_vm13 = vcmp.gt.f32.partialorder %v1709_v55, 0.0 }
 0x1d5   : > { %15429 = vst [vmem:[#allocation100_spill] sm:$0xff] %v15428_v49  ;;  %v15432_v0 = vsel %vm10622_vm15, 4294967295, %v15431_v0  ;;  %vm1742_vm3 = vcmp.gt.f32.partialorder %v1710_v38, 0.0  ;;  %v1773_v25 = vmul.f32 0.2, %v1709_v55  ;;  %vm15434_vm11 = vcmp.gt.f32.partialorder %v1706_v34, 0.0 }
 0x1d6   : > { %15433 = vst [vmem:[#allocation101_spill] sm:$0xff] %v15432_v0  ;;  %v1802_v36 = vsel %vm15434_vm11, %v1706_v34, %v1770_v61  ;;  %v10633_v1 = vsel %vm10542_vm12, %v1801_v20, -1e+30  ;;  %vm15435_vm7 = vcmp.gt.f32.partialorder %v10406_v47, 0.0  ;;  %vm15436_vm1 = vcmp.gt.f32.partialorder %v10427_v22, 0.0 }
 0x1d7   : > { %v1803_v43 = vsel %vm15435_vm7, %v10406_v47, %v1771_v24  ;;  %v1804_v44 = vsel %vm15436_vm1, %v10427_v22, %v1772_v41  ;;  %v10643_v17 = vsel %vm10551_vm0, %v1802_v36, -1e+30  ;;  %v1805_v60 = vsel %vm1741_vm13, %v1709_v55, %v1773_v25 }
 0x1d8   : > { %v10647_v10 = vsel %vm10557_vm6, %v1804_v44, -1e+30  ;;  %v10651_v34 = vsel %vm10563_vm4, %v1803_v43, -1e+30  ;;  %v1877_v47 = vmax.f32 %v10633_v1, %v10643_v17  ;;  %v1774_v22 = vmul.f32 0.2, %v1710_v38 }
 0x1d9   : > { %v1880_v13 = vmax.f32 %v10651_v34, %v10647_v10  ;;  %v10659_v41 = vsel %vm10573_vm14, %v1805_v60, -1e+30  ;;  %vm1743_vm7 = vcmp.gt.f32.partialorder %v10447_v40, 0.0  ;;  %vm1744_vm1 = vcmp.gt.f32.partialorder %v1712_v23, 0.0 }
 0x1da   : > { %v1775_v61 = vmul.f32 0.2, %v10447_v40  ;;  %v1776_v24 = vmul.f32 0.2, %v1712_v23  ;;  %v15437_v25 = vsub.f32 %v9925_v50, %v10131_v56  ;;  %v15438_v20 = vsub.f32 %v9929_v31, %v10131_v56  ;;  %1878 = vmax.xlane.f32.xlu0 %v1877_v47 }
 0x1db   : > { %v1167_v43 = vsub.f32 %v9966_v2, %v10153_v39  ;;  %1881 = vmax.xlane.f32.xlu1 %v1880_v13  ;;  %v1806_v44 = vsel %vm1742_vm3, %v1710_v38, %v1774_v22  ;;  %v1168_v60 = vsub.f32 %v9970_v11, %v10153_v39  ;;  %v1166_v31 = vsub.f32 %v9952_v33, %v10121_v37 }
 0x1dc   : > { %v1209_v55 = vmul.f32 1.442695, %v15437_v25  ;;  %v1211_v36 = vmul.f32 1.442695, %v15438_v20  ;;  %v10676_v28 = vsel %vm10606_vm10, %v1806_v44, -1e+30  ;;  %v1807_v50 = vsel %vm1743_vm7, %v10447_v40, %v1775_v61 }
 0x1dd   : > { %v1808_v25 = vsel %vm1744_vm1, %v1712_v23, %v1776_v24  ;;  %v1883_v2 = vmax.f32 %v10659_v41, %v10676_v28  ;;  %v10689_v11 = vsel %vm10622_vm15, %v1807_v50, -1e+30  ;;  %v15441_v39 = vsub.f32 %v9947_v5, %v10121_v37  ;;  %v15443_v24 = vld [vmem:[#allocation48_spill] sm:$0xff]  ;;  %v15445_v20 = vld [vmem:[#allocation54_spill] sm:$0xff] }
 0x1de   : > { %v10685_v56 = vsel %vm10616_vm9, %v1808_v25, -1e+30  ;;  %15440 = vst [vmem:[#allocation103_spill] sm:$0xff] %v10689_v11  ;;  %v1169_v33 = vsub.f32 %v9989_v6, %v10133_v63  ;;  %8571 = vpow2.f32 %v1209_v55  ;;  %v1217_v23 = vmul.f32 1.442695, %v1167_v43  ;;  %v15442_v6 = vld [vmem:[#allocation32_spill] sm:$0xff] }
 0x1df   : > { %15439 = vst [vmem:[#allocation102_spill] sm:$0xff] %v10685_v56  ;;  %v1213_v40 = vmul.f32 1.442695, %v15441_v39  ;;  %v1886_v38 = vmax.f32 %v10689_v11, %v10685_v56  ;;  %v1171_v47 = vsub.f32 %v10008_v8, %v10170_v62  ;;  %1884 = vmax.xlane.f32.xlu0 %v1883_v2  ;;  %8573 = vpow2.f32 %v1211_v36  ;;  %v15444_v8 = vld [vmem:[#allocation36_spill] sm:$0xff]  ;;  %v15447_v43 = vld [vmem:[#allocation39_spill] sm:$0xff]  ;;  %v15449_v25 = vld [vmem:[#allocation37_spill] sm:$0xff] }
 0x1e0   : > { %v1219_v13 = vmul.f32 1.442695, %v1168_v60  ;;  %8575 = vpow2.f32 %v10257_v18  ;;  %v1215_v5 = vmul.f32 1.442695, %v1166_v31  ;;  %v1170_v37 = vsub.f32 %v15442_v6, %v10133_v63  ;;  %v15446_v62 = vld [vmem:[#allocation52_spill] sm:$0xff]  ;;  %v15450_v2 = vld [vmem:[#allocation65_spill] sm:$0xff] }
 0x1e1   : > { %1887 = vmax.xlane.f32.xlu1 %v1886_v38  ;;  %v1248_v22 = vadd.f32 %v10255_v19, %v10240_v15  ;;  %8577 = vpow2.f32 %v1213_v40  ;;  %v1221_v61 = vmul.f32 1.442695, %v1169_v33  ;;  %v1173_v55 = vsub.f32 %v15444_v8, %v15443_v24  ;;  %v15448_v63 = vld [vmem:[#allocation40_spill] sm:$0xff]  ;;  %v15451_v39 = vld [vmem:[#allocation66_spill] sm:$0xff]  ;;  %v15452_v38 = vld [vmem:[#allocation49_spill] sm:$0xff] }
 0x1e2   : > { %v1245_v36 = vadd.f32 %v15445_v20, %v10211_v26  ;;  %8579 = vpow2.f32 %v1217_v23  ;;  %v1225_v3 = vmul.f32 1.442695, %v1171_v47  ;;  %v1175_v18 = vsub.f32 %v15447_v43, %v15446_v62  ;;  %v15453_v23 = vld [vmem:[#allocation43_spill] sm:$0xff]  ;;  %v15457_v8 = vld [vmem:[#allocation46_spill] sm:$0xff] }
 0x1e3   : > { %1249 = vadd.xlane.f32.xlu0 %v1248_v22  ;;  %8581 = vpow2.f32 %v1219_v13  ;;  %v1227_v44 = vmul.f32 1.442695, %v1172_v35  ;;  %v1176_v60 = vsub.f32 %v15448_v63, %v15446_v62  ;;  %v1223_v50 = vmul.f32 1.442695, %v1170_v37  ;;  %v15454_v6 = vld [vmem:[#allocation63_spill] sm:$0xff]  ;;  %v15455_v13 = vld [vmem:[#allocation64_spill] sm:$0xff] }
 0x1e4   : > { %8583 = vpow2.f32 %v1215_v5  ;;  %v1174_v31 = vsub.f32 %v15449_v25, %v15443_v24  ;;  %v1254_v40 = vadd.f32 %v15451_v39, %v15450_v2  ;;  %v1229_v33 = vmul.f32 1.442695, %v1173_v55  ;;  %v8417_v22 = vld [vmem:[%s14649_s4 + $0x40] sm:$0xff]   ;;  %v15456_v24 = vld [vmem:[#allocation53_spill] sm:$0xff]  ;;  %v10732_v55 = vpop.eup %8569  ;;  %v15458_v62 = vld [vmem:[#allocation47_spill] sm:$0xff] }
 0x1e5   : > { %1246 = vadd.xlane.f32.xlu1 %v1245_v36  ;;  %8585 = vpow2.f32 %v1221_v61  ;;  %v1177_v47 = vsub.f32 %v15453_v23, %v15452_v38  ;;  %v1251_v35 = vadd.f32 %v15455_v13, %v15454_v6  ;;  %v8418_v5 = vld [vmem:[%s14649_s4] sm:$0xff]   ;;  %v1233_v37 = vmul.f32 1.442695, %v1175_v18  ;;  %7737 = vmatprep.subr.bf16.mxu0 %v8417_v22 }
 0x1e6   : > { %8587 = vpow2.f32 %v1225_v3  ;;  %v1179_v61 = vsub.f32 %v15457_v8, %v15456_v24  ;;  %v1235_v36 = vmul.f32 1.442695, %v1176_v60  ;;  %v1180_v43 = vsub.f32 %v15458_v62, %v15456_v24  ;;  %v15459_v3 = vld [vmem:[#allocation44_spill] sm:$0xff]  ;;  %7738 = vmatpush3.bf16.msra.mxu0 %v8418_v5  ;;  %v15460_v60 = vld [vmem:[#allocation70_spill] sm:$0xff] }
 0x1e7   : > { %1255 = vadd.xlane.f32.xlu0 %v1254_v40  ;;  %8589 = vpow2.f32 %v1227_v44  ;;  %v1231_v25 = vmul.f32 1.442695, %v1174_v31  ;;  %v1178_v18 = vsub.f32 %v15459_v3, %v15452_v38  ;;  %v1260_v23 = vadd.f32 %v10351_v54, %v10337_v32 }
 0x1e8   : > { %v10736_v63 = vpop.eup %8571  ;;  %8591 = vpow2.f32 %v1223_v50  ;;  %v1237_v44 = vmul.f32 1.442695, %v1177_v47  ;;  %v1257_v24 = vadd.f32 %v15460_v60, %v10293_v52  ;;  %v8420_v50 = vld [vmem:[%s14649_s4 + $0x8] sm:$0xff]   ;;  %v1241_v38 = vmul.f32 1.442695, %v1179_v61 }
 0x1e9   : > { %1252 = vadd.xlane.f32.xlu1 %v1251_v35  ;;  %v10742_v40 = vpop.eup %8573  ;;  %8593 = vpow2.f32 %v1229_v33  ;;  %v8419_v35 = vld [vmem:[%s14649_s4 + $0x48] sm:$0xff]   ;;  %v1243_v33 = vmul.f32 1.442695, %v1180_v43  ;;  %v1239_v5 = vmul.f32 1.442695, %v1178_v18  ;;  %v8421_v43 = vld [vmem:[%s14649_s4 + $0x50] sm:$0xff]  }
 0x1ea   : > { %v10752_v31 = vpop.eup %8575  ;;  %8595 = vpow2.f32 %v1233_v37  ;;  %7739 = vmatprep.subr.bf16.mxu0 %v8419_v35  ;;  %v1266_v8 = vadd.f32 %v10742_v40, %v10736_v63 }
 0x1eb   : > { %1261 = vadd.xlane.f32.xlu0 %v1260_v23  ;;  %v10754_v22 = vpop.eup %8577  ;;  %8597 = vpow2.f32 %v1235_v36  ;;  %7740 = vmatpush3.bf16.msra.mxu0 %v8420_v50  ;;  %v1263_v37 = vadd.f32 %v10752_v31, %v10732_v55  ;;  %v8423_v50 = vld [vmem:[%s14649_s4 + $0x58] sm:$0xff]  }
 0x1ec   : > { %v10756_v47 = vpop.eup %8579  ;;  %8599 = vpow2.f32 %v1231_v25  ;;  %v8422_v25 = vld [vmem:[%s14649_s4 + $0x10] sm:$0xff]   ;;  %7741 = vmatprep.subr.bf16.mxu0 %v8421_v43  ;;  %v8425_v43 = vld [vmem:[%s14649_s4 + $0x60] sm:$0xff]  }
 0x1ed   : > { %1258 = vadd.xlane.f32.xlu1 %v1257_v24  ;;  %v10760_v62 = vpop.eup %8581  ;;  %8601 = vpow2.f32 %v1237_v44 }
 0x1ee   : > { %v10764_v61 = vpop.eup %8583  ;;  %8603 = vpow2.f32 %v1241_v38  ;;  %v1272_v18 = vadd.f32 %v10760_v62, %v10756_v47  ;;  %v8424_v38 = vld [vmem:[%s14649_s4 + $0x18] sm:$0xff]  }
 0x1ef   : > { %1267 = vadd.xlane.f32.xlu0 %v1266_v8  ;;  %v10766_v36 = vpop.eup %8585  ;;  %8605 = vpow2.f32 %v1243_v33  ;;  %v1269_v44 = vadd.f32 %v10764_v61, %v10754_v22  ;;  %7742 = vmatpush3.bf16.msra.mxu0 %v8422_v25 }
 0x1f0   : > { %v10774_v3 = vpop.eup %8587  ;;  %8607 = vpow2.f32 %v1239_v5  ;;  %7743 = vmatprep.subr.bf16.mxu0 %v8423_v50  ;;  %v8427_v50 = vld [vmem:[%s14649_s4 + $0x68] sm:$0xff]  }
 0x1f1   : > { %1264 = vadd.xlane.f32.xlu1 %v1263_v37  ;;  %v10778_v23 = vpop.eup %8589 }
 0x1f2   : > { %v10782_v24 = vpop.eup %8591  ;;  %v1278_v5 = vadd.f32 %v10778_v23, %v10774_v3 }
 0x1f3   : > { %1273 = vadd.xlane.f32.xlu0 %v1272_v18  ;;  %v10784_v35 = vpop.eup %8593  ;;  %v1275_v37 = vadd.f32 %v10782_v24, %v10766_v36  ;;  %7744 = vmatpush3.bf16.msra.mxu0 %v8424_v38  ;;  %v8426_v18 = vld [vmem:[%s14649_s4 + $0x20] sm:$0xff]  }
 0x1f4   : > { %15461 = vst [vmem:[#allocation32_spill] sm:$0xff] %v10784_v35  ;;  %v10792_v33 = vpop.eup %8595  ;;  %7745 = vmatprep.subr.bf16.mxu0 %v8425_v43  ;;  %v8429_v43 = vld [vmem:[%s14649_s4 + $0x70] sm:$0xff]  }
 0x1f5   : > { %1270 = vadd.xlane.f32.xlu1 %v1269_v44  ;;  %15462 = vst [vmem:[#allocation48_spill] sm:$0xff] %v10792_v33  ;;  %v10796_v8 = vpop.eup %8597 }
 0x1f6   : > { %v10803_v25 = vpop.eup %8599  ;;  %v1284_v0 = vadd.f32 %v10796_v8, %v10792_v33 }
 0x1f7   : > { %1279 = vadd.xlane.f32.xlu0 %v1278_v5  ;;  %v10808_v44 = vpop.eup %8601  ;;  %v1281_v38 = vadd.f32 %v10803_v25, %v10784_v35  ;;  %7746 = vmatpush3.bf16.msra.mxu0 %v8426_v18  ;;  %v8431_v18 = vld [vmem:[%s14649_s4 + $0x78] sm:$0xff]  }
 0x1f8   : > { %15463 = vst [vmem:[#allocation36_spill] sm:$0xff] %v10808_v44  ;;  %v10813_v49 = vpop.eup %8603  ;;  %7747 = vmatprep.subr.bf16.mxu0 %v8427_v50  ;;  %v8432_v50 = vld [vmem:[%s14649_s4 + $0x38] sm:$0xff]  }
 0x1f9   : > { %1276 = vadd.xlane.f32.xlu1 %v1275_v37  ;;  %15464 = vst [vmem:[#allocation54_spill] sm:$0xff] %v10813_v49  ;;  %v10817_v46 = vpop.eup %8605  ;;  %v8428_v37 = vld [vmem:[%s14649_s4 + $0x28] sm:$0xff]  }
 0x1fa   : > { %15465 = vst [vmem:[#allocation52_spill] sm:$0xff] %v10817_v46  ;;  %v10821_v5 = vpop.eup %8607  ;;  %v1290_v29 = vadd.f32 %v10817_v46, %v10813_v49  ;;  %v15471_v46 = vld [vmem:[#allocation75_spill] sm:$0xff] }
 0x1fb   : > { %15466 = vst [vmem:[#allocation39_spill] sm:$0xff] %v10821_v5  ;;  %1285 = vadd.xlane.f32.xlu0 %v1284_v0  ;;  %v1287_v12 = vadd.f32 %v10821_v5, %v10808_v44  ;;  %7748 = vmatpush3.bf16.msra.mxu0 %v8428_v37  ;;  %v8430_v0 = vld [vmem:[%s14649_s4 + $0x30] sm:$0xff]   ;;  %v15467_v37 = vld [vmem:[#allocation55_spill] sm:$0xff] }
 0x1fc   : > { %7749 = vmatprep.subr.bf16.mxu0 %v8429_v43  ;;  %v15470_v44 = vld [vmem:[#allocation71_spill] sm:$0xff] }
 0x1fd   : > { %1282 = vadd.xlane.f32.xlu1 %v1281_v38  ;;  %v9466_v38 = vmov 1  }
 0x1fe   : > { %8412 = vset.pattern.permute.xlu1 %v9466_v38  ;;  %8411 = vset.pattern.permute.xlu0 %v9466_v38  ;;  %v15472_v38 = vld [vmem:[#allocation73_spill] sm:$0xff] }
 0x1ff   : > { %1291 = vadd.xlane.f32.xlu0 %v1290_v29  ;;  %7750 = vmatpush3.bf16.msra.mxu0 %v8430_v0  ;;  %v15469_v0 = vld [vmem:[#allocation72_spill] sm:$0xff] }
 0x200   : > { %7751 = vmatprep.subr.bf16.mxu0 %v8431_v18 }
 0x201   : > { %1288 = vadd.xlane.f32.xlu1 %v1287_v12 }
 0x203   : > { %7752 = vmatpush3.bf16.msra.mxu0 %v8432_v50 }
 0x229   : > { %v1843_v29 = vpop.xlane.xlu1 %1842 }
 0x22a   : > { %v1889_v58 = vsub.f32 %v15467_v37, %v1843_v29  ;;  %v1890_v12 = vsub.f32 %v15468_v53, %v1843_v29  ;;  %v8433_v53 = vld [vmem:[%s14652_s7 + $0x40] sm:$0xff]   ;;  %v15473_v29 = vld [vmem:[#allocation77_spill] sm:$0xff] }
 0x22b   : > { %7801 = vmatprep.subr.bf16.mxu1 %v8433_v53  ;;  %v15477_v53 = vld [vmem:[#allocation86_spill] sm:$0xff] }
 0x22c   : > { %v1921_v43 = vmul.f32 1.442695, %v1889_v58  ;;  %v1923_v27 = vmul.f32 1.442695, %v1890_v12  ;;  %v15474_v12 = vld [vmem:[#allocation76_spill] sm:$0xff] }
 0x22e   : > { %8609 = vpow2.f32 %v1921_v43  ;;  %v15475_v43 = vld [vmem:[#allocation83_spill] sm:$0xff] }
 0x22f   : > { %8611 = vpow2.f32 %v1923_v27 }
 0x235   : > { %v1846_v16 = vpop.xlane.xlu0 %1845 }
 0x236   : > { %v1891_v49 = vsub.f32 %v15469_v0, %v1846_v16  ;;  %v1892_v56 = vsub.f32 %v15470_v44, %v1846_v16 }
 0x238   : > { %v1852_v11 = vpop.xlane.xlu1 %1851  ;;  %v1925_v18 = vmul.f32 1.442695, %v1891_v49  ;;  %v1927_v50 = vmul.f32 1.442695, %v1892_v56  ;;  %v10853_v49 = vpop.eup %8609 }
 0x239   : > { %v1895_v5 = vsub.f32 %v15471_v46, %v1852_v11  ;;  %v1896_v33 = vsub.f32 %v15472_v38, %v1852_v11  ;;  %v1849_v35 = vpop.xlane.xlu0 %1848  ;;  %v10855_v56 = vpop.eup %8611 }
 0x23a   : > { %8613 = vpow2.f32 %v1925_v18  ;;  %v1893_v37 = vsub.f32 %v15473_v29, %v1849_v35  ;;  %v1894_v16 = vsub.f32 %v15474_v12, %v1849_v35  ;;  %v1985_v18 = vadd.f32 %v10855_v56, %v10853_v49  ;;  %v15478_v29 = vld [vmem:[#allocation84_spill] sm:$0xff] }
 0x23b   : > { %v1933_v58 = vmul.f32 1.442695, %v1895_v5  ;;  %v1935_v27 = vmul.f32 1.442695, %v1896_v33  ;;  %8615 = vpow2.f32 %v1927_v50  ;;  %v15476_v5 = vld [vmem:[#allocation82_spill] sm:$0xff] }
 0x23c   : > { %v1929_v46 = vmul.f32 1.442695, %v1893_v37  ;;  %v1931_v11 = vmul.f32 1.442695, %v1894_v16  ;;  %1986 = vadd.xlane.f32.xlu0 %v1985_v18 }
 0x23d   : > { %8617 = vpow2.f32 %v1933_v58 }
 0x23e   : > { %8619 = vpow2.f32 %v1935_v27 }
 0x23f   : > { %8621 = vpow2.f32 %v1929_v46 }
 0x240   : > { %8623 = vpow2.f32 %v1931_v11 }
 0x241   : > { %v1855_v44 = vpop.xlane.xlu0 %1854 }
 0x242   : > { %v1897_v0 = vsub.f32 %v15475_v43, %v1855_v44  ;;  %v1898_v33 = vsub.f32 %v15476_v5, %v1855_v44 }
 0x244   : > { %v1858_v35 = vpop.xlane.xlu1 %1857  ;;  %v1937_v50 = vmul.f32 1.442695, %v1897_v0  ;;  %v1939_v38 = vmul.f32 1.442695, %v1898_v33  ;;  %v10863_v46 = vpop.eup %8613 }
 0x245   : > { %v1899_v58 = vsub.f32 %v15477_v53, %v1858_v35  ;;  %v1900_v37 = vsub.f32 %v15478_v29, %v1858_v35  ;;  %v10867_v43 = vpop.eup %8615 }
 0x246   : > { %8625 = vpow2.f32 %v1937_v50  ;;  %v1988_v53 = vadd.f32 %v10867_v43, %v10863_v46 }
 0x247   : > { %v1941_v27 = vmul.f32 1.442695, %v1899_v58  ;;  %v1943_v12 = vmul.f32 1.442695, %v1900_v37  ;;  %8627 = vpow2.f32 %v1939_v38  ;;  %v10869_v5 = vpop.eup %8617 }
 0x248   : > { %v10873_v38 = vpop.eup %8619  ;;  %1989 = vadd.xlane.f32.xlu1 %v1988_v53 }
 0x249   : > { %8629 = vpow2.f32 %v1941_v27 }
 0x24a   : > { %8631 = vpow2.f32 %v1943_v12 }
 0x24c   : > { %v1861_v16 = vpop.xlane.xlu0 %1860 }
 0x24d   : > { %v1901_v44 = vsub.f32 %v10477_v51, %v1861_v16  ;;  %v1902_v11 = vsub.f32 %v10473_v21, %v1861_v16  ;;  %v10877_v51 = vpop.eup %8621  ;;  %v8434_v16 = vld [vmem:[%s14652_s7] sm:$0xff]  }
 0x24e   : > { %v10879_v29 = vpop.eup %8623  ;;  %7802 = vmatpush3.bf16.msra.mxu1 %v8434_v16 }
 0x24f   : > { %v1945_v33 = vmul.f32 1.442695, %v1901_v44  ;;  %v1947_v18 = vmul.f32 1.442695, %v1902_v11  ;;  %v8435_v44 = vld [vmem:[%s14652_s7 + $0x48] sm:$0xff]  }
 0x250   : > { %7803 = vmatprep.subr.bf16.mxu1 %v8435_v44 }
 0x251   : > { %v1864_v0 = vpop.xlane.xlu1 %1863  ;;  %8633 = vpow2.f32 %v1945_v33 }
 0x252   : > { %v1903_v35 = vsub.f32 %v10508_v14, %v1864_v0  ;;  %v1904_v50 = vsub.f32 %v10504_v30, %v1864_v0  ;;  %8635 = vpow2.f32 %v1947_v18  ;;  %v1991_v0 = vadd.f32 %v10879_v29, %v10877_v51 }
 0x254   : > { %v1949_v21 = vmul.f32 1.442695, %v1903_v35  ;;  %v1951_v58 = vmul.f32 1.442695, %v1904_v50  ;;  %1992 = vadd.xlane.f32.xlu0 %v1991_v0 }
 0x255   : > { %v1867_v37 = vpop.xlane.xlu0 %1866  ;;  %v1870_v27 = vpop.xlane.xlu1 %1869 }
 0x256   : > { %8637 = vpow2.f32 %v1949_v21  ;;  %v1905_v14 = vsub.f32 %v10538_v59, %v1867_v37  ;;  %v1906_v30 = vsub.f32 %v10534_v48, %v1867_v37  ;;  %v1907_v12 = vsub.f32 %v10526_v57, %v1870_v27  ;;  %v10895_v48 = vpop.eup %8625 }
 0x257   : > { %8639 = vpow2.f32 %v1951_v58  ;;  %v1908_v11 = vsub.f32 %v10520_v45, %v1870_v27  ;;  %v1994_v59 = vadd.f32 %v10873_v38, %v10869_v5  ;;  %v10897_v35 = vpop.eup %8627 }
 0x258   : > { %v1953_v57 = vmul.f32 1.442695, %v1905_v14  ;;  %v1955_v33 = vmul.f32 1.442695, %v1906_v30  ;;  %v1957_v18 = vmul.f32 1.442695, %v1907_v12  ;;  %v10899_v21 = vpop.eup %8629  ;;  %v1997_v27 = vadd.f32 %v10897_v35, %v10895_v48 }
 0x259   : > { %v1959_v50 = vmul.f32 1.442695, %v1908_v11  ;;  %1995 = vadd.xlane.f32.xlu1 %v1994_v59  ;;  %v8436_v14 = vld [vmem:[%s14652_s7 + $0x8] sm:$0xff]   ;;  %v8437_v30 = vld [vmem:[%s14652_s7 + $0x50] sm:$0xff]   ;;  %v10911_v12 = vpop.eup %8631 }
 0x25a   : > { %8641 = vpow2.f32 %v1953_v57  ;;  %v2000_v44 = vadd.f32 %v10911_v12, %v10899_v21  ;;  %7804 = vmatpush3.bf16.msra.mxu1 %v8436_v14  ;;  %1998 = vadd.xlane.f32.xlu0 %v1997_v27  ;;  %v8440_v27 = vld [vmem:[%s14652_s7 + $0x18] sm:$0xff]  }
 0x25b   : > { %8643 = vpow2.f32 %v1955_v33  ;;  %7805 = vmatprep.subr.bf16.mxu1 %v8437_v30  ;;  %v10917_v57 = vpop.eup %8633 }
 0x25c   : > { %8645 = vpow2.f32 %v1957_v18  ;;  %v10925_v33 = vpop.eup %8635 }
 0x25d   : > { %8647 = vpow2.f32 %v1959_v50  ;;  %2001 = vadd.xlane.f32.xlu1 %v2000_v44  ;;  %v8441_v44 = vld [vmem:[%s14652_s7 + $0x60] sm:$0xff]  }
 0x25e   : > { %v1873_v53 = vpop.xlane.xlu0 %1872 }
 0x25f   : > { %v1909_v45 = vsub.f32 %v10589_v4, %v1873_v53  ;;  %v1910_v58 = vsub.f32 %v10585_v42, %v1873_v53  ;;  %v1876_v37 = vpop.xlane.xlu1 %1875 }
 0x260   : > { %v1911_v4 = vsub.f32 %v10596_v7, %v1876_v37  ;;  %v1912_v42 = vsub.f32 %v10602_v9, %v1876_v37  ;;  %v8438_v7 = vld [vmem:[%s14652_s7 + $0x10] sm:$0xff]   ;;  %v8439_v9 = vld [vmem:[%s14652_s7 + $0x58] sm:$0xff]   ;;  %v10927_v53 = vpop.eup %8637 }
 0x261   : > { %v1961_v16 = vmul.f32 1.442695, %v1909_v45  ;;  %v1963_v11 = vmul.f32 1.442695, %v1910_v58  ;;  %7806 = vmatpush3.bf16.msra.mxu1 %v8438_v7  ;;  %v10935_v14 = vpop.eup %8639 }
 0x262   : > { %v1965_v0 = vmul.f32 1.442695, %v1911_v4  ;;  %v1967_v59 = vmul.f32 1.442695, %v1912_v42  ;;  %v2003_v4 = vadd.f32 %v10925_v33, %v10917_v57  ;;  %7807 = vmatprep.subr.bf16.mxu1 %v8439_v9  ;;  %v8442_v9 = vld [vmem:[%s14652_s7 + $0x20] sm:$0xff]  }
 0x263   : > { %8649 = vpow2.f32 %v1961_v16 }
 0x264   : > { %8651 = vpow2.f32 %v1963_v11  ;;  %2004 = vadd.xlane.f32.xlu0 %v2003_v4 }
 0x265   : > { %8653 = vpow2.f32 %v1965_v0  ;;  %v10945_v0 = vpop.eup %8641  ;;  %7808 = vmatpush3.bf16.msra.mxu1 %v8440_v27 }
 0x266   : > { %8655 = vpow2.f32 %v1967_v59  ;;  %7809 = vmatprep.subr.bf16.mxu1 %v8441_v44 }
 0x267   : > { %v1879_v18 = vpop.xlane.xlu0 %1878 }
 0x268   : > { %v1882_v50 = vpop.xlane.xlu1 %1881  ;;  %v1913_v45 = vsub.f32 %v10633_v1, %v1879_v18  ;;  %v1914_v58 = vsub.f32 %v10643_v17, %v1879_v18  ;;  %v2006_v17 = vadd.f32 %v10935_v14, %v10927_v53  ;;  %v10954_v18 = vpop.eup %8643 }
 0x269   : > { %v1915_v37 = vsub.f32 %v10651_v34, %v1882_v50  ;;  %v1916_v30 = vsub.f32 %v10647_v10, %v1882_v50  ;;  %v10956_v50 = vpop.eup %8645  ;;  %7810 = vmatpush3.bf16.msra.mxu1 %v8442_v9  ;;  %v8445_v9 = vld [vmem:[%s14652_s7 + $0x70] sm:$0xff]  }
 0x26a   : > { %v1969_v42 = vmul.f32 1.442695, %v1913_v45  ;;  %v1971_v1 = vmul.f32 1.442695, %v1914_v58  ;;  %2007 = vadd.xlane.f32.xlu1 %v2006_v17 }
 0x26b   : > { %v1973_v16 = vmul.f32 1.442695, %v1915_v37  ;;  %v1975_v34 = vmul.f32 1.442695, %v1916_v30 }
 0x26c   : > { %v1885_v11 = vpop.xlane.xlu0 %1884  ;;  %8657 = vpow2.f32 %v1969_v42  ;;  %v8443_v42 = vld [vmem:[%s14652_s7 + $0x68] sm:$0xff]  }
 0x26d   : > { %v1917_v10 = vsub.f32 %v10659_v41, %v1885_v11  ;;  %v1918_v59 = vsub.f32 %v10676_v28, %v1885_v11  ;;  %8659 = vpow2.f32 %v1971_v1  ;;  %v2009_v28 = vadd.f32 %v10954_v18, %v10945_v0  ;;  %v10960_v41 = vpop.eup %8647  ;;  %v8444_v1 = vld [vmem:[%s14652_s7 + $0x28] sm:$0xff]   ;;  %7811 = vmatprep.subr.bf16.mxu1 %v8443_v42 }
 0x26e   : > { %v10949_v7 = vpop.xlane.xlu1 %1887  ;;  %8661 = vpow2.f32 %v1973_v16  ;;  %v10962_v27 = vpop.eup %8649  ;;  %v2012_v4 = vadd.f32 %v10960_v41, %v10956_v50  ;;  %7812 = vmatpush3.bf16.msra.mxu1 %v8444_v1 }
 0x26f   : > { %v1977_v45 = vmul.f32 1.442695, %v1917_v10  ;;  %v1979_v58 = vmul.f32 1.442695, %v1918_v59  ;;  %8663 = vpow2.f32 %v1975_v34  ;;  %15479 = vst [vmem:[#allocation40_spill] sm:$0xff] %v10962_v27  ;;  %2010 = vadd.xlane.f32.xlu0 %v2009_v28  ;;  %v10972_v16 = vpop.eup %8651  ;;  %7813 = vmatprep.subr.bf16.mxu1 %v8445_v9 }
 0x270   : > { %v1250_v37 = vpop.xlane.xlu0 %1249  ;;  %v10974_v17 = vpop.eup %8653  ;;  %2013 = vadd.xlane.f32.xlu1 %v2012_v4  ;;  %v2015_v34 = vadd.f32 %v10972_v16, %v10962_v27 }
 0x271   : > { %8665 = vpow2.f32 %v1977_v45  ;;  %15480 = vst [vmem:[#allocation37_spill] sm:$0xff] %v10974_v17  ;;  %v10978_v11 = vpop.eup %8655  ;;  %v8446_v45 = vld [vmem:[%s14652_s7 + $0x30] sm:$0xff]  }
 0x272   : > { %v1247_v30 = vpop.xlane.xlu1 %1246  ;;  %8667 = vpow2.f32 %v1979_v58  ;;  %15481 = vst [vmem:[#allocation65_spill] sm:$0xff] %v10978_v11  ;;  %v2018_v59 = vadd.f32 %v10978_v11, %v10974_v17  ;;  %7814 = vmatpush3.bf16.msra.mxu1 %v8446_v45 }
 0x273   : > { %8669 = vrcp.f32 %v1250_v37  ;;  %2016 = vadd.xlane.f32.xlu0 %v2015_v34 }
 0x274   : > { %v1256_v44 = vpop.xlane.xlu0 %1255  ;;  %8671 = vrcp.f32 %v1247_v30  ;;  %2019 = vadd.xlane.f32.xlu1 %v2018_v59  ;;  %v8447_v30 = vld [vmem:[%s14652_s7 + $0x78] sm:$0xff]  }
 0x275   : > { %8673 = vrcp.f32 %v1256_v44  ;;  %v8448_v44 = vld [vmem:[%s14652_s7 + $0x38] sm:$0xff]   ;;  %7815 = vmatprep.subr.bf16.mxu1 %v8447_v30 }
 0x276   : > { %v1253_v10 = vpop.xlane.xlu1 %1252  ;;  %v10988_v58 = vpop.eup %8657  ;;  %7816 = vmatpush3.bf16.msra.mxu1 %v8448_v44 }
 0x277   : > { %15482 = vst [vmem:[#allocation66_spill] sm:$0xff] %v10988_v58  ;;  %v10990_v28 = vpop.eup %8659  ;;  %8675 = vrcp.f32 %v1253_v10 }
 0x278   : > { %15483 = vst [vmem:[#allocation49_spill] sm:$0xff] %v10990_v28  ;;  %v1262_v37 = vpop.xlane.xlu0 %1261  ;;  %v10992_v4 = vpop.eup %8661  ;;  %v2021_v1 = vadd.f32 %v10990_v28, %v10988_v58 }
 0x279   : > { %15484 = vst [vmem:[#allocation43_spill] sm:$0xff] %v10992_v4  ;;  %v10996_v34 = vpop.eup %8663  ;;  %8677 = vrcp.f32 %v1262_v37 }
 0x27a   : > { %v1259_v42 = vpop.xlane.xlu1 %1258  ;;  %15485 = vst [vmem:[#allocation63_spill] sm:$0xff] %v10996_v34  ;;  %2022 = vadd.xlane.f32.xlu0 %v2021_v1  ;;  %v2024_v10 = vadd.f32 %v10996_v34, %v10992_v4 }
 0x27b   : > { %v11004_v59 = vpop.eup %8665  ;;  %8679 = vrcp.f32 %v1259_v42 }
 0x27c   : > { %15486 = vst [vmem:[#allocation64_spill] sm:$0xff] %v11004_v59  ;;  %v11008_v9 = vpop.eup %8667  ;;  %2025 = vadd.xlane.f32.xlu1 %v2024_v10  ;;  %v1268_v17 = vpop.xlane.xlu0 %1267 }
 0x27d   : > { %15487 = vst [vmem:[#allocation53_spill] sm:$0xff] %v11008_v9  ;;  %v2027_v45 = vadd.f32 %v11008_v9, %v11004_v59  ;;  %v8670_v58 = vpop.eup %8669  ;;  %8681 = vrcp.f32 %v1268_v17 }
 0x27e   : > { %v8672_v28 = vpop.eup %8671  ;;  %v1312_v27 = vmul.f32 %v8670_v58, %v10255_v19  ;;  %v1311_v37 = vmul.f32 %v8670_v58, %v10240_v15  ;;  %v1265_v11 = vpop.xlane.xlu1 %1264 }
 0x27f   : > { %2028 = vadd.xlane.f32.xlu0 %v2027_v45  ;;  %v8674_v1 = vpop.eup %8673  ;;  %v1310_v4 = vmul.f32 %v8672_v28, %v15445_v20  ;;  %v1309_v42 = vmul.f32 %v8672_v28, %v10211_v26  ;;  %8683 = vrcp.f32 %v1265_v11 }
 0x280   : > { %v1316_v10 = vmul.f32 %v8674_v1, %v15451_v39  ;;  %v1274_v15 = vpop.xlane.xlu0 %1273  ;;  %v1315_v26 = vmul.f32 %v8674_v1, %v15450_v2  ;;  %v9314_v1 = vld [vmem:[%s9670_s23 + $0x10] sm:$0xff] }
 0x281   : > { %v8676_v30 = vpop.eup %8675  ;;  %v1342_v59 = vpack.c.bf16 %v1312_v27, %v1310_v4  ;;  %v1341_v44 = vpack.c.bf16 %v1311_v37, %v1309_v42  ;;  %8685 = vrcp.f32 %v1274_v15  ;;  %v9313_v4 = vld [vmem:[%s9670_s23 + $0x8] sm:$0xff] }
 0x282   : > { %v1314_v45 = vmul.f32 %v8676_v30, %v15455_v13  ;;  %v1313_v20 = vmul.f32 %v8676_v30, %v15454_v6  ;;  %v1271_v58 = vpop.xlane.xlu1 %1270  ;;  %v9317_v15 = vld [vmem:[%s9670_s23 + $0x48] sm:$0xff] }
 0x283   : > { %v8678_v9 = vpop.eup %8677  ;;  %1517 = vmatprep.mubr.bf16.mxu0 %v1342_v59  ;;  %8687 = vrcp.f32 %v1271_v58 }
 0x284   : > { %v1344_v19 = vpack.c.bf16 %v1316_v10, %v1314_v45  ;;  %1518 = vmatmul.mubr.bf16.vlgmr.msra.gmra.mrb[0].mxu0 %v1341_v44  ;;  %v1320_v27 = vmul.f32 %v8678_v9, %v10351_v54  ;;  %v1343_v13 = vpack.c.bf16 %v1315_v26, %v1313_v20  ;;  %v1280_v6 = vpop.xlane.xlu0 %1279  ;;  %v9315_v44 = vld [vmem:[%s9670_s23] sm:$0xff] }
 0x285   : > { %v8680_v34 = vpop.eup %8679  ;;  %8689 = vrcp.f32 %v1280_v6  ;;  %v9318_v20 = vld [vmem:[%s9670_s23 + $0x20] sm:$0xff]  ;;  %v9322_v6 = vld [vmem:[%s9670_s23 + $0x30] sm:$0xff] }
 0x286   : > { %1525 = vmatprep.mubr.bf16.mxu0 %v1344_v19  ;;  %v1318_v39 = vmul.f32 %v8680_v34, %v15460_v60  ;;  %v1317_v2 = vmul.f32 %v8680_v34, %v10293_v52  ;;  %v1319_v60 = vmul.f32 %v8678_v9, %v10337_v32  ;;  %v1277_v59 = vpop.xlane.xlu1 %1276  ;;  %v9316_v34 = vld [vmem:[%s9670_s23 + $0x18] sm:$0xff] }
 0x287   : > { %v8682_v17 = vpop.eup %8681  ;;  %8691 = vrcp.f32 %v1277_v59 }
 0x288   : > { %v1346_v11 = vpack.c.bf16 %v1320_v27, %v1318_v39  ;;  %v1324_v37 = vmul.f32 %v8682_v17, %v10742_v40  ;;  %v1345_v42 = vpack.c.bf16 %v1319_v60, %v1317_v2  ;;  %v1286_v32 = vpop.xlane.xlu0 %1285  ;;  %v9320_v27 = vld [vmem:[%s9670_s23 + $0x28] sm:$0xff] }
 0x289   : > { %v8684_v28 = vpop.eup %8683  ;;  %8693 = vrcp.f32 %v1286_v32 }
 0x28a   : > { %v1322_v54 = vmul.f32 %v8684_v28, %v10752_v31  ;;  %v1321_v40 = vmul.f32 %v8684_v28, %v10732_v55  ;;  %v1323_v31 = vmul.f32 %v8682_v17, %v10736_v63  ;;  %v1283_v9 = vpop.xlane.xlu1 %1282  ;;  %v9319_v55 = vld [vmem:[%s9670_s23 + $0x58] sm:$0xff] }
 0x28b   : > { %v8686_v30 = vpop.eup %8685  ;;  %8695 = vrcp.f32 %v1283_v9  ;;  %v15490_v9 = vld [vmem:[#allocation39_spill] sm:$0xff] }
 0x28c   : > { %1526 = vmatmul.mubr.bf16.gmra.mrb[4].mxu0 %v1343_v13  ;;  %v1348_v10 = vpack.c.bf16 %v1324_v37, %v1322_v54  ;;  %v1328_v19 = vmul.f32 %v8686_v30, %v10760_v62  ;;  %v1347_v26 = vpack.c.bf16 %v1323_v31, %v1321_v40  ;;  %v1292_v62 = vpop.xlane.xlu0 %1291  ;;  %v1327_v13 = vmul.f32 %v8686_v30, %v10756_v47  ;;  %v9323_v54 = vld [vmem:[%s9670_s23 + $0x78] sm:$0xff]  ;;  %v15489_v40 = vld [vmem:[#allocation48_spill] sm:$0xff] }
 0x28d   : > { %2414 = vperm.xlu1 %8412, %v9313_v4   ;;  %1533 = vmatprep.mubr.bf16.mxu0 %v1346_v11  ;;  %v8688_v52 = vpop.eup %8687  ;;  %v9321_v4 = vld [vmem:[%s9670_s23 + $0x68] sm:$0xff]  ;;  %8697 = vrcp.f32 %v1292_v62  ;;  %v9324_v47 = vld [vmem:[%s9670_s23 + $0x38] sm:$0xff] }
 0x28e   : > { %v1326_v45 = vmul.f32 %v8688_v52, %v10764_v61  ;;  %v1325_v61 = vmul.f32 %v8688_v52, %v10754_v22  ;;  %v1289_v17 = vpop.xlane.xlu1 %1288 }
 0x28f   : > { %v8690_v58 = vpop.eup %8689  ;;  %8699 = vrcp.f32 %v1289_v17 }
 0x290   : > { %v1350_v39 = vpack.c.bf16 %v1328_v19, %v1326_v45  ;;  %v1332_v28 = vmul.f32 %v8690_v58, %v10778_v23  ;;  %v1349_v2 = vpack.c.bf16 %v1327_v13, %v1325_v61  ;;  %v1331_v23 = vmul.f32 %v8690_v58, %v10774_v3  ;;  %v15491_v45 = vld [vmem:[#allocation52_spill] sm:$0xff] }
 0x291   : > { %2418 = vperm.xlu1 %8412, %v9314_v1   ;;  %v8692_v63 = vpop.eup %8691  ;;  %v15494_v58 = vld [vmem:[#allocation36_spill] sm:$0xff] }
 0x292   : > { %v1330_v11 = vmul.f32 %v8692_v63, %v10782_v24  ;;  %v1329_v24 = vmul.f32 %v8692_v63, %v10766_v36 }
 0x293   : > { %v8694_v60 = vpop.eup %8693 }
 0x294   : > { %1534 = vmatmul.mubr.bf16.gmra.mrb[8].mxu0 %v1345_v42  ;;  %v1352_v59 = vpack.c.bf16 %v1332_v28, %v1330_v11  ;;  %v1336_v1 = vmul.f32 %v8694_v60, %v10796_v8  ;;  %v9325_v42 = vld [vmem:[%s9670_s23 + $0x40] sm:$0xff]  ;;  %v1351_v30 = vpack.c.bf16 %v1331_v23, %v1329_v24  ;;  %v1335_v31 = vmul.f32 %v8694_v60, %v15489_v40  ;;  %v15492_v8 = vld [vmem:[#allocation103_spill] sm:$0xff]  ;;  %v9326_v11 = vld [vmem:[%s9670_s23 + $0x50] sm:$0xff] }
 0x295   : > { %2410 = vperm.xlu0 %8411, %v9315_v44   ;;  %2422 = vperm.xlu1 %8412, %v9316_v34   ;;  %v8696_v22 = vpop.eup %8695  ;;  %v15488_v34 = vld [vmem:[#allocation32_spill] sm:$0xff]  ;;  %v9327_v28 = vld [vmem:[%s9670_s23 + $0x60] sm:$0xff] }
 0x296   : > { %1541 = vmatprep.mubr.bf16.mxu0 %v1348_v10  ;;  %v1334_v37 = vmul.f32 %v8696_v22, %v10803_v25  ;;  %v1333_v32 = vmul.f32 %v8696_v22, %v15488_v34 }
 0x297   : > { %v8698_v10 = vpop.eup %8697 }
 0x298   : > { %v1354_v44 = vpack.c.bf16 %v1336_v1, %v1334_v37  ;;  %v1340_v3 = vmul.f32 %v8698_v10, %v15491_v45  ;;  %v1353_v19 = vpack.c.bf16 %v1335_v31, %v1333_v32 }
 0x299   : > { %2446 = vperm.xlu0 %8411, %v9317_v15   ;;  %2426 = vperm.xlu1 %8412, %v9318_v20   ;;  %v8700_v52 = vpop.eup %8699  ;;  %v1919_v15 = vsub.f32 %v15492_v8, %v10949_v7  ;;  %v15493_v20 = vld [vmem:[#allocation102_spill] sm:$0xff] }
 0x29a   : > { %v1338_v36 = vmul.f32 %v8700_v52, %v15490_v9  ;;  %v15496_v8 = vld [vmem:[#allocation6_spill] sm:$0xff] }
 0x29c   : > { %1542 = vmatmul.mubr.bf16.gmra.mrb[12].mxu0 %v1347_v26  ;;  %v1356_v25 = vpack.c.bf16 %v1340_v3, %v1338_v36  ;;  %v1920_v26 = vsub.f32 %v15493_v20, %v10949_v7 }
 0x29d   : > { %2454 = vperm.xlu0 %8411, %v9319_v55   ;;  %2430 = vperm.xlu1 %8412, %v9320_v27   ;;  %v15495_v55 = vld [vmem:[#allocation54_spill] sm:$0xff]  ;;  %v1981_v27 = vmul.f32 1.442695, %v1919_v15  ;;  %v11081_v15 = vsub.s32 1, %v15496_v8 }
 0x29e   : > { %1549 = vmatprep.mubr.bf16.mxu0 %v1350_v39  ;;  %v1337_v39 = vmul.f32 %v8700_v52, %v15494_v58  ;;  %v1339_v63 = vmul.f32 %v8698_v10, %v15495_v55  ;;  %v1983_v62 = vmul.f32 1.442695, %v1920_v26  ;;  %v9329_v58 = vld [vmem:[%s14647_s2] sm:$0xff] }
 0x29f   : > { %8701 = vpow2.f32 %v1981_v27 }
 0x2a0   : > { %v1355_v61 = vpack.c.bf16 %v1339_v63, %v1337_v39  ;;  %8703 = vpow2.f32 %v1983_v62  ;;  %v2476_v39 = vrot.slane %v9329_v58, %v11081_v15 }
 0x2a1   : > { %2462 = vperm.xlu0 %8411, %v9321_v4   ;;  %2434 = vperm.xlu1 %8412, %v9322_v6   ;;  %v9328_v6 = vld [vmem:[%s9670_s23 + $0x70] sm:$0xff] }
 0x2a4   : > { %1550 = vmatmul.mubr.bf16.gmra.mrb[16].mxu0 %v1349_v2 }
 0x2a5   : > { %2470 = vperm.xlu0 %8411, %v9323_v54   ;;  %2438 = vperm.xlu1 %8412, %v9324_v47  }
 0x2a6   : > { %1557 = vmatprep.mubr.bf16.mxu0 %v1352_v59 }
 0x2a9   : > { %2442 = vperm.xlu1 %8412, %v9325_v42   ;;  %v11061_v13 = vpop.eup %8701 }
 0x2aa   : > { %v11063_v17 = vpop.eup %8703 }
 0x2ab   : > { %v2030_v7 = vadd.f32 %v11063_v17, %v11061_v13 }
 0x2ac   : > { %1558 = vmatmul.mubr.bf16.gmra.mrb[20].mxu0 %v1351_v30 }
 0x2ad   : > { %1565 = vmatprep.mubr.bf16.mxu0 %v1354_v44 }
 0x2b4   : > { %1566 = vmatmul.mubr.bf16.gmra.mrb[24].mxu0 %v1353_v19 }
 0x2b5   : > { %1573 = vmatprep.mubr.bf16.mxu0 %v1356_v25 }
 0x2bc   : > { %1574 = vmatmul.mubr.bf16.gmra.mrb[28].mxu0 %v1355_v61 }
 0x2c9   : > { %v1987_v4 = vpop.xlane.xlu0 %1986 }
 0x2ca   : > { %8705 = vrcp.f32 %v1987_v4 }
 0x2cd   : > { %2031 = vadd.xlane.f32.xlu1 %v2030_v7 }
 0x2d4   : > { %v8706_v22 = vpop.eup %8705 }
 0x2d5   : > { %v1990_v2 = vpop.xlane.xlu1 %1989  ;;  %v2050_v23 = vmul.f32 %v8706_v22, %v10855_v56  ;;  %v2049_v1 = vmul.f32 %v8706_v22, %v10853_v49 }
 0x2d6   : > { %8707 = vrcp.f32 %v1990_v2 }
 0x2de   : > { %2450 = vperm.xlu1 %8412, %v9326_v11  }
 0x2e0   : > { %v8708_v24 = vpop.eup %8707 }
 0x2e1   : > { %v1993_v60 = vpop.xlane.xlu0 %1992  ;;  %v2052_v37 = vmul.f32 %v8708_v24, %v10867_v43  ;;  %v2051_v42 = vmul.f32 %v8708_v24, %v10863_v46 }
 0x2e2   : > { %2458 = vperm.xlu1 %8412, %v9327_v28   ;;  %8709 = vrcp.f32 %v1993_v60 }
 0x2e3   : > { %v2082_v10 = vpack.c.bf16 %v2052_v37, %v2050_v23  ;;  %v2081_v44 = vpack.c.bf16 %v2051_v42, %v2049_v1 }
 0x2e5   : > { %2257 = vmatprep.mubr.bf16.mxu1 %v2082_v10 }
 0x2e6   : > { %2466 = vperm.xlu1 %8412, %v9328_v6   ;;  %v1996_v59 = vpop.xlane.xlu1 %1995  ;;  %2258 = vmatmul.mubr.bf16.vlgmr.msra.gmra.mrb[0].mxu1 %v2081_v44 }
 0x2e7   : > { %8711 = vrcp.f32 %v1996_v59  ;;  %v1999_v54 = vpop.xlane.xlu0 %1998 }
 0x2e8   : > { %8713 = vrcp.f32 %v1999_v54 }
 0x2ea   : > { %v2002_v47 = vpop.xlane.xlu1 %2001 }
 0x2eb   : > { %8715 = vrcp.f32 %v2002_v47 }
 0x2ec   : > { %v8710_v52 = vpop.eup %8709 }
 0x2ed   : > { %v2054_v40 = vmul.f32 %v8710_v52, %v10879_v29  ;;  %v2053_v49 = vmul.f32 %v8710_v52, %v10877_v51  ;;  %v14946_v51 = vsub.s32 5, %v15496_v8 }
 0x2ef   : > { %v2480_v55 = vrot.slane %v9329_v58, %v14946_v51 }
 0x2f1   : > { %v2005_v30 = vpop.xlane.xlu0 %2004  ;;  %v8712_v32 = vpop.eup %8711  ;;  %v11098_v28 = vrot.slane %v2480_v55, %v11081_v15 }
 0x2f2   : > { %v2056_v56 = vmul.f32 %v8712_v32, %v10873_v38  ;;  %v8714_v31 = vpop.eup %8713  ;;  %v2055_v46 = vmul.f32 %v8712_v32, %v10869_v5 }
 0x2f3   : > { %v2058_v45 = vmul.f32 %v8714_v31, %v10897_v35  ;;  %v2057_v26 = vmul.f32 %v8714_v31, %v10895_v48 }
 0x2f4   : > { %v2084_v9 = vpack.c.bf16 %v2056_v56, %v2054_v40  ;;  %v2083_v25 = vpack.c.bf16 %v2055_v46, %v2053_v49 }
 0x2f5   : > { %v8716_v36 = vpop.eup %8715 }
 0x2f6   : > { %2265 = vmatprep.mubr.bf16.mxu1 %v2084_v9  ;;  %v2060_v19 = vmul.f32 %v8716_v36, %v10911_v12  ;;  %v2059_v12 = vmul.f32 %v8716_v36, %v10899_v21  ;;  %v11095_v21 = vrot.slane %v2476_v39, %v11081_v15 }
 0x2f7   : > { %v2008_v34 = vpop.xlane.xlu1 %2007  ;;  %2266 = vmatmul.mubr.bf16.gmra.mrb[4].mxu1 %v2083_v25 }
 0x2f8   : > { %8717 = vrcp.f32 %v2008_v34  ;;  %v2086_v38 = vpack.c.bf16 %v2060_v19, %v2058_v45  ;;  %v2085_v48 = vpack.c.bf16 %v2059_v12, %v2057_v26 }
 0x2f9   : > { %8719 = vrcp.f32 %v2005_v30 }
 0x2fa   : > { %2273 = vmatprep.mubr.bf16.mxu1 %v2086_v38 }
 0x2fc   : > { %v2011_v43 = vpop.xlane.xlu0 %2010 }
 0x2fd   : > { %8721 = vrcp.f32 %v2011_v43  ;;  %v2014_v3 = vpop.xlane.xlu1 %2013 }
 0x2fe   : > { %8723 = vrcp.f32 %v2014_v3 }
 0x2ff   : > { %2274 = vmatmul.mubr.bf16.gmra.mrb[8].mxu1 %v2085_v48 }
 0x300   : > { %v2017_v29 = vpop.xlane.xlu0 %2016 }
 0x301   : > { %8725 = vrcp.f32 %v2017_v29  ;;  %v2020_v20 = vpop.xlane.xlu1 %2019 }
 0x302   : > { %v8718_v5 = vpop.eup %8717  ;;  %8727 = vrcp.f32 %v2020_v20 }
 0x303   : > { %v8720_v35 = vpop.eup %8719  ;;  %v2064_v63 = vmul.f32 %v8718_v5, %v10935_v14  ;;  %v2063_v14 = vmul.f32 %v8718_v5, %v10927_v53 }
 0x304   : > { %v2062_v62 = vmul.f32 %v8720_v35, %v10925_v33  ;;  %v2061_v23 = vmul.f32 %v8720_v35, %v10917_v57  ;;  %v15502_v35 = vld [vmem:[#allocation49_spill] sm:$0xff] }
 0x306   : > { %v2088_v4 = vpack.c.bf16 %v2064_v63, %v2062_v62  ;;  %v2087_v57 = vpack.c.bf16 %v2063_v14, %v2061_v23  ;;  %v15505_v14 = vld [vmem:[#allocation12_spill] sm:$0xff] }
 0x307   : > { %v2023_v27 = vpop.xlane.xlu0 %2022  ;;  %v8722_v61 = vpop.eup %8721  ;;  %v15509_v23 = vld [vmem:[#allocation8_spill] sm:$0xff] }
 0x308   : > { %8729 = vrcp.f32 %v2023_v27  ;;  %v8724_v11 = vpop.eup %8723  ;;  %2281 = vmatprep.mubr.bf16.mxu1 %v2088_v4  ;;  %v2066_v60 = vmul.f32 %v8722_v61, %v10954_v18  ;;  %v11104_v59 = vmul.f32 %v8722_v61, %v10945_v0  ;;  %v15498_v0 = vld [vmem:[#allocation40_spill] sm:$0xff]  ;;  %v15503_v4 = vld [vmem:[#allocation11_spill] sm:$0xff] }
 0x309   : > { %v2026_v7 = vpop.xlane.xlu1 %2025  ;;  %v2068_v33 = vmul.f32 %v8724_v11, %v10960_v41  ;;  %v11107_v54 = vmul.f32 %v8724_v11, %v10956_v50  ;;  %v15497_v41 = vld [vmem:[#allocation65_spill] sm:$0xff]  ;;  %2282 = vmatmul.mubr.bf16.gmra.mrb[12].mxu1 %v2087_v57 }
 0x30a   : > { %8731 = vrcp.f32 %v2026_v7  ;;  %v15499_v50 = vld [vmem:[#allocation37_spill] sm:$0xff] }
 0x30b   : > { %v8726_v6 = vpop.eup %8725  ;;  %v2090_v52 = vpack.c.bf16 %v2068_v33, %v2066_v60 }
 0x30c   : > { %v8728_v22 = vpop.eup %8727  ;;  %v11112_v53 = vpop.xlane.xlu0 %2028  ;;  %v11115_v18 = vmul.f32 %v8726_v6, %v10972_v16  ;;  %v11121_v1 = vmul.f32 %v8726_v6, %v15498_v0  ;;  %v2089_v16 = vpack.c.bf16 %v11107_v54, %v11104_v59  ;;  %v15512_v0 = vld [vmem:[#allocation63_spill] sm:$0xff] }
 0x30d   : > { %v2415_v2 = vpop.permute.xlu1 %2414  ;;  %v11118_v37 = vmul.f32 %v8728_v22, %v15497_v41  ;;  %v11124_v42 = vmul.f32 %v8728_v22, %v15499_v50  ;;  %2289 = vmatprep.mubr.bf16.mxu1 %v2090_v52  ;;  %v15513_v52 = vld [vmem:[#allocation13_spill] sm:$0xff]  ;;  %8733 = vrcp.f32 %v11112_v53 }
 0x30e   : > { %v2493_v47 = vadd.f32 %v11095_v21, %v2415_v2  ;;  %v2494_v24 = vadd.f32 %v11098_v28, %v2415_v2 }
 0x30f   : > { %v2092_v45 = vpack.c.bf16 %v11118_v37, %v11115_v18  ;;  %v2091_v3 = vpack.c.bf16 %v11124_v42, %v11121_v1 }
 0x310   : > { %vm2525_vm3 = vcmp.gt.f32.partialorder %v2493_v47, 0.0  ;;  %vm2526_vm11 = vcmp.gt.f32.partialorder %v2494_v24, 0.0  ;;  %v2557_v30 = vmul.f32 0.2, %v2493_v47  ;;  %v2558_v10 = vmul.f32 0.2, %v2494_v24 }
 0x311   : > { %v2419_v44 = vpop.permute.xlu1 %2418  ;;  %2290 = vmatmul.mubr.bf16.gmra.mrb[16].mxu1 %v2089_v16 }
 0x312   : > { %v8730_v34 = vpop.eup %8729  ;;  %v2495_v32 = vadd.f32 %v11095_v21, %v2419_v44  ;;  %v2496_v40 = vadd.f32 %v11098_v28, %v2419_v44  ;;  %v2589_v56 = vsel %vm2525_vm3, %v2493_v47, %v2557_v30  ;;  %v2590_v31 = vsel %vm2526_vm11, %v2494_v24, %v2558_v10  ;;  %v15507_v47 = vld [vmem:[#allocation7_spill] sm:$0xff]  ;;  %2297 = vmatprep.mubr.bf16.mxu1 %v2092_v45 }
 0x313   : > { %v11132_v49 = vsel %vm9741_vm2, %v2589_v56, -1e+30  ;;  %v11136_v36 = vsel %vm9745_vm5, %v2590_v31, -1e+30  ;;  %v11147_v26 = vmul.f32 %v8730_v34, %v15502_v35  ;;  %vm15504_vm5 = vnez %v15503_v4 }
 0x314   : > { %v2411_v43 = vpop.permute.xlu0 %2410  ;;  %vm2527_vm8 = vcmp.gt.f32.partialorder %v2495_v32, 0.0  ;;  %vm2528_vm13 = vcmp.gt.f32.partialorder %v2496_v40, 0.0  ;;  %v2559_v19 = vmul.f32 0.2, %v2495_v32  ;;  %v2560_v29 = vmul.f32 0.2, %v2496_v40  ;;  %v11151_v62 = vpop.eup %8731 }
 0x315   : > { %v2491_v25 = vadd.f32 %v11095_v21, %v2411_v43  ;;  %v2492_v38 = vadd.f32 %v11098_v28, %v2411_v43  ;;  %v2423_v20 = vpop.permute.xlu1 %2422  ;;  %v2654_v5 = vmax.f32 %v11132_v49, %v11136_v36  ;;  %vm15510_vm11 = vnez %v15509_v23 }
 0x316   : > { %v2497_v12 = vadd.f32 %v11095_v21, %v2423_v20  ;;  %v2498_v58 = vadd.f32 %v11098_v28, %v2423_v20  ;;  %v2591_v39 = vsel %vm2527_vm8, %v2495_v32, %v2559_v19  ;;  %v2592_v55 = vsel %vm2528_vm13, %v2496_v40, %v2560_v29  ;;  %v15515_v40 = vld [vmem:[#allocation66_spill] sm:$0xff]  ;;  %v15518_v20 = vld [vmem:[#allocation15_spill] sm:$0xff] }
 0x317   : > { %vm2523_vm7 = vcmp.gt.f32.partialorder %v2491_v25, 0.0  ;;  %vm2524_vm1 = vcmp.gt.f32.partialorder %v2492_v38, 0.0  ;;  %v2555_v63 = vmul.f32 0.2, %v2491_v25  ;;  %v2556_v27 = vmul.f32 0.2, %v2492_v38  ;;  %2655 = vmax.xlane.f32.xlu0 %v2654_v5 }
 0x318   : > { %vm2529_vm3 = vcmp.gt.f32.partialorder %v2497_v12, 0.0  ;;  %v2561_v61 = vmul.f32 0.2, %v2497_v12  ;;  %v2562_v7 = vmul.f32 0.2, %v2498_v58  ;;  %v2447_v48 = vpop.permute.xlu0 %2446  ;;  %vm15506_vm8 = vnez %v15505_v14  ;;  %v15516_v19 = vld [vmem:[#allocation14_spill] sm:$0xff] }
 0x319   : > { %v2427_v11 = vpop.permute.xlu1 %2426  ;;  %v11155_v6 = vsel %vm15504_vm5, %v2591_v39, -1e+30  ;;  %v11159_v2 = vsel %vm15506_vm8, %v2592_v55, -1e+30  ;;  %v2587_v60 = vsel %vm2523_vm7, %v2491_v25, %v2555_v63  ;;  %v2588_v33 = vsel %vm2524_vm1, %v2492_v38, %v2556_v27  ;;  %v15520_v63 = vld [vmem:[#allocation16_spill] sm:$0xff]  ;;  %2298 = vmatmul.mubr.bf16.gmra.mrb[20].mxu1 %v2091_v3 }
 0x31a   : > { %v2499_v59 = vadd.f32 %v11095_v21, %v2427_v11  ;;  %v2500_v54 = vadd.f32 %v11098_v28, %v2427_v11  ;;  %v2657_v22 = vmax.f32 %v11155_v6, %v11159_v2  ;;  %vm15508_vm13 = vnez %v15507_v47  ;;  %v15565_v14 = vld [vmem:[#allocation28_spill] sm:$0xff] }
 0x31b   : > { %v11167_v24 = vsel %vm15508_vm13, %v2587_v60, -1e+30  ;;  %v11171_v18 = vsel %vm15510_vm11, %v2588_v33, -1e+30  ;;  %v2593_v41 = vsel %vm2529_vm3, %v2497_v12, %v2561_v61  ;;  %vm15511_vm7 = vcmp.gt.f32.partialorder %v2498_v58, 0.0 }
 0x31c   : > { %v2594_v37 = vsel %vm15511_vm7, %v2498_v58, %v2562_v7  ;;  %v2076_v50 = vmul.f32 %v11151_v62, %v15512_v0  ;;  %vm2531_vm1 = vcmp.gt.f32.partialorder %v2499_v59, 0.0  ;;  %vm2532_vm8 = vcmp.gt.f32.partialorder %v2500_v54, 0.0  ;;  %2658 = vmax.xlane.f32.xlu0 %v2657_v22  ;;  %v2455_v25 = vpop.permute.xlu0 %2454 }
 0x31d   : > { %v2563_v30 = vmul.f32 0.2, %v2499_v59  ;;  %v2564_v10 = vmul.f32 0.2, %v2500_v54  ;;  %v2431_v44 = vpop.permute.xlu1 %2430  ;;  %v2651_v57 = vmax.f32 %v11167_v24, %v11171_v18  ;;  %vm15514_vm5 = vnez %v15513_v52  ;;  %v15570_v52 = vld [vmem:[#allocation33_spill] sm:$0xff] }
 0x31e   : > { %v11181_v16 = vsel %vm15514_vm5, %v2593_v41, -1e+30  ;;  %v11184_v32 = vadd.f32 %v11095_v21, %v2447_v48  ;;  %v11187_v56 = vmul.f32 %v8730_v34, %v15515_v40  ;;  %v2501_v31 = vadd.f32 %v11095_v21, %v2431_v44 }
 0x31f   : > { %v2502_v43 = vadd.f32 %v11098_v28, %v2431_v44  ;;  %vm15517_vm3 = vnez %v15516_v19  ;;  %v2595_v29 = vsel %vm2531_vm1, %v2499_v59, %v2563_v30  ;;  %2652 = vmax.xlane.f32.xlu1 %v2651_v57  ;;  %v2596_v38 = vsel %vm2532_vm8, %v2500_v54, %v2564_v10  ;;  %v15522_v59 = vld [vmem:[#allocation17_spill] sm:$0xff]  ;;  %v15524_v30 = vld [vmem:[#allocation18_spill] sm:$0xff] }
 0x320   : > { %v11193_v45 = vsel %vm15517_vm3, %v2594_v37, -1e+30  ;;  %vm15519_vm7 = vnez %v15518_v20  ;;  %v2094_v34 = vpack.c.bf16 %v2076_v50, %v11147_v26  ;;  %v11202_v35 = vadd.f32 %v11098_v28, %v2447_v48  ;;  %v2463_v40 = vpop.permute.xlu0 %2462 }
 0x321   : > { %v11198_v5 = vsel %vm15519_vm7, %v2595_v29, -1e+30  ;;  %vm2533_vm5 = vcmp.gt.f32.partialorder %v2501_v31, 0.0  ;;  %vm2534_vm11 = vcmp.gt.f32.partialorder %v2502_v43, 0.0  ;;  %v2565_v12 = vmul.f32 0.2, %v2501_v31  ;;  %v2435_v39 = vpop.permute.xlu1 %2434 }
 0x322   : > { %v2566_v58 = vmul.f32 0.2, %v2502_v43  ;;  %v2660_v55 = vmax.f32 %v11181_v16, %v11193_v45  ;;  %vm15521_vm1 = vnez %v15520_v63  ;;  %v11211_v61 = vmul.f32 0.2, %v11184_v32  ;;  %2305 = vmatprep.mubr.bf16.mxu1 %v2094_v34  ;;  %v15558_v63 = vld [vmem:[#allocation42_spill] sm:$0xff] }
 0x323   : > { %v11208_v27 = vsel %vm15521_vm1, %v2596_v38, -1e+30  ;;  %v11214_v26 = vadd.f32 %v11095_v21, %v2455_v25  ;;  %v2503_v7 = vadd.f32 %v11095_v21, %v2435_v39  ;;  %v2504_v48 = vadd.f32 %v11098_v28, %v2435_v39  ;;  %v15529_v38 = vld [vmem:[#allocation43_spill] sm:$0xff] }
 0x324   : > { %v2663_v11 = vmax.f32 %v11198_v5, %v11208_v27  ;;  %v2597_v60 = vsel %vm2533_vm5, %v2501_v31, %v2565_v12  ;;  %2661 = vmax.xlane.f32.xlu1 %v2660_v55  ;;  %v2598_v33 = vsel %vm2534_vm11, %v2502_v43, %v2566_v58  ;;  %vm15523_vm1 = vnez %v15522_v59  ;;  %v15527_v43 = vld [vmem:[#allocation19_spill] sm:$0xff]  ;;  %v15530_v55 = vld [vmem:[#allocation20_spill] sm:$0xff] }
 0x325   : > { %v11226_v54 = vsel %vm15523_vm1, %v2597_v60, -1e+30  ;;  %v2574_v22 = vmul.f32 0.2, %v11202_v35  ;;  %v11230_v41 = vadd.f32 %v11098_v28, %v2455_v25  ;;  %vm2535_vm7 = vcmp.gt.f32.partialorder %v2503_v7, 0.0  ;;  %v2439_v50 = vpop.permute.xlu1 %2438 }
 0x326   : > { %v2567_v37 = vmul.f32 0.2, %v2503_v7  ;;  %v2568_v0 = vmul.f32 0.2, %v2504_v48  ;;  %2664 = vmax.xlane.f32.xlu0 %v2663_v11  ;;  %vm15525_vm5 = vnez %v15524_v30  ;;  %v2577_v42 = vmul.f32 0.2, %v11214_v26 }
 0x327   : > { %v11234_v1 = vsel %vm15525_vm5, %v2598_v33, -1e+30  ;;  %v2505_v3 = vadd.f32 %v11095_v21, %v2439_v50  ;;  %v2506_v10 = vadd.f32 %v11098_v28, %v2439_v50  ;;  %vm15526_vm1 = vcmp.gt.f32.partialorder %v2504_v48, 0.0 }
 0x328   : > { %v2666_v44 = vmax.f32 %v11226_v54, %v11234_v1  ;;  %v2599_v57 = vsel %vm2535_vm7, %v2503_v7, %v2567_v37  ;;  %v2600_v31 = vsel %vm15526_vm1, %v2504_v48, %v2568_v0  ;;  %vm15528_vm5 = vnez %v15527_v43  ;;  %v15542_v43 = vld [vmem:[#allocation23_spill] sm:$0xff] }
 0x329   : > { %v11247_v29 = vsel %vm15528_vm5, %v2599_v57, -1e+30  ;;  %v2578_v25 = vmul.f32 0.2, %v11230_v41  ;;  %v2075_v34 = vmul.f32 %v11151_v62, %v15529_v38  ;;  %vm2537_vm8 = vcmp.gt.f32.partialorder %v2505_v3, 0.0  ;;  %v2443_v39 = vpop.permute.xlu1 %2442  ;;  %v15534_v38 = vld [vmem:[#allocation22_spill] sm:$0xff] }
 0x32a   : > { %vm2538_vm11 = vcmp.gt.f32.partialorder %v2506_v10, 0.0  ;;  %v2569_v12 = vmul.f32 0.2, %v2505_v3  ;;  %v2570_v58 = vmul.f32 0.2, %v2506_v10  ;;  %2667 = vmax.xlane.f32.xlu1 %v2666_v44  ;;  %vm15531_vm7 = vnez %v15530_v55  ;;  %v15532_v44 = vld [vmem:[#allocation21_spill] sm:$0xff] }
 0x32b   : > { %v11254_v7 = vsel %vm15531_vm7, %v2600_v31, -1e+30  ;;  %v2093_v48 = vpack.c.bf16 %v2075_v34, %v11187_v56  ;;  %v2517_v11 = vadd.f32 %v11095_v21, %v2463_v40  ;;  %v2518_v60 = vadd.f32 %v11098_v28, %v2463_v40  ;;  %v2471_v31 = vpop.permute.xlu0 %2470 }
 0x32c   : > { %v2507_v33 = vadd.f32 %v11095_v21, %v2443_v39  ;;  %v2508_v62 = vadd.f32 %v11098_v28, %v2443_v39  ;;  %v2669_v37 = vmax.f32 %v11247_v29, %v11254_v7  ;;  %v2601_v0 = vsel %vm2537_vm8, %v2505_v3, %v2569_v12 }
 0x32d   : > { %2306 = vmatmul.mubr.bf16.gmra.mrb[24].mxu1 %v2093_v48  ;;  %v2602_v50 = vsel %vm2538_vm11, %v2506_v10, %v2570_v58  ;;  %vm15533_vm1 = vnez %v15532_v44  ;;  %vm15535_vm2 = vnez %v15534_v38  ;;  %v2581_v39 = vmul.f32 0.2, %v2517_v11  ;;  %v15538_v48 = vld [vmem:[#allocation25_spill] sm:$0xff] }
 0x32e   : > { %v11265_v57 = vsel %vm15533_vm1, %v2601_v0, -1e+30  ;;  %vm2539_vm5 = vcmp.gt.f32.partialorder %v2507_v33, 0.0  ;;  %vm2540_vm13 = vcmp.gt.f32.partialorder %v2508_v62, 0.0  ;;  %v2571_v56 = vmul.f32 0.2, %v2507_v33  ;;  %2670 = vmax.xlane.f32.xlu0 %v2669_v37 }
 0x32f   : > { %v2572_v40 = vmul.f32 0.2, %v2508_v62  ;;  %v11269_v34 = vsel %vm15535_vm2, %v2602_v50, -1e+30  ;;  %v2582_v3 = vmul.f32 0.2, %v2518_v60  ;;  %vm15539_vm7 = vnez %v15538_v48 }
 0x330   : > { %vm15536_vm8 = vcmp.gt.f32.partialorder %v11184_v32, 0.0  ;;  %v2672_v12 = vmax.f32 %v11265_v57, %v11269_v34  ;;  %vm15537_vm11 = vcmp.gt.f32.partialorder %v11202_v35, 0.0  ;;  %v2603_v0 = vsel %vm2539_vm5, %v2507_v33, %v2571_v56  ;;  %v15540_v50 = vld [vmem:[#allocation26_spill] sm:$0xff]  ;;  %v15564_v44 = vld [vmem:[#allocation53_spill] sm:$0xff] }
 0x331   : > { %v2605_v10 = vsel %vm15536_vm8, %v11184_v32, %v11211_v61  ;;  %v2606_v58 = vsel %vm15537_vm11, %v11202_v35, %v2574_v22  ;;  %vm15541_vm3 = vnez %v15540_v50  ;;  %v2604_v55 = vsel %vm2540_vm13, %v2508_v62, %v2572_v40  ;;  %v15544_v22 = vld [vmem:[#allocation24_spill] sm:$0xff]  ;;  %v15562_v50 = vld [vmem:[#allocation27_spill] sm:$0xff] }
 0x332   : > { %v11282_v37 = vsel %vm15539_vm7, %v2605_v10, -1e+30  ;;  %v11286_v51 = vsel %vm15541_vm3, %v2606_v58, -1e+30  ;;  %vm15543_vm2 = vnez %v15542_v43  ;;  %v2521_v61 = vadd.f32 %v11095_v21, %v2471_v31  ;;  %2673 = vmax.xlane.f32.xlu1 %v2672_v12 }
 0x333   : > { %v11290_v32 = vsel %vm15543_vm2, %v2603_v0, -1e+30  ;;  %v2678_v35 = vmax.f32 %v11282_v37, %v11286_v51  ;;  %vm15545_vm8 = vnez %v15544_v22  ;;  %v2522_v33 = vadd.f32 %v11098_v28, %v2471_v31  ;;  %v15548_v0 = vld [vmem:[#allocation29_spill] sm:$0xff]  ;;  %v15551_v31 = vld [vmem:[#allocation30_spill] sm:$0xff] }
 0x334   : > { %v11297_v10 = vsel %vm15545_vm8, %v2604_v55, -1e+30  ;;  %vm15546_vm5 = vcmp.gt.f32.partialorder %v11214_v26, 0.0  ;;  %vm15547_vm13 = vcmp.gt.f32.partialorder %v11230_v41, 0.0  ;;  %v2585_v12 = vmul.f32 0.2, %v2521_v61 }
 0x335   : > { %v2609_v62 = vsel %vm15546_vm5, %v11214_v26, %v2577_v42  ;;  %v2675_v56 = vmax.f32 %v11290_v32, %v11297_v10  ;;  %v2610_v40 = vsel %vm15547_vm13, %v11230_v41, %v2578_v25  ;;  %v2586_v58 = vmul.f32 0.2, %v2522_v33  ;;  %v15554_v25 = vld [vmem:[#allocation34_spill] sm:$0xff] }
 0x336   : > { %vm15549_vm11 = vnez %v15548_v0  ;;  %vm15550_vm8 = vcmp.gt.f32.partialorder %v2517_v11, 0.0  ;;  %vm2553_vm2 = vcmp.gt.f32.partialorder %v2521_v61, 0.0  ;;  %vm2554_vm3 = vcmp.gt.f32.partialorder %v2522_v33, 0.0  ;;  %2679 = vmax.xlane.f32.xlu1 %v2678_v35 }
 0x337   : > { %v11310_v22 = vsel %vm15549_vm11, %v2609_v62, -1e+30  ;;  %v2613_v55 = vsel %vm15550_vm8, %v2517_v11, %v2581_v39  ;;  %2676 = vmax.xlane.f32.xlu0 %v2675_v56  ;;  %vm15552_vm5 = vnez %v15551_v31  ;;  %vm15553_vm7 = vcmp.gt.f32.partialorder %v2518_v60, 0.0  ;;  %v15556_v62 = vld [vmem:[#allocation35_spill] sm:$0xff] }
 0x338   : > { %v11315_v26 = vsel %vm15552_vm5, %v2610_v40, -1e+30  ;;  %v2614_v42 = vsel %vm15553_vm7, %v2518_v60, %v2582_v3  ;;  %vm15555_vm13 = vnez %v15554_v25  ;;  %vm15557_vm11 = vnez %v15556_v62  ;;  %v15560_v3 = vld [vmem:[#allocation45_spill] sm:$0xff]  ;;  %v8734_v62 = vpop.eup %8733 }
 0x339   : > { %v2684_v41 = vmax.f32 %v11310_v22, %v11315_v26  ;;  %v11322_v43 = vsel %vm15555_vm13, %v2613_v55, -1e+30  ;;  %v11326_v11 = vsel %vm15557_vm11, %v2614_v42, -1e+30  ;;  %v2617_v39 = vsel %vm2553_vm2, %v2521_v61, %v2585_v12 }
 0x33a   : > { %v2618_v56 = vsel %vm2554_vm3, %v2522_v33, %v2586_v58  ;;  %v2690_v40 = vmax.f32 %v11322_v43, %v11326_v11  ;;  %vm15559_vm7 = vnez %v15558_v63  ;;  %vm15561_vm8 = vnez %v15560_v3 }
 0x33b   : > { %2685 = vmax.xlane.f32.xlu1 %v2684_v41  ;;  %v11332_v60 = vsel %vm15559_vm7, %v2617_v39, -1e+30  ;;  %v11336_v35 = vsel %vm15561_vm8, %v2618_v56, -1e+30  ;;  %vm15563_vm8 = vnez %v15562_v50  ;;  %vm15566_vm13 = vnez %v15565_v14 }
 0x33c   : > { %v2696_v55 = vmax.f32 %v11332_v60, %v11336_v35 }
 0x33f   : > { %2691 = vmax.xlane.f32.xlu1 %v2690_v40 }
 0x343   : > { %2697 = vmax.xlane.f32.xlu1 %v2696_v55 }
 0x357   : > { %v7753_v61 = vpop.f32.mrb[0].mxu0 }
 0x358   : > { %v7754_v33 = vpop.f32.mrb[1].mxu0 }
 0x359   : > { %v11341_v12 = vadd.f32 %v7754_v33, %v7753_v61  ;;  %v7756_v58 = vpop.f32.mrb[2].mxu0 }
 0x35a   : > { %v2032_v42 = vpop.xlane.xlu1 %2031  ;;  %v7757_v41 = vpop.f32.mrb[3].mxu0 }
 0x35b   : > { %8735 = vrcp.f32 %v2032_v42  ;;  %v11343_v39 = vadd.f32 %v7757_v41, %v7756_v58 }
 0x35e   : > { %v2451_v3 = vpop.permute.xlu1 %2450 }
 0x35f   : > { %v2511_v56 = vadd.f32 %v11095_v21, %v2451_v3  ;;  %v2512_v40 = vadd.f32 %v11098_v28, %v2451_v3  ;;  %v7759_v63 = vpop.f32.mrb[4].mxu0 }
 0x360   : > { %v7760_v25 = vpop.f32.mrb[5].mxu0 }
 0x361   : > { %vm2543_vm2 = vcmp.gt.f32.partialorder %v2511_v56, 0.0  ;;  %vm2544_vm3 = vcmp.gt.f32.partialorder %v2512_v40, 0.0  ;;  %v2575_v55 = vmul.f32 0.2, %v2511_v56  ;;  %v2576_v53 = vmul.f32 0.2, %v2512_v40 }
 0x362   : > { %v2459_v61 = vpop.permute.xlu1 %2458  ;;  %v11347_v33 = vadd.f32 %v7760_v25, %v7759_v63  ;;  %v7762_v20 = vpop.f32.mrb[6].mxu0  ;;  %v2078_v63 = vmul.f32 %v8734_v62, %v15564_v44 }
 0x363   : > { %v2515_v42 = vadd.f32 %v11095_v21, %v2459_v61  ;;  %v2516_v58 = vadd.f32 %v11098_v28, %v2459_v61  ;;  %v2607_v41 = vsel %vm2543_vm2, %v2511_v56, %v2575_v55  ;;  %v7763_v31 = vpop.f32.mrb[7].mxu0  ;;  %v2608_v0 = vsel %vm2544_vm3, %v2512_v40, %v2576_v53 }
 0x364   : > { %v11353_v3 = vsel %vm15563_vm8, %v2607_v41, -1e+30  ;;  %v11355_v38 = vadd.f32 %v7763_v31, %v7762_v20  ;;  %v11360_v61 = vsel %vm15566_vm13, %v2608_v0, -1e+30  ;;  %v15567_v31 = vld [vmem:[#allocation64_spill] sm:$0xff]  ;;  %vm15571_vm8 = vnez %v15570_v52 }
 0x365   : > { %v8736_v48 = vpop.eup %8735  ;;  %vm2547_vm7 = vcmp.gt.f32.partialorder %v2515_v42, 0.0  ;;  %vm2548_vm11 = vcmp.gt.f32.partialorder %v2516_v58, 0.0  ;;  %v2579_v25 = vmul.f32 0.2, %v2515_v42  ;;  %v2580_v30 = vmul.f32 0.2, %v2516_v58 }
 0x366   : > { %v2467_v59 = vpop.permute.xlu1 %2466  ;;  %v2080_v56 = vmul.f32 %v8736_v48, %v11063_v17  ;;  %v2681_v20 = vmax.f32 %v11353_v3, %v11360_v61  ;;  %v2077_v53 = vmul.f32 %v8734_v62, %v15567_v31  ;;  %v2079_v50 = vmul.f32 %v8736_v48, %v11061_v13 }
 0x367   : > { %v2519_v40 = vadd.f32 %v11095_v21, %v2467_v59  ;;  %v2520_v55 = vadd.f32 %v11098_v28, %v2467_v59  ;;  %v7765_v41 = vpop.f32.mrb[8].mxu0  ;;  %v2611_v4 = vsel %vm2547_vm7, %v2515_v42, %v2579_v25  ;;  %v2612_v19 = vsel %vm2548_vm11, %v2516_v58, %v2580_v30  ;;  %v15568_v28 = vld [vmem:[#allocation31_spill] sm:$0xff]  ;;  %v15572_v25 = vld [vmem:[#allocation38_spill] sm:$0xff] }
 0x368   : > { %v2096_v44 = vpack.c.bf16 %v2080_v56, %v2078_v63  ;;  %2682 = vmax.xlane.f32.xlu0 %v2681_v20  ;;  %v7766_v17 = vpop.f32.mrb[9].mxu0  ;;  %v2095_v21 = vpack.c.bf16 %v2079_v50, %v2077_v53  ;;  %vm15569_vm13 = vnez %v15568_v28  ;;  %v11375_v62 = vsel %vm15571_vm8, %v2612_v19, -1e+30 }
 0x369   : > { %vm2551_vm2 = vcmp.gt.f32.partialorder %v2519_v40, 0.0  ;;  %vm2552_vm3 = vcmp.gt.f32.partialorder %v2520_v55, 0.0  ;;  %v2583_v0 = vmul.f32 0.2, %v2519_v40  ;;  %v2584_v14 = vmul.f32 0.2, %v2520_v55 }
 0x36a   : > { %2313 = vmatprep.mubr.bf16.mxu1 %v2096_v44  ;;  %v11371_v59 = vsel %vm15569_vm13, %v2611_v4, -1e+30  ;;  %v11377_v63 = vadd.f32 %v7766_v17, %v7765_v41  ;;  %v7768_v13 = vpop.f32.mrb[10].mxu0  ;;  %vm15573_vm11 = vnez %v15572_v25  ;;  %v15574_v4 = vld [vmem:[#allocation41_spill] sm:$0xff] }
 0x36b   : > { %v2687_v30 = vmax.f32 %v11371_v59, %v11375_v62  ;;  %v2615_v48 = vsel %vm2551_vm2, %v2519_v40, %v2583_v0  ;;  %v2616_v42 = vsel %vm2552_vm3, %v2520_v55, %v2584_v14  ;;  %v7769_v58 = vpop.f32.mrb[11].mxu0  ;;  %2314 = vmatmul.mubr.bf16.gmra.mrb[28].mxu1 %v2095_v21  ;;  %vm15575_vm7 = vnez %v15574_v4 }
 0x36c   : > { %v11383_v50 = vsel %vm15573_vm11, %v2615_v48, -1e+30  ;;  %v11387_v56 = vsel %vm15575_vm7, %v2616_v42, -1e+30  ;;  %v11389_v19 = vadd.f32 %v7769_v58, %v7768_v13  ;;  %vm2392_vm2 = vcmask 261120  }
 0x36d   : > { %2688 = vmax.xlane.f32.xlu0 %v2687_v30  ;;  %v2693_v20 = vmax.f32 %v11383_v50, %v11387_v56 }
 0x36f   : > { %v7771_v31 = vpop.f32.mrb[12].mxu0 }
 0x370   : > { %v7772_v53 = vpop.f32.mrb[13].mxu0 }
 0x371   : > { %2694 = vmax.xlane.f32.xlu0 %v2693_v20  ;;  %v11393_v14 = vadd.f32 %v7772_v53, %v7771_v31  ;;  %v7774_v40 = vpop.f32.mrb[14].mxu0 }
 0x372   : > { %v7775_v55 = vpop.f32.mrb[15].mxu0 }
 0x373   : > { %v11395_v41 = vadd.f32 %v7775_v55, %v7774_v40 }
 0x377   : > { %v7777_v44 = vpop.f32.mrb[16].mxu0 }
 0x378   : > { %v7778_v0 = vpop.f32.mrb[17].mxu0 }
 0x379   : > { %v11397_v17 = vadd.f32 %v7778_v0, %v7777_v44  ;;  %v7780_v21 = vpop.f32.mrb[18].mxu0 }
 0x37a   : > { %v7781_v13 = vpop.f32.mrb[19].mxu0 }
 0x37b   : > { %v11399_v48 = vadd.f32 %v7781_v13, %v7780_v21 }
 0x37f   : > { %v7783_v30 = vpop.f32.mrb[20].mxu0 }
 0x380   : > { %v7784_v42 = vpop.f32.mrb[21].mxu0 }
 0x381   : > { %v11401_v58 = vadd.f32 %v7784_v42, %v7783_v30  ;;  %v7786_v52 = vpop.f32.mrb[22].mxu0 }
 0x382   : > { %v7787_v20 = vpop.f32.mrb[23].mxu0 }
 0x383   : > { %v11403_v31 = vadd.f32 %v7787_v20, %v7786_v52 }
 0x387   : > { %v7789_v53 = vpop.f32.mrb[24].mxu0 }
 0x388   : > { %v7790_v28 = vpop.f32.mrb[25].mxu0 }
 0x389   : > { %v11405_v40 = vadd.f32 %v7790_v28, %v7789_v53  ;;  %v7792_v55 = vpop.f32.mrb[26].mxu0 }
 0x38a   : > { %v7793_v4 = vpop.f32.mrb[27].mxu0 }
 0x38b   : > { %v11407_v44 = vadd.f32 %v7793_v4, %v7792_v55 }
 0x38f   : > { %v7795_v0 = vpop.f32.mrb[28].mxu0 }
 0x390   : > { %v7796_v25 = vpop.f32.mrb[29].mxu0 }
 0x391   : > { %v11409_v21 = vadd.f32 %v7796_v25, %v7795_v0  ;;  %v7798_v13 = vpop.f32.mrb[30].mxu0 }
 0x392   : > { %v7799_v23 = vpop.f32.mrb[31].mxu0 }
 0x393   : > { %v11411_v30 = vadd.f32 %v7799_v23, %v7798_v13 }
 0x3a4   : > { %v2656_v42 = vpop.xlane.xlu0 %2655 }
 0x3a5   : > { %v2701_v52 = vsub.f32 %v11132_v49, %v2656_v42  ;;  %v2702_v20 = vsub.f32 %v11136_v36, %v2656_v42 }
 0x3a7   : > { %v2735_v47 = vmul.f32 1.442695, %v2701_v52  ;;  %v2737_v28 = vmul.f32 1.442695, %v2702_v20 }
 0x3a9   : > { %8737 = vpow2.f32 %v2735_v47  ;;  %v2659_v53 = vpop.xlane.xlu0 %2658 }
 0x3aa   : > { %8739 = vpow2.f32 %v2737_v28  ;;  %v2703_v4 = vsub.f32 %v11155_v6, %v2659_v53  ;;  %v2704_v55 = vsub.f32 %v11159_v2, %v2659_v53 }
 0x3ac   : > { %v2653_v25 = vpop.xlane.xlu1 %2652  ;;  %v2739_v13 = vmul.f32 1.442695, %v2703_v4  ;;  %v2741_v49 = vmul.f32 1.442695, %v2704_v55 }
 0x3ad   : > { %v2699_v0 = vsub.f32 %v11167_v24, %v2653_v25  ;;  %v2700_v23 = vsub.f32 %v11171_v18, %v2653_v25 }
 0x3af   : > { %v2731_v46 = vmul.f32 1.442695, %v2699_v0  ;;  %v2733_v9 = vmul.f32 1.442695, %v2700_v23 }
 0x3b1   : > { %v2662_v8 = vpop.xlane.xlu1 %2661  ;;  %8741 = vpow2.f32 %v2731_v46 }
 0x3b2   : > { %v2705_v47 = vsub.f32 %v11181_v16, %v2662_v8  ;;  %v2706_v42 = vsub.f32 %v11193_v45, %v2662_v8  ;;  %8743 = vpow2.f32 %v2733_v9 }
 0x3b3   : > { %v2665_v36 = vpop.xlane.xlu0 %2664  ;;  %v11423_v52 = vpop.eup %8737  ;;  %8745 = vpow2.f32 %v2739_v13 }
 0x3b4   : > { %v2707_v6 = vsub.f32 %v11198_v5, %v2665_v36  ;;  %v2708_v2 = vsub.f32 %v11208_v27, %v2665_v36  ;;  %v2743_v24 = vmul.f32 1.442695, %v2705_v47  ;;  %v11425_v18 = vpop.eup %8739  ;;  %8747 = vpow2.f32 %v2741_v49 }
 0x3b5   : > { %v2745_v46 = vmul.f32 1.442695, %v2706_v42  ;;  %v2798_v8 = vadd.f32 %v11425_v18, %v11423_v52 }
 0x3b6   : > { %v2747_v20 = vmul.f32 1.442695, %v2707_v6  ;;  %v2749_v28 = vmul.f32 1.442695, %v2708_v2  ;;  %8749 = vpow2.f32 %v2743_v24 }
 0x3b7   : > { %v2668_v53 = vpop.xlane.xlu1 %2667  ;;  %2799 = vadd.xlane.f32.xlu1 %v2798_v8 }
 0x3b8   : > { %8751 = vpow2.f32 %v2747_v20  ;;  %v2709_v9 = vsub.f32 %v11226_v54, %v2668_v53  ;;  %v2710_v16 = vsub.f32 %v11234_v1, %v2668_v53  ;;  %v8449_v54 = vld [vmem:[%s14649_s4 + $0xc0] sm:$0xff]  }
 0x3b9   : > { %8753 = vpow2.f32 %v2749_v28  ;;  %v8450_v1 = vld [vmem:[%s14649_s4 + $0x80] sm:$0xff]   ;;  %7865 = vmatprep.subr.bf16.mxu0 %v8449_v54 }
 0x3ba   : > { %8755 = vpow2.f32 %v2745_v46  ;;  %v2751_v45 = vmul.f32 1.442695, %v2709_v9  ;;  %v2753_v5 = vmul.f32 1.442695, %v2710_v16  ;;  %7866 = vmatpush3.bf16.msra.mxu0 %v8450_v1 }
 0x3bb   : > { %v2671_v27 = vpop.xlane.xlu0 %2670  ;;  %v11433_v25 = vpop.eup %8741 }
 0x3bc   : > { %8757 = vpow2.f32 %v2751_v45  ;;  %v2711_v4 = vsub.f32 %v11247_v29, %v2671_v27  ;;  %v2712_v55 = vsub.f32 %v11254_v7, %v2671_v27  ;;  %v11441_v0 = vpop.eup %8743 }
 0x3bd   : > { %8759 = vpow2.f32 %v2753_v5  ;;  %v11443_v49 = vpop.eup %8745  ;;  %v2795_v7 = vadd.f32 %v11441_v0, %v11433_v25 }
 0x3be   : > { %v2755_v23 = vmul.f32 1.442695, %v2711_v4  ;;  %v2757_v13 = vmul.f32 1.442695, %v2712_v55  ;;  %v11447_v36 = vpop.eup %8747 }
 0x3bf   : > { %v2674_v29 = vpop.xlane.xlu1 %2673  ;;  %2796 = vadd.xlane.f32.xlu0 %v2795_v7  ;;  %v8452_v7 = vld [vmem:[%s14649_s4 + $0x88] sm:$0xff]  }
 0x3c0   : > { %8761 = vpow2.f32 %v2755_v23  ;;  %v2713_v47 = vsub.f32 %v11265_v57, %v2674_v29  ;;  %v2714_v42 = vsub.f32 %v11269_v34, %v2674_v29  ;;  %v11451_v6 = vpop.eup %8749  ;;  %v2801_v57 = vadd.f32 %v11447_v36, %v11443_v49  ;;  %v8451_v29 = vld [vmem:[%s14649_s4 + $0xc8] sm:$0xff]  }
 0x3c1   : > { %8763 = vpow2.f32 %v2757_v13  ;;  %7867 = vmatprep.subr.bf16.mxu0 %v8451_v29 }
 0x3c2   : > { %v11453_v2 = vpop.eup %8751  ;;  %v2759_v24 = vmul.f32 1.442695, %v2713_v47  ;;  %v2761_v20 = vmul.f32 1.442695, %v2714_v42  ;;  %7868 = vmatpush3.bf16.msra.mxu0 %v8452_v7  ;;  %v8454_v7 = vld [vmem:[%s14649_s4 + $0x90] sm:$0xff]  }
 0x3c3   : > { %v11455_v46 = vpop.eup %8753  ;;  %v2680_v9 = vpop.xlane.xlu1 %2679  ;;  %2802 = vadd.xlane.f32.xlu0 %v2801_v57 }
 0x3c4   : > { %v2677_v28 = vpop.xlane.xlu0 %2676  ;;  %v11461_v34 = vpop.eup %8755  ;;  %8765 = vpow2.f32 %v2759_v24  ;;  %v2717_v16 = vsub.f32 %v11282_v37, %v2680_v9  ;;  %v2718_v45 = vsub.f32 %v11286_v51, %v2680_v9  ;;  %v2807_v37 = vadd.f32 %v11455_v46, %v11453_v2 }
 0x3c5   : > { %v2715_v53 = vsub.f32 %v11290_v32, %v2677_v28  ;;  %v2716_v8 = vsub.f32 %v11297_v10, %v2677_v28  ;;  %8767 = vpow2.f32 %v2761_v20  ;;  %v2804_v32 = vadd.f32 %v11461_v34, %v11451_v6 }
 0x3c6   : > { %v11467_v4 = vpop.eup %8757  ;;  %v2767_v10 = vmul.f32 1.442695, %v2717_v16  ;;  %v2769_v55 = vmul.f32 1.442695, %v2718_v45 }
 0x3c7   : > { %v2763_v5 = vmul.f32 1.442695, %v2715_v53  ;;  %v2765_v27 = vmul.f32 1.442695, %v2716_v8  ;;  %v11469_v54 = vpop.eup %8759  ;;  %2805 = vadd.xlane.f32.xlu1 %v2804_v32  ;;  %2808 = vadd.xlane.f32.xlu0 %v2807_v37 }
 0x3c8   : > { %v2686_v1 = vpop.xlane.xlu1 %2685  ;;  %v2810_v13 = vadd.f32 %v11469_v54, %v11467_v4 }
 0x3c9   : > { %8769 = vpow2.f32 %v2763_v5  ;;  %v2721_v51 = vsub.f32 %v11310_v22, %v2686_v1  ;;  %v2722_v23 = vsub.f32 %v11315_v26, %v2686_v1 }
 0x3ca   : > { %8771 = vpow2.f32 %v2765_v27  ;;  %v11483_v47 = vpop.eup %8761  ;;  %v7817_v27 = vpop.f32.mrb[0].mxu1 }
 0x3cb   : > { %8773 = vpow2.f32 %v2767_v10  ;;  %v2775_v42 = vmul.f32 1.442695, %v2721_v51  ;;  %v2777_v22 = vmul.f32 1.442695, %v2722_v23  ;;  %v11485_v24 = vpop.eup %8763  ;;  %2811 = vadd.xlane.f32.xlu1 %v2810_v13  ;;  %v7818_v10 = vpop.f32.mrb[1].mxu1 }
 0x3cc   : > { %8775 = vpow2.f32 %v2769_v55  ;;  %v2692_v26 = vpop.xlane.xlu1 %2691  ;;  %v2813_v53 = vadd.f32 %v11485_v24, %v11483_v47  ;;  %v7819_v51 = vadd.f32 %v7818_v10, %v7817_v27  ;;  %v7820_v23 = vpop.f32.mrb[2].mxu1 }
 0x3cd   : > { %8777 = vpow2.f32 %v2775_v42  ;;  %v2725_v20 = vsub.f32 %v11322_v43, %v2692_v26  ;;  %v2726_v28 = vsub.f32 %v11326_v11, %v2692_v26  ;;  %v7821_v29 = vpop.f32.mrb[3].mxu1  ;;  %v8455_v42 = vld [vmem:[%s14649_s4 + $0xd8] sm:$0xff]   ;;  %v2322_v26 = vmul.f32 0.4, %v11341_v12 }
 0x3ce   : > { %8779 = vpow2.f32 %v2777_v22  ;;  %v11491_v8 = vpop.eup %8765  ;;  %2814 = vadd.xlane.f32.xlu0 %v2813_v53 }
 0x3cf   : > { %v2783_v9 = vmul.f32 1.442695, %v2725_v20  ;;  %v2785_v57 = vmul.f32 1.442695, %v2726_v28  ;;  %v11493_v16 = vpop.eup %8767  ;;  %v2338_v20 = vmul.f32 0.6, %v7819_v51  ;;  %v7822_v28 = vadd.f32 %v7821_v29, %v7820_v23 }
 0x3d0   : > { %v2698_v45 = vpop.xlane.xlu1 %2697  ;;  %v2816_v11 = vadd.f32 %v11493_v16, %v11491_v8  ;;  %v8457_v29 = vld [vmem:[%s14649_s4 + $0xe0] sm:$0xff]  }
 0x3d1   : > { %8781 = vpow2.f32 %v2783_v9  ;;  %v2729_v5 = vsub.f32 %v11332_v60, %v2698_v45  ;;  %v2730_v43 = vsub.f32 %v11336_v35, %v2698_v45  ;;  %v8453_v60 = vld [vmem:[%s14649_s4 + $0xd0] sm:$0xff]   ;;  %v11524_v9 = vld [vmem:[%s14653_s8] ss:$0 sm:$0xff]  ;;  %v2323_v45 = vmul.f32 0.4, %v11343_v39 }
 0x3d2   : > { %8783 = vpow2.f32 %v2785_v57  ;;  %2817 = vadd.xlane.f32.xlu1 %v2816_v11  ;;  %7869 = vmatprep.subr.bf16.mxu0 %v8453_v60  ;;  %v8456_v57 = vld [vmem:[%s14649_s4 + $0x98] sm:$0xff]  }
 0x3d3   : > { %v11499_v32 = vpop.eup %8769  ;;  %v2791_v1 = vmul.f32 1.442695, %v2729_v5  ;;  %v2793_v37 = vmul.f32 1.442695, %v2730_v43  ;;  %7870 = vmatpush3.bf16.msra.mxu0 %v8454_v7  ;;  %v2354_v5 = vadd.f32 %v2338_v20, %v2322_v26  ;;  %v2339_v43 = vmul.f32 0.6, %v7822_v28 }
 0x3d4   : > { %v11501_v55 = vpop.eup %8771  ;;  %7871 = vmatprep.subr.bf16.mxu0 %v8455_v42  ;;  %v8458_v7 = vld [vmem:[%s14649_s4 + $0xa0] sm:$0xff]   ;;  %v8459_v42 = vld [vmem:[%s14649_s4 + $0xe8] sm:$0xff]   ;;  %v2324_v28 = vmul.f32 0.4, %v11347_v33  ;;  %v8461_v33 = vld [vmem:[%s14649_s4 + $0xf0] sm:$0xff]  }
 0x3d5   : > { %v11506_v35 = vpop.eup %8773  ;;  %v2819_v13 = vadd.f32 %v11501_v55, %v11499_v32  ;;  %8785 = vpow2.f32 %v2791_v1  ;;  %v2376_v27 = vadd.f32 %v11524_v9, %v2354_v5  ;;  %v2355_v10 = vadd.f32 %v2339_v43, %v2323_v45  ;;  %v8460_v5 = vld [vmem:[%s14649_s4 + $0xa8] sm:$0xff]  }
 0x3d6   : > { %v11516_v22 = vpop.eup %8775  ;;  %8787 = vpow2.f32 %v2793_v37  ;;  %v7823_v37 = vpop.f32.mrb[4].mxu1 }
 0x3d7   : > { %2820 = vadd.xlane.f32.xlu0 %v2819_v13  ;;  %v2822_v53 = vadd.f32 %v11516_v22, %v11506_v35  ;;  %v11529_v12 = vpop.eup %8777  ;;  %v7824_v51 = vpop.f32.mrb[5].mxu1  ;;  %7872 = vmatpush3.bf16.msra.mxu0 %v8456_v57  ;;  %v2377_v39 = vadd.f32 %v11524_v9, %v2355_v10  ;;  %2393 = vst.msk [vmem:[%s11550_s27] sm:$0xff] %vm2392_vm2, %v2376_v27  ;;  %v2325_v27 = vmul.f32 0.4, %v11355_v38 }
 0x3d8   : > { %v11532_v11 = vpop.eup %8779  ;;  %v7825_v60 = vadd.f32 %v7824_v51, %v7823_v37  ;;  %v7826_v13 = vpop.f32.mrb[6].mxu1  ;;  %7873 = vmatprep.subr.bf16.mxu0 %v8457_v29  ;;  %v8462_v29 = vld [vmem:[%s14649_s4 + $0xb0] sm:$0xff]  }
 0x3d9   : > { %2823 = vadd.xlane.f32.xlu1 %v2822_v53  ;;  %v2828_v1 = vadd.f32 %v11532_v11, %v11529_v12  ;;  %v7827_v20 = vpop.f32.mrb[7].mxu1  ;;  %2394 = vst.msk [vmem:[%s11550_s27 + $0x8] sm:$0xff] %vm2392_vm2, %v2377_v39 }
 0x3da   : > { %v2340_v57 = vmul.f32 0.6, %v7825_v60  ;;  %v7828_v45 = vadd.f32 %v7827_v20, %v7826_v13  ;;  %v7829_v13 = vpop.f32.mrb[8].mxu1 }
 0x3db   : > { %v11537_v23 = vpop.eup %8781  ;;  %7874 = vmatpush3.bf16.msra.mxu0 %v8458_v7  ;;  %v7830_v38 = vpop.f32.mrb[9].mxu1 }
 0x3dc   : > { %v11554_v26 = vpop.eup %8783  ;;  %v2356_v10 = vadd.f32 %v2340_v57, %v2324_v28  ;;  %7875 = vmatprep.subr.bf16.mxu0 %v8459_v42  ;;  %v7831_v42 = vadd.f32 %v7830_v38, %v7829_v13  ;;  %v7832_v20 = vpop.f32.mrb[10].mxu1  ;;  %v8463_v28 = vld [vmem:[%s14649_s4 + $0xf8] sm:$0xff]   ;;  %v2326_v57 = vmul.f32 0.4, %v11377_v63 }
 0x3dd   : > { %2829 = vadd.xlane.f32.xlu1 %v2828_v1  ;;  %v2834_v53 = vadd.f32 %v11554_v26, %v11537_v23  ;;  %v2341_v1 = vmul.f32 0.6, %v7828_v45 }
 0x3de   : > { %v2378_v51 = vadd.f32 %v11524_v9, %v2356_v10  ;;  %v2342_v45 = vmul.f32 0.6, %v7831_v42  ;;  %v2327_v10 = vmul.f32 0.4, %v11389_v19  ;;  %v2328_v19 = vmul.f32 0.4, %v11393_v14 }
 0x3df   : > { %v11564_v43 = vpop.eup %8785  ;;  %v2357_v39 = vadd.f32 %v2341_v1, %v2325_v27  ;;  %7876 = vmatpush3.bf16.msra.mxu0 %v8460_v5  ;;  %v8464_v27 = vld [vmem:[%s14649_s4 + $0xb8] sm:$0xff]  }
 0x3e0   : > { %v11570_v37 = vpop.eup %8787  ;;  %7877 = vmatprep.subr.bf16.mxu0 %v8461_v33  ;;  %2395 = vst.msk [vmem:[%s11550_s27 + $0x10] sm:$0xff] %vm2392_vm2, %v2378_v51  ;;  %v2358_v1 = vadd.f32 %v2342_v45, %v2326_v57 }
 0x3e1   : > { %2835 = vadd.xlane.f32.xlu1 %v2834_v53  ;;  %v2840_v60 = vadd.f32 %v11570_v37, %v11564_v43  ;;  %v2379_v7 = vadd.f32 %v11524_v9, %v2357_v39  ;;  %v7833_v53 = vpop.f32.mrb[11].mxu1 }
 0x3e2   : > { %v7834_v5 = vadd.f32 %v7833_v53, %v7832_v20  ;;  %v2380_v51 = vadd.f32 %v11524_v9, %v2358_v1  ;;  %v7835_v63 = vpop.f32.mrb[12].mxu1 }
 0x3e3   : > { %2396 = vst.msk [vmem:[%s11550_s27 + $0x18] sm:$0xff] %vm2392_vm2, %v2379_v7  ;;  %7878 = vmatpush3.bf16.msra.mxu0 %v8462_v29 }
 0x3e4   : > { %v2343_v33 = vmul.f32 0.6, %v7834_v5  ;;  %7879 = vmatprep.subr.bf16.mxu0 %v8463_v28  ;;  %2397 = vst.msk [vmem:[%s11550_s27 + $0x20] sm:$0xff] %vm2392_vm2, %v2380_v51  ;;  %v2329_v28 = vmul.f32 0.4, %v11395_v41 }
 0x3e5   : > { %2841 = vadd.xlane.f32.xlu1 %v2840_v60  ;;  %v7836_v60 = vpop.f32.mrb[13].mxu1 }
 0x3e6   : > { %v2359_v39 = vadd.f32 %v2343_v33, %v2327_v10  ;;  %v7837_v38 = vadd.f32 %v7836_v60, %v7835_v63  ;;  %v7838_v29 = vpop.f32.mrb[14].mxu1  ;;  %v9330_v63 = vld [vmem:[%s10097_s22 + $0x8] sm:$0xff] }
 0x3e7   : > { %7880 = vmatpush3.bf16.msra.mxu0 %v8464_v27  ;;  %v7839_v7 = vpop.f32.mrb[15].mxu1 }
 0x3e8   : > { %v2381_v13 = vadd.f32 %v11524_v9, %v2359_v39  ;;  %v2344_v42 = vmul.f32 0.6, %v7837_v38  ;;  %v7840_v20 = vadd.f32 %v7839_v7, %v7838_v29  ;;  %v7841_v27 = vpop.f32.mrb[16].mxu1  ;;  %v2330_v39 = vmul.f32 0.4, %v11397_v17 }
 0x3e9   : > { %v7842_v10 = vpop.f32.mrb[17].mxu1 }
 0x3ea   : > { %2398 = vst.msk [vmem:[%s11550_s27 + $0x28] sm:$0xff] %vm2392_vm2, %v2381_v13  ;;  %v2360_v53 = vadd.f32 %v2344_v42, %v2328_v19  ;;  %v2345_v57 = vmul.f32 0.6, %v7840_v20  ;;  %v7843_v33 = vadd.f32 %v7842_v10, %v7841_v27  ;;  %v7844_v14 = vpop.f32.mrb[18].mxu1  ;;  %v9331_v19 = vld [vmem:[%s10097_s22 + $0x10] sm:$0xff] }
 0x3eb   : > { %v7845_v51 = vpop.f32.mrb[19].mxu1  ;;  %v2331_v13 = vmul.f32 0.4, %v11399_v48 }
 0x3ec   : > { %v2382_v45 = vadd.f32 %v11524_v9, %v2360_v53  ;;  %v2361_v5 = vadd.f32 %v2345_v57, %v2329_v28  ;;  %v2346_v41 = vmul.f32 0.6, %v7843_v33  ;;  %v7846_v60 = vadd.f32 %v7845_v51, %v7844_v14  ;;  %v7847_v28 = vpop.f32.mrb[20].mxu1  ;;  %v9332_v14 = vld [vmem:[%s10097_s22 + $0x20] sm:$0xff] }
 0x3ed   : > { %v7848_v57 = vpop.f32.mrb[21].mxu1  ;;  %v2332_v33 = vmul.f32 0.4, %v11401_v58 }
 0x3ee   : > { %v2383_v1 = vadd.f32 %v11524_v9, %v2361_v5  ;;  %2399 = vst.msk [vmem:[%s11550_s27 + $0x30] sm:$0xff] %vm2392_vm2, %v2382_v45  ;;  %v2362_v38 = vadd.f32 %v2346_v41, %v2330_v39  ;;  %v2347_v29 = vmul.f32 0.6, %v7846_v60  ;;  %v7849_v5 = vadd.f32 %v7848_v57, %v7847_v28  ;;  %v7850_v48 = vpop.f32.mrb[22].mxu1 }
 0x3ef   : > { %v2333_v41 = vmul.f32 0.4, %v11403_v31 }
 0x3f0   : > { %2400 = vst.msk [vmem:[%s11550_s27 + $0x38] sm:$0xff] %vm2392_vm2, %v2383_v1  ;;  %v2384_v7 = vadd.f32 %v11524_v9, %v2362_v38  ;;  %v2363_v42 = vadd.f32 %v2347_v29, %v2331_v13  ;;  %v7851_v1 = vpop.f32.mrb[23].mxu1 }
 0x3f1   : > { %v7852_v39 = vadd.f32 %v7851_v1, %v7850_v48  ;;  %v2334_v48 = vmul.f32 0.4, %v11405_v40 }
 0x3f2   : > { %v2385_v45 = vadd.f32 %v11524_v9, %v2363_v42  ;;  %2401 = vst.msk [vmem:[%s11550_s27 + $0x40] sm:$0xff] %vm2392_vm2, %v2384_v7  ;;  %v9333_v7 = vld [vmem:[%s10097_s22 + $0x30] sm:$0xff] }
 0x3f3   : > { %v2349_v13 = vmul.f32 0.6, %v7852_v39 }
 0x3f4   : > { %2402 = vst.msk [vmem:[%s11550_s27 + $0x48] sm:$0xff] %vm2392_vm2, %v2385_v45 }
 0x3f5   : > { %v2683_v20 = vpop.xlane.xlu0 %2682 }
 0x3f6   : > { %3138 = vperm.xlu1 %8412, %v9330_v63   ;;  %v2719_v17 = vsub.f32 %v11353_v3, %v2683_v20  ;;  %v2720_v53 = vsub.f32 %v11360_v61, %v2683_v20  ;;  %v2348_v3 = vmul.f32 0.6, %v7849_v5 }
 0x3f8   : > { %v2771_v27 = vmul.f32 1.442695, %v2719_v17  ;;  %v2773_v10 = vmul.f32 1.442695, %v2720_v53  ;;  %v2364_v60 = vadd.f32 %v2348_v3, %v2332_v33  ;;  %v9335_v3 = vld [vmem:[%s10097_s22 + $0x50] sm:$0xff] }
 0x3fa   : > { %3142 = vperm.xlu1 %8412, %v9331_v19   ;;  %v2689_v51 = vpop.xlane.xlu0 %2688  ;;  %8789 = vpow2.f32 %v2771_v27  ;;  %v2386_v29 = vadd.f32 %v11524_v9, %v2364_v60  ;;  %v2365_v19 = vadd.f32 %v2349_v13, %v2333_v41  ;;  %v9334_v27 = vld [vmem:[%s10097_s22 + $0x40] sm:$0xff] }
 0x3fb   : > { %v2723_v61 = vsub.f32 %v11371_v59, %v2689_v51  ;;  %v2724_v63 = vsub.f32 %v11375_v62, %v2689_v51  ;;  %8791 = vpow2.f32 %v2773_v10  ;;  %v9336_v60 = vld [vmem:[%s10097_s22 + $0x60] sm:$0xff] }
 0x3fc   : > { %v2387_v28 = vadd.f32 %v11524_v9, %v2365_v19  ;;  %2403 = vst.msk [vmem:[%s11550_s27 + $0x50] sm:$0xff] %vm2392_vm2, %v2386_v29  ;;  %v9337_v29 = vld [vmem:[%s10097_s22 + $0x70] sm:$0xff]  ;;  %v9338_v19 = vld [vmem:[%s10097_s22] sm:$0xff] }
 0x3fd   : > { %v2779_v38 = vmul.f32 1.442695, %v2723_v61  ;;  %v2781_v58 = vmul.f32 1.442695, %v2724_v63 }
 0x3fe   : > { %3150 = vperm.xlu1 %8412, %v9332_v14   ;;  %v2695_v42 = vpop.xlane.xlu0 %2694  ;;  %2404 = vst.msk [vmem:[%s11550_s27 + $0x58] sm:$0xff] %vm2392_vm2, %v2387_v28  ;;  %v9344_v28 = vld [vmem:[%s10097_s22 + $0x68] sm:$0xff] }
 0x3ff   : > { %8793 = vpow2.f32 %v2779_v38  ;;  %v2727_v59 = vsub.f32 %v11383_v50, %v2695_v42  ;;  %v2728_v62 = vsub.f32 %v11387_v56, %v2695_v42  ;;  %v2335_v56 = vmul.f32 0.4, %v11407_v44  ;;  %v9339_v42 = vld [vmem:[%s10097_s22 + $0x18] sm:$0xff] }
 0x400   : > { %v7853_v20 = vpop.f32.mrb[24].mxu1  ;;  %8795 = vpow2.f32 %v2781_v58 }
 0x401   : > { %v7854_v31 = vpop.f32.mrb[25].mxu1  ;;  %v2787_v57 = vmul.f32 1.442695, %v2727_v59  ;;  %v2789_v45 = vmul.f32 1.442695, %v2728_v62  ;;  %v9341_v59 = vld [vmem:[%s10097_s22 + $0x38] sm:$0xff] }
 0x402   : > { %3158 = vperm.xlu1 %8412, %v9333_v7   ;;  %v7855_v17 = vadd.f32 %v7854_v31, %v7853_v20  ;;  %v7856_v53 = vpop.f32.mrb[26].mxu1  ;;  %v9340_v20 = vld [vmem:[%s10097_s22 + $0x28] sm:$0xff]  ;;  %v9343_v31 = vld [vmem:[%s10097_s22 + $0x58] sm:$0xff] }
 0x403   : > { %v7857_v5 = vpop.f32.mrb[27].mxu1  ;;  %8797 = vpow2.f32 %v2787_v57  ;;  %v9342_v62 = vld [vmem:[%s10097_s22 + $0x48] sm:$0xff] }
 0x404   : > { %v2350_v50 = vmul.f32 0.6, %v7855_v17  ;;  %v7858_v10 = vadd.f32 %v7857_v5, %v7856_v53  ;;  %8799 = vpow2.f32 %v2789_v45  ;;  %v11634_v14 = vpop.eup %8789 }
 0x405   : > { %v11636_v51 = vpop.eup %8791 }
 0x406   : > { %3166 = vperm.xlu1 %8412, %v9334_v27   ;;  %v2366_v1 = vadd.f32 %v2350_v50, %v2334_v48  ;;  %v2351_v33 = vmul.f32 0.6, %v7858_v10  ;;  %v2825_v61 = vadd.f32 %v11636_v51, %v11634_v14  ;;  %v2336_v48 = vmul.f32 0.4, %v11409_v21  ;;  %v9345_v50 = vld [vmem:[%s10097_s22 + $0x78] sm:$0xff] }
 0x408   : > { %v2388_v40 = vadd.f32 %v11524_v9, %v2366_v1  ;;  %v2367_v39 = vadd.f32 %v2351_v33, %v2335_v56  ;;  %2826 = vadd.xlane.f32.xlu0 %v2825_v61  ;;  %v2337_v56 = vmul.f32 0.4, %v11411_v30 }
 0x409   : > { %v11645_v63 = vpop.eup %8793 }
 0x40a   : > { %3174 = vperm.xlu1 %8412, %v9335_v3   ;;  %v2389_v44 = vadd.f32 %v11524_v9, %v2367_v39  ;;  %2405 = vst.msk [vmem:[%s11550_s27 + $0x60] sm:$0xff] %vm2392_vm2, %v2388_v40  ;;  %v11647_v41 = vpop.eup %8795 }
 0x40b   : > { %v2831_v13 = vadd.f32 %v11647_v41, %v11645_v63 }
 0x40c   : > { %2406 = vst.msk [vmem:[%s11550_s27 + $0x68] sm:$0xff] %vm2392_vm2, %v2389_v44 }
 0x40d   : > { %v11654_v38 = vpop.eup %8797  ;;  %2832 = vadd.xlane.f32.xlu0 %v2831_v13 }
 0x40e   : > { %3182 = vperm.xlu1 %8412, %v9336_v60   ;;  %v11656_v58 = vpop.eup %8799 }
 0x40f   : > { %v2837_v7 = vadd.f32 %v11656_v58, %v11654_v38 }
 0x411   : > { %2838 = vadd.xlane.f32.xlu0 %v2837_v7 }
 0x412   : > { %3190 = vperm.xlu1 %8412, %v9337_v29  }
 0x427   : > { %3134 = vperm.xlu0 %8411, %v9338_v19  }
 0x42b   : > { %3146 = vperm.xlu0 %8411, %v9339_v42  }
 0x42f   : > { %3154 = vperm.xlu0 %8411, %v9340_v20  }
 0x433   : > { %3162 = vperm.xlu0 %8411, %v9341_v59  }
 0x437   : > { %3170 = vperm.xlu0 %8411, %v9342_v62  }
 0x43b   : > { %3178 = vperm.xlu0 %8411, %v9343_v31  }
 0x43e   : > { %v7859_v17 = vpop.f32.mrb[28].mxu1 }
 0x43f   : > { %3186 = vperm.xlu0 %8411, %v9344_v28   ;;  %v7860_v53 = vpop.f32.mrb[29].mxu1 }
 0x440   : > { %v7861_v57 = vadd.f32 %v7860_v53, %v7859_v17  ;;  %v7862_v45 = vpop.f32.mrb[30].mxu1 }
 0x441   : > { %v7863_v5 = vpop.f32.mrb[31].mxu1 }
 0x442   : > { %v2352_v27 = vmul.f32 0.6, %v7861_v57  ;;  %v7864_v10 = vadd.f32 %v7863_v5, %v7862_v45 }
 0x443   : > { %3194 = vperm.xlu0 %8411, %v9345_v50  }
 0x444   : > { %v2368_v1 = vadd.f32 %v2352_v27, %v2336_v48  ;;  %v2353_v33 = vmul.f32 0.6, %v7864_v10  ;;  %v2800_v39 = vpop.xlane.xlu1 %2799 }
 0x445   : > { %8801 = vrcp.f32 %v2800_v39  ;;  %v9346_v39 = vld [vmem:[%s14650_s5] sm:$0xff] }
 0x446   : > { %v2390_v40 = vadd.f32 %v11524_v9, %v2368_v1  ;;  %v2369_v3 = vadd.f32 %v2353_v33, %v2337_v56 }
 0x448   : > { %v2391_v61 = vadd.f32 %v11524_v9, %v2369_v3  ;;  %2407 = vst.msk [vmem:[%s11550_s27 + $0x70] sm:$0xff] %vm2392_vm2, %v2390_v40 }
 0x44a   : > { %2408 = vst.msk [vmem:[%s11550_s27 + $0x78] sm:$0xff] %vm2392_vm2, %v2391_v61  ;;  %v3200_v61 = vrot.slane %v9346_v39, %v11081_v15 }
 0x44c   : > { %v2797_v21 = vpop.xlane.xlu0 %2796 }
 0x44d   : > { %8803 = vrcp.f32 %v2797_v21  ;;  %v15576_v21 = vld [vmem:[#allocation6_spill] sm:$0xff] }
 0x44f   : > { %v8802_v13 = vpop.eup %8801 }
 0x450   : > { %v2803_v44 = vpop.xlane.xlu0 %2802  ;;  %v2861_v19 = vmul.f32 %v8802_v13, %v11423_v52  ;;  %v2862_v20 = vmul.f32 %v8802_v13, %v11425_v18 }
 0x451   : > { %8805 = vrcp.f32 %v2803_v44  ;;  %v15577_v44 = vsub.s32 5, %v15576_v21 }
 0x454   : > { %v2806_v60 = vpop.xlane.xlu1 %2805  ;;  %v2809_v30 = vpop.xlane.xlu0 %2808 }
 0x455   : > { %8807 = vrcp.f32 %v2806_v60  ;;  %v3204_v60 = vrot.slane %v9346_v39, %v15577_v44 }
 0x456   : > { %8809 = vrcp.f32 %v2809_v30 }
 0x457   : > { %v8804_v7 = vpop.eup %8803 }
 0x458   : > { %v2812_v29 = vpop.xlane.xlu1 %2811  ;;  %v2859_v9 = vmul.f32 %v8804_v7, %v11433_v25  ;;  %v2860_v42 = vmul.f32 %v8804_v7, %v11441_v0 }
 0x459   : > { %8811 = vrcp.f32 %v2812_v29 }
 0x45a   : > { %v2892_v62 = vpack.c.bf16 %v2862_v20, %v2860_v42  ;;  %v2891_v31 = vpack.c.bf16 %v2861_v19, %v2859_v9 }
 0x45b   : > { %v2815_v59 = vpop.xlane.xlu0 %2814  ;;  %v8806_v28 = vpop.eup %8805 }
 0x45c   : > { %3068 = vmatprep.mubr.bf16.mxu0 %v2892_v62  ;;  %v2864_v17 = vmul.f32 %v8806_v28, %v11447_v36  ;;  %8813 = vrcp.f32 %v2815_v59  ;;  %v2863_v25 = vmul.f32 %v8806_v28, %v11443_v49 }
 0x45d   : > { %3069 = vmatmul.mubr.bf16.vlgmr.msra.gmra.mrb[32].mxu0 %v2891_v31 }
 0x45f   : > { %v8808_v53 = vpop.eup %8807  ;;  %v2818_v57 = vpop.xlane.xlu1 %2817 }
 0x460   : > { %8815 = vrcp.f32 %v2818_v57  ;;  %v2866_v52 = vmul.f32 %v8808_v53, %v11461_v34  ;;  %v8810_v45 = vpop.eup %8809  ;;  %v2865_v0 = vmul.f32 %v8808_v53, %v11451_v6 }
 0x461   : > { %v2868_v48 = vmul.f32 %v8810_v45, %v11455_v46  ;;  %v2867_v6 = vmul.f32 %v8810_v45, %v11453_v2 }
 0x462   : > { %v2894_v5 = vpack.c.bf16 %v2866_v52, %v2864_v17  ;;  %v2893_v10 = vpack.c.bf16 %v2865_v0, %v2863_v25  ;;  %v15578_v52 = vld [vmem:[#allocation57_spill] sm:$0xff]  ;;  %v15580_v25 = vld [vmem:[#allocation56_spill] sm:$0xff] }
 0x463   : > { %v8812_v27 = vpop.eup %8811  ;;  %vm15579_vm8 = vnez %v15578_v52  ;;  %vm15581_vm13 = vnez %v15580_v25 }
 0x464   : > { %v2821_v18 = vpop.xlane.xlu0 %2820  ;;  %3076 = vmatprep.mubr.bf16.mxu0 %v2894_v5  ;;  %v2870_v50 = vmul.f32 %v8812_v27, %v11469_v54  ;;  %v2869_v1 = vmul.f32 %v8812_v27, %v11467_v4 }
 0x465   : > { %8817 = vrcp.f32 %v2821_v18  ;;  %3077 = vmatmul.mubr.bf16.gmra.mrb[36].mxu0 %v2893_v10 }
 0x466   : > { %v2824_v36 = vpop.xlane.xlu1 %2823  ;;  %v2896_v56 = vpack.c.bf16 %v2870_v50, %v2868_v48  ;;  %v8814_v49 = vpop.eup %8813  ;;  %v2895_v54 = vpack.c.bf16 %v2869_v1, %v2867_v6  ;;  %v15584_v6 = vld [vmem:[#allocation61_spill] sm:$0xff] }
 0x467   : > { %8819 = vrcp.f32 %v2824_v36  ;;  %v2872_v3 = vmul.f32 %v8814_v49, %v11485_v24  ;;  %v11707_v24 = vrot.slane %v3204_v60, %v11081_v15  ;;  %v2871_v9 = vmul.f32 %v8814_v49, %v11483_v47 }
 0x468   : > { %3084 = vmatprep.mubr.bf16.mxu0 %v2896_v56  ;;  %v15582_v56 = vld [vmem:[#allocation62_spill] sm:$0xff] }
 0x46a   : > { %v11687_v34 = vpop.xlane.xlu1 %2829  ;;  %v8816_v33 = vpop.eup %8815 }
 0x46b   : > { %v2874_v46 = vmul.f32 %v8816_v33, %v11493_v16  ;;  %v11704_v16 = vrot.slane %v3200_v61, %v11081_v15  ;;  %v2873_v29 = vmul.f32 %v8816_v33, %v11491_v8  ;;  %8821 = vrcp.f32 %v11687_v34 }
 0x46d   : > { %v2898_v30 = vpack.c.bf16 %v2874_v46, %v2872_v3  ;;  %3085 = vmatmul.mubr.bf16.gmra.mrb[40].mxu0 %v2895_v54  ;;  %v2897_v62 = vpack.c.bf16 %v2873_v29, %v2871_v9 }
 0x46e   : > { %v11692_v40 = vpop.xlane.xlu1 %2835 }
 0x46f   : > { %v8818_v2 = vpop.eup %8817  ;;  %3092 = vmatprep.mubr.bf16.mxu0 %v2898_v30 }
 0x470   : > { %v2876_v7 = vmul.f32 %v8818_v2, %v11501_v55  ;;  %v2875_v8 = vmul.f32 %v8818_v2, %v11499_v32  ;;  %v15586_v2 = vld [vmem:[#allocation68_spill] sm:$0xff] }
 0x471   : > { %v8820_v4 = vpop.eup %8819 }
 0x472   : > { %v11701_v13 = vpop.xlane.xlu1 %2841  ;;  %v2878_v19 = vmul.f32 %v8820_v4, %v11516_v22  ;;  %v2877_v55 = vmul.f32 %v8820_v4, %v11506_v35  ;;  %v15588_v4 = vld [vmem:[#allocation67_spill] sm:$0xff] }
 0x474   : > { %v2900_v31 = vpack.c.bf16 %v2878_v19, %v2876_v7  ;;  %v2899_v48 = vpack.c.bf16 %v2877_v55, %v2875_v8 }
 0x475   : > { %3093 = vmatmul.mubr.bf16.gmra.mrb[44].mxu0 %v2897_v62 }
 0x476   : > { %v3139_v42 = vpop.permute.xlu1 %3138  ;;  %3100 = vmatprep.mubr.bf16.mxu0 %v2900_v31 }
 0x477   : > { %v3217_v20 = vadd.f32 %v11704_v16, %v3139_v42  ;;  %v3218_v59 = vadd.f32 %v11707_v24, %v3139_v42 }
 0x479   : > { %vm3249_vm3 = vcmp.gt.f32.partialorder %v3217_v20, 0.0  ;;  %vm3250_vm2 = vcmp.gt.f32.partialorder %v3218_v59, 0.0  ;;  %v3281_v28 = vmul.f32 0.2, %v3217_v20  ;;  %v3282_v15 = vmul.f32 0.2, %v3218_v59 }
 0x47a   : > { %v3143_v17 = vpop.permute.xlu1 %3142 }
 0x47b   : > { %v3219_v47 = vadd.f32 %v11704_v16, %v3143_v17  ;;  %v3220_v22 = vadd.f32 %v11707_v24, %v3143_v17  ;;  %v3313_v53 = vsel %vm3249_vm3, %v3217_v20, %v3281_v28  ;;  %v3314_v57 = vsel %vm3250_vm2, %v3218_v59, %v3282_v15  ;;  %v15590_v28 = vld [vmem:[#allocation79_spill] sm:$0xff]  ;;  %v15592_v17 = vld [vmem:[#allocation78_spill] sm:$0xff] }
 0x47c   : > { %v11721_v45 = vsel %vm15579_vm8, %v3313_v53, -1e+30  ;;  %v11725_v0 = vsel %vm15581_vm13, %v3314_v57, -1e+30  ;;  %vm15583_vm3 = vnez %v15582_v56  ;;  %vm15585_vm2 = vnez %v15584_v6  ;;  %v9378_v6 = vld [vmem:[%s9670_s23 + $0x78] sm:$0xff] }
 0x47d   : > { %vm3251_vm7 = vcmp.gt.f32.partialorder %v3219_v47, 0.0  ;;  %vm3252_vm11 = vcmp.gt.f32.partialorder %v3220_v22, 0.0  ;;  %v3283_v18 = vmul.f32 0.2, %v3219_v47  ;;  %v3284_v32 = vmul.f32 0.2, %v3220_v22  ;;  %3101 = vmatmul.mubr.bf16.gmra.mrb[48].mxu0 %v2899_v48 }
 0x47e   : > { %v3151_v5 = vpop.permute.xlu1 %3150  ;;  %v3378_v35 = vmax.f32 %v11721_v45, %v11725_v0 }
 0x47f   : > { %v3223_v27 = vadd.f32 %v11704_v16, %v3151_v5  ;;  %v3224_v36 = vadd.f32 %v11707_v24, %v3151_v5  ;;  %v3315_v50 = vsel %vm3251_vm7, %v3219_v47, %v3283_v18  ;;  %v3316_v10 = vsel %vm3252_vm11, %v3220_v22, %v3284_v32 }
 0x480   : > { %3379 = vmax.xlane.f32.xlu0 %v3378_v35  ;;  %v11733_v49 = vsel %vm15583_vm3, %v3315_v50, -1e+30  ;;  %v11737_v1 = vsel %vm15585_vm2, %v3316_v10, -1e+30  ;;  %vm15587_vm11 = vnez %v15586_v2  ;;  %vm15589_vm7 = vnez %v15588_v4  ;;  %v15594_v35 = vld [vmem:[#allocation89_spill] sm:$0xff] }
 0x481   : > { %vm3255_vm5 = vcmp.gt.f32.partialorder %v3223_v27, 0.0  ;;  %vm3256_vm1 = vcmp.gt.f32.partialorder %v3224_v36, 0.0  ;;  %v3287_v33 = vmul.f32 0.2, %v3223_v27  ;;  %v3288_v46 = vmul.f32 0.2, %v3224_v36 }
 0x482   : > { %v3159_v3 = vpop.permute.xlu1 %3158  ;;  %v3381_v54 = vmax.f32 %v11733_v49, %v11737_v1 }
 0x483   : > { %v3227_v39 = vadd.f32 %v11704_v16, %v3159_v3  ;;  %v3228_v61 = vadd.f32 %v11707_v24, %v3159_v3  ;;  %v3319_v44 = vsel %vm3255_vm5, %v3223_v27, %v3287_v33  ;;  %v3320_v60 = vsel %vm3256_vm1, %v3224_v36, %v3288_v46  ;;  %v15596_v27 = vld [vmem:[#allocation88_spill] sm:$0xff] }
 0x484   : > { %3382 = vmax.xlane.f32.xlu0 %v3381_v54  ;;  %v11745_v30 = vsel %vm15587_vm11, %v3319_v44, -1e+30  ;;  %v11749_v29 = vsel %vm15589_vm7, %v3320_v60, -1e+30  ;;  %vm15591_vm1 = vnez %v15590_v28  ;;  %vm15593_vm5 = vnez %v15592_v17  ;;  %v15598_v44 = vld [vmem:[#allocation91_spill] sm:$0xff] }
 0x485   : > { %vm3259_vm2 = vcmp.gt.f32.partialorder %v3227_v39, 0.0  ;;  %vm3260_vm3 = vcmp.gt.f32.partialorder %v3228_v61, 0.0  ;;  %v3291_v7 = vmul.f32 0.2, %v3227_v39  ;;  %v3292_v19 = vmul.f32 0.2, %v3228_v61 }
 0x486   : > { %v3167_v9 = vpop.permute.xlu1 %3166  ;;  %v3387_v42 = vmax.f32 %v11745_v30, %v11749_v29 }
 0x487   : > { %v3231_v20 = vadd.f32 %v11704_v16, %v3167_v9  ;;  %v3232_v59 = vadd.f32 %v11707_v24, %v3167_v9  ;;  %v3323_v62 = vsel %vm3259_vm2, %v3227_v39, %v3291_v7  ;;  %v3324_v31 = vsel %vm3260_vm3, %v3228_v61, %v3292_v19  ;;  %v15600_v7 = vld [vmem:[#allocation90_spill] sm:$0xff] }
 0x488   : > { %3388 = vmax.xlane.f32.xlu0 %v3387_v42  ;;  %v11757_v15 = vsel %vm15591_vm1, %v3323_v62, -1e+30  ;;  %v11761_v8 = vsel %vm15593_vm5, %v3324_v31, -1e+30  ;;  %vm15595_vm3 = vnez %v15594_v35  ;;  %vm15597_vm2 = vnez %v15596_v27 }
 0x489   : > { %vm3263_vm7 = vcmp.gt.f32.partialorder %v3231_v20, 0.0  ;;  %vm3264_vm11 = vcmp.gt.f32.partialorder %v3232_v59, 0.0  ;;  %v3295_v55 = vmul.f32 0.2, %v3231_v20  ;;  %v3296_v47 = vmul.f32 0.2, %v3232_v59 }
 0x48a   : > { %v3175_v22 = vpop.permute.xlu1 %3174  ;;  %v3393_v53 = vmax.f32 %v11757_v15, %v11761_v8 }
 0x48b   : > { %v3235_v57 = vadd.f32 %v11704_v16, %v3175_v22  ;;  %v3236_v18 = vadd.f32 %v11707_v24, %v3175_v22  ;;  %v3327_v32 = vsel %vm3263_vm7, %v3231_v20, %v3295_v55  ;;  %v3328_v5 = vsel %vm3264_vm11, %v3232_v59, %v3296_v47 }
 0x48c   : > { %3394 = vmax.xlane.f32.xlu0 %v3393_v53  ;;  %v11769_v48 = vsel %vm15595_vm3, %v3327_v32, -1e+30  ;;  %v11773_v36 = vsel %vm15597_vm2, %v3328_v5, -1e+30  ;;  %vm15599_vm11 = vnez %v15598_v44  ;;  %vm15601_vm7 = vnez %v15600_v7 }
 0x48d   : > { %vm3267_vm5 = vcmp.gt.f32.partialorder %v3235_v57, 0.0  ;;  %vm3268_vm1 = vcmp.gt.f32.partialorder %v3236_v18, 0.0  ;;  %v3299_v50 = vmul.f32 0.2, %v3235_v57  ;;  %v3300_v10 = vmul.f32 0.2, %v3236_v18 }
 0x48e   : > { %v3183_v33 = vpop.permute.xlu1 %3182  ;;  %v3399_v46 = vmax.f32 %v11769_v48, %v11773_v36 }
 0x48f   : > { %v3239_v3 = vadd.f32 %v11704_v16, %v3183_v33  ;;  %v3240_v54 = vadd.f32 %v11707_v24, %v3183_v33  ;;  %v3331_v39 = vsel %vm3267_vm5, %v3235_v57, %v3299_v50  ;;  %v3332_v61 = vsel %vm3268_vm1, %v3236_v18, %v3300_v10 }
 0x490   : > { %3400 = vmax.xlane.f32.xlu0 %v3399_v46  ;;  %v11781_v60 = vsel %vm15599_vm11, %v3331_v39, -1e+30  ;;  %v11785_v19 = vsel %vm15601_vm7, %v3332_v61, -1e+30 }
 0x491   : > { %vm3271_vm2 = vcmp.gt.f32.partialorder %v3239_v3, 0.0  ;;  %vm3272_vm3 = vcmp.gt.f32.partialorder %v3240_v54, 0.0  ;;  %v3303_v9 = vmul.f32 0.2, %v3239_v3  ;;  %v3304_v42 = vmul.f32 0.2, %v3240_v54 }
 0x492   : > { %v3191_v20 = vpop.permute.xlu1 %3190  ;;  %v3405_v59 = vmax.f32 %v11781_v60, %v11785_v19 }
 0x493   : > { %v3243_v62 = vadd.f32 %v11704_v16, %v3191_v20  ;;  %v3244_v31 = vadd.f32 %v11707_v24, %v3191_v20  ;;  %v3335_v55 = vsel %vm3271_vm2, %v3239_v3, %v3303_v9  ;;  %v3336_v47 = vsel %vm3272_vm3, %v3240_v54, %v3304_v42 }
 0x494   : > { %3406 = vmax.xlane.f32.xlu0 %v3405_v59  ;;  %v11793_v53 = vsel %vm10542_vm12, %v3335_v55, -1e+30  ;;  %v11797_v18 = vsel %vm10551_vm0, %v3336_v47, -1e+30  ;;  %v8822_v59 = vpop.eup %8821 }
 0x495   : > { %vm3275_vm1 = vcmp.gt.f32.partialorder %v3243_v62, 0.0  ;;  %vm3276_vm5 = vcmp.gt.f32.partialorder %v3244_v31, 0.0  ;;  %v3307_v32 = vmul.f32 0.2, %v3243_v62  ;;  %v3308_v5 = vmul.f32 0.2, %v3244_v31  ;;  %v2827_v9 = vpop.xlane.xlu0 %2826 }
 0x496   : > { %v3411_v50 = vmax.f32 %v11793_v53, %v11797_v18  ;;  %8823 = vrcp.f32 %v2827_v9  ;;  %v2882_v34 = vmul.f32 %v8822_v59, %v11532_v11  ;;  %v2881_v47 = vmul.f32 %v8822_v59, %v11529_v12 }
 0x497   : > { %v3339_v10 = vsel %vm3275_vm1, %v3243_v62, %v3307_v32  ;;  %v3340_v33 = vsel %vm3276_vm5, %v3244_v31, %v3308_v5  ;;  %8825 = vrcp.f32 %v11692_v40 }
 0x498   : > { %3412 = vmax.xlane.f32.xlu0 %v3411_v50  ;;  %v11803_v3 = vsel %vm10573_vm14, %v3339_v10, -1e+30  ;;  %v11807_v39 = vsel %vm10606_vm10, %v3340_v33, -1e+30 }
 0x499   : > { %v3417_v61 = vmax.f32 %v11803_v3, %v11807_v39 }
 0x49a   : > { %v2833_v42 = vpop.xlane.xlu0 %2832 }
 0x49b   : > { %8827 = vrcp.f32 %v2833_v42 }
 0x49c   : > { %3418 = vmax.xlane.f32.xlu0 %v3417_v61  ;;  %8829 = vrcp.f32 %v11701_v13 }
 0x49e   : > { %v2839_v20 = vpop.xlane.xlu0 %2838 }
 0x49f   : > { %8831 = vrcp.f32 %v2839_v20 }
 0x4a0   : > { %v8824_v62 = vpop.eup %8823 }
 0x4a1   : > { %v2880_v31 = vmul.f32 %v8824_v62, %v11636_v51  ;;  %v2879_v55 = vmul.f32 %v8824_v62, %v11634_v14  ;;  %v8826_v32 = vpop.eup %8825 }
 0x4a2   : > { %v2886_v33 = vmul.f32 %v8826_v32, %v11554_v26 }
 0x4a3   : > { %v2902_v5 = vpack.c.bf16 %v2882_v34, %v2880_v31  ;;  %v2901_v50 = vpack.c.bf16 %v2881_v47, %v2879_v55  ;;  %v15606_v47 = vld [vmem:[#allocation50_spill] sm:$0xff] }
 0x4a4   : > { %vm15607_vm1 = vnez %v15606_v47  ;;  %v9396_v47 = vld [vmem:[%s9670_s23 + $0x48] sm:$0xff] }
 0x4a5   : > { %v8828_v40 = vpop.eup %8827  ;;  %3108 = vmatprep.mubr.bf16.mxu0 %v2902_v5  ;;  %v15608_v5 = vld [vmem:[#allocation51_spill] sm:$0xff] }
 0x4a6   : > { %v3135_v10 = vpop.permute.xlu0 %3134  ;;  %v2884_v13 = vmul.f32 %v8828_v40, %v11647_v41  ;;  %3109 = vmatmul.mubr.bf16.gmra.mrb[52].mxu0 %v2901_v50  ;;  %v8830_v11 = vpop.eup %8829  ;;  %v2883_v14 = vmul.f32 %v8828_v40, %v11645_v63  ;;  %v2885_v41 = vmul.f32 %v8826_v32, %v11537_v23  ;;  %vm15609_vm5 = vnez %v15608_v5  ;;  %v9397_v5 = vld [vmem:[%s9670_s23 + $0x58] sm:$0xff] }
 0x4a7   : > { %v3215_v61 = vadd.f32 %v11704_v16, %v3135_v10  ;;  %v3216_v51 = vadd.f32 %v11707_v24, %v3135_v10  ;;  %v2890_v10 = vmul.f32 %v8830_v11, %v11570_v37 }
 0x4a8   : > { %v2904_v9 = vpack.c.bf16 %v2886_v33, %v2884_v13  ;;  %v2903_v40 = vpack.c.bf16 %v2885_v41, %v2883_v14  ;;  %v15610_v14 = vld [vmem:[#allocation60_spill] sm:$0xff] }
 0x4a9   : > { %v8832_v12 = vpop.eup %8831  ;;  %vm3247_vm3 = vcmp.gt.f32.partialorder %v3215_v61, 0.0  ;;  %vm3248_vm2 = vcmp.gt.f32.partialorder %v3216_v51, 0.0  ;;  %v3279_v42 = vmul.f32 0.2, %v3215_v61  ;;  %v3280_v20 = vmul.f32 0.2, %v3216_v51 }
 0x4aa   : > { %v3147_v59 = vpop.permute.xlu0 %3146  ;;  %3116 = vmatprep.mubr.bf16.mxu0 %v2904_v9  ;;  %v2888_v26 = vmul.f32 %v8832_v12, %v11656_v58  ;;  %v2887_v41 = vmul.f32 %v8832_v12, %v11654_v38  ;;  %v15616_v12 = vld [vmem:[#allocation69_spill] sm:$0xff] }
 0x4ab   : > { %v3221_v62 = vadd.f32 %v11704_v16, %v3147_v59  ;;  %v3222_v31 = vadd.f32 %v11707_v24, %v3147_v59  ;;  %v3311_v34 = vsel %vm3247_vm3, %v3215_v61, %v3279_v42  ;;  %v3312_v55 = vsel %vm3248_vm2, %v3216_v51, %v3280_v20  ;;  %v15612_v20 = vld [vmem:[#allocation58_spill] sm:$0xff] }
 0x4ac   : > { %v11829_v63 = vsel %vm15607_vm1, %v3311_v34, -1e+30  ;;  %v11833_v50 = vsel %vm15609_vm5, %v3312_v55, -1e+30  ;;  %v2906_v33 = vpack.c.bf16 %v2890_v10, %v2888_v26  ;;  %vm15611_vm3 = vnez %v15610_v14  ;;  %v12170_v14 = vld [vmem:[%s10097_s22] sm:$0xff] }
 0x4ad   : > { %vm3253_vm0 = vcmp.gt.f32.partialorder %v3221_v62, 0.0  ;;  %vm3254_vm12 = vcmp.gt.f32.partialorder %v3222_v31, 0.0  ;;  %v3285_v23 = vmul.f32 0.2, %v3221_v62  ;;  %v3286_v58 = vmul.f32 0.2, %v3222_v31 }
 0x4ae   : > { %v3155_v32 = vpop.permute.xlu0 %3154  ;;  %v3375_v13 = vmax.f32 %v11829_v63, %v11833_v50  ;;  %3117 = vmatmul.mubr.bf16.gmra.mrb[56].mxu0 %v2903_v40  ;;  %vm15613_vm2 = vnez %v15612_v20  ;;  %v9355_v20 = vld [vmem:[%s9670_s23 + $0x28] sm:$0xff]  ;;  %15644 = vst [vmem:[#allocation77_spill] sm:$0xff] %v12170_v14 }
 0x4af   : > { %v3225_v61 = vadd.f32 %v11704_v16, %v3155_v32  ;;  %v3226_v51 = vadd.f32 %v11707_v24, %v3155_v32  ;;  %v3317_v9 = vsel %vm3253_vm0, %v3221_v62, %v3285_v23  ;;  %v3318_v42 = vsel %vm3254_vm12, %v3222_v31, %v3286_v58  ;;  %3124 = vmatprep.mubr.bf16.mxu0 %v2906_v33  ;;  %v15614_v32 = vld [vmem:[#allocation74_spill] sm:$0xff] }
 0x4b0   : > { %3376 = vmax.xlane.f32.xlu1 %v3375_v13  ;;  %v11842_v37 = vsel %vm15611_vm3, %v3317_v9, -1e+30  ;;  %v11846_v59 = vsel %vm15613_vm2, %v3318_v42, -1e+30  ;;  %v2889_v31 = vmul.f32 %v8830_v11, %v11564_v43  ;;  %vm15615_vm12 = vnez %v15614_v32  ;;  %v9347_v32 = vld [vmem:[%s9670_s23 + $0x8] sm:$0xff] }
 0x4b1   : > { %vm3257_vm10 = vcmp.gt.f32.partialorder %v3225_v61, 0.0  ;;  %vm3258_vm14 = vcmp.gt.f32.partialorder %v3226_v51, 0.0  ;;  %v3289_v26 = vmul.f32 0.2, %v3225_v61  ;;  %v3290_v34 = vmul.f32 0.2, %v3226_v51 }
 0x4b2   : > { %v3163_v55 = vpop.permute.xlu0 %3162  ;;  %v3384_v62 = vmax.f32 %v11842_v37, %v11846_v59  ;;  %vm15617_vm0 = vnez %v15616_v12  ;;  %v2905_v33 = vpack.c.bf16 %v2889_v31, %v2887_v41  ;;  %v15620_v41 = vld [vmem:[#allocation80_spill] sm:$0xff] }
 0x4b3   : > { %v3229_v40 = vadd.f32 %v11704_v16, %v3163_v55  ;;  %v3230_v10 = vadd.f32 %v11707_v24, %v3163_v55  ;;  %v3321_v23 = vsel %vm3257_vm10, %v3225_v61, %v3289_v26  ;;  %v3322_v58 = vsel %vm3258_vm14, %v3226_v51, %v3290_v34  ;;  %v15618_v55 = vld [vmem:[#allocation81_spill] sm:$0xff] }
 0x4b4   : > { %3385 = vmax.xlane.f32.xlu1 %v3384_v62  ;;  %v11856_v38 = vsel %vm15615_vm12, %v3321_v23, -1e+30  ;;  %v11860_v13 = vsel %vm15617_vm0, %v3322_v58, -1e+30  ;;  %vm15619_vm14 = vnez %v15618_v55  ;;  %vm15621_vm10 = vnez %v15620_v41 }
 0x4b5   : > { %vm3261_vm7 = vcmp.gt.f32.partialorder %v3229_v40, 0.0  ;;  %vm3262_vm11 = vcmp.gt.f32.partialorder %v3230_v10, 0.0  ;;  %v3293_v9 = vmul.f32 0.2, %v3229_v40  ;;  %v3294_v43 = vmul.f32 0.2, %v3230_v10 }
 0x4b6   : > { %v3171_v11 = vpop.permute.xlu0 %3170  ;;  %v3390_v42 = vmax.f32 %v11856_v38, %v11860_v13  ;;  %3125 = vmatmul.mubr.bf16.gmra.mrb[60].mxu0 %v2905_v33 }
 0x4b7   : > { %v3233_v61 = vadd.f32 %v11704_v16, %v3171_v11  ;;  %v3234_v51 = vadd.f32 %v11707_v24, %v3171_v11  ;;  %v3325_v26 = vsel %vm3261_vm7, %v3229_v40, %v3293_v9  ;;  %v3326_v34 = vsel %vm3262_vm11, %v3230_v10, %v3294_v43  ;;  %v15622_v43 = vld [vmem:[#allocation87_spill] sm:$0xff] }
 0x4b8   : > { %3391 = vmax.xlane.f32.xlu1 %v3390_v42  ;;  %v11868_v62 = vsel %vm15619_vm14, %v3325_v26, -1e+30  ;;  %v11872_v31 = vsel %vm15621_vm10, %v3326_v34, -1e+30  ;;  %vm15623_vm11 = vnez %v15622_v43  ;;  %v15624_v26 = vld [vmem:[#allocation85_spill] sm:$0xff] }
 0x4b9   : > { %vm3265_vm0 = vcmp.gt.f32.partialorder %v3233_v61, 0.0  ;;  %vm3266_vm12 = vcmp.gt.f32.partialorder %v3234_v51, 0.0  ;;  %v3297_v23 = vmul.f32 0.2, %v3233_v61  ;;  %v3298_v58 = vmul.f32 0.2, %v3234_v51 }
 0x4ba   : > { %v3179_v57 = vpop.permute.xlu0 %3178  ;;  %v3396_v11 = vmax.f32 %v11868_v62, %v11872_v31  ;;  %vm15625_vm7 = vnez %v15624_v26 }
 0x4bb   : > { %v3237_v40 = vadd.f32 %v11704_v16, %v3179_v57  ;;  %v3238_v10 = vadd.f32 %v11707_v24, %v3179_v57  ;;  %v3329_v33 = vsel %vm3265_vm0, %v3233_v61, %v3297_v23  ;;  %v3330_v9 = vsel %vm3266_vm12, %v3234_v51, %v3298_v58  ;;  %v15626_v58 = vld [vmem:[#allocation92_spill] sm:$0xff] }
 0x4bc   : > { %3397 = vmax.xlane.f32.xlu1 %v3396_v11  ;;  %v11880_v42 = vsel %vm15623_vm11, %v3329_v33, -1e+30  ;;  %v11884_v34 = vsel %vm15625_vm7, %v3330_v9, -1e+30  ;;  %vm15627_vm12 = vnez %v15626_v58  ;;  %v15628_v33 = vld [vmem:[#allocation93_spill] sm:$0xff] }
 0x4bd   : > { %vm3269_vm10 = vcmp.gt.f32.partialorder %v3237_v40, 0.0  ;;  %vm3270_vm14 = vcmp.gt.f32.partialorder %v3238_v10, 0.0  ;;  %v3301_v22 = vmul.f32 0.2, %v3237_v40  ;;  %v3302_v54 = vmul.f32 0.2, %v3238_v10 }
 0x4be   : > { %v3187_v46 = vpop.permute.xlu0 %3186  ;;  %v3402_v7 = vmax.f32 %v11880_v42, %v11884_v34  ;;  %vm15629_vm0 = vnez %v15628_v33 }
 0x4bf   : > { %v3241_v57 = vadd.f32 %v11704_v16, %v3187_v46  ;;  %v3242_v61 = vadd.f32 %v11707_v24, %v3187_v46  ;;  %v3333_v51 = vsel %vm3269_vm10, %v3237_v40, %v3301_v22  ;;  %v3334_v23 = vsel %vm3270_vm14, %v3238_v10, %v3302_v54 }
 0x4c0   : > { %3403 = vmax.xlane.f32.xlu1 %v3402_v7  ;;  %v11892_v11 = vsel %vm15627_vm12, %v3333_v51, -1e+30  ;;  %v11896_v9 = vsel %vm15629_vm0, %v3334_v23, -1e+30 }
 0x4c1   : > { %vm3273_vm7 = vcmp.gt.f32.partialorder %v3241_v57, 0.0  ;;  %vm3274_vm11 = vcmp.gt.f32.partialorder %v3242_v61, 0.0  ;;  %v3305_v44 = vmul.f32 0.2, %v3241_v57  ;;  %v3306_v26 = vmul.f32 0.2, %v3242_v61 }
 0x4c2   : > { %v3195_v43 = vpop.permute.xlu0 %3194  ;;  %v3408_v27 = vmax.f32 %v11892_v11, %v11896_v9 }
 0x4c3   : > { %v3245_v22 = vadd.f32 %v11704_v16, %v3195_v43  ;;  %v3246_v7 = vadd.f32 %v11707_v24, %v3195_v43  ;;  %v3337_v46 = vsel %vm3273_vm7, %v3241_v57, %v3305_v44  ;;  %v3338_v54 = vsel %vm3274_vm11, %v3242_v61, %v3306_v26 }
 0x4c4   : > { %3409 = vmax.xlane.f32.xlu1 %v3408_v27  ;;  %v11904_v10 = vsel %vm10563_vm4, %v3337_v46, -1e+30  ;;  %v11908_v23 = vsel %vm10557_vm6, %v3338_v54, -1e+30  ;;  %v9467_v61 = vmov 2  }
 0x4c5   : > { %vm3277_vm14 = vcmp.gt.f32.partialorder %v3245_v22, 0.0  ;;  %vm3278_vm10 = vcmp.gt.f32.partialorder %v3246_v7, 0.0  ;;  %v3309_v33 = vmul.f32 0.2, %v3245_v22  ;;  %v3310_v58 = vmul.f32 0.2, %v3246_v7  ;;  %8414 = vset.pattern.permute.xlu1 %v9467_v61  ;;  %8413 = vset.pattern.permute.xlu0 %v9467_v61 }
 0x4c6   : > { %v3414_v16 = vmax.f32 %v11904_v10, %v11908_v23 }
 0x4c7   : > { %v3341_v35 = vsel %vm3277_vm14, %v3245_v22, %v3309_v33  ;;  %v3342_v24 = vsel %vm3278_vm10, %v3246_v7, %v3310_v58 }
 0x4c8   : > { %3415 = vmax.xlane.f32.xlu1 %v3414_v16  ;;  %v11914_v27 = vsel %vm10622_vm15, %v3341_v35, -1e+30  ;;  %v11918_v26 = vsel %vm10616_vm9, %v3342_v24, -1e+30 }
 0x4c9   : > { %v3420_v57 = vmax.f32 %v11914_v27, %v11918_v26 }
 0x4cc   : > { %3421 = vmax.xlane.f32.xlu1 %v3420_v57 }
 0x50d   : > { %v3380_v46 = vpop.xlane.xlu0 %3379 }
 0x50e   : > { %v3425_v33 = vsub.f32 %v11721_v45, %v3380_v46  ;;  %v3426_v58 = vsub.f32 %v11725_v0, %v3380_v46 }
 0x510   : > { %v3459_v22 = vmul.f32 1.442695, %v3425_v33  ;;  %v3461_v7 = vmul.f32 1.442695, %v3426_v58  ;;  %v8465_v33 = vld [vmem:[%s14652_s7 + $0xc0] sm:$0xff]  }
 0x511   : > { %v3383_v24 = vpop.xlane.xlu0 %3382  ;;  %v8466_v58 = vld [vmem:[%s14652_s7 + $0x80] sm:$0xff]   ;;  %7929 = vmatprep.subr.bf16.mxu1 %v8465_v33  ;;  %v8470_v33 = vld [vmem:[%s14652_s7 + $0x90] sm:$0xff]  }
 0x512   : > { %8833 = vpow2.f32 %v3459_v22  ;;  %v8467_v22 = vld [vmem:[%s14652_s7 + $0xc8] sm:$0xff]   ;;  %7930 = vmatpush3.bf16.msra.mxu1 %v8466_v58 }
 0x513   : > { %8835 = vpow2.f32 %v3461_v7  ;;  %v3427_v7 = vsub.f32 %v11733_v49, %v3383_v24  ;;  %7931 = vmatprep.subr.bf16.mxu1 %v8467_v22  ;;  %v8469_v49 = vld [vmem:[%s14652_s7 + $0xd0] sm:$0xff]  }
 0x515   : > { %v3389_v43 = vpop.xlane.xlu0 %3388  ;;  %v3463_v55 = vmul.f32 1.442695, %v3427_v7 }
 0x517   : > { %8837 = vpow2.f32 %v3463_v55 }
 0x51c   : > { %v11924_v35 = vpop.eup %8833 }
 0x51d   : > { %v11926_v54 = vpop.eup %8835 }
 0x51e   : > { %v3522_v16 = vadd.f32 %v11926_v54, %v11924_v35 }
 0x520   : > { %3523 = vadd.xlane.f32.xlu1 %v3522_v16  ;;  %v3428_v16 = vsub.f32 %v11737_v1, %v3383_v24 }
 0x522   : > { %v3465_v1 = vmul.f32 1.442695, %v3428_v16 }
 0x524   : > { %8839 = vpow2.f32 %v3465_v1  ;;  %v8471_v1 = vld [vmem:[%s14652_s7 + $0xd8] sm:$0xff]  }
 0x530   : > { %v7881_v57 = vpop.f32.mrb[32].mxu0 }
 0x531   : > { %v7882_v61 = vpop.f32.mrb[33].mxu0 }
 0x532   : > { %v11930_v44 = vadd.f32 %v7882_v61, %v7881_v57  ;;  %v7884_v45 = vpop.f32.mrb[34].mxu0  ;;  %v3395_v57 = vpop.xlane.xlu0 %3394 }
 0x533   : > { %v7885_v0 = vpop.f32.mrb[35].mxu0 }
 0x534   : > { %v11932_v46 = vadd.f32 %v7885_v0, %v7884_v45  ;;  %v8468_v45 = vld [vmem:[%s14652_s7 + $0x88] sm:$0xff]   ;;  %v3431_v0 = vsub.f32 %v11745_v30, %v3389_v43  ;;  %v3432_v30 = vsub.f32 %v11749_v29, %v3389_v43  ;;  %v3436_v29 = vsub.f32 %v11761_v8, %v3395_v57  ;;  %v8472_v8 = vld [vmem:[%s14652_s7 + $0x98] sm:$0xff]  }
 0x535   : > { %7932 = vmatpush3.bf16.msra.mxu1 %v8468_v45 }
 0x536   : > { %v3471_v58 = vmul.f32 1.442695, %v3431_v0  ;;  %7933 = vmatprep.subr.bf16.mxu1 %v8469_v49  ;;  %v11960_v22 = vpop.xlane.xlu0 %3400  ;;  %v3473_v28 = vmul.f32 1.442695, %v3432_v30 }
 0x538   : > { %v7887_v61 = vpop.f32.mrb[36].mxu0  ;;  %8841 = vpow2.f32 %v3471_v58 }
 0x539   : > { %v7888_v51 = vpop.f32.mrb[37].mxu0  ;;  %7934 = vmatpush3.bf16.msra.mxu1 %v8470_v33 }
 0x53a   : > { %v11949_v40 = vadd.f32 %v7888_v51, %v7887_v61  ;;  %v7890_v41 = vpop.f32.mrb[38].mxu0  ;;  %v11979_v33 = vpop.xlane.xlu0 %3406  ;;  %7935 = vmatprep.subr.bf16.mxu1 %v8471_v1 }
 0x53b   : > { %v7891_v17 = vpop.f32.mrb[39].mxu0 }
 0x53c   : > { %v11954_v24 = vadd.f32 %v7891_v17, %v7890_v41  ;;  %v3435_v17 = vsub.f32 %v11757_v15, %v3395_v57  ;;  %v8473_v57 = vld [vmem:[%s14652_s7 + $0xe0] sm:$0xff]  }
 0x53d   : > { %v3377_v51 = vpop.xlane.xlu1 %3376  ;;  %7936 = vmatpush3.bf16.msra.mxu1 %v8472_v8 }
 0x53e   : > { %v3423_v7 = vsub.f32 %v11829_v63, %v3377_v51  ;;  %v3424_v61 = vsub.f32 %v11833_v50, %v3377_v51  ;;  %v3481_v51 = vmul.f32 1.442695, %v3436_v29  ;;  %7937 = vmatprep.subr.bf16.mxu1 %v8473_v57  ;;  %v8476_v57 = vld [vmem:[%s14652_s7 + $0xa8] sm:$0xff]  }
 0x540   : > { %v3455_v41 = vmul.f32 1.442695, %v3423_v7  ;;  %v3457_v16 = vmul.f32 1.442695, %v3424_v61  ;;  %v7893_v45 = vpop.f32.mrb[40].mxu0  ;;  %v3439_v7 = vsub.f32 %v11769_v48, %v11960_v22  ;;  %v3440_v48 = vsub.f32 %v11773_v36, %v11960_v22 }
 0x541   : > { %v3386_v43 = vpop.xlane.xlu1 %3385  ;;  %v7894_v0 = vpop.f32.mrb[41].mxu0 }
 0x542   : > { %8843 = vpow2.f32 %v3455_v41  ;;  %v3429_v49 = vsub.f32 %v11842_v37, %v3386_v43  ;;  %v3430_v63 = vsub.f32 %v11846_v59, %v3386_v43  ;;  %v11968_v50 = vadd.f32 %v7894_v0, %v7893_v45  ;;  %v7896_v55 = vpop.f32.mrb[42].mxu0  ;;  %v11995_v43 = vpop.eup %8837 }
 0x543   : > { %8845 = vpow2.f32 %v3457_v16  ;;  %v7897_v15 = vpop.f32.mrb[43].mxu0  ;;  %v3479_v37 = vmul.f32 1.442695, %v3435_v17  ;;  %v8474_v17 = vld [vmem:[%s14652_s7 + $0xa0] sm:$0xff]   ;;  %v3443_v0 = vsub.f32 %v11781_v60, %v11979_v33 }
 0x544   : > { %v3467_v59 = vmul.f32 1.442695, %v3429_v49  ;;  %v3469_v30 = vmul.f32 1.442695, %v3430_v63  ;;  %v11981_v58 = vadd.f32 %v7897_v15, %v7896_v55  ;;  %8847 = vpow2.f32 %v3473_v28  ;;  %v8475_v28 = vld [vmem:[%s14652_s7 + $0xe8] sm:$0xff]   ;;  %v11999_v55 = vpop.eup %8839  ;;  %v12001_v15 = vpop.xlane.xlu0 %3412  ;;  %7938 = vmatpush3.bf16.msra.mxu1 %v8474_v17 }
 0x545   : > { %v3392_v61 = vpop.xlane.xlu1 %3391  ;;  %v12010_v60 = vpop.eup %8841  ;;  %7939 = vmatprep.subr.bf16.mxu1 %v8475_v28 }
 0x546   : > { %8849 = vpow2.f32 %v3467_v59  ;;  %v3433_v41 = vsub.f32 %v11856_v38, %v3392_v61  ;;  %v3434_v16 = vsub.f32 %v11860_v13, %v3392_v61  ;;  %v3487_v13 = vmul.f32 1.442695, %v3439_v7  ;;  %v8477_v59 = vld [vmem:[%s14652_s7 + $0xf0] sm:$0xff]  }
 0x547   : > { %8851 = vpow2.f32 %v3469_v30 }
 0x548   : > { %8853 = vpow2.f32 %v3479_v37  ;;  %v3475_v45 = vmul.f32 1.442695, %v3433_v41  ;;  %v3477_v29 = vmul.f32 1.442695, %v3434_v16  ;;  %v7899_v38 = vpop.f32.mrb[44].mxu0  ;;  %v3444_v41 = vsub.f32 %v11785_v19, %v11979_v33  ;;  %7940 = vmatpush3.bf16.msra.mxu1 %v8476_v57  ;;  %v3419_v19 = vpop.xlane.xlu0 %3418 }
 0x549   : > { %8855 = vpow2.f32 %v3481_v51  ;;  %v3398_v49 = vpop.xlane.xlu1 %3397  ;;  %v7900_v63 = vpop.f32.mrb[45].mxu0  ;;  %v3495_v16 = vmul.f32 1.442695, %v3443_v0  ;;  %7941 = vmatprep.subr.bf16.mxu1 %v8477_v59 }
 0x54a   : > { %8857 = vpow2.f32 %v3475_v45  ;;  %v3437_v1 = vsub.f32 %v11868_v62, %v3398_v49  ;;  %v3438_v36 = vsub.f32 %v11872_v31, %v3398_v49  ;;  %v12005_v22 = vadd.f32 %v7900_v63, %v7899_v38  ;;  %v7902_v8 = vpop.f32.mrb[46].mxu0 }
 0x54b   : > { %8859 = vpow2.f32 %v3477_v29  ;;  %v7903_v37 = vpop.f32.mrb[47].mxu0  ;;  %v3489_v31 = vmul.f32 1.442695, %v3440_v48  ;;  %v3447_v48 = vsub.f32 %v11793_v53, %v12001_v15  ;;  %v3448_v63 = vsub.f32 %v11797_v18, %v12001_v15 }
 0x54c   : > { %v12015_v62 = vpop.eup %8843  ;;  %v3483_v30 = vmul.f32 1.442695, %v3437_v1  ;;  %v3485_v51 = vmul.f32 1.442695, %v3438_v36  ;;  %v12017_v7 = vadd.f32 %v7903_v37, %v7902_v8  ;;  %8861 = vpow2.f32 %v3487_v13 }
 0x54d   : > { %v12019_v61 = vpop.eup %8845  ;;  %v3404_v17 = vpop.xlane.xlu1 %3403  ;;  %v3525_v18 = vadd.f32 %v11999_v55, %v11995_v43 }
 0x54e   : > { %8863 = vpow2.f32 %v3483_v30  ;;  %v3441_v28 = vsub.f32 %v11880_v42, %v3404_v17  ;;  %v3442_v45 = vsub.f32 %v11884_v34, %v3404_v17  ;;  %v12025_v29 = vpop.eup %8847  ;;  %v3519_v38 = vadd.f32 %v12019_v61, %v12015_v62 }
 0x54f   : > { %8865 = vpow2.f32 %v3485_v51  ;;  %v3497_v34 = vmul.f32 1.442695, %v3444_v41  ;;  %v3503_v30 = vmul.f32 1.442695, %v3447_v48  ;;  %v3452_v48 = vsub.f32 %v11807_v39, %v3419_v19 }
 0x550   : > { %v12031_v13 = vpop.eup %8849  ;;  %8867 = vpow2.f32 %v3489_v31  ;;  %v3491_v33 = vmul.f32 1.442695, %v3441_v28  ;;  %v3493_v0 = vmul.f32 1.442695, %v3442_v45  ;;  %v7905_v42 = vpop.f32.mrb[48].mxu0  ;;  %3520 = vadd.xlane.f32.xlu0 %v3519_v38 }
 0x551   : > { %v12033_v49 = vpop.eup %8851  ;;  %8869 = vpow2.f32 %v3495_v16  ;;  %v3410_v53 = vpop.xlane.xlu1 %3409  ;;  %v3505_v45 = vmul.f32 1.442695, %v3448_v63 }
 0x552   : > { %v7906_v1 = vpop.f32.mrb[49].mxu0  ;;  %v12037_v36 = vpop.eup %8853  ;;  %8871 = vpow2.f32 %v3491_v33  ;;  %v3445_v8 = vsub.f32 %v11892_v11, %v3410_v53  ;;  %v3446_v57 = vsub.f32 %v11896_v9, %v3410_v53  ;;  %v3528_v15 = vadd.f32 %v12033_v49, %v12031_v13 }
 0x553   : > { %v12041_v37 = vadd.f32 %v7906_v1, %v7905_v42  ;;  %v7908_v59 = vpop.f32.mrb[50].mxu0  ;;  %v12043_v31 = vpop.eup %8855  ;;  %8873 = vpow2.f32 %v3493_v0  ;;  %v3451_v11 = vsub.f32 %v11803_v3, %v3419_v19  ;;  %v3531_v3 = vadd.f32 %v12025_v29, %v12010_v60 }
 0x554   : > { %v7909_v51 = vpop.f32.mrb[51].mxu0  ;;  %v12049_v41 = vpop.eup %8857  ;;  %v3499_v16 = vmul.f32 1.442695, %v3445_v8  ;;  %v3501_v9 = vmul.f32 1.442695, %v3446_v57  ;;  %8875 = vpow2.f32 %v3497_v34  ;;  %3526 = vadd.xlane.f32.xlu0 %v3525_v18  ;;  %3529 = vadd.xlane.f32.xlu1 %v3528_v15  ;;  %v3537_v15 = vadd.f32 %v12043_v31, %v12037_v36 }
 0x555   : > { %v12052_v17 = vadd.f32 %v7909_v51, %v7908_v59  ;;  %v12054_v28 = vpop.eup %8859  ;;  %v3416_v38 = vpop.xlane.xlu1 %3415  ;;  %v3511_v39 = vmul.f32 1.442695, %v3451_v11 }
 0x556   : > { %8877 = vpow2.f32 %v3499_v16  ;;  %v3449_v33 = vsub.f32 %v11904_v10, %v3416_v38  ;;  %v3450_v0 = vsub.f32 %v11908_v23, %v3416_v38  ;;  %v12059_v42 = vpop.eup %8861  ;;  %v3534_v34 = vadd.f32 %v12054_v28, %v12049_v41 }
 0x557   : > { %8879 = vpow2.f32 %v3501_v9  ;;  %v3513_v10 = vmul.f32 1.442695, %v3452_v48 }
 0x558   : > { %v12065_v63 = vpop.eup %8863  ;;  %8881 = vpow2.f32 %v3503_v30  ;;  %v3507_v19 = vmul.f32 1.442695, %v3449_v33  ;;  %v3509_v53 = vmul.f32 1.442695, %v3450_v0  ;;  %3532 = vadd.xlane.f32.xlu0 %v3531_v3  ;;  %3535 = vadd.xlane.f32.xlu1 %v3534_v34 }
 0x559   : > { %v12067_v1 = vpop.eup %8865  ;;  %8883 = vpow2.f32 %v3505_v45  ;;  %v3422_v23 = vpop.xlane.xlu1 %3421 }
 0x55a   : > { %v12069_v8 = vpop.eup %8867  ;;  %8885 = vpow2.f32 %v3507_v19  ;;  %v3453_v57 = vsub.f32 %v11914_v27, %v3422_v23  ;;  %v3454_v59 = vsub.f32 %v11918_v26, %v3422_v23  ;;  %v3540_v30 = vadd.f32 %v12067_v1, %v12065_v63 }
 0x55b   : > { %v12075_v18 = vpop.eup %8869  ;;  %8887 = vpow2.f32 %v3509_v53  ;;  %v3543_v45 = vadd.f32 %v12069_v8, %v12059_v42 }
 0x55c   : > { %v12079_v51 = vpop.eup %8871  ;;  %8889 = vpow2.f32 %v3511_v39  ;;  %v3515_v11 = vmul.f32 1.442695, %v3453_v57  ;;  %v3517_v16 = vmul.f32 1.442695, %v3454_v59  ;;  %3538 = vadd.xlane.f32.xlu0 %v3537_v15  ;;  %3541 = vadd.xlane.f32.xlu1 %v3540_v30 }
 0x55d   : > { %v12081_v9 = vpop.eup %8873  ;;  %8891 = vpow2.f32 %v3513_v10 }
 0x55e   : > { %8893 = vpow2.f32 %v3515_v11  ;;  %v3546_v27 = vadd.f32 %v12081_v9, %v12079_v51  ;;  %v12085_v26 = vpop.eup %8875  ;;  %v8478_v11 = vld [vmem:[%s14652_s7 + $0xb0] sm:$0xff]  }
 0x55f   : > { %8895 = vpow2.f32 %v3517_v16  ;;  %v3549_v34 = vadd.f32 %v12085_v26, %v12075_v18  ;;  %v8479_v16 = vld [vmem:[%s14652_s7 + $0xf8] sm:$0xff]   ;;  %7942 = vmatpush3.bf16.msra.mxu1 %v8478_v11  ;;  %v9348_v11 = vld [vmem:[%s9670_s23 + $0x10] sm:$0xff] }
 0x560   : > { %v12089_v48 = vpop.eup %8877  ;;  %3544 = vadd.xlane.f32.xlu0 %v3543_v45  ;;  %3547 = vadd.xlane.f32.xlu1 %v3546_v27  ;;  %v8480_v45 = vld [vmem:[%s14652_s7 + $0xb8] sm:$0xff]  }
 0x561   : > { %v12091_v38 = vpop.eup %8879  ;;  %7943 = vmatprep.subr.bf16.mxu1 %v8479_v16 }
 0x562   : > { %v12093_v33 = vpop.eup %8881  ;;  %v3552_v0 = vadd.f32 %v12091_v38, %v12089_v48 }
 0x563   : > { %v12097_v3 = vpop.eup %8883  ;;  %7944 = vmatpush3.bf16.msra.mxu1 %v8480_v45 }
 0x564   : > { %v12101_v39 = vpop.eup %8885  ;;  %3550 = vadd.xlane.f32.xlu0 %v3549_v34  ;;  %3553 = vadd.xlane.f32.xlu1 %v3552_v0  ;;  %v3555_v57 = vadd.f32 %v12097_v3, %v12093_v33 }
 0x565   : > { %v12103_v19 = vpop.eup %8887 }
 0x566   : > { %v12105_v53 = vpop.eup %8889  ;;  %v3558_v10 = vadd.f32 %v12103_v19, %v12101_v39 }
 0x567   : > { %v12109_v23 = vpop.eup %8891 }
 0x568   : > { %v12113_v59 = vpop.eup %8893  ;;  %3556 = vadd.xlane.f32.xlu0 %v3555_v57  ;;  %3559 = vadd.xlane.f32.xlu1 %v3558_v10  ;;  %v3561_v27 = vadd.f32 %v12109_v23, %v12105_v53 }
 0x569   : > { %v12115_v30 = vpop.eup %8895 }
 0x56a   : > { %v3564_v15 = vadd.f32 %v12115_v30, %v12113_v59 }
 0x56c   : > { %3562 = vadd.xlane.f32.xlu0 %v3561_v27  ;;  %3565 = vadd.xlane.f32.xlu1 %v3564_v15  ;;  %v9349_v15 = vld [vmem:[%s14653_s8] ss:$0 sm:$0xff] }
 0x579   : > { %v7911_v0 = vpop.f32.mrb[52].mxu0 }
 0x57a   : > { %v7912_v34 = vpop.f32.mrb[53].mxu0 }
 0x57b   : > { %v12130_v10 = vadd.f32 %v7912_v34, %v7911_v0  ;;  %v7914_v57 = vpop.f32.mrb[54].mxu0  ;;  %v12149_v34 = vld [vmem:[%s9670_s23] sm:$0xff] }
 0x57c   : > { %v7915_v12 = vpop.f32.mrb[55].mxu0  ;;  %15638 = vst [vmem:[#allocation55_spill] sm:$0xff] %v12149_v34 }
 0x57d   : > { %4010 = vperm.xlu1 %8414, %v9347_v32   ;;  %v12133_v4 = vadd.f32 %v7915_v12, %v7914_v57  ;;  %v12143_v12 = vld [vmem:[%s9670_s23 + $0x20] sm:$0xff]  ;;  %v12153_v57 = vld [vmem:[%s9670_s23 + $0x30] sm:$0xff] }
 0x57e   : > { %15636 = vst [vmem:[#allocation44_spill] sm:$0xff] %v12143_v12  ;;  %15639 = vst [vmem:[#allocation59_spill] sm:$0xff] %v12153_v57 }
 0x57f   : > { %15634 = vst [vmem:[#allocation46_spill] sm:$0xff] %v12133_v4 }
 0x581   : > { %4014 = vperm.xlu1 %8414, %v9348_v11   ;;  %v7917_v2 = vpop.f32.mrb[56].mxu0  ;;  %v12157_v11 = vld [vmem:[%s9670_s23 + $0x18] sm:$0xff] }
 0x582   : > { %3905 = vrot.lane.b32.xlu0 %v9349_v15, %s9468_s25  ;;  %v7918_v16 = vpop.f32.mrb[57].mxu0  ;;  %15640 = vst [vmem:[#allocation72_spill] sm:$0xff] %v12157_v11 }
 0x583   : > { %v12140_v27 = vadd.f32 %v7918_v16, %v7917_v2  ;;  %v7920_v45 = vpop.f32.mrb[58].mxu0 }
 0x584   : > { %v7921_v32 = vpop.f32.mrb[59].mxu0 }
 0x585   : > { %15635 = vst [vmem:[#allocation47_spill] sm:$0xff] %v12140_v27  ;;  %4022 = vperm.xlu1 %8414, %v12143_v12   ;;  %v12146_v0 = vadd.f32 %v7921_v32, %v7920_v45  ;;  %v12163_v12 = vld [vmem:[%s9670_s23 + $0x40] sm:$0xff] }
 0x586   : > { %4006 = vperm.xlu0 %8413, %v12149_v34   ;;  %15642 = vst [vmem:[#allocation75_spill] sm:$0xff] %v12163_v12  ;;  %v9377_v34 = vld [vmem:[%s10097_s22 + $0x68] sm:$0xff] }
 0x587   : > { %15637 = vst [vmem:[#allocation70_spill] sm:$0xff] %v12146_v0 }
 0x589   : > { %4030 = vperm.xlu1 %8414, %v12153_v57   ;;  %v7923_v2 = vpop.f32.mrb[60].mxu0 }
 0x58a   : > { %4018 = vperm.xlu0 %8413, %v12157_v11   ;;  %v7924_v15 = vpop.f32.mrb[61].mxu0  ;;  %v9359_v11 = vld [vmem:[%s9670_s23 + $0x48] sm:$0xff] }
 0x58b   : > { %v12160_v16 = vadd.f32 %v7924_v15, %v7923_v2  ;;  %v7926_v45 = vpop.f32.mrb[62].mxu0  ;;  %v9357_v2 = vld [vmem:[%s9670_s23 + $0x38] sm:$0xff]  ;;  %v9358_v15 = vld [vmem:[%s10097_s22 + $0x10] sm:$0xff] }
 0x58c   : > { %v7927_v32 = vpop.f32.mrb[63].mxu0 }
 0x58d   : > { %15641 = vst [vmem:[#allocation71_spill] sm:$0xff] %v12160_v16  ;;  %4038 = vperm.xlu1 %8414, %v12163_v12   ;;  %v12166_v57 = vadd.f32 %v7927_v32, %v7926_v45  ;;  %v12177_v12 = vld [vmem:[%s10097_s22 + $0x20] sm:$0xff]  ;;  %v12185_v45 = vld [vmem:[%s10097_s22 + $0x30] sm:$0xff]  ;;  %v12189_v32 = vld [vmem:[%s10097_s22 + $0x18] sm:$0xff] }
 0x58e   : > { %4026 = vperm.xlu0 %8413, %v9355_v20   ;;  %15645 = vst [vmem:[#allocation76_spill] sm:$0xff] %v12177_v12  ;;  %v12181_v20 = vld [vmem:[%s10097_s22 + $0x8] sm:$0xff]  ;;  %15647 = vst [vmem:[#allocation82_spill] sm:$0xff] %v12185_v45 }
 0x58f   : > { %15643 = vst [vmem:[#allocation73_spill] sm:$0xff] %v12166_v57  ;;  %15646 = vst [vmem:[#allocation83_spill] sm:$0xff] %v12181_v20 }
 0x590   : > { %15648 = vst [vmem:[#allocation86_spill] sm:$0xff] %v12189_v32 }
 0x591   : > { %4730 = vperm.xlu1 %8414, %v12170_v14   ;;  %v9375_v14 = vld [vmem:[%s9670_s23 + $0x68] sm:$0xff] }
 0x592   : > { %4034 = vperm.xlu0 %8413, %v9357_v2   ;;  %v12197_v2 = vld [vmem:[%s10097_s22 + $0x28] sm:$0xff] }
 0x593   : > { %15650 = vst [vmem:[#allocation32_spill] sm:$0xff] %v12197_v2 }
 0x595   : > { %4738 = vperm.xlu1 %8414, %v9358_v15   ;;  %v12201_v15 = vld [vmem:[%s9670_s23 + $0x50] sm:$0xff] }
 0x596   : > { %4042 = vperm.xlu0 %8413, %v9359_v11   ;;  %v12193_v11 = vld [vmem:[%s10097_s22 + $0x40] sm:$0xff]  ;;  %15651 = vst [vmem:[#allocation48_spill] sm:$0xff] %v12201_v15 }
 0x597   : > { %15649 = vst [vmem:[#allocation84_spill] sm:$0xff] %v12193_v11 }
 0x599   : > { %4746 = vperm.xlu1 %8414, %v12177_v12   ;;  %v12209_v12 = vld [vmem:[%s10097_s22 + $0x50] sm:$0xff] }
 0x59a   : > { %4734 = vperm.xlu0 %8413, %v12181_v20   ;;  %15653 = vst [vmem:[#allocation52_spill] sm:$0xff] %v12209_v12  ;;  %v9373_v20 = vld [vmem:[%s10097_s22 + $0x58] sm:$0xff] }
 0x59d   : > { %4754 = vperm.xlu1 %8414, %v12185_v45   ;;  %v12205_v45 = vld [vmem:[%s10097_s22 + $0x38] sm:$0xff] }
 0x59e   : > { %4742 = vperm.xlu0 %8413, %v12189_v32   ;;  %15652 = vst [vmem:[#allocation39_spill] sm:$0xff] %v12205_v45  ;;  %v9371_v32 = vld [vmem:[%s9670_s23 + $0x58] sm:$0xff] }
 0x5a1   : > { %4762 = vperm.xlu1 %8414, %v12193_v11   ;;  %v12213_v11 = vld [vmem:[%s10097_s22 + $0x48] sm:$0xff] }
 0x5a2   : > { %4750 = vperm.xlu0 %8413, %v12197_v2   ;;  %15654 = vst [vmem:[#allocation103_spill] sm:$0xff] %v12213_v11  ;;  %v9370_v2 = vld [vmem:[%s9670_s23 + $0x60] sm:$0xff] }
 0x5a5   : > { %4046 = vperm.xlu1 %8414, %v12201_v15   ;;  %v9372_v15 = vld [vmem:[%s10097_s22 + $0x60] sm:$0xff] }
 0x5a6   : > { %4758 = vperm.xlu0 %8413, %v12205_v45   ;;  %v9374_v45 = vld [vmem:[%s9670_s23 + $0x70] sm:$0xff] }
 0x5a9   : > { %4770 = vperm.xlu1 %8414, %v12209_v12   ;;  %v9376_v12 = vld [vmem:[%s10097_s22 + $0x70] sm:$0xff] }
 0x5aa   : > { %4766 = vperm.xlu0 %8413, %v12213_v11   ;;  %v9379_v11 = vld [vmem:[%s10097_s22 + $0x78] sm:$0xff] }
 0x5ad   : > { %4054 = vperm.xlu1 %8414, %v9370_v2   ;;  %v3524_v2 = vpop.xlane.xlu1 %3523 }
 0x5ae   : > { %4050 = vperm.xlu0 %8413, %v9371_v32   ;;  %8897 = vrcp.f32 %v3524_v2 }
 0x5b1   : > { %4778 = vperm.xlu1 %8414, %v9372_v15  }
 0x5b2   : > { %4774 = vperm.xlu0 %8413, %v9373_v20  }
 0x5b5   : > { %4062 = vperm.xlu1 %8414, %v9374_v45  }
 0x5b6   : > { %4058 = vperm.xlu0 %8413, %v9375_v14  }
 0x5b8   : > { %v8898_v57 = vpop.eup %8897 }
 0x5b9   : > { %4786 = vperm.xlu1 %8414, %v9376_v12   ;;  %v3585_v12 = vmul.f32 %v8898_v57, %v11924_v35 }
 0x5ba   : > { %4782 = vperm.xlu0 %8413, %v9377_v34  }
 0x5be   : > { %4066 = vperm.xlu0 %8413, %v9378_v6  }
 0x5c2   : > { %4790 = vperm.xlu0 %8413, %v9379_v11  }
 0x5dd   : > { %v3521_v56 = vpop.xlane.xlu0 %3520 }
 0x5de   : > { %8899 = vrcp.f32 %v3521_v56  ;;  %v3586_v56 = vmul.f32 %v8898_v57, %v11926_v54 }
 0x5e1   : > { %v3527_v32 = vpop.xlane.xlu0 %3526  ;;  %v3530_v15 = vpop.xlane.xlu1 %3529 }
 0x5e2   : > { %8901 = vrcp.f32 %v3527_v32 }
 0x5e3   : > { %8903 = vrcp.f32 %v3530_v15 }
 0x5e5   : > { %v3533_v20 = vpop.xlane.xlu0 %3532  ;;  %v3536_v45 = vpop.xlane.xlu1 %3535 }
 0x5e6   : > { %8905 = vrcp.f32 %v3533_v20 }
 0x5e7   : > { %8907 = vrcp.f32 %v3536_v45 }
 0x5e8   : > { %v8900_v14 = vpop.eup %8899 }
 0x5e9   : > { %v3583_v6 = vmul.f32 %v8900_v14, %v12015_v62  ;;  %v3539_v34 = vpop.xlane.xlu0 %3538  ;;  %v3542_v11 = vpop.xlane.xlu1 %3541  ;;  %v3584_v2 = vmul.f32 %v8900_v14, %v12019_v61 }
 0x5ea   : > { %8909 = vrcp.f32 %v3539_v34  ;;  %v12237_v34 = vsub.s32 2, %v15576_v21 }
 0x5eb   : > { %v3616_v16 = vpack.c.bf16 %v3586_v56, %v3584_v2  ;;  %v3615_v32 = vpack.c.bf16 %v3585_v12, %v3583_v6  ;;  %8911 = vrcp.f32 %v3542_v11 }
 0x5ec   : > { %v8902_v15 = vpop.eup %8901 }
 0x5ed   : > { %v8904_v0 = vpop.eup %8903  ;;  %v3545_v27 = vpop.xlane.xlu0 %3544  ;;  %3792 = vmatprep.mubr.bf16.mxu1 %v3616_v16  ;;  %v3588_v45 = vmul.f32 %v8902_v15, %v11999_v55  ;;  %v3587_v61 = vmul.f32 %v8902_v15, %v11995_v43 }
 0x5ee   : > { %v3548_v20 = vpop.xlane.xlu1 %3547  ;;  %3793 = vmatmul.mubr.bf16.vlgmr.msra.gmra.mrb[32].mxu1 %v3615_v32  ;;  %v3590_v35 = vmul.f32 %v8904_v0, %v12033_v49  ;;  %v3589_v54 = vmul.f32 %v8904_v0, %v12031_v13  ;;  %8913 = vrcp.f32 %v3545_v27  ;;  %v4075_v49 = vsub.s32 6, %v15576_v21 }
 0x5ef   : > { %8915 = vrcp.f32 %v3548_v20 }
 0x5f0   : > { %v8906_v62 = vpop.eup %8905  ;;  %v3618_v4 = vpack.c.bf16 %v3590_v35, %v3588_v45  ;;  %v3617_v55 = vpack.c.bf16 %v3589_v54, %v3587_v61 }
 0x5f1   : > { %v8908_v57 = vpop.eup %8907  ;;  %v3551_v14 = vpop.xlane.xlu0 %3550  ;;  %v3592_v6 = vmul.f32 %v8906_v62, %v12025_v29  ;;  %v3591_v27 = vmul.f32 %v8906_v62, %v12010_v60 }
 0x5f2   : > { %v3554_v12 = vpop.xlane.xlu1 %3553  ;;  %3800 = vmatprep.mubr.bf16.mxu1 %v3618_v4  ;;  %v3594_v16 = vmul.f32 %v8908_v57, %v12054_v28  ;;  %v9380_v4 = vld [vmem:[%s14647_s2] sm:$0xff]  ;;  %v3593_v56 = vmul.f32 %v8908_v57, %v12049_v41  ;;  %8917 = vrcp.f32 %v3551_v14 }
 0x5f3   : > { %v4072_v29 = vrot.slane %v9380_v4, %v12237_v34  ;;  %v4076_v28 = vrot.slane %v9380_v4, %v4075_v49  ;;  %8919 = vrcp.f32 %v3554_v12 }
 0x5f4   : > { %v8910_v11 = vpop.eup %8909  ;;  %v3620_v13 = vpack.c.bf16 %v3594_v16, %v3592_v6  ;;  %v3619_v54 = vpack.c.bf16 %v3593_v56, %v3591_v27 }
 0x5f5   : > { %v3557_v43 = vpop.xlane.xlu0 %3556  ;;  %v8912_v0 = vpop.eup %8911  ;;  %v3596_v15 = vmul.f32 %v8910_v11, %v12043_v31  ;;  %v12251_v35 = vrot.slane %v4072_v29, %v12237_v34  ;;  %v12254_v61 = vrot.slane %v4076_v28, %v12237_v34  ;;  %v3595_v57 = vmul.f32 %v8910_v11, %v12037_v36 }
 0x5f6   : > { %v3560_v2 = vpop.xlane.xlu1 %3559  ;;  %3801 = vmatmul.mubr.bf16.gmra.mrb[36].mxu1 %v3617_v55  ;;  %v3598_v20 = vmul.f32 %v8912_v0, %v12067_v1  ;;  %v3597_v14 = vmul.f32 %v8912_v0, %v12065_v63  ;;  %8921 = vrcp.f32 %v3557_v43  ;;  %v15655_v43 = vld [vmem:[#allocation9_spill] sm:$0xff] }
 0x5f7   : > { %3808 = vmatprep.mubr.bf16.mxu1 %v3620_v13  ;;  %8923 = vrcp.f32 %v3560_v2  ;;  %vm15656_vm14 = vnez %v15655_v43  ;;  %v15682_v43 = vld [vmem:[#allocation62_spill] sm:$0xff] }
 0x5f8   : > { %v8914_v6 = vpop.eup %8913  ;;  %v3622_v60 = vpack.c.bf16 %v3598_v20, %v3596_v15  ;;  %v3621_v28 = vpack.c.bf16 %v3597_v14, %v3595_v57 }
 0x5f9   : > { %v3563_v45 = vpop.xlane.xlu0 %3562  ;;  %v8916_v62 = vpop.eup %8915  ;;  %v3600_v4 = vmul.f32 %v8914_v6, %v12069_v8  ;;  %v3599_v8 = vmul.f32 %v8914_v6, %v12059_v42 }
 0x5fa   : > { %v3566_v32 = vpop.xlane.xlu1 %3565  ;;  %v3602_v29 = vmul.f32 %v8916_v62, %v12081_v9  ;;  %v3601_v9 = vmul.f32 %v8916_v62, %v12079_v51  ;;  %v9381_v51 = vld [vmem:[%s14650_s5] sm:$0xff]  ;;  %8925 = vrcp.f32 %v3563_v45 }
 0x5fb   : > { %v4796_v6 = vrot.slane %v9381_v51, %v12237_v34  ;;  %v4800_v62 = vrot.slane %v9381_v51, %v4075_v49  ;;  %8927 = vrcp.f32 %v3566_v32 }
 0x5fc   : > { %v8918_v27 = vpop.eup %8917  ;;  %v3624_v36 = vpack.c.bf16 %v3602_v29, %v3600_v4 }
 0x5fd   : > { %v12258_v1 = vpop.permute.xlu0 %3905  ;;  %v8920_v0 = vpop.eup %8919  ;;  %v12302_v49 = vrot.slane %v4800_v62, %v12237_v34  ;;  %v3603_v32 = vmul.f32 %v8918_v27, %v12075_v18 }
 0x5fe   : > { %v4011_v16 = vpop.permute.xlu1 %4010  ;;  %3809 = vmatmul.mubr.bf16.gmra.mrb[40].mxu1 %v3619_v54  ;;  %v3606_v42 = vmul.f32 %v8920_v0, %v12091_v38  ;;  %v3605_v45 = vmul.f32 %v8920_v0, %v12089_v48 }
 0x5ff   : > { %v4089_v41 = vadd.f32 %v12251_v35, %v4011_v16  ;;  %v4090_v31 = vadd.f32 %v12254_v61, %v4011_v16  ;;  %3816 = vmatprep.mubr.bf16.mxu1 %v3622_v60  ;;  %v15657_v16 = vld [vmem:[#allocation10_spill] sm:$0xff] }
 0x600   : > { %vm15658_vm10 = vnez %v15657_v16  ;;  %v8922_v4 = vpop.eup %8921 }
 0x601   : > { %v4153_v12 = vmul.f32 0.2, %v4089_v41  ;;  %v4154_v55 = vmul.f32 0.2, %v4090_v31  ;;  %vm4121_vm11 = vcmp.gt.f32.partialorder %v4089_v41, 0.0  ;;  %vm4122_vm7 = vcmp.gt.f32.partialorder %v4090_v31, 0.0  ;;  %v8924_v29 = vpop.eup %8923 }
 0x602   : > { %v12262_v13 = vpop.permute.xlu1 %4014 }
 0x603   : > { %v4185_v11 = vsel %vm4121_vm11, %v4089_v41, %v4153_v12  ;;  %v4186_v63 = vsel %vm4122_vm7, %v4090_v31, %v4154_v55  ;;  %v3604_v12 = vmul.f32 %v8918_v27, %v12085_v26  ;;  %v3623_v26 = vpack.c.bf16 %v3601_v9, %v3599_v8  ;;  %v15659_v8 = vld [vmem:[#allocation7_spill] sm:$0xff] }
 0x604   : > { %v12274_v2 = vsel %vm15656_vm14, %v4185_v11, -1e+30  ;;  %v12278_v60 = vsel %vm15658_vm10, %v4186_v63, -1e+30  ;;  %v12299_v63 = vrot.slane %v4796_v6, %v12237_v34  ;;  %vm15660_vm10 = vnez %v15659_v8  ;;  %v8926_v51 = vpop.eup %8925 }
 0x605   : > { %v4007_v56 = vpop.permute.xlu0 %4006  ;;  %v4250_v55 = vmax.f32 %v12274_v2, %v12278_v60  ;;  %v3625_v27 = vpack.c.bf16 %v3605_v45, %v3603_v32  ;;  %v3612_v32 = vmul.f32 %v8926_v51, %v12109_v23 }
 0x606   : > { %v12266_v15 = vpop.permute.xlu1 %4022  ;;  %v4087_v20 = vadd.f32 %v12251_v35, %v4007_v56  ;;  %v4088_v54 = vadd.f32 %v12254_v61, %v4007_v56  ;;  %3817 = vmatmul.mubr.bf16.gmra.mrb[44].mxu1 %v3621_v28  ;;  %v3626_v56 = vpack.c.bf16 %v3606_v42, %v3604_v12  ;;  %v15661_v12 = vld [vmem:[#allocation8_spill] sm:$0xff] }
 0x607   : > { %3824 = vmatprep.mubr.bf16.mxu1 %v3624_v36  ;;  %4251 = vmax.xlane.f32.xlu1 %v4250_v55 }
 0x608   : > { %v4151_v41 = vmul.f32 0.2, %v4087_v20  ;;  %v4152_v31 = vmul.f32 0.2, %v4088_v54  ;;  %vm4119_vm11 = vcmp.gt.f32.partialorder %v4087_v20, 0.0  ;;  %vm4120_vm7 = vcmp.gt.f32.partialorder %v4088_v54, 0.0 }
 0x609   : > { %v12280_v57 = vpop.permute.xlu0 %4018 }
 0x60a   : > { %v12282_v14 = vpop.permute.xlu1 %4030  ;;  %v4183_v36 = vsel %vm4119_vm11, %v4087_v20, %v4151_v41  ;;  %v4184_v11 = vsel %vm4120_vm7, %v4088_v54, %v4152_v31  ;;  %vm15662_vm11 = vnez %v15661_v12  ;;  %v3608_v54 = vmul.f32 %v8922_v4, %v12097_v3 }
 0x60b   : > { %v12308_v9 = vsel %vm15660_vm10, %v4183_v36, -1e+30  ;;  %v12312_v20 = vsel %vm15662_vm11, %v4184_v11, -1e+30  ;;  %v3610_v41 = vmul.f32 %v8924_v29, %v12103_v19  ;;  %v8928_v19 = vpop.eup %8927  ;;  %v3609_v36 = vmul.f32 %v8924_v29, %v12101_v39 }
 0x60c   : > { %v4247_v48 = vmax.f32 %v12308_v9, %v12312_v20  ;;  %v3614_v45 = vmul.f32 %v8928_v19, %v12115_v30 }
 0x60d   : > { %v12294_v38 = vpop.permute.xlu0 %4026  ;;  %v3628_v0 = vpack.c.bf16 %v3610_v41, %v3608_v54 }
 0x60e   : > { %v12296_v28 = vpop.permute.xlu1 %4038  ;;  %3825 = vmatmul.mubr.bf16.gmra.mrb[48].mxu1 %v3623_v26  ;;  %4248 = vmax.xlane.f32.xlu0 %v4247_v48  ;;  %v3630_v23 = vpack.c.bf16 %v3614_v45, %v3612_v32  ;;  %v3611_v48 = vmul.f32 %v8926_v51, %v12105_v53  ;;  %v3858_v32 = vmul.f32 0.4, %v11932_v46  ;;  %v3860_v46 = vmul.f32 0.4, %v11954_v24 }
 0x60f   : > { %3832 = vmatprep.mubr.bf16.mxu1 %v3626_v56  ;;  %v3607_v56 = vmul.f32 %v8922_v4, %v12093_v33  ;;  %v4098_v16 = vadd.f32 %v12254_v61, %v12294_v38 }
 0x611   : > { %v12316_v31 = vpop.permute.xlu0 %4034  ;;  %v3627_v39 = vpack.c.bf16 %v3609_v36, %v3607_v56 }
 0x612   : > { %v4731_v34 = vpop.permute.xlu1 %4730 }
 0x613   : > { %v4811_v42 = vadd.f32 %v12299_v63, %v4731_v34  ;;  %v4812_v18 = vadd.f32 %v12302_v49, %v4731_v34 }
 0x615   : > { %vm4843_vm7 = vcmp.gt.f32.partialorder %v4811_v42, 0.0  ;;  %vm4844_vm14 = vcmp.gt.f32.partialorder %v4812_v18, 0.0  ;;  %v4875_v6 = vmul.f32 0.2, %v4811_v42  ;;  %v4876_v62 = vmul.f32 0.2, %v4812_v18  ;;  %v12322_v3 = vpop.permute.xlu0 %4042 }
 0x616   : > { %3833 = vmatmul.mubr.bf16.gmra.mrb[52].mxu1 %v3625_v27  ;;  %v3613_v27 = vmul.f32 %v8928_v19, %v12113_v59  ;;  %v3857_v59 = vmul.f32 0.4, %v11930_v44 }
 0x617   : > { %3840 = vmatprep.mubr.bf16.mxu1 %v3628_v0  ;;  %v4907_v55 = vsel %vm4843_vm7, %v4811_v42, %v4875_v6  ;;  %v4908_v26 = vsel %vm4844_vm14, %v4812_v18, %v4876_v62 }
 0x618   : > { %v12332_v34 = vsel %vm15607_vm1, %v4907_v55, -1e+30  ;;  %v12336_v42 = vsel %vm15609_vm5, %v4908_v26, -1e+30  ;;  %v3629_v62 = vpack.c.bf16 %v3613_v27, %v3611_v48 }
 0x619   : > { %v4735_v11 = vpop.permute.xlu0 %4734  ;;  %v4971_v30 = vmax.f32 %v12332_v34, %v12336_v42 }
 0x61a   : > { %v4813_v54 = vadd.f32 %v12299_v63, %v4735_v11  ;;  %v4814_v41 = vadd.f32 %v12302_v49, %v4735_v11 }
 0x61b   : > { %4972 = vmax.xlane.f32.xlu0 %v4971_v30 }
 0x61c   : > { %v4877_v33 = vmul.f32 0.2, %v4813_v54  ;;  %v4878_v4 = vmul.f32 0.2, %v4814_v41  ;;  %vm4845_vm14 = vcmp.gt.f32.partialorder %v4813_v54, 0.0  ;;  %vm4846_vm7 = vcmp.gt.f32.partialorder %v4814_v41, 0.0 }
 0x61e   : > { %3841 = vmatmul.mubr.bf16.gmra.mrb[56].mxu1 %v3627_v39  ;;  %v4909_v29 = vsel %vm4845_vm14, %v4813_v54, %v4877_v33  ;;  %v4910_v18 = vsel %vm4846_vm7, %v4814_v41, %v4878_v4 }
 0x61f   : > { %3848 = vmatprep.mubr.bf16.mxu1 %v3630_v23  ;;  %v12344_v0 = vsel %vm15579_vm8, %v4909_v29, -1e+30  ;;  %v12348_v6 = vsel %vm15581_vm13, %v4910_v18, -1e+30  ;;  %v3859_v18 = vmul.f32 0.4, %v11949_v40 }
 0x620   : > { %15663 = vst [vmem:[#allocation102_spill] sm:$0xff] %v12344_v0  ;;  %15664 = vst [vmem:[#allocation36_spill] sm:$0xff] %v12348_v6  ;;  %v4974_v55 = vmax.f32 %v12344_v0, %v12348_v6 }
 0x622   : > { %4975 = vmax.xlane.f32.xlu0 %v4974_v55 }
 0x626   : > { %3849 = vmatmul.mubr.bf16.gmra.mrb[60].mxu1 %v3629_v62 }
 0x6c1   : > { %v7945_v26 = vpop.f32.mrb[32].mxu1 }
 0x6c2   : > { %v7946_v56 = vpop.f32.mrb[33].mxu1 }
 0x6c3   : > { %v7947_v36 = vadd.f32 %v7946_v56, %v7945_v26  ;;  %v7948_v53 = vpop.f32.mrb[34].mxu1 }
 0x6c4   : > { %v7949_v51 = vpop.f32.mrb[35].mxu1 }
 0x6c5   : > { %v3873_v19 = vmul.f32 0.6, %v7947_v36  ;;  %v7950_v11 = vadd.f32 %v7949_v51, %v7948_v53 }
 0x6c7   : > { %v3889_v45 = vadd.f32 %v3873_v19, %v3857_v59  ;;  %v3874_v54 = vmul.f32 0.6, %v7950_v11  ;;  %v3861_v11 = vmul.f32 0.4, %v11968_v50 }
 0x6c9   : > { %v3908_v41 = vadd.f32 %v12258_v1, %v3889_v45  ;;  %v3890_v33 = vadd.f32 %v3874_v54, %v3858_v32  ;;  %v7951_v4 = vpop.f32.mrb[36].mxu1  ;;  %v3862_v45 = vmul.f32 0.4, %v11981_v58  ;;  %v3864_v58 = vmul.f32 0.4, %v12017_v7 }
 0x6ca   : > { %v7952_v39 = vpop.f32.mrb[37].mxu1 }
 0x6cb   : > { %v7953_v23 = vadd.f32 %v7952_v39, %v7951_v4  ;;  %v7954_v30 = vpop.f32.mrb[38].mxu1  ;;  %3940 = vrot.lane.b32.xlu1 %v3908_v41, %s9469_s21  ;;  %v3909_v44 = vadd.f32 %v12258_v1, %v3890_v33 }
 0x6cc   : > { %v7955_v29 = vpop.f32.mrb[39].mxu1 }
 0x6cd   : > { %v3875_v48 = vmul.f32 0.6, %v7953_v23  ;;  %v7956_v27 = vadd.f32 %v7955_v29, %v7954_v30 }
 0x6cf   : > { %v3891_v62 = vadd.f32 %v3875_v48, %v3859_v18  ;;  %v3876_v55 = vmul.f32 0.6, %v7956_v27  ;;  %3942 = vrot.lane.b32.xlu1 %v3909_v44, %s9469_s21  ;;  %v3863_v44 = vmul.f32 0.4, %v12005_v22 }
 0x6d1   : > { %v3910_v26 = vadd.f32 %v12258_v1, %v3891_v62  ;;  %v3892_v56 = vadd.f32 %v3876_v55, %v3860_v46  ;;  %v7957_v36 = vpop.f32.mrb[40].mxu1  ;;  %v9470_v55 = vmov 3  }
 0x6d2   : > { %v7958_v53 = vpop.f32.mrb[41].mxu1  ;;  %8415 = vset.pattern.permute.xlu1 %v9470_v55  ;;  %8416 = vset.pattern.permute.xlu0 %v9470_v55 }
 0x6d3   : > { %v3911_v51 = vadd.f32 %v12258_v1, %v3892_v56  ;;  %v7959_v59 = vadd.f32 %v7958_v53, %v7957_v36  ;;  %v7960_v19 = vpop.f32.mrb[42].mxu1  ;;  %3944 = vrot.lane.b32.xlu0 %v3910_v26, %s9469_s21 }
 0x6d4   : > { %v7961_v40 = vpop.f32.mrb[43].mxu1 }
 0x6d5   : > { %v3877_v32 = vmul.f32 0.6, %v7959_v59  ;;  %v7962_v24 = vadd.f32 %v7961_v40, %v7960_v19  ;;  %3946 = vrot.lane.b32.xlu1 %v3911_v51, %s9469_s21  ;;  %v3865_v40 = vmul.f32 0.4, %v12041_v37  ;;  %v3867_v37 = vmul.f32 0.4, %v12130_v10 }
 0x6d7   : > { %v3893_v54 = vadd.f32 %v3877_v32, %v3861_v11  ;;  %v3878_v41 = vmul.f32 0.6, %v7962_v24  ;;  %v3866_v32 = vmul.f32 0.4, %v12052_v17 }
 0x6d9   : > { %v3912_v33 = vadd.f32 %v12258_v1, %v3893_v54  ;;  %v3894_v4 = vadd.f32 %v3878_v41, %v3862_v45  ;;  %v7963_v39 = vpop.f32.mrb[44].mxu1 }
 0x6da   : > { %v7964_v23 = vpop.f32.mrb[45].mxu1 }
 0x6db   : > { %v3913_v30 = vadd.f32 %v12258_v1, %v3894_v4  ;;  %v7965_v29 = vadd.f32 %v7964_v23, %v7963_v39  ;;  %v7966_v18 = vpop.f32.mrb[46].mxu1  ;;  %3948 = vrot.lane.b32.xlu0 %v3912_v33, %s9469_s21 }
 0x6dc   : > { %v7967_v50 = vpop.f32.mrb[47].mxu1 }
 0x6dd   : > { %v3879_v48 = vmul.f32 0.6, %v7965_v29  ;;  %v7968_v27 = vadd.f32 %v7967_v50, %v7966_v18  ;;  %3950 = vrot.lane.b32.xlu1 %v3913_v30, %s9469_s21  ;;  %v15665_v50 = vld [vmem:[#allocation46_spill] sm:$0xff] }
 0x6df   : > { %v3895_v46 = vadd.f32 %v3879_v48, %v3863_v44  ;;  %v3880_v62 = vmul.f32 0.6, %v7968_v27  ;;  %v3868_v44 = vmul.f32 0.4, %v15665_v50 }
 0x6e1   : > { %v3914_v26 = vadd.f32 %v12258_v1, %v3895_v46  ;;  %v3896_v56 = vadd.f32 %v3880_v62, %v3864_v58  ;;  %v7969_v36 = vpop.f32.mrb[48].mxu1 }
 0x6e2   : > { %v7970_v53 = vpop.f32.mrb[49].mxu1 }
 0x6e3   : > { %v3915_v51 = vadd.f32 %v12258_v1, %v3896_v56  ;;  %v7971_v59 = vadd.f32 %v7970_v53, %v7969_v36  ;;  %v7972_v22 = vpop.f32.mrb[50].mxu1  ;;  %3952 = vrot.lane.b32.xlu0 %v3914_v26, %s9469_s21  ;;  %v15666_v56 = vld [vmem:[#allocation47_spill] sm:$0xff] }
 0x6e4   : > { %v7973_v19 = vpop.f32.mrb[51].mxu1  ;;  %v3869_v36 = vmul.f32 0.4, %v15666_v56 }
 0x6e5   : > { %v3881_v7 = vmul.f32 0.6, %v7971_v59  ;;  %v7974_v11 = vadd.f32 %v7973_v19, %v7972_v22  ;;  %3954 = vrot.lane.b32.xlu1 %v3915_v51, %s9469_s21  ;;  %v15667_v59 = vld [vmem:[#allocation70_spill] sm:$0xff] }
 0x6e6   : > { %v3870_v22 = vmul.f32 0.4, %v15667_v59 }
 0x6e7   : > { %v3897_v24 = vadd.f32 %v3881_v7, %v3865_v40  ;;  %v3882_v45 = vmul.f32 0.6, %v7974_v11  ;;  %v4093_v40 = vadd.f32 %v12251_v35, %v12280_v57  ;;  %v4094_v7 = vadd.f32 %v12254_v61, %v12280_v57 }
 0x6e9   : > { %v3916_v54 = vadd.f32 %v12258_v1, %v3897_v24  ;;  %v12379_v41 = vadd.f32 %v3882_v45, %v3866_v32  ;;  %v7975_v33 = vpop.f32.mrb[52].mxu1  ;;  %v4091_v24 = vadd.f32 %v12251_v35, %v12262_v13  ;;  %v4092_v45 = vadd.f32 %v12254_v61, %v12262_v13  ;;  %v4739_v13 = vpop.permute.xlu1 %4738 }
 0x6ea   : > { %v7976_v4 = vpop.f32.mrb[53].mxu1  ;;  %v4158_v50 = vmul.f32 0.2, %v4094_v7  ;;  %vm4125_vm14 = vcmp.gt.f32.partialorder %v4093_v40, 0.0  ;;  %vm4126_vm7 = vcmp.gt.f32.partialorder %v4094_v7, 0.0 }
 0x6eb   : > { %v7977_v39 = vadd.f32 %v7976_v4, %v7975_v33  ;;  %v7978_v23 = vpop.f32.mrb[54].mxu1  ;;  %3956 = vrot.lane.b32.xlu0 %v3916_v54, %s9469_s21  ;;  %vm4123_vm13 = vcmp.gt.f32.partialorder %v4091_v24, 0.0  ;;  %vm4124_vm8 = vcmp.gt.f32.partialorder %v4092_v45, 0.0 }
 0x6ec   : > { %v7979_v30 = vpop.f32.mrb[55].mxu1 }
 0x6ed   : > { %v3883_v29 = vmul.f32 0.6, %v7977_v39  ;;  %v7980_v18 = vadd.f32 %v7979_v30, %v7978_v23  ;;  %v15668_v39 = vld [vmem:[#allocation71_spill] sm:$0xff]  ;;  %v15669_v30 = vld [vmem:[#allocation73_spill] sm:$0xff] }
 0x6ee   : > { %v3871_v23 = vmul.f32 0.4, %v15668_v39 }
 0x6ef   : > { %v12384_v17 = vadd.f32 %v3883_v29, %v3867_v37  ;;  %v3884_v48 = vmul.f32 0.6, %v7980_v18  ;;  %v3872_v37 = vmul.f32 0.4, %v15669_v30  ;;  %v4157_v18 = vmul.f32 0.2, %v4093_v40 }
 0x6f1   : > { %v3900_v27 = vadd.f32 %v3884_v48, %v3868_v44  ;;  %v7981_v58 = vpop.f32.mrb[56].mxu1  ;;  %v12400_v44 = vpop.permute.xlu0 %4742  ;;  %v4189_v56 = vsel %vm4125_vm14, %v4093_v40, %v4157_v18  ;;  %v15679_v40 = vld [vmem:[#allocation12_spill] sm:$0xff] }
 0x6f2   : > { %v7982_v46 = vpop.f32.mrb[57].mxu1  ;;  %vm15680_vm14 = vnez %v15679_v40 }
 0x6f3   : > { %v7983_v62 = vadd.f32 %v7982_v46, %v7981_v58  ;;  %v7984_v55 = vpop.f32.mrb[58].mxu1  ;;  %v4155_v58 = vmul.f32 0.2, %v4091_v24  ;;  %v4156_v46 = vmul.f32 0.2, %v4092_v45 }
 0x6f4   : > { %v7985_v26 = vpop.f32.mrb[59].mxu1 }
 0x6f5   : > { %v3885_v53 = vmul.f32 0.6, %v7983_v62  ;;  %v7986_v51 = vadd.f32 %v7985_v26, %v7984_v55  ;;  %v12404_v59 = vpop.permute.xlu0 %4750 }
 0x6f7   : > { %v12388_v10 = vadd.f32 %v3885_v53, %v3869_v36  ;;  %v3886_v19 = vmul.f32 0.6, %v7986_v51  ;;  %v4190_v36 = vsel %vm4126_vm7, %v4094_v7, %v4158_v50  ;;  %v4187_v53 = vsel %vm4123_vm13, %v4091_v24, %v4155_v58 }
 0x6f8   : > { %v4188_v51 = vsel %vm4124_vm8, %v4092_v45, %v4156_v46  ;;  %v3919_v58 = vadd.f32 %v12258_v1, %v3900_v27  ;;  %vm15683_vm7 = vnez %v15682_v43 }
 0x6f9   : > { %v3902_v11 = vadd.f32 %v3886_v19, %v3870_v22  ;;  %v7987_v32 = vpop.f32.mrb[60].mxu1  ;;  %v15670_v22 = vld [vmem:[#allocation13_spill] sm:$0xff]  ;;  %v12422_v7 = vsel %vm15680_vm14, %v4188_v51, -1e+30 }
 0x6fa   : > { %v7988_v54 = vpop.f32.mrb[61].mxu1  ;;  %vm15671_vm9 = vnez %v15670_v22  ;;  %15681 = vst [vmem:[#allocation37_spill] sm:$0xff] %v12422_v7  ;;  %v15685_v22 = vld [vmem:[#allocation61_spill] sm:$0xff] }
 0x6fb   : > { %v7989_v33 = vadd.f32 %v7988_v54, %v7987_v32  ;;  %v7990_v4 = vpop.f32.mrb[62].mxu1  ;;  %v12408_v19 = vsel %vm15671_vm9, %v4189_v56, -1e+30  ;;  %v15673_v32 = vld [vmem:[#allocation14_spill] sm:$0xff]  ;;  %v3921_v56 = vadd.f32 %v12258_v1, %v3902_v11  ;;  %v4815_v11 = vadd.f32 %v12299_v63, %v4739_v13 }
 0x6fc   : > { %v7991_v29 = vpop.f32.mrb[63].mxu1  ;;  %15672 = vst [vmem:[#allocation54_spill] sm:$0xff] %v12408_v19  ;;  %vm15674_vm15 = vnez %v15673_v32  ;;  %vm15686_vm14 = vnez %v15685_v22  ;;  %v4106_v22 = vadd.f32 %v12254_v61, %v12322_v3 }
 0x6fd   : > { %v3887_v57 = vmul.f32 0.6, %v7989_v33  ;;  %v7992_v48 = vadd.f32 %v7991_v29, %v7990_v4  ;;  %v12412_v54 = vsel %vm15674_vm15, %v4190_v36, -1e+30  ;;  %v12414_v33 = vpop.permute.xlu1 %4746  ;;  %v15676_v4 = vld [vmem:[#allocation11_spill] sm:$0xff]  ;;  %vm4847_vm13 = vcmp.gt.f32.partialorder %v4815_v11, 0.0 }
 0x6fe   : > { %15675 = vst [vmem:[#allocation65_spill] sm:$0xff] %v12412_v54  ;;  %vm15677_vm6 = vnez %v15676_v4  ;;  %v4256_v24 = vmax.f32 %v12408_v19, %v12412_v54  ;;  %v15689_v19 = vld [vmem:[#allocation17_spill] sm:$0xff] }
 0x6ff   : > { %v12402_v62 = vadd.f32 %v3887_v57, %v3871_v23  ;;  %v3888_v55 = vmul.f32 0.6, %v7992_v48  ;;  %v12418_v39 = vsel %vm15677_vm6, %v4187_v53, -1e+30  ;;  %v12428_v23 = vpop.permute.xlu0 %4758  ;;  %v3917_v57 = vadd.f32 %v12258_v1, %v12379_v41 }
 0x700   : > { %15678 = vst [vmem:[#allocation40_spill] sm:$0xff] %v12418_v39  ;;  %v4253_v45 = vmax.f32 %v12418_v39, %v12422_v7  ;;  %vm14991_vm6 = vcmask 523520   ;;  %vm15690_vm15 = vnez %v15689_v19  ;;  %v15697_v19 = vld [vmem:[#allocation25_spill] sm:$0xff] }
 0x701   : > { %v3904_v26 = vadd.f32 %v3888_v55, %v3872_v37  ;;  %v12430_v30 = vpop.permute.xlu1 %4754  ;;  %v3918_v55 = vadd.f32 %v12258_v1, %v12384_v17 }
 0x703   : > { %v12432_v37 = vpop.permute.xlu0 %4766  ;;  %v3923_v53 = vadd.f32 %v12258_v1, %v3904_v26 }
 0x705   : > { %v12434_v29 = vpop.permute.xlu1 %4762 }
 0x707   : > { %v12436_v18 = vpop.permute.xlu0 %4050 }
 0x709   : > { %4257 = vmax.xlane.f32.xlu1 %v4256_v24  ;;  %v12438_v50 = vpop.permute.xlu1 %4046  ;;  %v4816_v24 = vadd.f32 %v12302_v49, %v4739_v13  ;;  %v4097_v13 = vadd.f32 %v12251_v35, %v12294_v38  ;;  %v4101_v38 = vadd.f32 %v12251_v35, %v12316_v31 }
 0x70a   : > { %4254 = vmax.xlane.f32.xlu0 %v4253_v45 }
 0x70b   : > { %v12443_v48 = vpop.permute.xlu0 %4774  ;;  %vm4848_vm8 = vcmp.gt.f32.partialorder %v4816_v24, 0.0 }
 0x70d   : > { %v12446_v46 = vpop.permute.xlu1 %4770 }
 0x70f   : > { %v12453_v36 = vpop.permute.xlu0 %4058 }
 0x711   : > { %v12456_v41 = vpop.permute.xlu1 %4054 }
 0x713   : > { %v12460_v27 = vpop.permute.xlu0 %4782 }
 0x715   : > { %v12462_v51 = vpop.permute.xlu1 %4778 }
 0x717   : > { %v12464_v17 = vpop.permute.xlu0 %4066 }
 0x719   : > { %v12468_v45 = vpop.permute.xlu1 %4062 }
 0x71a   : > { %3958 = vrot.lane.b32.xlu1 %v3917_v57, %s9469_s21  ;;  %v4879_v57 = vmul.f32 0.2, %v4815_v11 }
 0x71d   : > { %v12472_v26 = vpop.permute.xlu1 %4786 }
 0x71e   : > { %3962 = vrot.lane.b32.xlu1 %v3919_v58, %s9469_s21  ;;  %v4880_v58 = vmul.f32 0.2, %v4816_v24 }
 0x720   : > { %3960 = vrot.lane.b32.xlu0 %v3918_v55, %s9469_s21  ;;  %v12470_v55 = vpop.permute.xlu0 %4790  ;;  %v4912_v40 = vsel %vm4848_vm8, %v4816_v24, %v4880_v58  ;;  %v4162_v58 = vmul.f32 0.2, %v4098_v16  ;;  %vm4130_vm8 = vcmp.gt.f32.partialorder %v4098_v16, 0.0 }
 0x721   : > { %v12476_v4 = vpop.xlane.xlu1 %4251  ;;  %v12488_v25 = vsel %vm15686_vm14, %v4912_v40, -1e+30  ;;  %v4105_v40 = vadd.f32 %v12251_v35, %v12322_v3  ;;  %vm4133_vm14 = vcmp.gt.f32.partialorder %v4101_v38, 0.0  ;;  %v15691_v3 = vld [vmem:[#allocation18_spill] sm:$0xff] }
 0x722   : > { %3966 = vrot.lane.b32.xlu1 %v3921_v56, %s9469_s21  ;;  %15687 = vst [vmem:[#allocation63_spill] sm:$0xff] %v12488_v25  ;;  %v4194_v39 = vsel %vm4130_vm8, %v4098_v16, %v4162_v58  ;;  %vm15692_vm9 = vnez %v15691_v3  ;;  %vm4138_vm8 = vcmp.gt.f32.partialorder %v4106_v22, 0.0  ;;  %v15693_v58 = vld [vmem:[#allocation21_spill] sm:$0xff]  ;;  %v15695_v3 = vld [vmem:[#allocation22_spill] sm:$0xff] }
 0x723   : > { %v12514_v0 = vsel %vm15692_vm9, %v4194_v39, -1e+30  ;;  %vm15694_vm9 = vnez %v15693_v58  ;;  %v15700_v58 = vld [vmem:[#allocation26_spill] sm:$0xff] }
 0x724   : > { %v12474_v56 = vpop.xlane.xlu0 %4248 }
 0x726   : > { %3970 = vrot.lane.b32.xlu1 %v3923_v53, %s9469_s21  ;;  %v4911_v53 = vsel %vm4847_vm13, %v4815_v11, %v4879_v57  ;;  %v4161_v57 = vmul.f32 0.2, %v4097_v13  ;;  %vm4129_vm13 = vcmp.gt.f32.partialorder %v4097_v13, 0.0 }
 0x727   : > { %v12484_v32 = vsel %vm15683_vm7, %v4911_v53, -1e+30  ;;  %v4102_v53 = vadd.f32 %v12254_v61, %v12316_v31 }
 0x728   : > { %15684 = vst [vmem:[#allocation49_spill] sm:$0xff] %v12484_v32  ;;  %v12490_v52 = vpop.xlane.xlu0 %4972  ;;  %v4977_v24 = vmax.f32 %v12484_v32, %v12488_v25  ;;  %v4165_v32 = vmul.f32 0.2, %v4101_v38  ;;  %v4193_v31 = vsel %vm4129_vm13, %v4097_v13, %v4161_v57  ;;  %vm4137_vm13 = vcmp.gt.f32.partialorder %v4105_v40, 0.0 }
 0x729   : > { %v4166_v7 = vmul.f32 0.2, %v4102_v53  ;;  %vm4134_vm7 = vcmp.gt.f32.partialorder %v4102_v53, 0.0  ;;  %v12510_v6 = vsel %vm15690_vm15, %v4193_v31, -1e+30  ;;  %vm15696_vm15 = vnez %v15695_v3  ;;  %v15738_v3 = vld [vmem:[#allocation15_spill] sm:$0xff] }
 0x72a   : > { %v4197_v16 = vsel %vm4133_vm14, %v4101_v38, %v4165_v32  ;;  %v4262_v39 = vmax.f32 %v12510_v6, %v12514_v0 }
 0x72b   : > { %v4198_v13 = vsel %vm4134_vm7, %v4102_v53, %v4166_v7  ;;  %v12528_v31 = vsel %vm15694_vm9, %v4197_v16, -1e+30  ;;  %vm15701_vm9 = vnez %v15700_v58  ;;  %v15708_v58 = vld [vmem:[#allocation30_spill] sm:$0xff] }
 0x72c   : > { %v12504_v43 = vpop.xlane.xlu0 %4975 }
 0x72d   : > { %15688 = vst [vmem:[#allocation66_spill] sm:$0xff] %v12504_v43  ;;  %v4109_v43 = vadd.f32 %v12251_v35, %v12436_v18 }
 0x72f   : > { %vm4141_vm14 = vcmp.gt.f32.partialorder %v4109_v43, 0.0 }
 0x73d   : > { %v3941_v11 = vpop.permute.xlu1 %3940 }
 0x73e   : > { %3989 = vst.msk [vmem:[%s11550_s27] sm:$0xff] %vm14991_vm6, %v3941_v11  ;;  %v4169_v11 = vmul.f32 0.2, %v4105_v40 }
 0x73f   : > { %4978 = vmax.xlane.f32.xlu0 %v4977_v24  ;;  %v4170_v24 = vmul.f32 0.2, %v4106_v22 }
 0x740   : > { %v4201_v7 = vsel %vm4137_vm13, %v4105_v40, %v4169_v11 }
 0x741   : > { %v3943_v25 = vpop.permute.xlu1 %3942  ;;  %v4202_v38 = vsel %vm4138_vm8, %v4106_v22, %v4170_v24 }
 0x742   : > { %3990 = vst.msk [vmem:[%s11550_s27 + $0x8] sm:$0xff] %vm14991_vm6, %v3943_v25  ;;  %v4110_v25 = vadd.f32 %v12254_v61, %v12436_v18  ;;  %v12532_v18 = vsel %vm15696_vm15, %v4198_v13, -1e+30  ;;  %v12542_v13 = vsel %vm15701_vm9, %v4202_v38, -1e+30  ;;  %vm15703_vm15 = vcmask 523520  }
 0x743   : > { %v4268_v53 = vmax.f32 %v12528_v31, %v12532_v18  ;;  %15702 = vst [vmem:[#allocation53_spill] sm:$0xff] %v12542_v13  ;;  %vm15704_vm13 = vmmov %vm15703_vm15  ;;  %vm15709_vm9 = vnez %v15708_v58 }
 0x744   : > { %v4174_v32 = vmul.f32 0.2, %v4110_v25  ;;  %vm4142_vm7 = vcmp.gt.f32.partialorder %v4110_v25, 0.0 }
 0x745   : > { %v3945_v54 = vpop.permute.xlu0 %3944 }
 0x746   : > { %3991 = vst.msk [vmem:[%s11550_s27 + $0x10] sm:$0xff] %vm14991_vm6, %v3945_v54  ;;  %v4173_v54 = vmul.f32 0.2, %v4109_v43  ;;  %v4206_v40 = vsel %vm4142_vm7, %v4110_v25, %v4174_v32  ;;  %vm15713_vm7 = vmmov %vm15704_vm13 }
 0x747   : > { %v3947_v57 = vpop.permute.xlu1 %3946  ;;  %v12556_v38 = vsel %vm15709_vm9, %v4206_v40, -1e+30 }
 0x748   : > { %3992 = vst.msk [vmem:[%s11550_s27 + $0x18] sm:$0xff] %vm14991_vm6, %v3947_v57  ;;  %vm15698_vm6 = vnez %v15697_v19  ;;  %v4205_v22 = vsel %vm4141_vm14, %v4109_v43, %v4173_v54  ;;  %15710 = vst [vmem:[#allocation6_spill] sm:$0xff] %v12556_v38  ;;  %v3920_v43 = vadd.f32 %v12258_v1, %v12388_v10  ;;  %v4818_v10 = vadd.f32 %v12302_v49, %v12400_v44  ;;  %v15722_v19 = vld [vmem:[#allocation86_spill] sm:$0xff] }
 0x749   : > { %v12538_v16 = vsel %vm15698_vm6, %v4201_v7, -1e+30  ;;  %vm15712_vm14 = vmmov %vm15704_vm13  ;;  %vm15744_vm6 = vcmask 523520  }
 0x74a   : > { %4263 = vmax.xlane.f32.xlu1 %v4262_v39  ;;  %15699 = vst [vmem:[#allocation43_spill] sm:$0xff] %v12538_v16  ;;  %v4274_v24 = vmax.f32 %v12538_v16, %v12542_v13  ;;  %v15705_v39 = vld [vmem:[#allocation29_spill] sm:$0xff]  ;;  %vm4850_vm9 = vcmp.gt.f32.partialorder %v4818_v10, 0.0  ;;  %v4100_v13 = vadd.f32 %v12254_v61, %v12282_v14 }
 0x74b   : > { %vm15706_vm8 = vnez %v15705_v39 }
 0x74c   : > { %v12552_v7 = vsel %vm15706_vm8, %v4205_v22, -1e+30  ;;  %v15714_v22 = vld [vmem:[#allocation55_spill] sm:$0xff] }
 0x74d   : > { %v3949_v57 = vpop.permute.xlu0 %3948  ;;  %15707 = vst [vmem:[#allocation64_spill] sm:$0xff] %v12552_v7  ;;  %v4280_v25 = vmax.f32 %v12552_v7, %v12556_v38 }
 0x74e   : > { %3993 = vst.msk [vmem:[%s11550_s27 + $0x20] sm:$0xff] %vm15703_vm15, %v3949_v57  ;;  %4269 = vmax.xlane.f32.xlu1 %v4268_v53  ;;  %vm15711_vm15 = vmmov %vm15704_vm13  ;;  %v4817_v57 = vadd.f32 %v12299_v63, %v12400_v44 }
 0x74f   : > { %v3951_v11 = vpop.permute.xlu1 %3950 }
 0x750   : > { %3994 = vst.msk [vmem:[%s11550_s27 + $0x28] sm:$0xff] %vm15704_vm13, %v3951_v11  ;;  %v4881_v40 = vmul.f32 0.2, %v4817_v57  ;;  %v4882_v11 = vmul.f32 0.2, %v4818_v10  ;;  %vm4849_vm13 = vcmp.gt.f32.partialorder %v4817_v57, 0.0 }
 0x752   : > { %4275 = vmax.xlane.f32.xlu1 %v4274_v24  ;;  %v15715_v24 = vld [vmem:[#allocation77_spill] sm:$0xff] }
 0x755   : > { %v3953_v54 = vpop.permute.xlu0 %3952  ;;  %3964 = vrot.lane.b32.xlu0 %v3920_v43, %s9469_s21  ;;  %v4913_v43 = vsel %vm4849_vm13, %v4817_v57, %v4881_v40  ;;  %v15723_v57 = vld [vmem:[#allocation44_spill] sm:$0xff] }
 0x756   : > { %3995 = vst.msk [vmem:[%s11550_s27 + $0x30] sm:$0xff] %vm15711_vm15, %v3953_v54  ;;  %4281 = vmax.xlane.f32.xlu1 %v4280_v25  ;;  %v4914_v25 = vsel %vm4850_vm9, %v4818_v10, %v4882_v11  ;;  %v15716_v54 = vld [vmem:[#allocation83_spill] sm:$0xff]  ;;  %v15724_v10 = vld [vmem:[#allocation76_spill] sm:$0xff]  ;;  %vm15731_vm9 = vmmov %vm15713_vm7 }
 0x757   : > { %v3955_v32 = vpop.permute.xlu1 %3954  ;;  %v12582_v39 = vsel %vm15613_vm2, %v4914_v25, -1e+30  ;;  %v15725_v40 = vld [vmem:[#allocation32_spill] sm:$0xff]  ;;  %v15726_v11 = vld [vmem:[#allocation59_spill] sm:$0xff]  ;;  %vm15733_vm15 = vmmov %vm15713_vm7 }
 0x758   : > { %3996 = vst.msk [vmem:[%s11550_s27 + $0x38] sm:$0xff] %vm15712_vm14, %v3955_v32  ;;  %15720 = vst [vmem:[#allocation51_spill] sm:$0xff] %v12582_v39  ;;  %v15728_v25 = vld [vmem:[#allocation39_spill] sm:$0xff] }
 0x759   : > { %vm15734_vm13 = vmmov %vm15731_vm9 }
 0x75a   : > { %vm15736_vm8 = vmmov %vm15734_vm13 }
 0x75d   : > { %v3957_v53 = vpop.permute.xlu0 %3956 }
 0x75e   : > { %3997 = vst.msk [vmem:[%s11550_s27 + $0x40] sm:$0xff] %vm15713_vm7, %v3957_v53  ;;  %v12578_v53 = vsel %vm15611_vm3, %v4913_v43, -1e+30  ;;  %v15727_v43 = vld [vmem:[#allocation82_spill] sm:$0xff] }
 0x75f   : > { %15718 = vst [vmem:[#allocation50_spill] sm:$0xff] %v12578_v53  ;;  %v4980_v44 = vmax.f32 %v12578_v53, %v12582_v39  ;;  %v4823_v39 = vadd.f32 %v12299_v63, %v12430_v30  ;;  %v4164_v53 = vmul.f32 0.2, %v4100_v13 }
 0x767   : > { %5602 = vperm.xlu1 %8415, %v15714_v22   ;;  %v15721_v22 = vld [vmem:[#allocation72_spill] sm:$0xff] }
 0x76b   : > { %6326 = vperm.xlu1 %8415, %v15715_v24   ;;  %v3922_v24 = vadd.f32 %v12258_v1, %v12402_v62  ;;  %v4096_v1 = vadd.f32 %v12254_v61, %v12266_v15 }
 0x76d   : > { %vm4128_vm7 = vcmp.gt.f32.partialorder %v4096_v1, 0.0 }
 0x76f   : > { %6330 = vperm.xlu1 %8415, %v15716_v54  }
 0x773   : > { %5614 = vperm.xlu1 %8415, %v15721_v22  }
 0x774   : > { %4981 = vmax.xlane.f32.xlu0 %v4980_v44  ;;  %v15730_v44 = vld [vmem:[#allocation84_spill] sm:$0xff] }
 0x777   : > { %6338 = vperm.xlu1 %8415, %v15722_v19   ;;  %v15729_v19 = vld [vmem:[#allocation75_spill] sm:$0xff] }
 0x77b   : > { %5618 = vperm.xlu1 %8415, %v15723_v57   ;;  %v4095_v57 = vadd.f32 %v12251_v35, %v12266_v15 }
 0x77d   : > { %vm4127_vm14 = vcmp.gt.f32.partialorder %v4095_v57, 0.0 }
 0x77f   : > { %6342 = vperm.xlu1 %8415, %v15724_v10   ;;  %v15732_v10 = vld [vmem:[#allocation103_spill] sm:$0xff] }
 0x783   : > { %6346 = vperm.xlu1 %8415, %v15725_v40  }
 0x787   : > { %5626 = vperm.xlu1 %8415, %v15726_v11   ;;  %v4819_v11 = vadd.f32 %v12299_v63, %v12414_v33 }
 0x78a   : > { %3968 = vrot.lane.b32.xlu0 %v3922_v24, %s9469_s21  ;;  %v4820_v24 = vadd.f32 %v12302_v49, %v12414_v33  ;;  %v4822_v33 = vadd.f32 %v12302_v49, %v12404_v59 }
 0x78b   : > { %6350 = vperm.xlu1 %8415, %v15727_v43   ;;  %v4159_v43 = vmul.f32 0.2, %v4095_v57 }
 0x78d   : > { %v4191_v38 = vsel %vm4127_vm14, %v4095_v57, %v4159_v43  ;;  %v15741_v57 = vld [vmem:[#allocation16_spill] sm:$0xff] }
 0x78e   : > { %vm15742_vm14 = vnez %v15741_v57  ;;  %v15745_v57 = vld [vmem:[#allocation68_spill] sm:$0xff] }
 0x78f   : > { %6354 = vperm.xlu1 %8415, %v15728_v25   ;;  %v4160_v25 = vmul.f32 0.2, %v4096_v1 }
 0x793   : > { %5634 = vperm.xlu1 %8415, %v15729_v19   ;;  %v15735_v19 = vld [vmem:[#allocation48_spill] sm:$0xff] }
 0x796   : > { %v12598_v54 = vpop.xlane.xlu1 %4257 }
 0x797   : > { %6358 = vperm.xlu1 %8415, %v15730_v44   ;;  %v12601_v22 = vpop.xlane.xlu0 %4254  ;;  %v4883_v44 = vmul.f32 0.2, %v4819_v11 }
 0x79a   : > { %v3959_v62 = vpop.permute.xlu1 %3958 }
 0x79b   : > { %3998 = vst.msk [vmem:[%s11550_s27 + $0x48] sm:$0xff] %vm15731_vm9, %v3959_v62  ;;  %6362 = vperm.xlu1 %8415, %v15732_v10   ;;  %v3961_v40 = vpop.permute.xlu0 %3960  ;;  %v4884_v62 = vmul.f32 0.2, %v4820_v24  ;;  %v4821_v10 = vadd.f32 %v12299_v63, %v12404_v59  ;;  %vm4851_vm9 = vcmp.gt.f32.partialorder %v4819_v11, 0.0 }
 0x79c   : > { %3999 = vst.msk [vmem:[%s11550_s27 + $0x50] sm:$0xff] %vm15733_vm15, %v3961_v40  ;;  %v4192_v40 = vsel %vm4128_vm7, %v4096_v1, %v4160_v25  ;;  %vm4852_vm15 = vcmp.gt.f32.partialorder %v4820_v24, 0.0  ;;  %v4886_v25 = vmul.f32 0.2, %v4822_v33  ;;  %v4915_v16 = vsel %vm4851_vm9, %v4819_v11, %v4883_v44 }
 0x79d   : > { %v12636_v1 = vsel %vm15742_vm14, %v4192_v40, -1e+30  ;;  %v4885_v43 = vmul.f32 0.2, %v4821_v10  ;;  %vm4854_vm7 = vcmp.gt.f32.partialorder %v4822_v33, 0.0  ;;  %v4824_v40 = vadd.f32 %v12302_v49, %v12430_v30 }
 0x79e   : > { %v3963_v15 = vpop.permute.xlu1 %3962  ;;  %15743 = vst [vmem:[#allocation8_spill] sm:$0xff] %v12636_v1  ;;  %vm15746_vm9 = vnez %v15745_v57  ;;  %vm4132_vm14 = vcmp.gt.f32.partialorder %v4100_v13, 0.0 }
 0x79f   : > { %4000 = vst.msk [vmem:[%s11550_s27 + $0x58] sm:$0xff] %vm15734_vm13, %v3963_v15  ;;  %5642 = vperm.xlu1 %8415, %v15735_v19   ;;  %v15737_v15 = vld [vmem:[#allocation52_spill] sm:$0xff]  ;;  %v4099_v19 = vadd.f32 %v12251_v35, %v12282_v14  ;;  %vm15739_vm13 = vnez %v15738_v3  ;;  %v9382_v14 = vld [vmem:[%s10097_s22 + $0x58] sm:$0xff]  ;;  %v12649_v11 = vsel %vm15746_vm9, %v4915_v16, -1e+30  ;;  %v4918_v3 = vsel %vm4854_vm7, %v4822_v33, %v4886_v25  ;;  %v9384_v25 = vld [vmem:[%s10097_s22 + $0x60] sm:$0xff] }
 0x7a0   : > { %v12632_v59 = vsel %vm15739_vm13, %v4191_v38, -1e+30  ;;  %15747 = vst [vmem:[#allocation46_spill] sm:$0xff] %v12649_v11  ;;  %v4888_v16 = vmul.f32 0.2, %v4824_v40  ;;  %v4826_v33 = vadd.f32 %v12302_v49, %v12428_v23  ;;  %vm4856_vm7 = vcmp.gt.f32.partialorder %v4824_v40, 0.0 }
 0x7a1   : > { %15740 = vst [vmem:[#allocation7_spill] sm:$0xff] %v12632_v59  ;;  %v4259_v38 = vmax.f32 %v12632_v59, %v12636_v1  ;;  %v9383_v1 = vld [vmem:[%s9670_s23 + $0x60] sm:$0xff] }
 0x7a2   : > { %v3967_v7 = vpop.permute.xlu1 %3966  ;;  %v15751_v59 = vld [vmem:[#allocation74_spill] sm:$0xff] }
 0x7a3   : > { %4002 = vst.msk [vmem:[%s11550_s27 + $0x68] sm:$0xff] %vm15736_vm8, %v3967_v7  ;;  %6366 = vperm.xlu1 %8415, %v15737_v15   ;;  %v4916_v7 = vsel %vm4852_vm15, %v4820_v24, %v4884_v62  ;;  %vm4853_vm8 = vcmp.gt.f32.partialorder %v4821_v10, 0.0  ;;  %v15748_v24 = vld [vmem:[#allocation67_spill] sm:$0xff]  ;;  %v4163_v62 = vmul.f32 0.2, %v4099_v19  ;;  %vm15752_vm9 = vnez %v15751_v59 }
 0x7a4   : > { %vm15749_vm15 = vnez %v15748_v24 }
 0x7a5   : > { %v12653_v44 = vsel %vm15749_vm15, %v4916_v7, -1e+30  ;;  %v15754_v7 = vld [vmem:[#allocation69_spill] sm:$0xff] }
 0x7a6   : > { %v3971_v15 = vpop.permute.xlu1 %3970  ;;  %15750 = vst [vmem:[#allocation47_spill] sm:$0xff] %v12653_v44  ;;  %v4983_v30 = vmax.f32 %v12649_v11, %v12653_v44  ;;  %vm15755_vm15 = vnez %v15754_v7  ;;  %v15757_v44 = vld [vmem:[#allocation19_spill] sm:$0xff] }
 0x7a7   : > { %4004 = vst.msk [vmem:[%s11550_s27 + $0x78] sm:$0xff] %vm15744_vm6, %v3971_v15  ;;  %6370 = vperm.xlu1 %8415, %v9382_v14   ;;  %v4917_v15 = vsel %vm4853_vm8, %v4821_v10, %v4885_v43  ;;  %vm4131_vm6 = vcmp.gt.f32.partialorder %v4099_v19, 0.0  ;;  %v4887_v14 = vmul.f32 0.2, %v4823_v39  ;;  %v12664_v57 = vsel %vm15755_vm15, %v4918_v3, -1e+30 }
 0x7a8   : > { %v12660_v24 = vsel %vm15752_vm9, %v4917_v15, -1e+30  ;;  %15756 = vst [vmem:[#allocation71_spill] sm:$0xff] %v12664_v57  ;;  %v4825_v10 = vadd.f32 %v12299_v63, %v12428_v23  ;;  %v4196_v43 = vsel %vm4132_vm14, %v4100_v13, %v4164_v53  ;;  %vm4855_vm8 = vcmp.gt.f32.partialorder %v4823_v39, 0.0 }
 0x7a9   : > { %4260 = vmax.xlane.f32.xlu0 %v4259_v38  ;;  %15753 = vst [vmem:[#allocation70_spill] sm:$0xff] %v12660_v24  ;;  %v4986_v38 = vmax.f32 %v12660_v24, %v12664_v57  ;;  %v4103_v3 = vadd.f32 %v12251_v35, %v12296_v28  ;;  %v4104_v15 = vadd.f32 %v12254_v61, %v12296_v28  ;;  %vm4858_vm9 = vcmp.gt.f32.partialorder %v4826_v33, 0.0  ;;  %v9385_v28 = vld [vmem:[%s10097_s22 + $0x68] sm:$0xff] }
 0x7aa   : > { %vm15758_vm15 = vnez %v15757_v44  ;;  %v4889_v53 = vmul.f32 0.2, %v4825_v10  ;;  %v4827_v57 = vadd.f32 %v12299_v63, %v12434_v29  ;;  %v15763_v24 = vld [vmem:[#allocation79_spill] sm:$0xff] }
 0x7ab   : > { %5650 = vperm.xlu1 %8415, %v9383_v1   ;;  %v4195_v1 = vsel %vm4131_vm6, %v4099_v19, %v4163_v62  ;;  %v15760_v19 = vld [vmem:[#allocation20_spill] sm:$0xff]  ;;  %v4890_v62 = vmul.f32 0.2, %v4826_v33  ;;  %vm4857_vm6 = vcmp.gt.f32.partialorder %v4825_v10, 0.0 }
 0x7ac   : > { %v12679_v23 = vsel %vm15758_vm15, %v4195_v1, -1e+30  ;;  %vm15761_vm14 = vnez %v15760_v19  ;;  %vm4136_vm15 = vcmp.gt.f32.partialorder %v4104_v15, 0.0 }
 0x7ad   : > { %4984 = vmax.xlane.f32.xlu0 %v4983_v30  ;;  %15759 = vst [vmem:[#allocation73_spill] sm:$0xff] %v12679_v23  ;;  %v12683_v13 = vsel %vm15761_vm14, %v4196_v43, -1e+30  ;;  %v4919_v30 = vsel %vm4855_vm8, %v4823_v39, %v4887_v14  ;;  %v4828_v43 = vadd.f32 %v12302_v49, %v12434_v29  ;;  %vm15764_vm14 = vnez %v15763_v24  ;;  %v15766_v39 = vld [vmem:[#allocation78_spill] sm:$0xff] }
 0x7ae   : > { %15762 = vst [vmem:[#allocation55_spill] sm:$0xff] %v12683_v13  ;;  %v4265_v1 = vmax.f32 %v12679_v23, %v12683_v13  ;;  %v12694_v11 = vsel %vm15764_vm14, %v4919_v30, -1e+30  ;;  %vm15767_vm8 = vnez %v15766_v39  ;;  %v4167_v14 = vmul.f32 0.2, %v4103_v3  ;;  %v9386_v13 = vld [vmem:[%s9670_s23 + $0x70] sm:$0xff] }
 0x7af   : > { %6374 = vperm.xlu1 %8415, %v9384_v25   ;;  %v4920_v25 = vsel %vm4856_vm7, %v4824_v40, %v4888_v16  ;;  %15765 = vst [vmem:[#allocation77_spill] sm:$0xff] %v12694_v11  ;;  %v4168_v16 = vmul.f32 0.2, %v4104_v15  ;;  %v4922_v19 = vsel %vm4858_vm9, %v4826_v33, %v4890_v62  ;;  %vm4135_vm7 = vcmp.gt.f32.partialorder %v4103_v3, 0.0  ;;  %v15769_v23 = vld [vmem:[#allocation81_spill] sm:$0xff]  ;;  %v9387_v62 = vld [vmem:[%s10097_s22 + $0x70] sm:$0xff] }
 0x7b0   : > { %v12698_v40 = vsel %vm15767_vm8, %v4920_v25, -1e+30  ;;  %v4892_v30 = vmul.f32 0.2, %v4828_v43  ;;  %vm15770_vm14 = vnez %v15769_v23  ;;  %v15772_v25 = vld [vmem:[#allocation80_spill] sm:$0xff]  ;;  %v4830_v33 = vadd.f32 %v12302_v49, %v12432_v37 }
 0x7b1   : > { %4987 = vmax.xlane.f32.xlu0 %v4986_v38  ;;  %15768 = vst [vmem:[#allocation83_spill] sm:$0xff] %v12698_v40  ;;  %v4921_v38 = vsel %vm4857_vm6, %v4825_v10, %v4889_v53  ;;  %v4989_v29 = vmax.f32 %v12694_v11, %v12698_v40  ;;  %vm15773_vm8 = vnez %v15772_v25  ;;  %v4829_v10 = vadd.f32 %v12299_v63, %v12432_v37  ;;  %v15775_v40 = vld [vmem:[#allocation23_spill] sm:$0xff] }
 0x7b2   : > { %v12705_v39 = vsel %vm15770_vm14, %v4921_v38, -1e+30  ;;  %v12709_v24 = vsel %vm15773_vm8, %v4922_v19, -1e+30  ;;  %v4200_v53 = vsel %vm4136_vm15, %v4104_v15, %v4168_v16  ;;  %vm4859_vm9 = vcmp.gt.f32.partialorder %v4827_v57, 0.0 }
 0x7b3   : > { %6378 = vperm.xlu1 %8415, %v9385_v28   ;;  %v4891_v28 = vmul.f32 0.2, %v4827_v57  ;;  %15771 = vst [vmem:[#allocation60_spill] sm:$0xff] %v12705_v39  ;;  %15774 = vst [vmem:[#allocation58_spill] sm:$0xff] %v12709_v24  ;;  %vm4860_vm6 = vcmp.gt.f32.partialorder %v4828_v43, 0.0  ;;  %v4107_v19 = vadd.f32 %v12251_v35, %v12438_v50  ;;  %v4108_v38 = vadd.f32 %v12254_v61, %v12438_v50 }
 0x7b4   : > { %vm15776_vm8 = vnez %v15775_v40  ;;  %v4894_v16 = vmul.f32 0.2, %v4830_v33  ;;  %vm4862_vm14 = vcmp.gt.f32.partialorder %v4830_v33, 0.0 }
 0x7b5   : > { %4266 = vmax.xlane.f32.xlu0 %v4265_v1  ;;  %v4992_v1 = vmax.f32 %v12705_v39, %v12709_v24  ;;  %v4831_v24 = vadd.f32 %v12299_v63, %v12446_v46  ;;  %v9388_v39 = vld [vmem:[%s10097_s22 + $0x78] sm:$0xff] }
 0x7b7   : > { %5658 = vperm.xlu1 %8415, %v9386_v13   ;;  %v4199_v13 = vsel %vm4135_vm7, %v4103_v3, %v4167_v14  ;;  %v15778_v3 = vld [vmem:[#allocation24_spill] sm:$0xff]  ;;  %v4893_v14 = vmul.f32 0.2, %v4829_v10  ;;  %vm4861_vm7 = vcmp.gt.f32.partialorder %v4829_v10, 0.0 }
 0x7b8   : > { %v12724_v37 = vsel %vm15776_vm8, %v4199_v13, -1e+30  ;;  %vm15779_vm15 = vnez %v15778_v3  ;;  %v4832_v13 = vadd.f32 %v12302_v49, %v12446_v46  ;;  %v4926_v3 = vsel %vm4862_vm14, %v4830_v33, %v4894_v16 }
 0x7b9   : > { %4990 = vmax.xlane.f32.xlu0 %v4989_v29  ;;  %15777 = vst [vmem:[#allocation72_spill] sm:$0xff] %v12724_v37  ;;  %v12728_v15 = vsel %vm15779_vm15, %v4200_v53, -1e+30  ;;  %v4923_v29 = vsel %vm4859_vm9, %v4827_v57, %v4891_v28  ;;  %v15781_v53 = vld [vmem:[#allocation89_spill] sm:$0xff]  ;;  %v4172_v28 = vmul.f32 0.2, %v4108_v38 }
 0x7ba   : > { %15780 = vst [vmem:[#allocation86_spill] sm:$0xff] %v12728_v15  ;;  %v4271_v50 = vmax.f32 %v12724_v37, %v12728_v15  ;;  %vm15782_vm15 = vnez %v15781_v53  ;;  %vm4140_vm8 = vcmp.gt.f32.partialorder %v4108_v38, 0.0  ;;  %v4896_v46 = vmul.f32 0.2, %v4832_v13  ;;  %v15787_v37 = vld [vmem:[#allocation87_spill] sm:$0xff]  ;;  %v15790_v53 = vld [vmem:[#allocation85_spill] sm:$0xff] }
 0x7bb   : > { %6382 = vperm.xlu1 %8415, %v9387_v62   ;;  %v4924_v62 = vsel %vm4860_vm6, %v4828_v43, %v4892_v30  ;;  %v12739_v11 = vsel %vm15782_vm15, %v4923_v29, -1e+30  ;;  %v4171_v43 = vmul.f32 0.2, %v4107_v19  ;;  %v4925_v30 = vsel %vm4861_vm7, %v4829_v10, %v4893_v14 }
 0x7bc   : > { %15783 = vst [vmem:[#allocation44_spill] sm:$0xff] %v12739_v11  ;;  %vm4139_vm6 = vcmp.gt.f32.partialorder %v4107_v19, 0.0  ;;  %vm15788_vm13 = vnez %v15787_v37  ;;  %vm15791_vm15 = vnez %v15790_v53  ;;  %v4834_v10 = vadd.f32 %v12302_v49, %v12443_v48 }
 0x7bd   : > { %4993 = vmax.xlane.f32.xlu0 %v4992_v1  ;;  %v15784_v1 = vld [vmem:[#allocation88_spill] sm:$0xff]  ;;  %v12749_v29 = vsel %vm15788_vm13, %v4925_v30, -1e+30  ;;  %v4203_v33 = vsel %vm4139_vm6, %v4107_v19, %v4171_v43  ;;  %v4204_v14 = vsel %vm4140_vm8, %v4108_v38, %v4172_v28  ;;  %vm4863_vm14 = vcmp.gt.f32.partialorder %v4831_v24, 0.0  ;;  %v15793_v30 = vld [vmem:[#allocation27_spill] sm:$0xff] }
 0x7be   : > { %vm15785_vm9 = vnez %v15784_v1  ;;  %15789 = vst [vmem:[#allocation32_spill] sm:$0xff] %v12749_v29  ;;  %vm4864_vm7 = vcmp.gt.f32.partialorder %v4832_v13, 0.0  ;;  %vm15794_vm13 = vnez %v15793_v30  ;;  %v4898_v37 = vmul.f32 0.2, %v4834_v10  ;;  %v15799_v43 = vld [vmem:[#allocation91_spill] sm:$0xff] }
 0x7bf   : > { %6386 = vperm.xlu1 %8415, %v9388_v39   ;;  %v12743_v57 = vsel %vm15785_vm9, %v4924_v62, -1e+30  ;;  %v4895_v39 = vmul.f32 0.2, %v4831_v24  ;;  %v12753_v62 = vsel %vm15791_vm15, %v4926_v3, -1e+30  ;;  %v4928_v19 = vsel %vm4864_vm7, %v4832_v13, %v4896_v46 }
 0x7c0   : > { %15786 = vst [vmem:[#allocation76_spill] sm:$0xff] %v12743_v57  ;;  %v4995_v15 = vmax.f32 %v12739_v11, %v12743_v57  ;;  %15792 = vst [vmem:[#allocation59_spill] sm:$0xff] %v12753_v62  ;;  %v4998_v16 = vmax.f32 %v12749_v29, %v12753_v62  ;;  %v12763_v57 = vsel %vm15794_vm13, %v4203_v33, -1e+30  ;;  %v15796_v3 = vld [vmem:[#allocation28_spill] sm:$0xff]  ;;  %vm4866_vm6 = vcmp.gt.f32.partialorder %v4834_v10, 0.0 }
 0x7c1   : > { %4272 = vmax.xlane.f32.xlu0 %v4271_v50  ;;  %v4833_v50 = vadd.f32 %v12299_v63, %v12443_v48  ;;  %15795 = vst [vmem:[#allocation82_spill] sm:$0xff] %v12763_v57  ;;  %vm15797_vm15 = vnez %v15796_v3  ;;  %v4927_v48 = vsel %vm4863_vm14, %v4831_v24, %v4895_v39  ;;  %vm15800_vm13 = vnez %v15799_v43  ;;  %v15802_v33 = vld [vmem:[#allocation90_spill] sm:$0xff]  ;;  %v15993_v1 = vld [vmem:[#allocation27_spill] sm:$0xff] }
 0x7c2   : > { %v12767_v11 = vsel %vm15797_vm15, %v4204_v14, -1e+30  ;;  %v12775_v28 = vsel %vm15800_vm13, %v4927_v48, -1e+30  ;;  %vm15803_vm15 = vnez %v15802_v33  ;;  %v4930_v62 = vsel %vm4866_vm6, %v4834_v10, %v4898_v37 }
 0x7c3   : > { %15798 = vst [vmem:[#allocation39_spill] sm:$0xff] %v12767_v11  ;;  %v4897_v53 = vmul.f32 0.2, %v4833_v50  ;;  %vm4865_vm8 = vcmp.gt.f32.partialorder %v4833_v50, 0.0  ;;  %v4277_v38 = vmax.f32 %v12763_v57, %v12767_v11  ;;  %15801 = vst [vmem:[#allocation75_spill] sm:$0xff] %v12775_v28  ;;  %vm15809_vm14 = vcmask 523520  }
 0x7c4   : > { %v12779_v14 = vsel %vm15803_vm15, %v4928_v19, -1e+30  ;;  %v12789_v57 = vsel %vm15629_vm0, %v4930_v62, -1e+30  ;;  %v4113_v48 = vadd.f32 %v12251_v35, %v12453_v36  ;;  %v4114_v37 = vadd.f32 %v12254_v61, %v12453_v36  ;;  %v15813_v11 = vld [vmem:[#allocation35_spill] sm:$0xff] }
 0x7c5   : > { %4996 = vmax.xlane.f32.xlu0 %v4995_v15  ;;  %15804 = vst [vmem:[#allocation84_spill] sm:$0xff] %v12779_v14  ;;  %v5001_v24 = vmax.f32 %v12775_v28, %v12779_v14  ;;  %15808 = vst [vmem:[#allocation48_spill] sm:$0xff] %v12789_v57  ;;  %v4116_v62 = vadd.f32 %v12254_v61, %v12468_v45  ;;  %v4839_v36 = vadd.f32 %v12299_v63, %v12472_v26  ;;  %v15810_v28 = vld [vmem:[#allocation34_spill] sm:$0xff] }
 0x7c6   : > { %v4177_v10 = vmul.f32 0.2, %v4113_v48  ;;  %v4178_v19 = vmul.f32 0.2, %v4114_v37  ;;  %vm4145_vm7 = vcmp.gt.f32.partialorder %v4113_v48, 0.0  ;;  %v5671_v14 = vsub.s32 7, %v15576_v21 }
 0x7c7   : > { %vm15811_vm0 = vnez %v15810_v28  ;;  %v4903_v33 = vmul.f32 0.2, %v4839_v36  ;;  %v15819_v28 = vld [vmem:[#allocation41_spill] sm:$0xff] }
 0x7c9   : > { %4999 = vmax.xlane.f32.xlu0 %v4998_v16  ;;  %v4929_v16 = vsel %vm4865_vm8, %v4833_v50, %v4897_v53  ;;  %v4115_v50 = vadd.f32 %v12251_v35, %v12468_v45  ;;  %vm4146_vm8 = vcmp.gt.f32.partialorder %v4114_v37, 0.0  ;;  %v5667_v45 = vsub.s32 3, %v15576_v21  ;;  %v9389_v21 = vld [vmem:[%s14647_s2] sm:$0xff] }
 0x7ca   : > { %v12785_v46 = vsel %vm15627_vm12, %v4929_v16, -1e+30  ;;  %vm15814_vm12 = vnez %v15813_v11  ;;  %v15816_v11 = vld [vmem:[#allocation38_spill] sm:$0xff] }
 0x7cb   : > { %15806 = vst [vmem:[#allocation103_spill] sm:$0xff] %v12785_v46  ;;  %v5004_v53 = vmax.f32 %v12785_v46, %v12789_v57  ;;  %v4179_v16 = vmul.f32 0.2, %v4115_v50  ;;  %v4209_v57 = vsel %vm4145_vm7, %v4113_v48, %v4177_v10  ;;  %v4210_v46 = vsel %vm4146_vm8, %v4114_v37, %v4178_v19 }
 0x7cc   : > { %v12771_v15 = vpop.xlane.xlu0 %4978  ;;  %vm4147_vm6 = vcmp.gt.f32.partialorder %v4115_v50, 0.0  ;;  %v12815_v29 = vsel %vm15811_vm0, %v4209_v57, -1e+30  ;;  %v12819_v39 = vsel %vm15814_vm12, %v4210_v46, -1e+30  ;;  %vm4871_vm7 = vcmp.gt.f32.partialorder %v4839_v36, 0.0 }
 0x7cd   : > { %4278 = vmax.xlane.f32.xlu0 %v4277_v38  ;;  %15812 = vst [vmem:[#allocation52_spill] sm:$0xff] %v12815_v29  ;;  %15815 = vst [vmem:[#allocation74_spill] sm:$0xff] %v12819_v39  ;;  %v4211_v48 = vsel %vm4147_vm6, %v4115_v50, %v4179_v16  ;;  %v5668_v10 = vrot.slane %v9389_v21, %v5667_v45  ;;  %v5672_v19 = vrot.slane %v9389_v21, %v5671_v14  ;;  %v9390_v21 = vld [vmem:[%s14650_s5] sm:$0xff] }
 0x7ce   : > { %v4286_v57 = vmax.f32 %v12815_v29, %v12819_v39  ;;  %vm15817_vm12 = vnez %v15816_v11  ;;  %vm15820_vm0 = vnez %v15819_v28  ;;  %v6392_v39 = vrot.slane %v9390_v21, %v5667_v45  ;;  %v15822_v29 = vld [vmem:[#allocation98_spill] sm:$0xff] }
 0x7cf   : > { %v12830_v46 = vsel %vm15817_vm12, %v4211_v48, -1e+30  ;;  %v12840_v30 = vrot.slane %v5672_v19, %v5667_v45  ;;  %v6396_v48 = vrot.slane %v9390_v21, %v5671_v14  ;;  %vm15823_vm6 = vnez %v15822_v29 }
 0x7d0   : > { %v3965_v13 = vpop.permute.xlu0 %3964  ;;  %15818 = vst [vmem:[#allocation69_spill] sm:$0xff] %v12830_v46  ;;  %v12857_v19 = vrot.slane %v6392_v39, %v5667_v45 }
 0x7d1   : > { %4001 = vst.msk [vmem:[%s11550_s27 + $0x60] sm:$0xff] %vm15809_vm14, %v3965_v13  ;;  %5002 = vmax.xlane.f32.xlu0 %v5001_v24  ;;  %v4180_v24 = vmul.f32 0.2, %v4116_v62  ;;  %v4840_v13 = vadd.f32 %v12302_v49, %v12472_v26  ;;  %vm4148_vm14 = vcmp.gt.f32.partialorder %v4116_v62, 0.0  ;;  %v12859_v14 = vrot.slane %v6396_v48, %v5667_v45 }
 0x7d3   : > { %v4904_v26 = vmul.f32 0.2, %v4840_v13  ;;  %v4212_v37 = vsel %vm4148_vm14, %v4116_v62, %v4180_v24  ;;  %vm4872_vm8 = vcmp.gt.f32.partialorder %v4840_v13, 0.0  ;;  %v4935_v62 = vsel %vm4871_vm7, %v4839_v36, %v4903_v33  ;;  %v15825_v33 = vld [vmem:[#allocation99_spill] sm:$0xff] }
 0x7d4   : > { %v12834_v3 = vsel %vm15820_vm0, %v4212_v37, -1e+30  ;;  %v12838_v24 = vrot.slane %v5668_v10, %v5667_v45  ;;  %vm15826_vm14 = vnez %v15825_v33 }
 0x7d5   : > { %5005 = vmax.xlane.f32.xlu0 %v5004_v53  ;;  %15821 = vst [vmem:[#allocation19_spill] sm:$0xff] %v12834_v3  ;;  %v4936_v16 = vsel %vm4872_vm8, %v4840_v13, %v4904_v26  ;;  %v4289_v37 = vmax.f32 %v12830_v46, %v12834_v3 }
 0x7d6   : > { %v12853_v36 = vsel %vm15826_vm14, %v4936_v16, -1e+30  ;;  %v9391_v16 = vld [vmem:[%s9670_s23 + $0x8] sm:$0xff] }
 0x7d7   : > { %v12803_v38 = vpop.xlane.xlu1 %4263  ;;  %15827 = vst [vmem:[#allocation80_spill] sm:$0xff] %v12853_v36 }
 0x7db   : > { %v12809_v53 = vpop.xlane.xlu1 %4269 }
 0x7df   : > { %v12821_v43 = vpop.xlane.xlu1 %4275 }
 0x7e3   : > { %4287 = vmax.xlane.f32.xlu1 %v4286_v57  ;;  %v12836_v50 = vpop.xlane.xlu1 %4281  ;;  %v12849_v57 = vsel %vm15823_vm6, %v4935_v62, -1e+30 }
 0x7e4   : > { %15824 = vst [vmem:[#allocation81_spill] sm:$0xff] %v12849_v57  ;;  %v5013_v21 = vmax.f32 %v12849_v57, %v12853_v36  ;;  %v9392_v57 = vld [vmem:[%s9670_s23 + $0x10] sm:$0xff] }
 0x7e7   : > { %4290 = vmax.xlane.f32.xlu1 %v4289_v37  ;;  %v5603_v13 = vpop.permute.xlu1 %5602 }
 0x7e8   : > { %v5683_v26 = vadd.f32 %v12838_v24, %v5603_v13  ;;  %v5684_v10 = vadd.f32 %v12840_v30, %v5603_v13 }
 0x7ea   : > { %vm5715_vm7 = vcmp.gt.f32.partialorder %v5683_v26, 0.0  ;;  %vm5716_vm8 = vcmp.gt.f32.partialorder %v5684_v10, 0.0  ;;  %v5747_v62 = vmul.f32 0.2, %v5683_v26  ;;  %v5748_v3 = vmul.f32 0.2, %v5684_v10 }
 0x7eb   : > { %5606 = vperm.xlu0 %8416, %v9391_v16   ;;  %5014 = vmax.xlane.f32.xlu1 %v5013_v21  ;;  %v6327_v37 = vpop.permute.xlu1 %6326 }
 0x7ec   : > { %v6407_v46 = vadd.f32 %v12857_v19, %v6327_v37  ;;  %v6408_v13 = vadd.f32 %v12859_v14, %v6327_v37  ;;  %v5779_v39 = vsel %vm5715_vm7, %v5683_v26, %v5747_v62  ;;  %v5780_v45 = vsel %vm5716_vm8, %v5684_v10, %v5748_v3  ;;  %v9393_v62 = vld [vmem:[%s10097_s22 + $0x10] sm:$0xff]  ;;  %v9395_v37 = vld [vmem:[%s9670_s23 + $0x38] sm:$0xff] }
 0x7ed   : > { %v12868_v48 = vsel %vm15660_vm10, %v5779_v39, -1e+30  ;;  %v12872_v36 = vsel %vm15662_vm11, %v5780_v45, -1e+30  ;;  %v9398_v45 = vld [vmem:[%s9670_s23 + $0x68] sm:$0xff] }
 0x7ee   : > { %15828 = vst [vmem:[#allocation23_spill] sm:$0xff] %v12868_v48  ;;  %15829 = vst [vmem:[#allocation88_spill] sm:$0xff] %v12872_v36  ;;  %vm6439_vm14 = vcmp.gt.f32.partialorder %v6407_v46, 0.0  ;;  %vm6440_vm6 = vcmp.gt.f32.partialorder %v6408_v13, 0.0  ;;  %v6471_v21 = vmul.f32 0.2, %v6407_v46  ;;  %v5843_v3 = vmax.f32 %v12868_v48, %v12872_v36 }
 0x7ef   : > { %v6472_v16 = vmul.f32 0.2, %v6408_v13  ;;  %5610 = vperm.xlu0 %8416, %v9392_v57  }
 0x7f0   : > { %v6503_v26 = vsel %vm6439_vm14, %v6407_v46, %v6471_v21  ;;  %5844 = vmax.xlane.f32.xlu1 %v5843_v3  ;;  %v9394_v46 = vld [vmem:[%s9670_s23 + $0x28] sm:$0xff]  ;;  %v9399_v21 = vld [vmem:[%s9670_s23 + $0x78] sm:$0xff]  ;;  %v4112_v3 = vadd.f32 %v12254_v61, %v12456_v41  ;;  %s9405_s23 = sshll.u32 %s9472_s14, 4  ;;  %s9406_s23 = int_to_ptr.vmem [resolvable:$false] %s9405_s23 }
 0x7f1   : > { %v6504_v8 = vsel %vm6440_vm6, %v6408_v13, %v6472_v16  ;;  %v12879_v12 = vsel %vm15607_vm1, %v6503_v26, -1e+30  ;;  %vm15832_vm1 = vcmask 523520   ;;  %v4111_v16 = vadd.f32 %v12251_v35, %v12456_v41  ;;  %s9407_s22 = scalar_lea.vmem %s9406_s23, 4096 }
 0x7f2   : > { %15830 = vst [vmem:[#allocation104_spill] sm:$0xff] %v12879_v12  ;;  %v12883_v10 = vsel %vm15609_vm5, %v6504_v8, -1e+30  ;;  %v4835_v26 = vadd.f32 %v12299_v63, %v12462_v51  ;;  %v4836_v8 = vadd.f32 %v12302_v49, %v12462_v51  ;;  %vm4144_vm10 = vcmp.gt.f32.partialorder %v4112_v3, 0.0 }
 0x7f3   : > { %15831 = vst [vmem:[#allocation105_spill] sm:$0xff] %v12883_v10  ;;  %6334 = vperm.xlu0 %8416, %v9393_v62   ;;  %v6567_v57 = vmax.f32 %v12879_v12, %v12883_v10  ;;  %v4175_v62 = vmul.f32 0.2, %v4111_v16  ;;  %vm4143_vm5 = vcmp.gt.f32.partialorder %v4111_v16, 0.0  ;;  %v4118_v51 = vadd.f32 %v12254_v61, %v12464_v17  ;;  %v15836_v12 = vld [vmem:[#allocation33_spill] sm:$0xff]  ;;  %v15839_v61 = vld [vmem:[#allocation94_spill] sm:$0xff] }
 0x7f4   : > { %vm4867_vm11 = vcmp.gt.f32.partialorder %v4835_v26, 0.0  ;;  %vm4868_vm6 = vcmp.gt.f32.partialorder %v4836_v8, 0.0  ;;  %vm15837_vm7 = vnez %v15836_v12 }
 0x7f5   : > { %6568 = vmax.xlane.f32.xlu1 %v6567_v57  ;;  %v4176_v57 = vmul.f32 0.2, %v4112_v3 }
 0x7f7   : > { %5622 = vperm.xlu0 %8416, %v9394_v46   ;;  %v4899_v46 = vmul.f32 0.2, %v4835_v26  ;;  %v4208_v41 = vsel %vm4144_vm10, %v4112_v3, %v4176_v57  ;;  %v4182_v57 = vmul.f32 0.2, %v4118_v51 }
 0x7f8   : > { %v12920_v36 = vsel %vm15837_vm7, %v4208_v41, -1e+30  ;;  %v4841_v41 = vadd.f32 %v12299_v63, %v12470_v55 }
 0x7f9   : > { %15838 = vst [vmem:[#allocation107_spill] sm:$0xff] %v12920_v36 }
 0x7fb   : > { %5630 = vperm.xlu0 %8416, %v9395_v37   ;;  %v4900_v37 = vmul.f32 0.2, %v4836_v8 }
 0x7fd   : > { %v4932_v3 = vsel %vm4868_vm6, %v4836_v8, %v4900_v37  ;;  %vm4150_vm6 = vcmp.gt.f32.partialorder %v4118_v51, 0.0 }
 0x7ff   : > { %5638 = vperm.xlu0 %8416, %v9396_v47   ;;  %v4837_v47 = vadd.f32 %v12299_v63, %v12460_v27  ;;  %v4905_v63 = vmul.f32 0.2, %v4841_v41 }
 0x801   : > { %v12891_v13 = vpop.xlane.xlu0 %4981  ;;  %v4901_v48 = vmul.f32 0.2, %v4837_v47  ;;  %vm4869_vm8 = vcmp.gt.f32.partialorder %v4837_v47, 0.0 }
 0x803   : > { %5646 = vperm.xlu0 %8416, %v9397_v5   ;;  %v4838_v5 = vadd.f32 %v12302_v49, %v12460_v27  ;;  %v4933_v8 = vsel %vm4869_vm8, %v4837_v47, %v4901_v48  ;;  %vm4873_vm8 = vcmp.gt.f32.partialorder %v4841_v41, 0.0  ;;  %v15850_v47 = vld [vmem:[#allocation42_spill] sm:$0xff] }
 0x804   : > { %vm15851_vm12 = vnez %v15850_v47 }
 0x805   : > { %v3969_v39 = vpop.permute.xlu0 %3968  ;;  %v4902_v27 = vmul.f32 0.2, %v4838_v5 }
 0x806   : > { %4003 = vst.msk [vmem:[%s11550_s27 + $0x70] sm:$0xff] %vm15832_vm1, %v3969_v39  ;;  %v4207_v39 = vsel %vm4143_vm5, %v4111_v16, %v4175_v62  ;;  %v4931_v16 = vsel %vm4867_vm11, %v4835_v26, %v4899_v46  ;;  %vm4870_vm1 = vcmp.gt.f32.partialorder %v4838_v5, 0.0  ;;  %vm15840_vm5 = vnez %v15839_v61 }
 0x807   : > { %5654 = vperm.xlu0 %8416, %v9398_v45   ;;  %v4117_v45 = vadd.f32 %v12251_v35, %v12464_v17  ;;  %v12926_v17 = vsel %vm15840_vm5, %v4931_v16, -1e+30  ;;  %v4842_v26 = vadd.f32 %v12302_v49, %v12470_v55  ;;  %v4934_v46 = vsel %vm4870_vm1, %v4838_v5, %v4902_v27  ;;  %v15853_v27 = vld [vmem:[#allocation45_spill] sm:$0xff] }
 0x808   : > { %15841 = vst [vmem:[#allocation108_spill] sm:$0xff] %v12926_v17  ;;  %v4214_v55 = vsel %vm4150_vm6, %v4118_v51, %v4182_v57  ;;  %v15856_v51 = vld [vmem:[#allocation101_spill] sm:$0xff]  ;;  %v15859_v57 = vld [vmem:[#allocation100_spill] sm:$0xff] }
 0x809   : > { %v4181_v62 = vmul.f32 0.2, %v4117_v45  ;;  %vm4149_vm11 = vcmp.gt.f32.partialorder %v4117_v45, 0.0  ;;  %v4906_v29 = vmul.f32 0.2, %v4842_v26  ;;  %vm4874_vm1 = vcmp.gt.f32.partialorder %v4842_v26, 0.0 }
 0x80a   : > { %vm15860_vm6 = vnez %v15859_v57 }
 0x80b   : > { %5662 = vperm.xlu0 %8416, %v9399_v21   ;;  %v15833_v21 = vld [vmem:[#allocation31_spill] sm:$0xff]  ;;  %v4213_v49 = vsel %vm4149_vm11, %v4117_v45, %v4181_v62  ;;  %vm15857_vm11 = vnez %v15856_v51 }
 0x80c   : > { %vm15834_vm14 = vnez %v15833_v21  ;;  %v12950_v5 = vsel %vm15851_vm12, %v4213_v49, -1e+30 }
 0x80d   : > { %v12916_v10 = vsel %vm15834_vm14, %v4207_v39, -1e+30  ;;  %v15842_v39 = vld [vmem:[#allocation95_spill] sm:$0xff]  ;;  %15852 = vst [vmem:[#allocation112_spill] sm:$0xff] %v12950_v5 }
 0x80e   : > { %15835 = vst [vmem:[#allocation106_spill] sm:$0xff] %v12916_v10  ;;  %v4283_v35 = vmax.f32 %v12916_v10, %v12920_v36  ;;  %vm15843_vm10 = vnez %v15842_v39  ;;  %v12940_v36 = vsel %vm10563_vm4, %v4933_v8, -1e+30  ;;  %vm15854_vm4 = vnez %v15853_v27 }
 0x80f   : > { %v12930_v33 = vsel %vm15843_vm10, %v4932_v3, -1e+30  ;;  %15846 = vst [vmem:[#allocation110_spill] sm:$0xff] %v12940_v36  ;;  %v15847_v3 = vld [vmem:[#allocation96_spill] sm:$0xff]  ;;  %v4937_v8 = vsel %vm4873_vm8, %v4841_v41, %v4905_v63  ;;  %v6331_v41 = vpop.permute.xlu1 %6330  ;;  %v4297_v63 = vsub.f32 %v12274_v2, %v12476_v4 }
 0x810   : > { %15844 = vst [vmem:[#allocation109_spill] sm:$0xff] %v12930_v33  ;;  %v5007_v37 = vmax.f32 %v12926_v17, %v12930_v33  ;;  %vm15848_vm0 = vnez %v15847_v3  ;;  %v12960_v62 = vsel %vm15857_vm11, %v4937_v8, -1e+30  ;;  %v4298_v8 = vsub.f32 %v12278_v60, %v12476_v4  ;;  %v15864_v60 = vld [vmem:[#allocation102_spill] sm:$0xff] }
 0x811   : > { %v12944_v10 = vsel %vm15848_vm0, %v4934_v46, -1e+30  ;;  %v4938_v46 = vsel %vm4874_vm1, %v4842_v26, %v4906_v29  ;;  %15858 = vst [vmem:[#allocation114_spill] sm:$0xff] %v12960_v62 }
 0x812   : > { %15849 = vst [vmem:[#allocation111_spill] sm:$0xff] %v12944_v10  ;;  %v5010_v48 = vmax.f32 %v12940_v36, %v12944_v10  ;;  %v4333_v2 = vmul.f32 1.442695, %v4298_v8  ;;  %v15863_v36 = vld [vmem:[#allocation66_spill] sm:$0xff] }
 0x813   : > { %v5021_v4 = vsub.f32 %v15864_v60, %v15863_v36 }
 0x82a   : > { %4284 = vmax.xlane.f32.xlu0 %v4283_v35  ;;  %v12954_v35 = vsel %vm15854_vm4, %v4214_v55, -1e+30 }
 0x82b   : > { %15855 = vst [vmem:[#allocation113_spill] sm:$0xff] %v12954_v35  ;;  %v4292_v45 = vmax.f32 %v12950_v5, %v12954_v35  ;;  %v4331_v35 = vmul.f32 1.442695, %v4297_v63  ;;  %v5020_v5 = vsub.f32 %v12336_v42, %v12490_v52  ;;  %v15868_v42 = vld [vmem:[#allocation65_spill] sm:$0xff] }
 0x82c   : > { %v4302_v8 = vsub.f32 %v15868_v42, %v12598_v54 }
 0x82d   : > { %8929 = vpow2.f32 %v4331_v35  ;;  %v5053_v57 = vmul.f32 1.442695, %v5020_v5  ;;  %v15871_v5 = vld [vmem:[#allocation37_spill] sm:$0xff] }
 0x82e   : > { %5008 = vmax.xlane.f32.xlu0 %v5007_v37  ;;  %v12964_v37 = vsel %vm15860_vm6, %v4938_v46, -1e+30  ;;  %v4295_v46 = vsub.f32 %v12308_v9, %v12474_v56  ;;  %v15865_v9 = vld [vmem:[#allocation36_spill] sm:$0xff]  ;;  %8931 = vpow2.f32 %v4333_v2  ;;  %v4300_v35 = vsub.f32 %v15871_v5, %v12601_v22 }
 0x82f   : > { %15861 = vst [vmem:[#allocation115_spill] sm:$0xff] %v12964_v37  ;;  %v5016_v55 = vmax.f32 %v12960_v62, %v12964_v37  ;;  %v5615_v37 = vpop.permute.xlu1 %5614  ;;  %v5022_v17 = vsub.f32 %v15865_v9, %v15863_v36  ;;  %v4341_v2 = vmul.f32 1.442695, %v4302_v8  ;;  %v6409_v5 = vadd.f32 %v12857_v19, %v6331_v41 }
 0x830   : > { %v4327_v10 = vmul.f32 1.442695, %v4295_v46  ;;  %v5690_v27 = vadd.f32 %v12840_v30, %v5615_v37 }
 0x831   : > { %v5057_v46 = vmul.f32 1.442695, %v5022_v17  ;;  %vm6441_vm8 = vcmp.gt.f32.partialorder %v6409_v5, 0.0 }
 0x832   : > { %5011 = vmax.xlane.f32.xlu0 %v5010_v48  ;;  %8933 = vpow2.f32 %v4327_v10  ;;  %vm5722_vm4 = vcmp.gt.f32.partialorder %v5690_v27, 0.0 }
 0x833   : > { %v6339_v51 = vpop.permute.xlu1 %6338 }
 0x836   : > { %v12966_v49 = vpop.xlane.xlu0 %4260  ;;  %4293 = vmax.xlane.f32.xlu0 %v4292_v45  ;;  %v4296_v45 = vsub.f32 %v12312_v20, %v12474_v56 }
 0x837   : > { %v13010_v17 = vpop.eup %8929 }
 0x838   : > { %v4329_v33 = vmul.f32 1.442695, %v4296_v45  ;;  %v15869_v45 = vld [vmem:[#allocation40_spill] sm:$0xff]  ;;  %v13012_v9 = vpop.eup %8931 }
 0x839   : > { %v4299_v36 = vsub.f32 %v15869_v45, %v12601_v22  ;;  %15874 = vst [vmem:[#allocation65_spill] sm:$0xff] %v13012_v9 }
 0x83a   : > { %v12970_v48 = vpop.xlane.xlu0 %4984  ;;  %5017 = vmax.xlane.f32.xlu0 %v5016_v55  ;;  %v5019_v55 = vsub.f32 %v12332_v34, %v12490_v52  ;;  %v15867_v34 = vld [vmem:[#allocation54_spill] sm:$0xff]  ;;  %v5055_v52 = vmul.f32 1.442695, %v5021_v4  ;;  %8935 = vpow2.f32 %v4329_v33  ;;  %v13006_v4 = vpop.permute.xlu1 %5618  ;;  %v4337_v33 = vmul.f32 1.442695, %v4300_v35 }
 0x83b   : > { %v4301_v63 = vsub.f32 %v15867_v34, %v12598_v54  ;;  %v4335_v10 = vmul.f32 1.442695, %v4299_v36  ;;  %15873 = vst [vmem:[#allocation54_spill] sm:$0xff] %v13010_v17  ;;  %v6410_v35 = vadd.f32 %v12859_v14, %v6331_v41 }
 0x83c   : > { %v5051_v56 = vmul.f32 1.442695, %v5019_v55  ;;  %v13016_v22 = vpop.eup %8933 }
 0x83d   : > { %v4339_v55 = vmul.f32 1.442695, %v4301_v63  ;;  %15876 = vst [vmem:[#allocation37_spill] sm:$0xff] %v13016_v22  ;;  %vm6442_vm1 = vcmp.gt.f32.partialorder %v6410_v35, 0.0 }
 0x83e   : > { %v12972_v29 = vpop.xlane.xlu0 %4987  ;;  %8937 = vpow2.f32 %v5051_v56  ;;  %v13020_v34 = vpop.permute.xlu1 %6342 }
 0x83f   : > { %8939 = vpow2.f32 %v5053_v57  ;;  %v13122_v32 = vadd.f32 %v12859_v14, %v13020_v34 }
 0x840   : > { %8941 = vpow2.f32 %v5055_v52 }
 0x841   : > { %8943 = vpow2.f32 %v5057_v46  ;;  %v15882_v46 = vld [vmem:[#allocation49_spill] sm:$0xff] }
 0x842   : > { %v12974_v26 = vpop.xlane.xlu0 %4266  ;;  %8945 = vpow2.f32 %v4339_v55  ;;  %v5023_v45 = vsub.f32 %v15882_v46, %v12771_v15  ;;  %v5689_v55 = vadd.f32 %v12838_v24, %v5615_v37  ;;  %v6414_v46 = vadd.f32 %v12859_v14, %v6339_v51  ;;  %v13046_v47 = vpop.permute.xlu1 %6346 }
 0x843   : > { %8947 = vpow2.f32 %v4341_v2  ;;  %v6413_v2 = vadd.f32 %v12857_v19, %v6339_v51  ;;  %v4305_v37 = vsub.f32 %v12510_v6, %v12803_v38 }
 0x844   : > { %8949 = vpow2.f32 %v4335_v10  ;;  %v13018_v57 = vpop.eup %8935  ;;  %v13040_v10 = vadd.f32 %v13012_v9, %v13010_v17  ;;  %v15886_v9 = vld [vmem:[#allocation63_spill] sm:$0xff]  ;;  %v5753_v6 = vmul.f32 0.2, %v5689_v55  ;;  %vm5721_vm11 = vcmp.gt.f32.partialorder %v5689_v55, 0.0 }
 0x845   : > { %8951 = vpow2.f32 %v4337_v33  ;;  %15877 = vst [vmem:[#allocation117_spill] sm:$0xff] %v13018_v57  ;;  %v5024_v17 = vsub.f32 %v15886_v9, %v12771_v15  ;;  %v6477_v9 = vmul.f32 0.2, %v6413_v2  ;;  %vm6445_vm6 = vcmp.gt.f32.partialorder %v6413_v2, 0.0 }
 0x846   : > { %v12984_v62 = vpop.xlane.xlu0 %4990  ;;  %vm6446_vm12 = vcmp.gt.f32.partialorder %v6414_v46, 0.0 }
 0x847   : > { %15862 = vst [vmem:[#allocation116_spill] sm:$0xff] %v12984_v62  ;;  %v6509_v61 = vsel %vm6445_vm6, %v6413_v2, %v6477_v9 }
 0x848   : > { %v13022_v63 = vpop.eup %8937 }
 0x849   : > { %15878 = vst [vmem:[#allocation118_spill] sm:$0xff] %v13022_v63  ;;  %v13024_v52 = vpop.eup %8939 }
 0x84a   : > { %v12994_v20 = vpop.xlane.xlu0 %4993  ;;  %15879 = vst [vmem:[#allocation119_spill] sm:$0xff] %v13024_v52  ;;  %v13028_v8 = vpop.eup %8941  ;;  %v13054_v41 = vadd.f32 %v13024_v52, %v13022_v63  ;;  %v4309_v52 = vsub.f32 %v12528_v31, %v12809_v53  ;;  %v6473_v63 = vmul.f32 0.2, %v6409_v5  ;;  %v4347_v31 = vmul.f32 1.442695, %v4305_v37 }
 0x84b   : > { %15866 = vst [vmem:[#allocation66_spill] sm:$0xff] %v12994_v20  ;;  %15881 = vst [vmem:[#allocation121_spill] sm:$0xff] %v13028_v8  ;;  %v13032_v36 = vpop.eup %8943 }
 0x84c   : > { %15883 = vst [vmem:[#allocation49_spill] sm:$0xff] %v13032_v36  ;;  %v13042_v33 = vpop.eup %8945  ;;  %v13064_v51 = vadd.f32 %v13032_v36, %v13028_v8  ;;  %v6478_v36 = vmul.f32 0.2, %v6414_v46  ;;  %v4355_v39 = vmul.f32 1.442695, %v4309_v52  ;;  %v6417_v52 = vadd.f32 %v12857_v19, %v13046_v47 }
 0x84d   : > { %15884 = vst [vmem:[#allocation122_spill] sm:$0xff] %v13042_v33 }
 0x84e   : > { %v13002_v60 = vpop.xlane.xlu0 %4272  ;;  %v6510_v37 = vsel %vm6446_vm12, %v6414_v46, %v6478_v36  ;;  %v13106_v36 = vsel %vm15611_vm3, %v6509_v61, -1e+30 }
 0x84f   : > { %15870 = vst [vmem:[#allocation102_spill] sm:$0xff] %v13002_v60 }
 0x852   : > { %v13008_v54 = vpop.xlane.xlu0 %4996 }
 0x853   : > { %15872 = vst [vmem:[#allocation36_spill] sm:$0xff] %v13008_v54  ;;  %v5059_v54 = vmul.f32 1.442695, %v5023_v45  ;;  %v5754_v45 = vmul.f32 0.2, %v5690_v27 }
 0x855   : > { %8953 = vpow2.f32 %v5059_v54  ;;  %v5786_v20 = vsel %vm5722_vm4, %v5690_v27, %v5754_v45  ;;  %v15893_v54 = vld [vmem:[#allocation56_spill] sm:$0xff]  ;;  %v6415_v27 = vadd.f32 %v12857_v19, %v13020_v34  ;;  %v13145_v34 = vadd.f32 %v12859_v14, %v13046_v47 }
 0x856   : > { %v13014_v56 = vpop.xlane.xlu0 %4999 }
 0x857   : > { %15875 = vst [vmem:[#allocation40_spill] sm:$0xff] %v13014_v56  ;;  %v13056_v56 = vpop.eup %8947  ;;  %v6479_v45 = vmul.f32 0.2, %v6415_v27 }
 0x858   : > { %15885 = vst [vmem:[#allocation123_spill] sm:$0xff] %v13056_v56  ;;  %v13066_v28 = vpop.eup %8949  ;;  %v13078_v8 = vadd.f32 %v13056_v56, %v13042_v33  ;;  %v5691_v33 = vadd.f32 %v12838_v24, %v13006_v4  ;;  %v5785_v56 = vsel %vm5721_vm11, %v5689_v55, %v5753_v6  ;;  %v13118_v55 = vsel %vm15613_vm2, %v6510_v37, -1e+30 }
 0x859   : > { %15887 = vst [vmem:[#allocation63_spill] sm:$0xff] %v13066_v28  ;;  %v13074_v15 = vpop.eup %8951  ;;  %vm6447_vm2 = vcmp.gt.f32.partialorder %v6415_v27, 0.0 }
 0x85a   : > { %v13026_v42 = vpop.xlane.xlu0 %4278  ;;  %15889 = vst [vmem:[#allocation125_spill] sm:$0xff] %v13074_v15  ;;  %v13084_v16 = vadd.f32 %v13074_v15, %v13066_v28  ;;  %v5755_v2 = vmul.f32 0.2, %v5691_v33  ;;  %vm5723_vm3 = vcmp.gt.f32.partialorder %v5691_v33, 0.0 }
 0x85b   : > { %15880 = vst [vmem:[#allocation120_spill] sm:$0xff] %v13026_v42  ;;  %v13050_v42 = vadd.f32 %v13018_v57, %v13016_v22  ;;  %v4306_v57 = vsub.f32 %v12514_v0, %v12803_v38  ;;  %v6474_v22 = vmul.f32 0.2, %v6410_v35  ;;  %v5061_v0 = vmul.f32 1.442695, %v5024_v17  ;;  %v13080_v38 = vpop.permute.xlu1 %5626 }
 0x85c   : > { %v5787_v37 = vsel %vm5723_vm3, %v5691_v33, %v5755_v2  ;;  %v15906_v2 = vld [vmem:[#allocation10_spill] sm:$0xff] }
 0x85d   : > { %v6506_v3 = vsel %vm6442_vm1, %v6410_v35, %v6474_v22  ;;  %v4349_v60 = vmul.f32 1.442695, %v4306_v57  ;;  %8955 = vpow2.f32 %v5061_v0  ;;  %v5692_v22 = vadd.f32 %v12840_v30, %v13006_v4  ;;  %v15896_v4 = vld [vmem:[#allocation13_spill] sm:$0xff]  ;;  %v15899_v35 = vld [vmem:[#allocation14_spill] sm:$0xff] }
 0x85e   : > { %v13072_v11 = vpop.xlane.xlu0 %5002  ;;  %vm15894_vm1 = vnez %v15893_v54  ;;  %8957 = vpow2.f32 %v4347_v31  ;;  %vm15897_vm4 = vnez %v15896_v4  ;;  %vm15900_vm12 = vnez %v15899_v35 }
 0x85f   : > { %15888 = vst [vmem:[#allocation124_spill] sm:$0xff] %v13072_v11  ;;  %v6505_v11 = vsel %vm6441_vm8, %v6409_v5, %v6473_v63  ;;  %v15891_v63 = vld [vmem:[#allocation57_spill] sm:$0xff]  ;;  %v13098_v57 = vsel %vm15894_vm1, %v6506_v3, -1e+30  ;;  %8959 = vpow2.f32 %v4349_v60  ;;  %v13114_v3 = vsel %vm15900_vm12, %v5786_v20, -1e+30  ;;  %v13124_v61 = vpop.permute.xlu1 %6350 }
 0x860   : > { %vm15892_vm8 = vnez %v15891_v63  ;;  %15895 = vst [vmem:[#allocation57_spill] sm:$0xff] %v13098_v57  ;;  %15901 = vst [vmem:[#allocation13_spill] sm:$0xff] %v13114_v3  ;;  %8961 = vpow2.f32 %v4355_v39  ;;  %vm5724_vm11 = vcmp.gt.f32.partialorder %v5692_v22, 0.0  ;;  %v5756_v46 = vmul.f32 0.2, %v5692_v22  ;;  %v13137_v63 = vpop.eup %8953 }
 0x861   : > { %v13094_v5 = vsel %vm15892_vm8, %v6505_v11, -1e+30  ;;  %v13110_v11 = vsel %vm15897_vm4, %v5785_v56, -1e+30  ;;  %vm6448_vm1 = vcmp.gt.f32.partialorder %v13122_v32, 0.0  ;;  %15902 = vst [vmem:[#allocation14_spill] sm:$0xff] %v13137_v63  ;;  %vm15907_vm12 = vnez %v15906_v2 }
 0x862   : > { %v13088_v17 = vpop.xlane.xlu0 %5005  ;;  %15898 = vst [vmem:[#allocation56_spill] sm:$0xff] %v13110_v11  ;;  %v6480_v0 = vmul.f32 0.2, %v13122_v32  ;;  %v15903_v56 = vld [vmem:[#allocation9_spill] sm:$0xff] }
 0x863   : > { %15890 = vst [vmem:[#allocation126_spill] sm:$0xff] %v13088_v17  ;;  %v13147_v39 = vpop.permute.xlu1 %6354  ;;  %vm15904_vm4 = vnez %v15903_v56  ;;  %v5788_v56 = vsel %vm5724_vm11, %v5692_v22, %v5756_v46  ;;  %v6481_v22 = vmul.f32 0.2, %v6417_v52  ;;  %v15916_v46 = vld [vmem:[#allocation11_spill] sm:$0xff] }
 0x864   : > { %vm15917_vm11 = vnez %v15916_v46 }
 0x86a   : > { %v5607_v60 = vpop.permute.xlu0 %5606 }
 0x86b   : > { %v5685_v20 = vadd.f32 %v12838_v24, %v5607_v60  ;;  %v5686_v58 = vadd.f32 %v12840_v30, %v5607_v60 }
 0x86d   : > { %vm5717_vm6 = vcmp.gt.f32.partialorder %v5685_v20, 0.0  ;;  %vm5718_vm8 = vcmp.gt.f32.partialorder %v5686_v58, 0.0  ;;  %v5749_v6 = vmul.f32 0.2, %v5685_v20  ;;  %v5750_v9 = vmul.f32 0.2, %v5686_v58 }
 0x86e   : > { %v5611_v31 = vpop.permute.xlu0 %5610 }
 0x86f   : > { %v5687_v54 = vadd.f32 %v12838_v24, %v5611_v31  ;;  %v5688_v4 = vadd.f32 %v12840_v30, %v5611_v31  ;;  %v5781_v35 = vsel %vm5717_vm6, %v5685_v20, %v5749_v6  ;;  %v5782_v60 = vsel %vm5718_vm8, %v5686_v58, %v5750_v9  ;;  %v13157_v31 = vpop.eup %8955 }
 0x870   : > { %v13151_v33 = vsel %vm15904_vm4, %v5781_v35, -1e+30  ;;  %v13155_v28 = vsel %vm15907_vm12, %v5782_v60, -1e+30  ;;  %15909 = vst [vmem:[#allocation127_spill] sm:$0xff] %v13157_v31  ;;  %v13159_v6 = vpop.eup %8957  ;;  %v15911_v35 = vld [vmem:[#allocation15_spill] sm:$0xff]  ;;  %v6511_v60 = vsel %vm6447_vm2, %v6415_v27, %v6479_v45 }
 0x871   : > { %15905 = vst [vmem:[#allocation9_spill] sm:$0xff] %v13151_v33  ;;  %15908 = vst [vmem:[#allocation10_spill] sm:$0xff] %v13155_v28  ;;  %vm5719_vm3 = vcmp.gt.f32.partialorder %v5687_v54, 0.0  ;;  %vm5720_vm6 = vcmp.gt.f32.partialorder %v5688_v4, 0.0  ;;  %v5751_v20 = vmul.f32 0.2, %v5687_v54  ;;  %v5846_v9 = vmax.f32 %v13151_v33, %v13155_v28  ;;  %v13169_v2 = vpop.eup %8959 }
 0x872   : > { %v5752_v58 = vmul.f32 0.2, %v5688_v4  ;;  %15910 = vst [vmem:[#allocation128_spill] sm:$0xff] %v13159_v6  ;;  %v6335_v47 = vpop.permute.xlu0 %6334  ;;  %vm15912_vm8 = vnez %v15911_v35  ;;  %15914 = vst [vmem:[#allocation129_spill] sm:$0xff] %v13169_v2  ;;  %v13173_v6 = vpop.eup %8961  ;;  %vm6449_vm4 = vcmp.gt.f32.partialorder %v6417_v52, 0.0  ;;  %vm6450_vm12 = vcmp.gt.f32.partialorder %v13145_v34, 0.0 }
 0x873   : > { %v13166_v15 = vsel %vm15912_vm8, %v5787_v37, -1e+30  ;;  %v6411_v17 = vadd.f32 %v12857_v19, %v6335_v47  ;;  %v6412_v62 = vadd.f32 %v12859_v14, %v6335_v47  ;;  %v5783_v12 = vsel %vm5719_vm3, %v5687_v54, %v5751_v20  ;;  %15915 = vst [vmem:[#allocation130_spill] sm:$0xff] %v13173_v6  ;;  %5847 = vmax.xlane.f32.xlu0 %v5846_v9  ;;  %v15919_v35 = vld [vmem:[#allocation50_spill] sm:$0xff]  ;;  %v15923_v9 = vld [vmem:[#allocation16_spill] sm:$0xff] }
 0x874   : > { %15913 = vst [vmem:[#allocation15_spill] sm:$0xff] %v13166_v15  ;;  %v5784_v21 = vsel %vm5720_vm6, %v5688_v4, %v5752_v58  ;;  %v13178_v37 = vsel %vm15917_vm11, %v5783_v12, -1e+30  ;;  %v5025_v47 = vsub.f32 %v15919_v35, %v12891_v13  ;;  %v6482_v54 = vmul.f32 0.2, %v13145_v34  ;;  %v13183_v4 = vpop.permute.xlu1 %5634  ;;  %v15920_v58 = vld [vmem:[#allocation12_spill] sm:$0xff] }
 0x875   : > { %15918 = vst [vmem:[#allocation11_spill] sm:$0xff] %v13178_v37  ;;  %vm6443_vm2 = vcmp.gt.f32.partialorder %v6411_v17, 0.0  ;;  %vm6444_vm8 = vcmp.gt.f32.partialorder %v6412_v62, 0.0  ;;  %v6475_v27 = vmul.f32 0.2, %v6411_v17  ;;  %vm15921_vm3 = vnez %v15920_v58  ;;  %v15927_v2 = vld [vmem:[#allocation68_spill] sm:$0xff] }
 0x876   : > { %v6476_v45 = vmul.f32 0.2, %v6412_v62  ;;  %v5623_v20 = vpop.permute.xlu0 %5622  ;;  %v13187_v28 = vsel %vm15921_vm3, %v5784_v21, -1e+30  ;;  %vm15924_vm6 = vnez %v15923_v9  ;;  %v6512_v6 = vsel %vm6448_vm1, %v13122_v32, %v6480_v0 }
 0x877   : > { %15922 = vst [vmem:[#allocation50_spill] sm:$0xff] %v13187_v28  ;;  %v13191_v12 = vsel %vm15924_vm6, %v5788_v56, -1e+30  ;;  %v5693_v46 = vadd.f32 %v12838_v24, %v5623_v20  ;;  %v5694_v33 = vadd.f32 %v12840_v30, %v5623_v20  ;;  %v5849_v35 = vmax.f32 %v13178_v37, %v13187_v28 }
 0x878   : > { %15925 = vst [vmem:[#allocation12_spill] sm:$0xff] %v13191_v12  ;;  %v5695_v58 = vadd.f32 %v12838_v24, %v13080_v38  ;;  %v15926_v21 = vmax.f32 %v13094_v5, %v13098_v57  ;;  %v6507_v56 = vsel %vm6443_vm2, %v6411_v17, %v6475_v27  ;;  %v6508_v9 = vsel %vm6444_vm8, %v6412_v62, %v6476_v45  ;;  %v13232_v37 = vpop.permute.xlu1 %6358 }
 0x879   : > { %vm15928_vm11 = vnez %v15927_v2  ;;  %v5696_v28 = vadd.f32 %v12840_v30, %v13080_v38  ;;  %vm5725_vm3 = vcmp.gt.f32.partialorder %v5693_v46, 0.0  ;;  %v5757_v32 = vmul.f32 0.2, %v5693_v46  ;;  %5850 = vmax.xlane.f32.xlu1 %v5849_v35  ;;  %v15930_v2 = vld [vmem:[#allocation62_spill] sm:$0xff]  ;;  %v15933_v38 = vld [vmem:[#allocation61_spill] sm:$0xff]  ;;  %v15936_v35 = vld [vmem:[#allocation67_spill] sm:$0xff] }
 0x87a   : > { %6571 = vmax.xlane.f32.xlu0 %v15926_v21  ;;  %v13209_v20 = vsel %vm15928_vm11, %v6511_v60, -1e+30  ;;  %v5855_v0 = vmax.f32 %v13166_v15, %v13191_v12  ;;  %v6419_v21 = vadd.f32 %v12857_v19, %v13124_v61  ;;  %v6420_v17 = vadd.f32 %v12859_v14, %v13124_v61  ;;  %v5631_v27 = vpop.permute.xlu0 %5630 }
 0x87b   : > { %15929 = vst [vmem:[#allocation16_spill] sm:$0xff] %v13209_v20  ;;  %v5758_v62 = vmul.f32 0.2, %v5694_v33  ;;  %vm15931_vm1 = vnez %v15930_v2  ;;  %vm5726_vm2 = vcmp.gt.f32.partialorder %v5694_v33, 0.0  ;;  %vm15934_vm8 = vnez %v15933_v38 }
 0x87c   : > { %v13221_v60 = vsel %vm15931_vm1, %v6507_v56, -1e+30  ;;  %v13225_v45 = vsel %vm15934_vm8, %v6508_v9, -1e+30  ;;  %vm15937_vm6 = vnez %v15936_v35  ;;  %v6513_v15 = vsel %vm6449_vm4, %v6417_v52, %v6481_v22 }
 0x87d   : > { %15932 = vst [vmem:[#allocation68_spill] sm:$0xff] %v13221_v60  ;;  %15935 = vst [vmem:[#allocation62_spill] sm:$0xff] %v13225_v45  ;;  %v13229_v12 = vsel %vm15937_vm6, %v6512_v6, -1e+30  ;;  %v5697_v61 = vadd.f32 %v12838_v24, %v5631_v27  ;;  %v5698_v57 = vadd.f32 %v12840_v30, %v5631_v27  ;;  %v6573_v56 = vmax.f32 %v13221_v60, %v13225_v45  ;;  %v15940_v45 = vld [vmem:[#allocation17_spill] sm:$0xff] }
 0x87e   : > { %15938 = vst [vmem:[#allocation61_spill] sm:$0xff] %v13229_v12  ;;  %v15939_v2 = vmax.f32 %v13110_v11, %v13114_v3  ;;  %v5789_v9 = vsel %vm5725_vm3, %v5693_v46, %v5757_v32  ;;  %vm5727_vm11 = vcmp.gt.f32.partialorder %v5695_v58, 0.0  ;;  %vm5728_vm1 = vcmp.gt.f32.partialorder %v5696_v28, 0.0 }
 0x87f   : > { %v5759_v6 = vmul.f32 0.2, %v5695_v58  ;;  %v6514_v52 = vsel %vm6450_vm12, %v13145_v34, %v6482_v54  ;;  %v5760_v22 = vmul.f32 0.2, %v5696_v28  ;;  %vm6451_vm4 = vcmp.gt.f32.partialorder %v6419_v21, 0.0  ;;  %6574 = vmax.xlane.f32.xlu1 %v6573_v56  ;;  %v15943_v56 = vld [vmem:[#allocation18_spill] sm:$0xff] }
 0x880   : > { %5853 = vmax.xlane.f32.xlu0 %v15939_v2  ;;  %vm6452_vm8 = vcmp.gt.f32.partialorder %v6420_v17, 0.0  ;;  %v5790_v27 = vsel %vm5726_vm2, %v5694_v33, %v5758_v62  ;;  %v6483_v38 = vmul.f32 0.2, %v6419_v21  ;;  %v6484_v35 = vmul.f32 0.2, %v6420_v17  ;;  %v15946_v62 = vld [vmem:[#allocation51_spill] sm:$0xff] }
 0x881   : > { %v6421_v2 = vadd.f32 %v12857_v19, %v13147_v39  ;;  %vm15941_vm3 = vnez %v15940_v45  ;;  %v6422_v32 = vadd.f32 %v12859_v14, %v13147_v39  ;;  %v5761_v60 = vmul.f32 0.2, %v5697_v61  ;;  %v6363_v45 = vpop.permute.xlu1 %6362 }
 0x882   : > { %v13250_v46 = vsel %vm15941_vm3, %v5789_v9, -1e+30  ;;  %v5762_v34 = vmul.f32 0.2, %v5698_v57  ;;  %v15942_v54 = vmax.f32 %v13106_v36, %v13118_v55  ;;  %vm15944_vm12 = vnez %v15943_v56 }
 0x883   : > { %v13259_v33 = vsel %vm15944_vm12, %v5790_v27, -1e+30  ;;  %v5026_v3 = vsub.f32 %v15946_v62, %v12891_v13  ;;  %v5063_v11 = vmul.f32 1.442695, %v5025_v47  ;;  %vm5729_vm2 = vcmp.gt.f32.partialorder %v5697_v61, 0.0  ;;  %5856 = vmax.xlane.f32.xlu1 %v5855_v0 }
 0x884   : > { %6577 = vmax.xlane.f32.xlu0 %v15942_v54  ;;  %15945 = vst [vmem:[#allocation67_spill] sm:$0xff] %v13259_v33  ;;  %vm5730_vm6 = vcmp.gt.f32.partialorder %v5698_v57, 0.0  ;;  %v5858_v39 = vmax.f32 %v13250_v46, %v13259_v33  ;;  %v6579_v9 = vmax.f32 %v13209_v20, %v13229_v12  ;;  %v5791_v54 = vsel %vm5727_vm11, %v5695_v58, %v5759_v6 }
 0x885   : > { %v5792_v56 = vsel %vm5728_vm1, %v5696_v28, %v5760_v22  ;;  %vm15947_vm3 = vnez %v15751_v59  ;;  %vm15948_vm12 = vnez %v15754_v7  ;;  %v6515_v47 = vsel %vm6451_vm4, %v6419_v21, %v6483_v38  ;;  %v15950_v28 = vld [vmem:[#allocation20_spill] sm:$0xff] }
 0x886   : > { %v13271_v27 = vsel %vm15947_vm3, %v6513_v15, -1e+30  ;;  %v13275_v13 = vsel %vm15948_vm12, %v6514_v52, -1e+30  ;;  %v6516_v0 = vsel %vm6452_vm8, %v6420_v17, %v6484_v35  ;;  %v6485_v62 = vmul.f32 0.2, %v6421_v2 }
 0x887   : > { %v6486_v33 = vmul.f32 0.2, %v6422_v32  ;;  %v5793_v12 = vsel %vm5729_vm2, %v5697_v61, %v5761_v60  ;;  %v5794_v20 = vsel %vm5730_vm6, %v5698_v57, %v5762_v34  ;;  %vm6453_vm11 = vcmp.gt.f32.partialorder %v6421_v2, 0.0  ;;  %v15952_v15 = vld [vmem:[#allocation43_spill] sm:$0xff]  ;;  %6580 = vmax.xlane.f32.xlu1 %v6579_v9  ;;  %v15955_v61 = vld [vmem:[#allocation21_spill] sm:$0xff]  ;;  %v15957_v52 = vld [vmem:[#allocation22_spill] sm:$0xff]  ;;  %v5643_v34 = vpop.permute.xlu1 %5642 }
 0x888   : > { %5859 = vmax.xlane.f32.xlu0 %v5858_v39  ;;  %vm6454_vm0 = vcmp.gt.f32.partialorder %v6422_v32, 0.0  ;;  %vm15949_vm1 = vnez %v15757_v44  ;;  %vm15951_vm3 = vnez %v15950_v28  ;;  %v4313_v58 = vsub.f32 %v15952_v15, %v12821_v43  ;;  %v15953_v60 = vld [vmem:[#allocation79_spill] sm:$0xff] }
 0x889   : > { %v13281_v59 = vsel %vm15949_vm1, %v5791_v54, -1e+30  ;;  %v13285_v7 = vsel %vm15951_vm3, %v5792_v56, -1e+30  ;;  %v5065_v21 = vmul.f32 1.442695, %v5026_v3  ;;  %v6582_v17 = vmax.f32 %v13271_v27, %v13275_v13 }
 0x88a   : > { %vm15954_vm4 = vnez %v15953_v60  ;;  %v5699_v44 = vadd.f32 %v12838_v24, %v13183_v4  ;;  %vm15956_vm8 = vnez %v15955_v61  ;;  %vm15958_vm2 = vnez %v15957_v52  ;;  %v15959_v3 = vld [vmem:[#allocation78_spill] sm:$0xff]  ;;  %v15962_v56 = vld [vmem:[#allocation53_spill] sm:$0xff] }
 0x88b   : > { %v13293_v57 = vsel %vm15954_vm4, %v6515_v47, -1e+30  ;;  %v13299_v6 = vsel %vm15956_vm8, %v5793_v12, -1e+30  ;;  %v13303_v22 = vsel %vm15958_vm2, %v5794_v20, -1e+30  ;;  %vm15960_vm6 = vnez %v15959_v3  ;;  %v6367_v60 = vpop.permute.xlu1 %6366 }
 0x88c   : > { %v13307_v38 = vsel %vm15960_vm6, %v6516_v0, -1e+30  ;;  %v5700_v35 = vadd.f32 %v12840_v30, %v13183_v4  ;;  %6583 = vmax.xlane.f32.xlu0 %v6582_v17  ;;  %v5861_v39 = vmax.f32 %v13281_v59, %v13285_v7  ;;  %v6517_v9 = vsel %vm6453_vm11, %v6421_v2, %v6485_v62  ;;  %v5639_v0 = vpop.permute.xlu0 %5638 }
 0x88d   : > { %v6518_v12 = vsel %vm6454_vm0, %v6422_v32, %v6486_v33  ;;  %v15961_v20 = vsub.f32 %v12532_v18, %v12809_v53  ;;  %v4314_v47 = vsub.f32 %v15962_v56, %v12821_v43  ;;  %8963 = vpow2.f32 %v5063_v11 }
 0x88e   : > { %v13322_v4 = vadd.f32 %v13157_v31, %v13137_v63  ;;  %v4363_v28 = vmul.f32 1.442695, %v4313_v58  ;;  %8965 = vpow2.f32 %v5065_v21  ;;  %5862 = vmax.xlane.f32.xlu1 %v5861_v39  ;;  %v5864_v2 = vmax.f32 %v13299_v6, %v13303_v22  ;;  %v15999_v31 = vld [vmem:[#allocation46_spill] sm:$0xff] }
 0x88f   : > { %v4357_v54 = vmul.f32 1.442695, %v15961_v20  ;;  %v6585_v32 = vmax.f32 %v13293_v57, %v13307_v38  ;;  %v5763_v18 = vmul.f32 0.2, %v5699_v44  ;;  %v6423_v53 = vadd.f32 %v12857_v19, %v13232_v37 }
 0x890   : > { %vm15963_vm0 = vnez %v15769_v23  ;;  %vm15964_vm12 = vnez %v15772_v25  ;;  %vm5731_vm11 = vcmp.gt.f32.partialorder %v5699_v44, 0.0  ;;  %v5764_v33 = vmul.f32 0.2, %v5700_v35  ;;  %5865 = vmax.xlane.f32.xlu0 %v5864_v2 }
 0x891   : > { %v13332_v43 = vsel %vm15963_vm0, %v6517_v9, -1e+30  ;;  %v13336_v11 = vsel %vm15964_vm12, %v6518_v12, -1e+30  ;;  %v5701_v62 = vadd.f32 %v12838_v24, %v5639_v0  ;;  %v5702_v15 = vadd.f32 %v12840_v30, %v5639_v0 }
 0x892   : > { %8967 = vpow2.f32 %v4357_v54  ;;  %vm5732_vm1 = vcmp.gt.f32.partialorder %v5700_v35, 0.0  ;;  %v6424_v58 = vadd.f32 %v12859_v14, %v13232_v37  ;;  %v6425_v23 = vadd.f32 %v12857_v19, %v6363_v45  ;;  %6586 = vmax.xlane.f32.xlu1 %v6585_v32 }
 0x893   : > { %v13343_v21 = vmul.f32 1.442695, %v4314_v47  ;;  %v6426_v25 = vadd.f32 %v12859_v14, %v6363_v45  ;;  %v5703_v17 = vadd.f32 %v12838_v24, %v5643_v34  ;;  %v6588_v61 = vmax.f32 %v13332_v43, %v13336_v11 }
 0x894   : > { %8969 = vpow2.f32 %v4363_v28  ;;  %vm6455_vm3 = vcmp.gt.f32.partialorder %v6423_v53, 0.0  ;;  %v5704_v52 = vadd.f32 %v12840_v30, %v5643_v34  ;;  %v5795_v3 = vsel %vm5731_vm11, %v5699_v44, %v5763_v18  ;;  %v15966_v44 = vld [vmem:[#allocation64_spill] sm:$0xff] }
 0x895   : > { %v6487_v37 = vmul.f32 0.2, %v6423_v53  ;;  %v5765_v39 = vmul.f32 0.2, %v5701_v62  ;;  %v5766_v9 = vmul.f32 0.2, %v5702_v15  ;;  %6589 = vmax.xlane.f32.xlu0 %v6588_v61  ;;  %v5796_v12 = vsel %vm5732_vm1, %v5700_v35, %v5764_v33  ;;  %v6371_v35 = vpop.permute.xlu1 %6370 }
 0x896   : > { %v6488_v45 = vmul.f32 0.2, %v6424_v58  ;;  %v6489_v20 = vmul.f32 0.2, %v6425_v23  ;;  %vm5733_vm4 = vcmp.gt.f32.partialorder %v5701_v62, 0.0  ;;  %vm5734_vm8 = vcmp.gt.f32.partialorder %v5702_v15, 0.0  ;;  %4392 = vadd.xlane.f32.xlu1 %v13050_v42 }
 0x897   : > { %vm6456_vm2 = vcmp.gt.f32.partialorder %v6424_v58, 0.0  ;;  %v6490_v54 = vmul.f32 0.2, %v6426_v25  ;;  %v5767_v56 = vmul.f32 0.2, %v5703_v17  ;;  %v13353_v47 = vpop.eup %8963  ;;  %vm6458_vm0 = vcmp.gt.f32.partialorder %v6426_v25, 0.0 }
 0x898   : > { %15965 = vst [vmem:[#allocation17_spill] sm:$0xff] %v13353_v47  ;;  %vm5735_vm12 = vcmp.gt.f32.partialorder %v5703_v17, 0.0  ;;  %v5768_v0 = vmul.f32 0.2, %v5704_v52  ;;  %v13357_v28 = vpop.eup %8965  ;;  %vm15968_vm1 = vnez %v15775_v40  ;;  %v5797_v42 = vsel %vm5733_vm4, %v5701_v62, %v5765_v39  ;;  %v15969_v18 = vld [vmem:[#allocation24_spill] sm:$0xff] }
 0x899   : > { %15967 = vst [vmem:[#allocation18_spill] sm:$0xff] %v13357_v28  ;;  %4395 = vadd.xlane.f32.xlu0 %v13040_v10  ;;  %v13362_v2 = vsel %vm15968_vm1, %v5795_v3, -1e+30  ;;  %v5798_v32 = vsel %vm5734_vm8, %v5702_v15, %v5766_v9  ;;  %vm15970_vm6 = vnez %v15969_v18  ;;  %v6519_v61 = vsel %vm6455_vm3, %v6423_v53, %v6487_v37  ;;  %v15973_v10 = vld [vmem:[#allocation6_spill] sm:$0xff]  ;;  %v5651_v18 = vpop.permute.xlu1 %5650 }
 0x89a   : > { %v13368_v33 = vsel %vm15970_vm6, %v5796_v12, -1e+30  ;;  %v6520_v34 = vsel %vm6456_vm2, %v6424_v58, %v6488_v45  ;;  %vm15972_vm11 = vcmp.gt.f32.partialorder %v6425_v23, 0.0  ;;  %v13376_v40 = vadd.f32 %v12857_v19, %v6367_v60  ;;  %5116 = vadd.xlane.f32.xlu1 %v13054_v41  ;;  %v15975_v58 = vld [vmem:[#allocation25_spill] sm:$0xff]  ;;  %v15978_v37 = vld [vmem:[#allocation26_spill] sm:$0xff]  ;;  %v15986_v12 = vld [vmem:[#allocation87_spill] sm:$0xff] }
 0x89b   : > { %15971 = vst [vmem:[#allocation51_spill] sm:$0xff] %v13368_v33  ;;  %v6521_v63 = vsel %vm15972_vm11, %v6425_v23, %v6489_v20  ;;  %v6522_v62 = vsel %vm6458_vm0, %v6426_v25, %v6490_v54  ;;  %v5799_v15 = vsel %vm5735_vm12, %v5703_v17, %v5767_v56  ;;  %v13384_v53 = vadd.f32 %v12859_v14, %v6367_v60  ;;  %v15982_v25 = vld [vmem:[#allocation89_spill] sm:$0xff] }
 0x89c   : > { %v13381_v3 = vpop.eup %8967  ;;  %vm15976_vm3 = vnez %v15975_v58  ;;  %vm15979_vm4 = vnez %v15978_v37  ;;  %vm15981_vm8 = vcmp.gt.f32.partialorder %v5704_v52, 0.0  ;;  %v5867_v41 = vmax.f32 %v13362_v2, %v13368_v33  ;;  %v15990_v54 = vld [vmem:[#allocation85_spill] sm:$0xff] }
 0x89d   : > { %15974 = vst [vmem:[#allocation20_spill] sm:$0xff] %v13381_v3  ;;  %v13388_v23 = vsel %vm15976_vm3, %v5797_v42, -1e+30  ;;  %v13392_v39 = vsel %vm15979_vm4, %v5798_v32, -1e+30  ;;  %v5800_v9 = vsel %vm15981_vm8, %v5704_v52, %v5768_v0  ;;  %5119 = vadd.xlane.f32.xlu0 %v13064_v51  ;;  %vm15983_vm2 = vnez %v15982_v25  ;;  %v5647_v51 = vpop.permute.xlu0 %5646  ;;  %v8482_v42 = vld [vmem:[%s14649_s4 + $0x100] sm:$0xff]  }
 0x89e   : > { %15977 = vst [vmem:[#allocation43_spill] sm:$0xff] %v13388_v23  ;;  %15980 = vst [vmem:[#allocation79_spill] sm:$0xff] %v13392_v39  ;;  %v13400_v17 = vsel %vm15983_vm2, %v6519_v61, -1e+30  ;;  %v13404_v60 = vsel %vm15785_vm9, %v6520_v34, -1e+30  ;;  %vm15987_vm6 = vnez %v15986_v12  ;;  %v13410_v20 = vpop.eup %8969  ;;  %v6429_v52 = vadd.f32 %v12857_v19, %v6371_v35  ;;  %5868 = vmax.xlane.f32.xlu1 %v5867_v41 }
 0x89f   : > { %15984 = vst [vmem:[#allocation21_spill] sm:$0xff] %v13400_v17  ;;  %15985 = vst [vmem:[#allocation22_spill] sm:$0xff] %v13404_v60  ;;  %v13408_v45 = vsel %vm15987_vm6, %v6521_v63, -1e+30  ;;  %vm15991_vm0 = vnez %v15990_v54  ;;  %v13419_v0 = vadd.f32 %v13357_v28, %v13353_v47  ;;  %vm15994_vm9 = vnez %v15993_v1  ;;  %v8481_v63 = vld [vmem:[%s14649_s4 + $0x140] sm:$0xff]   ;;  %v15995_v61 = vld [vmem:[#allocation7_spill] sm:$0xff] }
 0x8a0   : > { %15988 = vst [vmem:[#allocation78_spill] sm:$0xff] %v13408_v45  ;;  %15989 = vst [vmem:[#allocation53_spill] sm:$0xff] %v13410_v20  ;;  %v13415_v56 = vsel %vm15991_vm0, %v6522_v62, -1e+30  ;;  %v13423_v34 = vsel %vm15994_vm9, %v5799_v15, -1e+30  ;;  %v6430_v32 = vadd.f32 %v12859_v14, %v6371_v35  ;;  %v4303_v62 = vsub.f32 %v15995_v61, %v12966_v49  ;;  %7993 = vmatprep.subr.bf16.mxu0 %v8481_v63 }
 0x8a1   : > { %15992 = vst [vmem:[#allocation64_spill] sm:$0xff] %v13415_v56  ;;  %v5870_v58 = vmax.f32 %v13388_v23, %v13392_v39  ;;  %v15996_v15 = vld [vmem:[#allocation28_spill] sm:$0xff]  ;;  %vm6459_vm11 = vcmp.gt.f32.partialorder %v13376_v40, 0.0  ;;  %vm6460_vm1 = vcmp.gt.f32.partialorder %v13384_v53, 0.0  ;;  %v6591_v35 = vmax.f32 %v13400_v17, %v13404_v60  ;;  %7994 = vmatpush3.bf16.msra.mxu0 %v8482_v42  ;;  %v8483_v63 = vld [vmem:[%s14649_s4 + $0x148] sm:$0xff]   ;;  %v6375_v39 = vpop.permute.xlu1 %6374 }
 0x8a2   : > { %vm15997_vm12 = vnez %v15996_v15  ;;  %v15998_v25 = vld [vmem:[#allocation8_spill] sm:$0xff]  ;;  %v6491_v41 = vmul.f32 0.2, %v13376_v40  ;;  %v6492_v54 = vmul.f32 0.2, %v13384_v53  ;;  %v5705_v1 = vadd.f32 %v12838_v24, %v5647_v51  ;;  %v16000_v60 = vld [vmem:[#allocation47_spill] sm:$0xff]  ;;  %7995 = vmatprep.subr.bf16.mxu0 %v8483_v63 }
 0x8a3   : > { %v13438_v37 = vsel %vm15997_vm12, %v5800_v9, -1e+30  ;;  %v4304_v12 = vsub.f32 %v15998_v25, %v12966_v49  ;;  %v5706_v9 = vadd.f32 %v12840_v30, %v5647_v51  ;;  %5871 = vmax.xlane.f32.xlu0 %v5870_v58  ;;  %vm6461_vm3 = vcmp.gt.f32.partialorder %v6429_v52, 0.0  ;;  %v8484_v25 = vld [vmem:[%s14652_s7 + $0x140] sm:$0xff]   ;;  %v8485_v51 = vld [vmem:[%s14649_s4 + $0x108] sm:$0xff]   ;;  %6592 = vmax.xlane.f32.xlu1 %v6591_v35 }
 0x8a4   : > { %v6493_v61 = vmul.f32 0.2, %v6429_v52  ;;  %v6594_v15 = vmax.f32 %v13408_v45, %v13415_v56  ;;  %vm6462_vm4 = vcmp.gt.f32.partialorder %v6430_v32, 0.0  ;;  %v6494_v42 = vmul.f32 0.2, %v6430_v32  ;;  %v8486_v49 = vld [vmem:[%s14652_s7 + $0x100] sm:$0xff]   ;;  %8057 = vmatprep.subr.bf16.mxu1 %v8484_v25 }
 0x8a5   : > { %v4343_v58 = vmul.f32 1.442695, %v4303_v62  ;;  %v5027_v47 = vsub.f32 %v15999_v31, %v12970_v48  ;;  %v5707_v28 = vadd.f32 %v12838_v24, %v5651_v18  ;;  %v5708_v56 = vadd.f32 %v12840_v30, %v5651_v18  ;;  %v16001_v62 = vld [vmem:[#allocation70_spill] sm:$0xff]  ;;  %7996 = vmatpush3.bf16.msra.mxu0 %v8485_v51  ;;  %v16002_v18 = vld [vmem:[#allocation71_spill] sm:$0xff]  ;;  %8058 = vmatpush3.bf16.msra.mxu1 %v8486_v49 }
 0x8a6   : > { %v4345_v45 = vmul.f32 1.442695, %v4304_v12  ;;  %v5028_v17 = vsub.f32 %v16000_v60, %v12970_v48  ;;  %v5029_v23 = vsub.f32 %v16001_v62, %v12972_v29  ;;  %v5769_v31 = vmul.f32 0.2, %v5705_v1  ;;  %v8487_v60 = vld [vmem:[%s14649_s4 + $0x150] sm:$0xff]   ;;  %v16013_v62 = vld [vmem:[#allocation30_spill] sm:$0xff] }
 0x8a7   : > { %v5770_v35 = vmul.f32 0.2, %v5706_v9  ;;  %6595 = vmax.xlane.f32.xlu0 %v6594_v15  ;;  %v6523_v33 = vsel %vm6459_vm11, %v13376_v40, %v6491_v41  ;;  %v5030_v12 = vsub.f32 %v16002_v18, %v12972_v29  ;;  %vm5737_vm8 = vcmp.gt.f32.partialorder %v5705_v1, 0.0  ;;  %v8488_v15 = vld [vmem:[%s14652_s7 + $0x148] sm:$0xff]   ;;  %v8489_v40 = vld [vmem:[%s14649_s4 + $0x110] sm:$0xff]   ;;  %4398 = vadd.xlane.f32.xlu1 %v13084_v16 }
 0x8a8   : > { %vm5738_vm2 = vcmp.gt.f32.partialorder %v5706_v9, 0.0  ;;  %v6524_v48 = vsel %vm6460_vm1, %v13384_v53, %v6492_v54  ;;  %8971 = vpow2.f32 %v4343_v58  ;;  %v5067_v29 = vmul.f32 1.442695, %v5027_v47  ;;  %v8490_v54 = vld [vmem:[%s14652_s7 + $0x108] sm:$0xff]   ;;  %7997 = vmatprep.subr.bf16.mxu0 %v8487_v60  ;;  %8059 = vmatprep.subr.bf16.mxu1 %v8488_v15  ;;  %v5655_v60 = vpop.permute.xlu0 %5654 }
 0x8a9   : > { %v6525_v41 = vsel %vm6461_vm3, %v6429_v52, %v6493_v61  ;;  %v6526_v53 = vsel %vm6462_vm4, %v6430_v32, %v6494_v42  ;;  %v5771_v49 = vmul.f32 0.2, %v5707_v28  ;;  %v5772_v63 = vmul.f32 0.2, %v5708_v56  ;;  %7998 = vmatpush3.bf16.msra.mxu0 %v8489_v40  ;;  %8060 = vmatpush3.bf16.msra.mxu1 %v8490_v54  ;;  %v16022_v54 = vld [vmem:[#allocation55_spill] sm:$0xff] }
 0x8aa   : > { %8973 = vpow2.f32 %v4345_v45  ;;  %v5069_v25 = vmul.f32 1.442695, %v5028_v17  ;;  %v6431_v51 = vadd.f32 %v12857_v19, %v6375_v39  ;;  %v5071_v58 = vmul.f32 1.442695, %v5029_v23  ;;  %v6379_v45 = vpop.permute.xlu1 %6378 }
 0x8ab   : > { %4401 = vadd.xlane.f32.xlu0 %v13078_v8  ;;  %v5801_v16 = vsel %vm5737_vm8, %v5705_v1, %v5769_v31  ;;  %v5802_v47 = vsel %vm5738_vm2, %v5706_v9, %v5770_v35  ;;  %vm5739_vm6 = vcmp.gt.f32.partialorder %v5707_v28, 0.0  ;;  %vm5740_vm0 = vcmp.gt.f32.partialorder %v5708_v56, 0.0  ;;  %5122 = vadd.xlane.f32.xlu1 %v13322_v4  ;;  %v16007_v9 = vld [vmem:[#allocation92_spill] sm:$0xff]  ;;  %v16016_v31 = vld [vmem:[#allocation93_spill] sm:$0xff] }
 0x8ac   : > { %v6432_v52 = vadd.f32 %v12859_v14, %v6375_v39  ;;  %v5073_v32 = vmul.f32 1.442695, %v5030_v12  ;;  %8975 = vpow2.f32 %v5067_v29  ;;  %v13505_v23 = vsel %vm15800_vm13, %v6523_v33, -1e+30  ;;  %v16010_v39 = vld [vmem:[#allocation29_spill] sm:$0xff] }
 0x8ad   : > { %16004 = vst [vmem:[#allocation24_spill] sm:$0xff] %v13505_v23  ;;  %v13509_v1 = vsel %vm15803_vm15, %v6524_v48, -1e+30  ;;  %vm16008_vm9 = vnez %v16007_v9  ;;  %8977 = vpow2.f32 %v5069_v25  ;;  %vm16011_vm12 = vnez %v16010_v39  ;;  %v16019_v29 = vld [vmem:[#allocation73_spill] sm:$0xff]  ;;  %v16034_v9 = vld [vmem:[#allocation60_spill] sm:$0xff] }
 0x8ae   : > { %16006 = vst [vmem:[#allocation6_spill] sm:$0xff] %v13509_v1  ;;  %v13513_v61 = vsel %vm16008_vm9, %v6525_v41, -1e+30  ;;  %v13517_v42 = vsel %vm16011_vm12, %v5801_v16, -1e+30  ;;  %vm16014_vm11 = vnez %v16013_v62  ;;  %vm16017_vm13 = vnez %v16016_v31  ;;  %v16024_v25 = vld [vmem:[#allocation129_spill] sm:$0xff] }
 0x8af   : > { %16009 = vst [vmem:[#allocation25_spill] sm:$0xff] %v13513_v61  ;;  %16012 = vst [vmem:[#allocation26_spill] sm:$0xff] %v13517_v42  ;;  %v13521_v4 = vsel %vm16014_vm11, %v5802_v47, -1e+30  ;;  %v13525_v33 = vsel %vm16017_vm13, %v6526_v53, -1e+30  ;;  %8979 = vpow2.f32 %v5071_v58  ;;  %5125 = vadd.xlane.f32.xlu0 %v13419_v0  ;;  %v5803_v35 = vsel %vm5739_vm6, %v5707_v28, %v5771_v49  ;;  %v5659_v47 = vpop.permute.xlu1 %5658 }
 0x8b0   : > { %16015 = vst [vmem:[#allocation89_spill] sm:$0xff] %v13521_v4  ;;  %16018 = vst [vmem:[#allocation87_spill] sm:$0xff] %v13525_v33  ;;  %vm6463_vm1 = vcmp.gt.f32.partialorder %v6431_v51, 0.0  ;;  %v5804_v18 = vsel %vm5740_vm0, %v5708_v56, %v5772_v63  ;;  %vm6464_vm15 = vcmp.gt.f32.partialorder %v6432_v52, 0.0  ;;  %v6495_v12 = vmul.f32 0.2, %v6431_v51 }
 0x8b1   : > { %v6496_v48 = vmul.f32 0.2, %v6432_v52  ;;  %8981 = vpow2.f32 %v5073_v32  ;;  %v13531_v15 = vadd.f32 %v12857_v19, %v6379_v45  ;;  %v13534_v40 = vadd.f32 %v12859_v14, %v6379_v45  ;;  %v16023_v63 = vld [vmem:[#allocation128_spill] sm:$0xff] }
 0x8b2   : > { %v4307_v41 = vsub.f32 %v16019_v29, %v12974_v26  ;;  %v16020_v0 = vmax.f32 %v13423_v34, %v13438_v37  ;;  %v5876_v28 = vmax.f32 %v13517_v42, %v13521_v4  ;;  %8983 = vpow2.f32 %v13343_v21  ;;  %v13553_v16 = vpop.eup %8971 }
 0x8b3   : > { %v16021_v56 = vsub.f32 %v15966_v44, %v12836_v50  ;;  %v4308_v49 = vsub.f32 %v16022_v54, %v12974_v26  ;;  %v4406_v58 = vadd.f32 %v16024_v25, %v16023_v63  ;;  %16025 = vst [vmem:[#allocation85_spill] sm:$0xff] %v13553_v16  ;;  %v5709_v32 = vadd.f32 %v12838_v24, %v5655_v60  ;;  %v16031_v26 = vld [vmem:[#allocation83_spill] sm:$0xff] }
 0x8b4   : > { %5874 = vmax.xlane.f32.xlu1 %v16020_v0  ;;  %v5710_v45 = vadd.f32 %v12840_v30, %v5655_v60  ;;  %5877 = vmax.xlane.f32.xlu0 %v5876_v28  ;;  %v6597_v21 = vmax.f32 %v13505_v23, %v13509_v1  ;;  %v6600_v44 = vmax.f32 %v13513_v61, %v13525_v33  ;;  %v13561_v17 = vpop.eup %8973  ;;  %v13565_v8 = vsel %vm15834_vm14, %v5803_v35, -1e+30  ;;  %v16029_v28 = vld [vmem:[#allocation116_spill] sm:$0xff]  ;;  %v16036_v61 = vld [vmem:[#allocation58_spill] sm:$0xff] }
 0x8b5   : > { %v13547_v53 = vmul.f32 1.442695, %v16021_v56  ;;  %16026 = vst [vmem:[#allocation27_spill] sm:$0xff] %v13561_v17  ;;  %v13569_v39 = vsel %vm15837_vm7, %v5804_v18, -1e+30  ;;  %v6527_v62 = vsel %vm6463_vm1, %v6431_v51, %v6495_v12  ;;  %v6528_v31 = vsel %vm6464_vm15, %v6432_v52, %v6496_v48  ;;  %v16030_v56 = vld [vmem:[#allocation77_spill] sm:$0xff] }
 0x8b6   : > { %v6497_v60 = vmul.f32 0.2, %v13531_v15  ;;  %v6498_v29 = vmul.f32 0.2, %v13534_v40  ;;  %v4351_v0 = vmul.f32 1.442695, %v4307_v41  ;;  %v5031_v54 = vsub.f32 %v16030_v56, %v16029_v28  ;;  %v13592_v41 = vpop.eup %8975 }
 0x8b7   : > { %vm6465_vm14 = vcmp.gt.f32.partialorder %v13531_v15, 0.0  ;;  %v13579_v35 = vadd.f32 %v12838_v24, %v5659_v47  ;;  %v4353_v18 = vmul.f32 1.442695, %v4308_v49  ;;  %v5032_v51 = vsub.f32 %v16031_v26, %v16029_v28  ;;  %v8491_v52 = vld [vmem:[%s14649_s4 + $0x158] sm:$0xff]   ;;  %v8492_v12 = vld [vmem:[%s14652_s7 + $0x150] sm:$0xff]   ;;  %16032 = vst [vmem:[#allocation7_spill] sm:$0xff] %v13592_v41  ;;  %v13601_v25 = vpop.eup %8977 }
 0x8b8   : > { %6598 = vmax.xlane.f32.xlu1 %v6597_v21  ;;  %v8493_v48 = vld [vmem:[%s14649_s4 + $0x118] sm:$0xff]   ;;  %v16033_v21 = vld [vmem:[#allocation66_spill] sm:$0xff]  ;;  %v5773_v56 = vmul.f32 0.2, %v5709_v32  ;;  %v5774_v63 = vmul.f32 0.2, %v5710_v45  ;;  %v4403_v28 = vadd.f32 %v13561_v17, %v13553_v16  ;;  %6601 = vmax.xlane.f32.xlu0 %v6600_v44  ;;  %v13604_v33 = vadd.f32 %v12840_v30, %v5659_v47  ;;  %v6383_v47 = vpop.permute.xlu1 %6382 }
 0x8b9   : > { %v5033_v49 = vsub.f32 %v16034_v9, %v16033_v21  ;;  %v8494_v26 = vld [vmem:[%s14652_s7 + $0x110] sm:$0xff]   ;;  %16035 = vst [vmem:[#allocation28_spill] sm:$0xff] %v13601_v25  ;;  %v5034_v1 = vsub.f32 %v16036_v61, %v16033_v21  ;;  %vm5741_vm7 = vcmp.gt.f32.partialorder %v5709_v32, 0.0  ;;  %vm5742_vm3 = vcmp.gt.f32.partialorder %v5710_v45, 0.0  ;;  %7999 = vmatprep.subr.bf16.mxu0 %v8491_v52  ;;  %8061 = vmatprep.subr.bf16.mxu1 %v8492_v12  ;;  %v8495_v44 = vld [vmem:[%s14649_s4 + $0x160] sm:$0xff]   ;;  %v8496_v9 = vld [vmem:[%s14652_s7 + $0x158] sm:$0xff]   ;;  %v13614_v16 = vpop.eup %8979 }
 0x8ba   : > { %16037 = vst [vmem:[#allocation8_spill] sm:$0xff] %v13614_v16  ;;  %vm6466_vm4 = vcmp.gt.f32.partialorder %v13534_v40, 0.0  ;;  %8985 = vpow2.f32 %v4351_v0  ;;  %v5075_v17 = vmul.f32 1.442695, %v5031_v54  ;;  %v13619_v52 = vsel %vm15840_vm5, %v6527_v62, -1e+30  ;;  %8000 = vmatpush3.bf16.msra.mxu0 %v8493_v48  ;;  %8062 = vmatpush3.bf16.msra.mxu1 %v8494_v26 }
 0x8bb   : > { %v8497_v12 = vld [vmem:[%s14649_s4 + $0x120] sm:$0xff]   ;;  %v13624_v21 = vpop.eup %8981  ;;  %8987 = vpow2.f32 %v4353_v18  ;;  %v5077_v23 = vmul.f32 1.442695, %v5032_v51  ;;  %v13628_v42 = vsel %vm15843_vm10, %v6528_v31, -1e+30  ;;  %v6529_v0 = vsel %vm6465_vm14, %v13531_v15, %v6497_v60  ;;  %8001 = vmatprep.subr.bf16.mxu0 %v8495_v44  ;;  %v8498_v62 = vld [vmem:[%s14652_s7 + $0x118] sm:$0xff]   ;;  %8063 = vmatprep.subr.bf16.mxu1 %v8496_v9 }
 0x8bc   : > { %4404 = vadd.xlane.f32.xlu1 %v4403_v28  ;;  %16039 = vst [vmem:[#allocation46_spill] sm:$0xff] %v13624_v21  ;;  %v8499_v54 = vld [vmem:[%s14649_s4 + $0x168] sm:$0xff]   ;;  %v5079_v18 = vmul.f32 1.442695, %v5033_v49  ;;  %v5127_v4 = vadd.f32 %v13601_v25, %v13592_v41  ;;  %4407 = vadd.xlane.f32.xlu0 %v4406_v58  ;;  %v5805_v31 = vsel %vm5741_vm7, %v5709_v32, %v5773_v56  ;;  %v8500_v15 = vld [vmem:[%s14652_s7 + $0x160] sm:$0xff]   ;;  %v13646_v60 = vpop.eup %8983  ;;  %vm5743_vm5 = vcmp.gt.f32.partialorder %v13579_v35, 0.0  ;;  %v6387_v9 = vpop.permute.xlu1 %6386 }
 0x8bd   : > { %v5806_v51 = vsel %vm5742_vm3, %v5710_v45, %v5774_v63  ;;  %16041 = vst [vmem:[#allocation47_spill] sm:$0xff] %v13646_v60  ;;  %v5775_v48 = vmul.f32 0.2, %v13579_v35  ;;  %v5776_v28 = vmul.f32 0.2, %v13604_v33  ;;  %v6530_v58 = vsel %vm6466_vm4, %v13534_v40, %v6498_v29  ;;  %v8501_v32 = vld [vmem:[%s14649_s4 + $0x128] sm:$0xff]  }
 0x8be   : > { %v5081_v49 = vmul.f32 1.442695, %v5034_v1  ;;  %vm5744_vm10 = vcmp.gt.f32.partialorder %v13604_v33, 0.0  ;;  %8989 = vpow2.f32 %v5075_v17  ;;  %v5130_v63 = vadd.f32 %v13624_v21, %v13614_v16  ;;  %8002 = vmatpush3.bf16.msra.mxu0 %v8497_v12  ;;  %v16042_v45 = vld [vmem:[#allocation34_spill] sm:$0xff]  ;;  %v16044_v29 = vld [vmem:[#allocation35_spill] sm:$0xff]  ;;  %8064 = vmatpush3.bf16.msra.mxu1 %v8498_v62  ;;  %v8503_v26 = vld [vmem:[%s14649_s4 + $0x170] sm:$0xff]  }
 0x8bf   : > { %v6435_v1 = vadd.f32 %v12857_v19, %v6383_v47  ;;  %8991 = vpow2.f32 %v5077_v23  ;;  %vm16043_vm8 = vnez %v16042_v45  ;;  %vm16045_vm2 = vnez %v16044_v29  ;;  %8003 = vmatprep.subr.bf16.mxu0 %v8499_v54  ;;  %v8502_v17 = vld [vmem:[%s14652_s7 + $0x120] sm:$0xff]   ;;  %8065 = vmatprep.subr.bf16.mxu1 %v8500_v15  ;;  %v8504_v62 = vld [vmem:[%s14652_s7 + $0x168] sm:$0xff]  }
 0x8c0   : > { %5128 = vadd.xlane.f32.xlu1 %v5127_v4  ;;  %v13663_v40 = vsel %vm16043_vm8, %v5805_v31, -1e+30  ;;  %v13667_v56 = vsel %vm16045_vm2, %v5806_v51, -1e+30  ;;  %v16046_v23 = vsub.f32 %v15973_v10, %v12836_v50  ;;  %8993 = vpow2.f32 %v5079_v18  ;;  %5131 = vadd.xlane.f32.xlu0 %v5130_v63  ;;  %v5663_v50 = vpop.permute.xlu0 %5662  ;;  %v16047_v4 = vld [vmem:[#allocation102_spill] sm:$0xff]  ;;  %v16048_v31 = vld [vmem:[#allocation72_spill] sm:$0xff] }
 0x8c1   : > { %v5879_v61 = vmax.f32 %v13565_v8, %v13569_v39  ;;  %v6603_v12 = vmax.f32 %v13619_v52, %v13628_v42  ;;  %v13688_v54 = vadd.f32 %v12859_v14, %v6383_v47  ;;  %8995 = vpow2.f32 %v5081_v49  ;;  %v16049_v63 = vld [vmem:[#allocation97_spill] sm:$0xff]  ;;  %v16052_v49 = vld [vmem:[#allocation96_spill] sm:$0xff] }
 0x8c2   : > { %v13678_v44 = vmul.f32 1.442695, %v16046_v23  ;;  %v5807_v10 = vsel %vm5743_vm5, %v13579_v35, %v5775_v48  ;;  %v5808_v18 = vsel %vm5744_vm10, %v13604_v33, %v5776_v28  ;;  %v4311_v51 = vsub.f32 %v16048_v31, %v16047_v4  ;;  %8004 = vmatpush3.bf16.msra.mxu0 %v8501_v32  ;;  %v8505_v33 = vld [vmem:[%s14649_s4 + $0x130] sm:$0xff]   ;;  %v16055_v28 = vld [vmem:[#allocation86_spill] sm:$0xff]  ;;  %8066 = vmatpush3.bf16.msra.mxu1 %v8502_v17  ;;  %v16059_v17 = vld [vmem:[#allocation41_spill] sm:$0xff] }
 0x8c3   : > { %v5882_v15 = vmax.f32 %v13663_v40, %v13667_v56  ;;  %vm16050_vm6 = vnez %v16049_v63  ;;  %vm16053_vm0 = vnez %v16052_v49  ;;  %vm6467_vm9 = vcmp.gt.f32.partialorder %v6435_v1, 0.0  ;;  %8005 = vmatprep.subr.bf16.mxu0 %v8503_v26  ;;  %8067 = vmatprep.subr.bf16.mxu1 %v8504_v62  ;;  %v8508_v31 = vld [vmem:[%s14652_s7 + $0x170] sm:$0xff]   ;;  %v16064_v49 = vld [vmem:[#allocation130_spill] sm:$0xff] }
 0x8c4   : > { %5880 = vmax.xlane.f32.xlu1 %v5879_v61  ;;  %v13702_v47 = vsel %vm16050_vm6, %v6529_v0, -1e+30  ;;  %v13706_v45 = vsel %vm16053_vm0, %v6530_v58, -1e+30  ;;  %v6499_v35 = vmul.f32 0.2, %v6435_v1  ;;  %v13712_v48 = vadd.f32 %v12857_v19, %v6387_v9  ;;  %v13722_v32 = vpop.eup %8985 }
 0x8c5   : > { %16051 = vst [vmem:[#allocation70_spill] sm:$0xff] %v13702_v47  ;;  %16054 = vst [vmem:[#allocation71_spill] sm:$0xff] %v13706_v45  ;;  %v4312_v29 = vsub.f32 %v16055_v28, %v16047_v4  ;;  %v8506_v0 = vld [vmem:[%s14652_s7 + $0x128] sm:$0xff]   ;;  %v8507_v58 = vld [vmem:[%s14649_s4 + $0x178] sm:$0xff]   ;;  %v5713_v23 = vadd.f32 %v12838_v24, %v5663_v50  ;;  %v5714_v19 = vadd.f32 %v12840_v30, %v5663_v50  ;;  %5883 = vmax.xlane.f32.xlu0 %v5882_v15  ;;  %v13737_v63 = vpop.eup %8987  ;;  %v13742_v15 = vpop.xlane.xlu0 %4284  ;;  %vm5584_vm6 = vcmask 785920  }
 0x8c6   : > { %16056 = vst [vmem:[#allocation91_spill] sm:$0xff] %v13722_v32  ;;  %v16057_v61 = vld [vmem:[#allocation38_spill] sm:$0xff]  ;;  %vm16060_vm11 = vnez %v16059_v17  ;;  %16061 = vst [vmem:[#allocation90_spill] sm:$0xff] %v13737_v63  ;;  %vm6468_vm13 = vcmp.gt.f32.partialorder %v13688_v54, 0.0  ;;  %v16062_v24 = vld [vmem:[#allocation36_spill] sm:$0xff]  ;;  %v13750_v28 = vadd.f32 %v12859_v14, %v6387_v9  ;;  %8006 = vmatpush3.bf16.msra.mxu0 %v8505_v33  ;;  %8068 = vmatpush3.bf16.msra.mxu1 %v8506_v0  ;;  %vm6469_vm14 = vcmp.gt.f32.partialorder %v13712_v48, 0.0 }
 0x8c7   : > { %vm16058_vm12 = vnez %v16057_v61  ;;  %v13732_v26 = vsel %vm16060_vm11, %v5808_v18, -1e+30  ;;  %v16063_v30 = vld [vmem:[#allocation44_spill] sm:$0xff]  ;;  %v4412_v18 = vadd.f32 %v13381_v3, %v16064_v49  ;;  %v6500_v62 = vmul.f32 0.2, %v13688_v54  ;;  %8007 = vmatprep.subr.bf16.mxu0 %v8507_v58  ;;  %8069 = vmatprep.subr.bf16.mxu1 %v8508_v31  ;;  %v16069_v58 = vld [vmem:[#allocation59_spill] sm:$0xff] }
 0x8c8   : > { %v13728_v4 = vsel %vm16058_vm12, %v5807_v10, -1e+30  ;;  %v5035_v50 = vsub.f32 %v16063_v30, %v16062_v24  ;;  %v6606_v10 = vmax.f32 %v13702_v47, %v13706_v45  ;;  %v4359_v61 = vmul.f32 1.442695, %v4311_v51  ;;  %v16065_v17 = vld [vmem:[#allocation76_spill] sm:$0xff]  ;;  %6604 = vmax.xlane.f32.xlu1 %v6603_v12  ;;  %v8509_v30 = vld [vmem:[%s14649_s4 + $0x138] sm:$0xff]   ;;  %v13764_v9 = vpop.eup %8989  ;;  %v13788_v45 = vpop.xlane.xlu1 %4287 }
 0x8c9   : > { %v5036_v16 = vsub.f32 %v16065_v17, %v16062_v24  ;;  %v6501_v41 = vmul.f32 0.2, %v13712_v48  ;;  %v4361_v21 = vmul.f32 1.442695, %v4312_v29  ;;  %v6531_v3 = vsel %vm6467_vm9, %v6435_v1, %v6499_v35  ;;  %v8510_v14 = vld [vmem:[%s14652_s7 + $0x130] sm:$0xff]   ;;  %16066 = vst [vmem:[#allocation92_spill] sm:$0xff] %v13764_v9  ;;  %v13773_v35 = vpop.eup %8991  ;;  %v13790_v47 = vpop.xlane.xlu0 %5008 }
 0x8ca   : > { %v16067_v12 = vld [vmem:[#allocation40_spill] sm:$0xff]  ;;  %v5777_v24 = vmul.f32 0.2, %v5713_v23  ;;  %v5778_v17 = vmul.f32 0.2, %v5714_v19  ;;  %v4409_v29 = vadd.f32 %v13737_v63, %v13722_v32  ;;  %6607 = vmax.xlane.f32.xlu0 %v6606_v10  ;;  %v8511_v1 = vld [vmem:[%s14652_s7 + $0x178] sm:$0xff]   ;;  %8997 = vpow2.f32 %v4359_v61  ;;  %8008 = vmatpush3.bf16.msra.mxu0 %v8509_v30 }
 0x8cb   : > { %v16068_v51 = vld [vmem:[#allocation32_spill] sm:$0xff]  ;;  %v5083_v0 = vmul.f32 1.442695, %v5035_v50  ;;  %v5038_v49 = vsub.f32 %v16069_v58, %v16067_v12  ;;  %vm5745_vm1 = vcmp.gt.f32.partialorder %v5713_v23, 0.0  ;;  %vm5746_vm15 = vcmp.gt.f32.partialorder %v5714_v19, 0.0  ;;  %v16071_v31 = vld [vmem:[#allocation82_spill] sm:$0xff]  ;;  %8070 = vmatpush3.bf16.msra.mxu1 %v8510_v14 }
 0x8cc   : > { %v5037_v33 = vsub.f32 %v16068_v51, %v16067_v12  ;;  %v13777_v51 = vpop.eup %8993  ;;  %v5085_v32 = vmul.f32 1.442695, %v5036_v16  ;;  %v16070_v10 = vld [vmem:[#allocation120_spill] sm:$0xff]  ;;  %4410 = vadd.xlane.f32.xlu1 %v4409_v29  ;;  %vm6470_vm7 = vcmp.gt.f32.partialorder %v13750_v28, 0.0  ;;  %v6502_v50 = vmul.f32 0.2, %v13750_v28  ;;  %8071 = vmatprep.subr.bf16.mxu1 %v8511_v1 }
 0x8cd   : > { %v4315_v63 = vsub.f32 %v16071_v31, %v16070_v10  ;;  %v13782_v25 = vpop.eup %8995  ;;  %8999 = vpow2.f32 %v4361_v21  ;;  %v16072_v12 = vld [vmem:[#allocation39_spill] sm:$0xff]  ;;  %v8512_v16 = vld [vmem:[%s14652_s7 + $0x138] sm:$0xff]   ;;  %v5133_v30 = vadd.f32 %v13773_v35, %v13764_v9  ;;  %v5809_v29 = vsel %vm5745_vm1, %v5713_v23, %v5777_v24 }
 0x8ce   : > { %v4316_v58 = vsub.f32 %v16072_v12, %v16070_v10  ;;  %v5087_v61 = vmul.f32 1.442695, %v5037_v33  ;;  %4413 = vadd.xlane.f32.xlu0 %v4412_v18  ;;  %v5810_v21 = vsel %vm5746_vm15, %v5714_v19, %v5778_v17  ;;  %9001 = vpow2.f32 %v5083_v0  ;;  %v16073_v12 = vld [vmem:[#allocation124_spill] sm:$0xff]  ;;  %v16074_v9 = vld [vmem:[#allocation75_spill] sm:$0xff]  ;;  %v16076_v17 = vld [vmem:[#allocation42_spill] sm:$0xff] }
 0x8cf   : > { %v5089_v10 = vmul.f32 1.442695, %v5038_v49  ;;  %v6532_v14 = vsel %vm6468_vm13, %v13688_v54, %v6500_v62  ;;  %v6533_v31 = vsel %vm6469_vm14, %v13712_v48, %v6501_v41  ;;  %9003 = vpow2.f32 %v5085_v32  ;;  %v16075_v49 = vld [vmem:[#allocation84_spill] sm:$0xff]  ;;  %v16078_v62 = vld [vmem:[#allocation45_spill] sm:$0xff]  ;;  %8072 = vmatpush3.bf16.msra.mxu1 %v8512_v16  ;;  %v16080_v48 = vld [vmem:[#allocation126_spill] sm:$0xff]  ;;  %v5012_v16 = vpop.xlane.xlu0 %5011 }
 0x8d0   : > { %v4367_v33 = vmul.f32 1.442695, %v4315_v63  ;;  %v5039_v18 = vsub.f32 %v16074_v9, %v16073_v12  ;;  %5134 = vadd.xlane.f32.xlu1 %v5133_v30  ;;  %v5136_v23 = vadd.f32 %v13782_v25, %v13777_v51  ;;  %v4369_v19 = vmul.f32 1.442695, %v4316_v58  ;;  %v16081_v32 = vld [vmem:[#allocation103_spill] sm:$0xff]  ;;  %v16082_v9 = vld [vmem:[#allocation98_spill] sm:$0xff] }
 0x8d1   : > { %v5040_v24 = vsub.f32 %v16075_v49, %v16073_v12  ;;  %vm16077_vm3 = vnez %v16076_v17  ;;  %vm16079_vm4 = vnez %v16078_v62  ;;  %9005 = vpow2.f32 %v5087_v61  ;;  %v16084_v58 = vld [vmem:[#allocation48_spill] sm:$0xff]  ;;  %v16085_v61 = vld [vmem:[#allocation99_spill] sm:$0xff]  ;;  %v16087_v12 = vld [vmem:[#allocation101_spill] sm:$0xff] }
 0x8d2   : > { %v13813_v54 = vsel %vm16077_vm3, %v5809_v29, -1e+30  ;;  %v13817_v41 = vsel %vm16079_vm4, %v5810_v21, -1e+30  ;;  %v5041_v63 = vsub.f32 %v16081_v32, %v16080_v48  ;;  %5137 = vadd.xlane.f32.xlu0 %v5136_v23  ;;  %vm16083_vm5 = vnez %v16082_v9  ;;  %v13830_v29 = vpop.xlane.xlu1 %4290  ;;  %v16089_v49 = vld [vmem:[#allocation106_spill] sm:$0xff]  ;;  %v16095_v32 = vld [vmem:[#allocation52_spill] sm:$0xff] }
 0x8d3   : > { %v13823_v1 = vsel %vm16083_vm5, %v6531_v3, -1e+30  ;;  %v6534_v0 = vsel %vm6470_vm7, %v13750_v28, %v6502_v50  ;;  %9007 = vpow2.f32 %v5089_v10  ;;  %v5042_v30 = vsub.f32 %v16084_v58, %v16080_v48  ;;  %v16092_v48 = vld [vmem:[#allocation100_spill] sm:$0xff] }
 0x8d4   : > { %vm16086_vm10 = vnez %v16085_v61  ;;  %vm16088_vm8 = vnez %v16087_v12  ;;  %9009 = vpow2.f32 %v4367_v33  ;;  %v5091_v3 = vmul.f32 1.442695, %v5039_v18  ;;  %v13853_v33 = vpop.eup %8997 }
 0x8d5   : > { %v13834_v21 = vsel %vm16086_vm10, %v6532_v14, -1e+30  ;;  %v13838_v23 = vsel %vm16088_vm8, %v6533_v31, -1e+30  ;;  %v4319_v28 = vsub.f32 %v16089_v49, %v13742_v15  ;;  %v16090_v50 = vmax.f32 %v13728_v4, %v13732_v26  ;;  %v16091_v14 = vld [vmem:[#allocation107_spill] sm:$0xff]  ;;  %16094 = vst [vmem:[#allocation29_spill] sm:$0xff] %v13853_v33 }
 0x8d6   : > { %v5888_v10 = vmax.f32 %v13813_v54, %v13817_v41  ;;  %9011 = vpow2.f32 %v4369_v19  ;;  %v5093_v17 = vmul.f32 1.442695, %v5040_v24  ;;  %v4320_v62 = vsub.f32 %v16091_v14, %v13742_v15  ;;  %v4294_v14 = vpop.xlane.xlu0 %4293 }
 0x8d7   : > { %5886 = vmax.xlane.f32.xlu1 %v16090_v50  ;;  %vm16093_vm2 = vnez %v16092_v48  ;;  %9013 = vpow2.f32 %v13547_v53  ;;  %v5095_v18 = vmul.f32 1.442695, %v5041_v63  ;;  %v4321_v9 = vsub.f32 %v16095_v32, %v13788_v45  ;;  %v13860_v24 = vpop.eup %8999  ;;  %v16097_v53 = vld [vmem:[#allocation108_spill] sm:$0xff]  ;;  %v13871_v50 = vpop.xlane.xlu1 %5014 }
 0x8d8   : > { %v13851_v31 = vsel %vm16093_vm2, %v6534_v0, -1e+30  ;;  %5889 = vmax.xlane.f32.xlu0 %v5888_v10  ;;  %v6609_v19 = vmax.f32 %v13823_v1, %v13834_v21  ;;  %9015 = vpow2.f32 %v13678_v44  ;;  %v5097_v15 = vmul.f32 1.442695, %v5042_v30  ;;  %v16096_v0 = vld [vmem:[#allocation74_spill] sm:$0xff]  ;;  %v13869_v49 = vpop.eup %9001  ;;  %v16099_v44 = vld [vmem:[#allocation109_spill] sm:$0xff] }
 0x8d9   : > { %v4322_v58 = vsub.f32 %v16096_v0, %v13788_v45  ;;  %9017 = vpow2.f32 %v5091_v3  ;;  %v4375_v61 = vmul.f32 1.442695, %v4319_v28  ;;  %v5043_v63 = vsub.f32 %v16097_v53, %v13790_v47  ;;  %16098 = vst [vmem:[#allocation30_spill] sm:$0xff] %v13869_v49  ;;  %v13875_v45 = vpop.eup %9003  ;;  %v16100_v28 = vld [vmem:[#allocation110_spill] sm:$0xff] }
 0x8da   : > { %v6612_v12 = vmax.f32 %v13838_v23, %v13851_v31  ;;  %9019 = vpow2.f32 %v5093_v17  ;;  %v4377_v10 = vmul.f32 1.442695, %v4320_v62  ;;  %v5044_v30 = vsub.f32 %v16099_v44, %v13790_v47  ;;  %v16101_v17 = vld [vmem:[#allocation111_spill] sm:$0xff]  ;;  %v16103_v62 = vld [vmem:[#allocation69_spill] sm:$0xff] }
 0x8db   : > { %6610 = vmax.xlane.f32.xlu1 %v6609_v19  ;;  %9021 = vpow2.f32 %v5095_v18  ;;  %v4379_v3 = vmul.f32 1.442695, %v4321_v9  ;;  %v5045_v48 = vsub.f32 %v16100_v28, %v5012_v16  ;;  %v4415_v32 = vadd.f32 %v13860_v24, %v13853_v33  ;;  %v13881_v53 = vpop.eup %9005  ;;  %v16105_v28 = vld [vmem:[#allocation19_spill] sm:$0xff] }
 0x8dc   : > { %6613 = vmax.xlane.f32.xlu0 %v6612_v12  ;;  %9023 = vpow2.f32 %v5097_v15  ;;  %v4381_v19 = vmul.f32 1.442695, %v4322_v58  ;;  %v5046_v0 = vsub.f32 %v16101_v17, %v5012_v16  ;;  %16102 = vst [vmem:[#allocation93_spill] sm:$0xff] %v13881_v53  ;;  %v4323_v47 = vsub.f32 %v16103_v62, %v13830_v29  ;;  %v16107_v17 = vld [vmem:[#allocation112_spill] sm:$0xff] }
 0x8dd   : > { %9025 = vpow2.f32 %v4375_v61  ;;  %v5099_v44 = vmul.f32 1.442695, %v5043_v63  ;;  %v4418_v18 = vadd.f32 %v13646_v60, %v13410_v20  ;;  %v13887_v9 = vpop.eup %9007  ;;  %v4324_v12 = vsub.f32 %v16105_v28, %v13830_v29  ;;  %v16108_v20 = vld [vmem:[#allocation113_spill] sm:$0xff]  ;;  %v5018_v29 = vpop.xlane.xlu0 %5017 }
 0x8de   : > { %16104 = vst [vmem:[#allocation73_spill] sm:$0xff] %v13887_v9  ;;  %9027 = vpow2.f32 %v4377_v10  ;;  %v5101_v15 = vmul.f32 1.442695, %v5044_v30  ;;  %v13891_v58 = vpop.eup %9009  ;;  %v5103_v16 = vmul.f32 1.442695, %v5045_v48  ;;  %v4325_v33 = vsub.f32 %v16107_v17, %v4294_v14 }
 0x8df   : > { %4416 = vadd.xlane.f32.xlu1 %v4415_v32  ;;  %16106 = vst [vmem:[#allocation55_spill] sm:$0xff] %v13891_v58  ;;  %9029 = vpow2.f32 %v4379_v3  ;;  %v5139_v61 = vadd.f32 %v13875_v45, %v13869_v49  ;;  %v5845_v32 = vpop.xlane.xlu1 %5844  ;;  %v5105_v62 = vmul.f32 1.442695, %v5046_v0  ;;  %v4326_v60 = vsub.f32 %v16108_v20, %v4294_v14  ;;  %v16109_v3 = vld [vmem:[#allocation81_spill] sm:$0xff] }
 0x8e0   : > { %4419 = vadd.xlane.f32.xlu0 %v4418_v18  ;;  %v13896_v63 = vpop.eup %9011  ;;  %9031 = vpow2.f32 %v4381_v19  ;;  %v4383_v30 = vmul.f32 1.442695, %v4323_v47  ;;  %v5047_v48 = vsub.f32 %v16109_v3, %v13871_v50  ;;  %v5142_v28 = vadd.f32 %v13887_v9, %v13881_v53  ;;  %v16110_v19 = vld [vmem:[#allocation80_spill] sm:$0xff]  ;;  %v16112_v47 = vld [vmem:[#allocation114_spill] sm:$0xff]  ;;  %v16113_v53 = vld [vmem:[#allocation115_spill] sm:$0xff] }
 0x8e1   : > { %v13899_v10 = vpop.eup %9013  ;;  %9033 = vpow2.f32 %v5099_v44  ;;  %v4385_v17 = vmul.f32 1.442695, %v4324_v12  ;;  %v5048_v0 = vsub.f32 %v16110_v19, %v13871_v50  ;;  %v4387_v14 = vmul.f32 1.442695, %v4325_v33 }
 0x8e2   : > { %v13905_v18 = vpop.eup %9015  ;;  %9035 = vpow2.f32 %v5101_v15  ;;  %v5049_v49 = vsub.f32 %v16112_v47, %v5018_v29  ;;  %v4421_v44 = vadd.f32 %v13896_v63, %v13891_v58  ;;  %v4389_v3 = vmul.f32 1.442695, %v4326_v60  ;;  %v16114_v15 = vld [vmem:[#allocation23_spill] sm:$0xff]  ;;  %v16115_v47 = vld [vmem:[#allocation88_spill] sm:$0xff] }
 0x8e3   : > { %5140 = vadd.xlane.f32.xlu1 %v5139_v61  ;;  %v13909_v20 = vpop.eup %9017  ;;  %9037 = vpow2.f32 %v5103_v16  ;;  %v5050_v12 = vsub.f32 %v16113_v53, %v5018_v29  ;;  %v5107_v50 = vmul.f32 1.442695, %v5047_v48  ;;  %v5891_v19 = vsub.f32 %v16114_v15, %v5845_v32 }
 0x8e4   : > { %16111 = vst [vmem:[#allocation31_spill] sm:$0xff] %v13909_v20  ;;  %5143 = vadd.xlane.f32.xlu0 %v5142_v28  ;;  %v13914_v61 = vpop.eup %9019  ;;  %9039 = vpow2.f32 %v5105_v62  ;;  %v4424_v33 = vadd.f32 %v13905_v18, %v13899_v10  ;;  %v5109_v28 = vmul.f32 1.442695, %v5048_v0  ;;  %v5892_v58 = vsub.f32 %v16115_v47, %v5845_v32  ;;  %v6569_v62 = vpop.xlane.xlu1 %6568  ;;  %v16118_v0 = vld [vmem:[#allocation104_spill] sm:$0xff]  ;;  %v16119_v47 = vld [vmem:[#allocation105_spill] sm:$0xff] }
 0x8e5   : > { %v13917_v9 = vpop.eup %9021  ;;  %9041 = vpow2.f32 %v4383_v30  ;;  %v5111_v53 = vmul.f32 1.442695, %v5049_v49  ;;  %v5145_v29 = vadd.f32 %v13914_v61, %v13909_v20  ;;  %v5113_v48 = vmul.f32 1.442695, %v5050_v12 }
 0x8e6   : > { %v13922_v16 = vpop.eup %9023  ;;  %9043 = vpow2.f32 %v4385_v17  ;;  %v5923_v17 = vmul.f32 1.442695, %v5891_v19  ;;  %v6615_v15 = vsub.f32 %v16118_v0, %v6569_v62  ;;  %v5925_v49 = vmul.f32 1.442695, %v5892_v58 }
 0x8e7   : > { %4422 = vadd.xlane.f32.xlu1 %v4421_v44  ;;  %v13925_v60 = vpop.eup %9025  ;;  %9045 = vpow2.f32 %v4387_v14  ;;  %v5148_v32 = vadd.f32 %v13922_v16, %v13917_v9  ;;  %vm7180_vm0 = vcmask 1048320  }
 0x8e8   : > { %16116 = vst [vmem:[#allocation33_spill] sm:$0xff] %v13925_v60  ;;  %4425 = vadd.xlane.f32.xlu0 %v4424_v33  ;;  %v13929_v30 = vpop.eup %9027  ;;  %9047 = vpow2.f32 %v4389_v3  ;;  %v6616_v33 = vsub.f32 %v16119_v47, %v6569_v62  ;;  %v6647_v19 = vmul.f32 1.442695, %v6615_v15 }
 0x8e9   : > { %v13931_v44 = vpop.eup %9029  ;;  %9049 = vpow2.f32 %v5107_v50  ;;  %v4427_v3 = vadd.f32 %v13929_v30, %v13925_v60 }
 0x8ea   : > { %16117 = vst [vmem:[#allocation116_spill] sm:$0xff] %v13931_v44  ;;  %v13936_v14 = vpop.eup %9031  ;;  %9051 = vpow2.f32 %v5109_v28  ;;  %v6649_v62 = vmul.f32 1.442695, %v6616_v33 }
 0x8eb   : > { %5146 = vadd.xlane.f32.xlu1 %v5145_v29  ;;  %v13939_v20 = vpop.eup %9033  ;;  %9053 = vpow2.f32 %v5111_v53  ;;  %v4430_v58 = vadd.f32 %v13936_v14, %v13931_v44 }
 0x8ec   : > { %16120 = vst [vmem:[#allocation77_spill] sm:$0xff] %v13939_v20  ;;  %5149 = vadd.xlane.f32.xlu0 %v5148_v32  ;;  %v13943_v12 = vpop.eup %9035  ;;  %9055 = vpow2.f32 %v5113_v48 }
 0x8ed   : > { %16121 = vst [vmem:[#allocation83_spill] sm:$0xff] %v13943_v12  ;;  %v13945_v50 = vpop.eup %9037  ;;  %9057 = vpow2.f32 %v5923_v17  ;;  %v5151_v29 = vadd.f32 %v13943_v12, %v13939_v20  ;;  %v16138_v20 = vld [vmem:[#allocation57_spill] sm:$0xff]  ;;  %v16140_v12 = vld [vmem:[#allocation50_spill] sm:$0xff] }
 0x8ee   : > { %16122 = vst [vmem:[#allocation66_spill] sm:$0xff] %v13945_v50  ;;  %v13949_v28 = vpop.eup %9039  ;;  %9059 = vpow2.f32 %v5925_v49 }
 0x8ef   : > { %4428 = vadd.xlane.f32.xlu1 %v4427_v3  ;;  %16123 = vst [vmem:[#allocation60_spill] sm:$0xff] %v13949_v28  ;;  %v13951_v53 = vpop.eup %9041  ;;  %9061 = vpow2.f32 %v6647_v19  ;;  %v5154_v17 = vadd.f32 %v13949_v28, %v13945_v50 }
 0x8f0   : > { %16124 = vst [vmem:[#allocation58_spill] sm:$0xff] %v13951_v53  ;;  %4431 = vadd.xlane.f32.xlu0 %v4430_v58  ;;  %v13955_v0 = vpop.eup %9043  ;;  %9063 = vpow2.f32 %v6649_v62 }
 0x8f1   : > { %16125 = vst [vmem:[#allocation94_spill] sm:$0xff] %v13955_v0  ;;  %v13957_v48 = vpop.eup %9045  ;;  %v4433_v49 = vadd.f32 %v13955_v0, %v13951_v53 }
 0x8f2   : > { %16126 = vst [vmem:[#allocation95_spill] sm:$0xff] %v13957_v48  ;;  %v13961_v15 = vpop.eup %9047 }
 0x8f3   : > { %5152 = vadd.xlane.f32.xlu1 %v5151_v29  ;;  %16127 = vst [vmem:[#allocation34_spill] sm:$0xff] %v13961_v15  ;;  %v13963_v32 = vpop.eup %9049  ;;  %v4436_v3 = vadd.f32 %v13961_v15, %v13957_v48 }
 0x8f4   : > { %16128 = vst [vmem:[#allocation35_spill] sm:$0xff] %v13963_v32  ;;  %5155 = vadd.xlane.f32.xlu0 %v5154_v17  ;;  %v13967_v47 = vpop.eup %9051 }
 0x8f5   : > { %16129 = vst [vmem:[#allocation102_spill] sm:$0xff] %v13967_v47  ;;  %v13969_v33 = vpop.eup %9053  ;;  %v5157_v62 = vadd.f32 %v13967_v47, %v13963_v32  ;;  %v16136_v47 = vld [vmem:[#allocation9_spill] sm:$0xff] }
 0x8f6   : > { %16130 = vst [vmem:[#allocation72_spill] sm:$0xff] %v13969_v33  ;;  %v13973_v19 = vpop.eup %9055 }
 0x8f7   : > { %4434 = vadd.xlane.f32.xlu1 %v4433_v49  ;;  %16131 = vst [vmem:[#allocation97_spill] sm:$0xff] %v13973_v19  ;;  %v13975_v58 = vpop.eup %9057  ;;  %v5160_v17 = vadd.f32 %v13973_v19, %v13969_v33 }
 0x8f8   : > { %16132 = vst [vmem:[#allocation96_spill] sm:$0xff] %v13975_v58  ;;  %4437 = vadd.xlane.f32.xlu0 %v4436_v3  ;;  %v13979_v29 = vpop.eup %9059 }
 0x8f9   : > { %16133 = vst [vmem:[#allocation86_spill] sm:$0xff] %v13979_v29  ;;  %v13983_v53 = vpop.eup %9061  ;;  %v5987_v49 = vadd.f32 %v13979_v29, %v13975_v58 }
 0x8fa   : > { %16134 = vst [vmem:[#allocation38_spill] sm:$0xff] %v13983_v53  ;;  %v13987_v48 = vpop.eup %9063 }
 0x8fb   : > { %5158 = vadd.xlane.f32.xlu1 %v5157_v62  ;;  %16135 = vst [vmem:[#allocation41_spill] sm:$0xff] %v13987_v48  ;;  %v6711_v3 = vadd.f32 %v13987_v48, %v13983_v53  ;;  %v16137_v62 = vld [vmem:[#allocation10_spill] sm:$0xff] }
 0x8fc   : > { %5161 = vadd.xlane.f32.xlu0 %v5160_v17 }
 0x8ff   : > { %5988 = vadd.xlane.f32.xlu1 %v5987_v49  ;;  %v16139_v49 = vld [vmem:[#allocation11_spill] sm:$0xff] }
 0x900   : > { %v5848_v32 = vpop.xlane.xlu0 %5847 }
 0x901   : > { %v5893_v15 = vsub.f32 %v16136_v47, %v5848_v32  ;;  %v5894_v0 = vsub.f32 %v16137_v62, %v5848_v32  ;;  %v16142_v32 = vld [vmem:[#allocation13_spill] sm:$0xff] }
 0x903   : > { %6712 = vadd.xlane.f32.xlu1 %v6711_v3  ;;  %v5927_v50 = vmul.f32 1.442695, %v5893_v15  ;;  %v5929_v33 = vmul.f32 1.442695, %v5894_v0  ;;  %v16141_v15 = vld [vmem:[#allocation56_spill] sm:$0xff] }
 0x905   : > { %9065 = vpow2.f32 %v5927_v50 }
 0x906   : > { %v5851_v58 = vpop.xlane.xlu1 %5850  ;;  %9067 = vpow2.f32 %v5929_v33  ;;  %v16143_v33 = vld [vmem:[#allocation68_spill] sm:$0xff] }
 0x907   : > { %v6572_v19 = vpop.xlane.xlu0 %6571  ;;  %v5895_v28 = vsub.f32 %v16139_v49, %v5851_v58  ;;  %v5896_v48 = vsub.f32 %v16140_v12, %v5851_v58  ;;  %v16144_v49 = vld [vmem:[#allocation62_spill] sm:$0xff] }
 0x908   : > { %v6617_v17 = vsub.f32 %v13094_v5, %v6572_v19  ;;  %v6618_v29 = vsub.f32 %v16138_v20, %v6572_v19 }
 0x909   : > { %v5931_v60 = vmul.f32 1.442695, %v5895_v28  ;;  %v5933_v47 = vmul.f32 1.442695, %v5896_v48 }
 0x90a   : > { %v6651_v3 = vmul.f32 1.442695, %v6617_v17  ;;  %v6653_v53 = vmul.f32 1.442695, %v6618_v29 }
 0x90c   : > { %9069 = vpow2.f32 %v6651_v3  ;;  %v6575_v5 = vpop.xlane.xlu1 %6574 }
 0x90d   : > { %v5854_v44 = vpop.xlane.xlu0 %5853  ;;  %9071 = vpow2.f32 %v6653_v53  ;;  %v6619_v62 = vsub.f32 %v16143_v33, %v6575_v5  ;;  %v6620_v12 = vsub.f32 %v16144_v49, %v6575_v5  ;;  %v8515_v53 = vld [vmem:[%s14652_s7 + $0x1c0] sm:$0xff]   ;;  %v16147_v33 = vld [vmem:[#allocation67_spill] sm:$0xff] }
 0x90e   : > { %v5897_v0 = vsub.f32 %v16141_v15, %v5854_v44  ;;  %v5898_v50 = vsub.f32 %v16142_v32, %v5854_v44  ;;  %9073 = vpow2.f32 %v5931_v60  ;;  %v8513_v60 = vld [vmem:[%s14649_s4 + $0x1c0] sm:$0xff]   ;;  %8185 = vmatprep.subr.bf16.mxu1 %v8515_v53  ;;  %v16149_v53 = vld [vmem:[#allocation61_spill] sm:$0xff] }
 0x90f   : > { %9075 = vpow2.f32 %v5933_v47  ;;  %v6655_v28 = vmul.f32 1.442695, %v6619_v62  ;;  %v6657_v17 = vmul.f32 1.442695, %v6620_v12  ;;  %v14009_v3 = vpop.eup %9065  ;;  %8121 = vmatprep.subr.bf16.mxu0 %v8513_v60 }
 0x910   : > { %v5935_v20 = vmul.f32 1.442695, %v5897_v0  ;;  %v5937_v19 = vmul.f32 1.442695, %v5898_v50  ;;  %v5857_v44 = vpop.xlane.xlu1 %5856  ;;  %v16145_v0 = vld [vmem:[#allocation15_spill] sm:$0xff]  ;;  %v14012_v32 = vpop.eup %9067 }
 0x911   : > { %v6578_v58 = vpop.xlane.xlu0 %6577 }
 0x912   : > { %9077 = vpow2.f32 %v5935_v20  ;;  %v6621_v48 = vsub.f32 %v13106_v36, %v6578_v58  ;;  %v6622_v29 = vsub.f32 %v13118_v55, %v6578_v58  ;;  %v5899_v36 = vsub.f32 %v16145_v0, %v5857_v44  ;;  %v16146_v55 = vld [vmem:[#allocation12_spill] sm:$0xff] }
 0x913   : > { %9079 = vpow2.f32 %v5937_v19  ;;  %v5900_v50 = vsub.f32 %v16146_v55, %v5857_v44  ;;  %v5990_v58 = vadd.f32 %v14012_v32, %v14009_v3 }
 0x914   : > { %9081 = vpow2.f32 %v6655_v28  ;;  %v6659_v47 = vmul.f32 1.442695, %v6621_v48  ;;  %v6661_v15 = vmul.f32 1.442695, %v6622_v29  ;;  %v5939_v20 = vmul.f32 1.442695, %v5899_v36  ;;  %v6581_v12 = vpop.xlane.xlu1 %6580 }
 0x915   : > { %9083 = vpow2.f32 %v6657_v17  ;;  %v5860_v5 = vpop.xlane.xlu0 %5859  ;;  %v5941_v49 = vmul.f32 1.442695, %v5900_v50  ;;  %v16148_v17 = vld [vmem:[#allocation16_spill] sm:$0xff]  ;;  %5991 = vadd.xlane.f32.xlu0 %v5990_v58 }
 0x916   : > { %9085 = vpow2.f32 %v6659_v47  ;;  %v5901_v19 = vsub.f32 %v13250_v46, %v5860_v5  ;;  %v5902_v62 = vsub.f32 %v16147_v33, %v5860_v5  ;;  %v14019_v28 = vpop.eup %9069  ;;  %v6623_v44 = vsub.f32 %v16148_v17, %v6581_v12 }
 0x917   : > { %9087 = vpow2.f32 %v6661_v15  ;;  %v14022_v60 = vpop.eup %9071  ;;  %v6624_v46 = vsub.f32 %v16149_v53, %v6581_v12 }
 0x918   : > { %9089 = vpow2.f32 %v5939_v20  ;;  %v5943_v48 = vmul.f32 1.442695, %v5901_v19  ;;  %v5945_v29 = vmul.f32 1.442695, %v5902_v62  ;;  %v14025_v15 = vpop.eup %9073  ;;  %v6663_v0 = vmul.f32 1.442695, %v6623_v44 }
 0x919   : > { %9091 = vpow2.f32 %v5941_v49  ;;  %v6584_v47 = vpop.xlane.xlu0 %6583  ;;  %v14029_v50 = vpop.eup %9075  ;;  %v6665_v5 = vmul.f32 1.442695, %v6624_v46  ;;  %v6714_v19 = vadd.f32 %v14022_v60, %v14019_v28 }
 0x91a   : > { %9093 = vpow2.f32 %v5943_v48  ;;  %v6625_v36 = vsub.f32 %v13271_v27, %v6584_v47  ;;  %v6626_v55 = vsub.f32 %v13275_v13, %v6584_v47  ;;  %v5993_v13 = vadd.f32 %v14029_v50, %v14025_v15 }
 0x91b   : > { %9095 = vpow2.f32 %v5945_v29  ;;  %v5863_v20 = vpop.xlane.xlu1 %5862  ;;  %6715 = vadd.xlane.f32.xlu0 %v6714_v19 }
 0x91c   : > { %v14033_v33 = vpop.eup %9077  ;;  %9097 = vpow2.f32 %v6663_v0  ;;  %v6667_v62 = vmul.f32 1.442695, %v6625_v36  ;;  %v6669_v49 = vmul.f32 1.442695, %v6626_v55  ;;  %v5903_v12 = vsub.f32 %v13281_v59, %v5863_v20  ;;  %5994 = vadd.xlane.f32.xlu1 %v5993_v13 }
 0x91d   : > { %v14036_v58 = vpop.eup %9079  ;;  %9099 = vpow2.f32 %v6665_v5  ;;  %v5904_v27 = vsub.f32 %v13285_v7, %v5863_v20  ;;  %v5866_v48 = vpop.xlane.xlu0 %5865 }
 0x91e   : > { %v14041_v29 = vpop.eup %9081  ;;  %9101 = vpow2.f32 %v6667_v62  ;;  %v5947_v17 = vmul.f32 1.442695, %v5903_v12  ;;  %v5905_v44 = vsub.f32 %v13299_v6, %v5866_v48  ;;  %v5906_v53 = vsub.f32 %v13303_v22, %v5866_v48 }
 0x91f   : > { %16150 = vst [vmem:[#allocation36_spill] sm:$0xff] %v14041_v29  ;;  %v14045_v46 = vpop.eup %9083  ;;  %9103 = vpow2.f32 %v6669_v49  ;;  %v5949_v59 = vmul.f32 1.442695, %v5904_v27  ;;  %v6587_v47 = vpop.xlane.xlu1 %6586  ;;  %v5996_v7 = vadd.f32 %v14036_v58, %v14033_v33 }
 0x920   : > { %16151 = vst [vmem:[#allocation44_spill] sm:$0xff] %v14045_v46  ;;  %v14049_v0 = vpop.eup %9085  ;;  %9105 = vpow2.f32 %v5947_v17  ;;  %v5951_v36 = vmul.f32 1.442695, %v5905_v44  ;;  %v5953_v55 = vmul.f32 1.442695, %v5906_v53  ;;  %v6627_v5 = vsub.f32 %v13293_v57, %v6587_v47 }
 0x921   : > { %16152 = vst [vmem:[#allocation76_spill] sm:$0xff] %v14049_v0  ;;  %v14052_v20 = vpop.eup %9087  ;;  %9107 = vpow2.f32 %v5949_v59  ;;  %v6628_v6 = vsub.f32 %v13307_v38, %v6587_v47  ;;  %5997 = vadd.xlane.f32.xlu0 %v5996_v7  ;;  %v6717_v22 = vadd.f32 %v14045_v46, %v14041_v29  ;;  %v16182_v29 = vld [vmem:[#allocation121_spill] sm:$0xff] }
 0x922   : > { %16153 = vst [vmem:[#allocation40_spill] sm:$0xff] %v14052_v20  ;;  %v6590_v19 = vpop.xlane.xlu0 %6589  ;;  %v14057_v62 = vpop.eup %9089  ;;  %9109 = vpow2.f32 %v5951_v36  ;;  %v6671_v49 = vmul.f32 1.442695, %v6627_v5  ;;  %v6720_v38 = vadd.f32 %v14052_v20, %v14049_v0 }
 0x923   : > { %16154 = vst [vmem:[#allocation32_spill] sm:$0xff] %v14057_v62  ;;  %v6629_v12 = vsub.f32 %v13332_v43, %v6590_v19  ;;  %v6630_v27 = vsub.f32 %v13336_v11, %v6590_v19  ;;  %v14061_v13 = vpop.eup %9091  ;;  %9111 = vpow2.f32 %v5953_v55  ;;  %v6673_v57 = vmul.f32 1.442695, %v6628_v6  ;;  %6718 = vadd.xlane.f32.xlu1 %v6717_v22  ;;  %v4393_v48 = vpop.xlane.xlu1 %4392 }
 0x924   : > { %16155 = vst [vmem:[#allocation59_spill] sm:$0xff] %v14061_v13  ;;  %v14065_v17 = vpop.eup %9093  ;;  %9113 = vpow2.f32 %v6671_v49  ;;  %v5999_v59 = vadd.f32 %v14061_v13, %v14057_v62  ;;  %v16177_v13 = vld [vmem:[#allocation37_spill] sm:$0xff] }
 0x925   : > { %16156 = vst [vmem:[#allocation120_spill] sm:$0xff] %v14065_v17  ;;  %v6675_v44 = vmul.f32 1.442695, %v6629_v12  ;;  %v6677_v53 = vmul.f32 1.442695, %v6630_v27  ;;  %v14069_v43 = vpop.eup %9095  ;;  %9115 = vpow2.f32 %v6673_v57  ;;  %6721 = vadd.xlane.f32.xlu0 %v6720_v38 }
 0x926   : > { %16157 = vst [vmem:[#allocation82_spill] sm:$0xff] %v14069_v43  ;;  %v4396_v11 = vpop.xlane.xlu0 %4395  ;;  %v14071_v47 = vpop.eup %9097  ;;  %v6002_v7 = vadd.f32 %v14069_v43, %v14065_v17 }
 0x927   : > { %16158 = vst [vmem:[#allocation39_spill] sm:$0xff] %v14071_v47  ;;  %9117 = vpow2.f32 %v6675_v44  ;;  %v14075_v36 = vpop.eup %9099  ;;  %6000 = vadd.xlane.f32.xlu1 %v5999_v59  ;;  %v5117_v55 = vpop.xlane.xlu1 %5116  ;;  %v16165_v44 = vld [vmem:[#allocation51_spill] sm:$0xff] }
 0x928   : > { %16159 = vst [vmem:[#allocation124_spill] sm:$0xff] %v14075_v36  ;;  %9119 = vpow2.f32 %v6677_v53  ;;  %v14077_v5 = vpop.eup %9101  ;;  %v6723_v6 = vadd.f32 %v14075_v36, %v14071_v47 }
 0x929   : > { %16160 = vst [vmem:[#allocation75_spill] sm:$0xff] %v14077_v5  ;;  %9121 = vrcp.f32 %v4393_v48  ;;  %v14081_v22 = vpop.eup %9103  ;;  %6003 = vadd.xlane.f32.xlu0 %v6002_v7 }
 0x92a   : > { %16161 = vst [vmem:[#allocation84_spill] sm:$0xff] %v14081_v22  ;;  %9123 = vrcp.f32 %v4396_v11  ;;  %v5120_v19 = vpop.xlane.xlu0 %5119  ;;  %v14083_v49 = vpop.eup %9105  ;;  %v6726_v12 = vadd.f32 %v14081_v22, %v14077_v5  ;;  %v16169_v22 = vld [vmem:[#allocation79_spill] sm:$0xff] }
 0x92b   : > { %16162 = vst [vmem:[#allocation42_spill] sm:$0xff] %v14083_v49  ;;  %9125 = vrcp.f32 %v5117_v55  ;;  %v14087_v27 = vpop.eup %9107  ;;  %6724 = vadd.xlane.f32.xlu1 %v6723_v6  ;;  %v5869_v57 = vpop.xlane.xlu1 %5868  ;;  %v16168_v6 = vld [vmem:[#allocation43_spill] sm:$0xff] }
 0x92c   : > { %16163 = vst [vmem:[#allocation45_spill] sm:$0xff] %v14087_v27  ;;  %9127 = vrcp.f32 %v5120_v19  ;;  %v14089_v48 = vpop.eup %9109  ;;  %v5907_v38 = vsub.f32 %v13362_v2, %v5869_v57  ;;  %v5908_v53 = vsub.f32 %v16165_v44, %v5869_v57  ;;  %v6005_v59 = vadd.f32 %v14087_v27, %v14083_v49  ;;  %v16172_v27 = vld [vmem:[#allocation21_spill] sm:$0xff] }
 0x92d   : > { %16164 = vst [vmem:[#allocation126_spill] sm:$0xff] %v14089_v48  ;;  %v14095_v11 = vpop.eup %9111  ;;  %6727 = vadd.xlane.f32.xlu0 %v6726_v12 }
 0x92e   : > { %16166 = vst [vmem:[#allocation103_spill] sm:$0xff] %v14095_v11  ;;  %v14097_v55 = vpop.eup %9113  ;;  %v5955_v5 = vmul.f32 1.442695, %v5907_v38  ;;  %v5957_v47 = vmul.f32 1.442695, %v5908_v53  ;;  %v6008_v57 = vadd.f32 %v14095_v11, %v14089_v48  ;;  %v16174_v53 = vld [vmem:[#allocation22_spill] sm:$0xff] }
 0x92f   : > { %16167 = vst [vmem:[#allocation98_spill] sm:$0xff] %v14097_v55  ;;  %v14101_v17 = vpop.eup %9115  ;;  %6006 = vadd.xlane.f32.xlu1 %v6005_v59  ;;  %v16175_v11 = vld [vmem:[#allocation78_spill] sm:$0xff] }
 0x930   : > { %v5872_v7 = vpop.xlane.xlu0 %5871  ;;  %16170 = vst [vmem:[#allocation48_spill] sm:$0xff] %v14101_v17  ;;  %v6593_v2 = vpop.xlane.xlu1 %6592  ;;  %9129 = vpow2.f32 %v5955_v5  ;;  %v16176_v5 = vld [vmem:[#allocation64_spill] sm:$0xff] }
 0x931   : > { %v5909_v19 = vsub.f32 %v16168_v6, %v5872_v7  ;;  %v5910_v36 = vsub.f32 %v16169_v22, %v5872_v7  ;;  %v14105_v44 = vpop.eup %9117  ;;  %v6631_v62 = vsub.f32 %v16172_v27, %v6593_v2  ;;  %9131 = vpow2.f32 %v5957_v47  ;;  %6009 = vadd.xlane.f32.xlu0 %v6008_v57 }
 0x932   : > { %16171 = vst [vmem:[#allocation99_spill] sm:$0xff] %v14105_v44  ;;  %v14108_v38 = vpop.eup %9119  ;;  %v6632_v6 = vsub.f32 %v16174_v53, %v6593_v2  ;;  %v6729_v22 = vadd.f32 %v14101_v17, %v14097_v55  ;;  %v16178_v53 = vld [vmem:[#allocation54_spill] sm:$0xff] }
 0x933   : > { %v5959_v12 = vmul.f32 1.442695, %v5909_v19  ;;  %v5961_v49 = vmul.f32 1.442695, %v5910_v36  ;;  %16173 = vst [vmem:[#allocation101_spill] sm:$0xff] %v14108_v38  ;;  %v9122_v7 = vpop.eup %9121  ;;  %v6732_v2 = vadd.f32 %v14108_v38, %v14105_v44 }
 0x934   : > { %v6596_v59 = vpop.xlane.xlu0 %6595  ;;  %v6679_v48 = vmul.f32 1.442695, %v6631_v62  ;;  %v9124_v36 = vpop.eup %9123  ;;  %v4455_v27 = vmul.f32 %v9122_v7, %v16177_v13  ;;  %v6681_v0 = vmul.f32 1.442695, %v6632_v6  ;;  %6730 = vadd.xlane.f32.xlu1 %v6729_v22  ;;  %v16180_v13 = vld [vmem:[#allocation65_spill] sm:$0xff]  ;;  %v16181_v6 = vld [vmem:[#allocation118_spill] sm:$0xff] }
 0x935   : > { %9133 = vpow2.f32 %v5959_v12  ;;  %v6633_v43 = vsub.f32 %v16175_v11, %v6596_v59  ;;  %v6634_v19 = vsub.f32 %v16176_v5, %v6596_v59  ;;  %v4399_v47 = vpop.xlane.xlu1 %4398  ;;  %v9126_v57 = vpop.eup %9125  ;;  %v4457_v55 = vmul.f32 %v9124_v36, %v16178_v53  ;;  %6733 = vadd.xlane.f32.xlu0 %v6732_v2  ;;  %v16179_v59 = vld [vmem:[#allocation117_spill] sm:$0xff] }
 0x936   : > { %9135 = vpow2.f32 %v5961_v49  ;;  %v9128_v17 = vpop.eup %9127  ;;  %v4456_v5 = vmul.f32 %v9122_v7, %v16179_v59  ;;  %v4458_v49 = vmul.f32 %v9124_v36, %v16180_v13  ;;  %v5179_v22 = vmul.f32 %v9126_v57, %v16181_v6  ;;  %v8516_v36 = vld [vmem:[%s14649_s4 + $0x1c8] sm:$0xff]  }
 0x937   : > { %9137 = vpow2.f32 %v6679_v48  ;;  %v6683_v12 = vmul.f32 1.442695, %v6633_v43  ;;  %v6685_v62 = vmul.f32 1.442695, %v6634_v19  ;;  %v5181_v20 = vmul.f32 %v9128_v17, %v16182_v29  ;;  %v16183_v48 = vld [vmem:[#allocation119_spill] sm:$0xff]  ;;  %v16184_v19 = vld [vmem:[#allocation49_spill] sm:$0xff] }
 0x938   : > { %9139 = vpow2.f32 %v6681_v0  ;;  %v4402_v11 = vpop.xlane.xlu0 %4401  ;;  %v4487_v44 = vpack.c.bf16 %v4457_v55, %v4455_v27  ;;  %v4488_v38 = vpack.c.bf16 %v4458_v49, %v4456_v5  ;;  %v5180_v43 = vmul.f32 %v9126_v57, %v16183_v48  ;;  %v8514_v0 = vld [vmem:[%s14649_s4 + $0x180] sm:$0xff]   ;;  %v8522_v5 = vld [vmem:[%s14652_s7 + $0x188] sm:$0xff]   ;;  %v8524_v48 = vld [vmem:[%s14652_s7 + $0x1d0] sm:$0xff]  }
 0x939   : > { %9141 = vpow2.f32 %v6683_v12  ;;  %v5123_v53 = vpop.xlane.xlu1 %5122  ;;  %v5182_v46 = vmul.f32 %v9128_v17, %v16184_v19  ;;  %v5211_v7 = vpack.c.bf16 %v5181_v20, %v5179_v22  ;;  %v8517_v27 = vld [vmem:[%s14652_s7 + $0x180] sm:$0xff]   ;;  %v8520_v20 = vld [vmem:[%s14652_s7 + $0x1c8] sm:$0xff]   ;;  %v16188_v22 = vld [vmem:[#allocation89_spill] sm:$0xff] }
 0x93a   : > { %9143 = vpow2.f32 %v6685_v62  ;;  %4664 = vmatprep.mubr.bf16.mxu0 %v4488_v38  ;;  %v14134_v2 = vpop.eup %9129  ;;  %v8519_v62 = vld [vmem:[%s14649_s4 + $0x1d0] sm:$0xff]   ;;  %v16187_v49 = vld [vmem:[#allocation26_spill] sm:$0xff] }
 0x93b   : > { %9145 = vrcp.f32 %v4399_v47  ;;  %v5212_v55 = vpack.c.bf16 %v5182_v46, %v5180_v43  ;;  %4665 = vmatmul.mubr.bf16.vlgmr.msra.gmra.mrb[64].mxu0 %v4487_v44  ;;  %v14139_v17 = vpop.eup %9131  ;;  %v8518_v46 = vld [vmem:[%s14649_s4 + $0x188] sm:$0xff]  }
 0x93c   : > { %9147 = vrcp.f32 %v4402_v11  ;;  %v5126_v29 = vpop.xlane.xlu0 %5125  ;;  %8122 = vmatpush3.bf16.msra.mxu0 %v8514_v0  ;;  %v6011_v12 = vadd.f32 %v14139_v17, %v14134_v2 }
 0x93d   : > { %9149 = vrcp.f32 %v5123_v53  ;;  %5388 = vmatprep.mubr.bf16.mxu1 %v5212_v55  ;;  %8123 = vmatprep.subr.bf16.mxu0 %v8516_v36 }
 0x93e   : > { %9151 = vrcp.f32 %v5126_v29  ;;  %5389 = vmatmul.mubr.bf16.vlgmr.msra.gmra.mrb[64].mxu1 %v5211_v7  ;;  %6012 = vadd.xlane.f32.xlu1 %v6011_v12  ;;  %v8521_v7 = vld [vmem:[%s14649_s4 + $0x190] sm:$0xff]  }
 0x93f   : > { %v14144_v38 = vpop.eup %9133  ;;  %8186 = vmatpush3.bf16.msra.mxu1 %v8517_v27  ;;  %v16191_v27 = vld [vmem:[#allocation24_spill] sm:$0xff] }
 0x940   : > { %16185 = vst [vmem:[#allocation106_spill] sm:$0xff] %v14144_v38  ;;  %v14153_v11 = vpop.eup %9135  ;;  %8187 = vmatprep.subr.bf16.mxu1 %v8520_v20  ;;  %8124 = vmatpush3.bf16.msra.mxu0 %v8518_v46  ;;  %v16193_v46 = vld [vmem:[#allocation6_spill] sm:$0xff] }
 0x941   : > { %v5875_v47 = vpop.xlane.xlu1 %5874  ;;  %v5878_v59 = vpop.xlane.xlu0 %5877  ;;  %v6014_v0 = vadd.f32 %v14153_v11, %v14144_v38  ;;  %8125 = vmatprep.subr.bf16.mxu0 %v8519_v62 }
 0x942   : > { %v5911_v57 = vsub.f32 %v13423_v34, %v5875_v47  ;;  %v5912_v44 = vsub.f32 %v13438_v37, %v5875_v47  ;;  %v14158_v34 = vpop.eup %9137  ;;  %v5913_v6 = vsub.f32 %v16187_v49, %v5878_v59  ;;  %v5914_v53 = vsub.f32 %v16188_v22, %v5878_v59  ;;  %v8523_v47 = vld [vmem:[%s14649_s4 + $0x1d8] sm:$0xff]  }
 0x943   : > { %16186 = vst [vmem:[#allocation107_spill] sm:$0xff] %v14158_v34  ;;  %v14165_v43 = vpop.eup %9139  ;;  %6015 = vadd.xlane.f32.xlu0 %v6014_v0  ;;  %8188 = vmatpush3.bf16.msra.mxu1 %v8522_v5 }
 0x944   : > { %v5963_v37 = vmul.f32 1.442695, %v5911_v57  ;;  %v5965_v13 = vmul.f32 1.442695, %v5912_v44  ;;  %16189 = vst [vmem:[#allocation100_spill] sm:$0xff] %v14165_v43  ;;  %v14172_v36 = vpop.eup %9141  ;;  %v6735_v12 = vadd.f32 %v14165_v43, %v14158_v34  ;;  %8189 = vmatprep.subr.bf16.mxu1 %v8524_v48  ;;  %v16196_v34 = vld [vmem:[#allocation125_spill] sm:$0xff]  ;;  %8126 = vmatpush3.bf16.msra.mxu0 %v8521_v7 }
 0x945   : > { %v6599_v19 = vpop.xlane.xlu1 %6598  ;;  %16190 = vst [vmem:[#allocation52_spill] sm:$0xff] %v14172_v36  ;;  %v5967_v29 = vmul.f32 1.442695, %v5913_v6  ;;  %v5969_v55 = vmul.f32 1.442695, %v5914_v53  ;;  %v14178_v57 = vpop.eup %9143  ;;  %v16194_v6 = vld [vmem:[#allocation25_spill] sm:$0xff]  ;;  %8127 = vmatprep.subr.bf16.mxu0 %v8523_v47 }
 0x946   : > { %9153 = vpow2.f32 %v5963_v37  ;;  %v6635_v20 = vsub.f32 %v16191_v27, %v6599_v19  ;;  %16192 = vst [vmem:[#allocation74_spill] sm:$0xff] %v14178_v57  ;;  %v6636_v44 = vsub.f32 %v16193_v46, %v6599_v19  ;;  %v6602_v59 = vpop.xlane.xlu0 %6601  ;;  %v8526_v37 = vld [vmem:[%s14652_s7 + $0x190] sm:$0xff]   ;;  %v9146_v62 = vpop.eup %9145  ;;  %v16195_v53 = vld [vmem:[#allocation87_spill] sm:$0xff]  ;;  %6736 = vadd.xlane.f32.xlu1 %v6735_v12  ;;  %v6738_v46 = vadd.f32 %v14178_v57, %v14172_v36  ;;  %v16199_v36 = vld [vmem:[#allocation122_spill] sm:$0xff] }
 0x947   : > { %9155 = vpow2.f32 %v5965_v13  ;;  %v6637_v22 = vsub.f32 %v16194_v6, %v6602_v59  ;;  %v6638_v27 = vsub.f32 %v16195_v53, %v6602_v59  ;;  %v8528_v13 = vld [vmem:[%s14652_s7 + $0x1d8] sm:$0xff]   ;;  %v9148_v19 = vpop.eup %9147  ;;  %v16197_v53 = vld [vmem:[#allocation123_spill] sm:$0xff]  ;;  %8190 = vmatpush3.bf16.msra.mxu1 %v8526_v37 }
 0x948   : > { %9157 = vpow2.f32 %v5967_v29  ;;  %v6687_v49 = vmul.f32 1.442695, %v6635_v20  ;;  %v6689_v0 = vmul.f32 1.442695, %v6636_v44  ;;  %v4460_v29 = vmul.f32 %v9146_v62, %v16196_v34  ;;  %v8525_v20 = vld [vmem:[%s14649_s4 + $0x198] sm:$0xff]   ;;  %v9150_v48 = vpop.eup %9149  ;;  %6739 = vadd.xlane.f32.xlu0 %v6738_v46  ;;  %v16198_v7 = vld [vmem:[#allocation63_spill] sm:$0xff]  ;;  %8191 = vmatprep.subr.bf16.mxu1 %v8528_v13 }
 0x949   : > { %9159 = vpow2.f32 %v5969_v55  ;;  %v4405_v5 = vpop.xlane.xlu1 %4404  ;;  %v6691_v59 = vmul.f32 1.442695, %v6637_v22  ;;  %v6693_v6 = vmul.f32 1.442695, %v6638_v27  ;;  %v4462_v43 = vmul.f32 %v9148_v19, %v16197_v53  ;;  %v8527_v55 = vld [vmem:[%s14649_s4 + $0x1e0] sm:$0xff]   ;;  %v9152_v44 = vpop.eup %9151  ;;  %v16200_v47 = vld [vmem:[#allocation127_spill] sm:$0xff]  ;;  %8128 = vmatpush3.bf16.msra.mxu0 %v8525_v20 }
 0x94a   : > { %9161 = vpow2.f32 %v6687_v49  ;;  %v4408_v34 = vpop.xlane.xlu0 %4407  ;;  %v4459_v12 = vmul.f32 %v9146_v62, %v16198_v7  ;;  %v4461_v57 = vmul.f32 %v9148_v19, %v16199_v36  ;;  %v8530_v49 = vld [vmem:[%s14652_s7 + $0x198] sm:$0xff]   ;;  %v5184_v27 = vmul.f32 %v9150_v48, %v16200_v47  ;;  %v16201_v53 = vld [vmem:[#allocation18_spill] sm:$0xff]  ;;  %8129 = vmatprep.subr.bf16.mxu0 %v8527_v55  ;;  %v8531_v13 = vld [vmem:[%s14649_s4 + $0x1e8] sm:$0xff]  }
 0x94b   : > { %9163 = vpow2.f32 %v6689_v0  ;;  %v4490_v22 = vpack.c.bf16 %v4462_v43, %v4460_v29  ;;  %v5186_v38 = vmul.f32 %v9152_v44, %v16201_v53  ;;  %v8532_v0 = vld [vmem:[%s14652_s7 + $0x1e0] sm:$0xff]   ;;  %v16203_v19 = vld [vmem:[#allocation17_spill] sm:$0xff]  ;;  %8192 = vmatpush3.bf16.msra.mxu1 %v8530_v49  ;;  %v8533_v55 = vld [vmem:[%s14649_s4 + $0x1a8] sm:$0xff]  }
 0x94c   : > { %9165 = vpow2.f32 %v6691_v59  ;;  %v4489_v46 = vpack.c.bf16 %v4461_v57, %v4459_v12  ;;  %v16202_v36 = vld [vmem:[#allocation14_spill] sm:$0xff]  ;;  %v5185_v7 = vmul.f32 %v9152_v44, %v16203_v19  ;;  %8193 = vmatprep.subr.bf16.mxu1 %v8532_v0  ;;  %v8538_v53 = vld [vmem:[%s14652_s7 + $0x1a8] sm:$0xff]  }
 0x94d   : > { %9167 = vpow2.f32 %v6693_v6  ;;  %v5129_v62 = vpop.xlane.xlu1 %5128  ;;  %v5183_v37 = vmul.f32 %v9150_v48, %v16202_v36  ;;  %v8529_v43 = vld [vmem:[%s14649_s4 + $0x1a0] sm:$0xff]   ;;  %4672 = vmatprep.mubr.bf16.mxu0 %v4490_v22  ;;  %v5214_v29 = vpack.c.bf16 %v5186_v38, %v5184_v27  ;;  %v8536_v38 = vld [vmem:[%s14652_s7 + $0x1e8] sm:$0xff]   ;;  %v8535_v22 = vld [vmem:[%s14649_s4 + $0x1f0] sm:$0xff]  }
 0x94e   : > { %9169 = vrcp.f32 %v4405_v5  ;;  %4673 = vmatmul.mubr.bf16.gmra.mrb[68].mxu0 %v4489_v46  ;;  %v5132_v57 = vpop.xlane.xlu0 %5131  ;;  %v8534_v20 = vld [vmem:[%s14652_s7 + $0x1a0] sm:$0xff]   ;;  %v8540_v36 = vld [vmem:[%s14652_s7 + $0x1f0] sm:$0xff]  }
 0x94f   : > { %9171 = vrcp.f32 %v4408_v34  ;;  %v5213_v59 = vpack.c.bf16 %v5185_v7, %v5183_v37  ;;  %5396 = vmatprep.mubr.bf16.mxu1 %v5214_v29  ;;  %8130 = vmatpush3.bf16.msra.mxu0 %v8529_v43  ;;  %v8537_v43 = vld [vmem:[%s14649_s4 + $0x1b0] sm:$0xff]  }
 0x950   : > { %v14222_v48 = vpop.eup %9153  ;;  %9173 = vrcp.f32 %v5129_v62  ;;  %8131 = vmatprep.subr.bf16.mxu0 %v8531_v13  ;;  %8194 = vmatpush3.bf16.msra.mxu1 %v8534_v20 }
 0x951   : > { %v14227_v5 = vpop.eup %9155  ;;  %9175 = vrcp.f32 %v5132_v57  ;;  %v5881_v6 = vpop.xlane.xlu1 %5880  ;;  %5397 = vmatmul.mubr.bf16.gmra.mrb[68].mxu1 %v5213_v59  ;;  %8195 = vmatprep.subr.bf16.mxu1 %v8536_v38  ;;  %v8539_v57 = vld [vmem:[%s14649_s4 + $0x1f8] sm:$0xff]  }
 0x952   : > { %v14232_v44 = vpop.eup %9157  ;;  %v5915_v34 = vsub.f32 %v13565_v8, %v5881_v6  ;;  %v5916_v12 = vsub.f32 %v13569_v39, %v5881_v6  ;;  %v6017_v49 = vadd.f32 %v14227_v5, %v14222_v48  ;;  %v5884_v27 = vpop.xlane.xlu0 %5883 }
 0x953   : > { %v14241_v47 = vpop.eup %9159  ;;  %v5917_v62 = vsub.f32 %v13663_v40, %v5884_v27  ;;  %v5918_v46 = vsub.f32 %v13667_v56, %v5884_v27  ;;  %8132 = vmatpush3.bf16.msra.mxu0 %v8533_v55 }
 0x954   : > { %v14246_v0 = vpop.eup %9161  ;;  %v5971_v8 = vmul.f32 1.442695, %v5915_v34  ;;  %v5973_v39 = vmul.f32 1.442695, %v5916_v12  ;;  %6018 = vadd.xlane.f32.xlu1 %v6017_v49  ;;  %v6020_v7 = vadd.f32 %v14241_v47, %v14232_v44  ;;  %8133 = vmatprep.subr.bf16.mxu0 %v8535_v22  ;;  %v16207_v12 = vld [vmem:[#allocation70_spill] sm:$0xff]  ;;  %v16208_v22 = vld [vmem:[#allocation71_spill] sm:$0xff] }
 0x955   : > { %16204 = vst [vmem:[#allocation108_spill] sm:$0xff] %v14246_v0  ;;  %v14253_v37 = vpop.eup %9163  ;;  %v6605_v19 = vpop.xlane.xlu1 %6604  ;;  %v5975_v40 = vmul.f32 1.442695, %v5917_v62  ;;  %v5977_v56 = vmul.f32 1.442695, %v5918_v46  ;;  %8196 = vmatpush3.bf16.msra.mxu1 %v8538_v53  ;;  %v16209_v46 = vld [vmem:[#allocation27_spill] sm:$0xff] }
 0x956   : > { %v14260_v29 = vpop.eup %9165  ;;  %9177 = vpow2.f32 %v5971_v8  ;;  %v6639_v13 = vsub.f32 %v13619_v52, %v6605_v19  ;;  %v6640_v20 = vsub.f32 %v13628_v42, %v6605_v19  ;;  %6021 = vadd.xlane.f32.xlu0 %v6020_v7  ;;  %v6741_v38 = vadd.f32 %v14253_v37, %v14246_v0  ;;  %v8542_v52 = vld [vmem:[%s14652_s7 + $0x1b0] sm:$0xff]   ;;  %8197 = vmatprep.subr.bf16.mxu1 %v8540_v36  ;;  %v8543_v42 = vld [vmem:[%s14652_s7 + $0x1f8] sm:$0xff]   ;;  %v16214_v0 = vld [vmem:[#allocation46_spill] sm:$0xff] }
 0x957   : > { %16205 = vst [vmem:[#allocation109_spill] sm:$0xff] %v14260_v29  ;;  %v14266_v59 = vpop.eup %9167  ;;  %9179 = vpow2.f32 %v5973_v39  ;;  %v6608_v6 = vpop.xlane.xlu0 %6607  ;;  %8134 = vmatpush3.bf16.msra.mxu0 %v8537_v43  ;;  %v8541_v7 = vld [vmem:[%s14649_s4 + $0x1b8] sm:$0xff]  }
 0x958   : > { %16206 = vst [vmem:[#allocation110_spill] sm:$0xff] %v14266_v59  ;;  %v9170_v55 = vpop.eup %9169  ;;  %9181 = vpow2.f32 %v5975_v40  ;;  %v6695_v34 = vmul.f32 1.442695, %v6639_v13  ;;  %v6641_v49 = vsub.f32 %v16207_v12, %v6608_v6  ;;  %v6642_v27 = vsub.f32 %v16208_v22, %v6608_v6  ;;  %6742 = vadd.xlane.f32.xlu1 %v6741_v38  ;;  %v16210_v6 = vld [vmem:[#allocation129_spill] sm:$0xff]  ;;  %8135 = vmatprep.subr.bf16.mxu0 %v8539_v57 }
 0x959   : > { %v9172_v8 = vpop.eup %9171  ;;  %9183 = vpow2.f32 %v5977_v56  ;;  %v6697_v39 = vmul.f32 1.442695, %v6640_v20  ;;  %v4411_v53 = vpop.xlane.xlu1 %4410  ;;  %v6744_v62 = vadd.f32 %v14266_v59, %v14260_v29  ;;  %v4464_v19 = vmul.f32 %v9170_v55, %v16209_v46  ;;  %v16211_v38 = vld [vmem:[#allocation85_spill] sm:$0xff]  ;;  %v16212_v29 = vld [vmem:[#allocation128_spill] sm:$0xff]  ;;  %8198 = vmatpush3.bf16.msra.mxu1 %v8542_v52 }
 0x95a   : > { %v9174_v36 = vpop.eup %9173  ;;  %9185 = vpow2.f32 %v6695_v34  ;;  %v6699_v40 = vmul.f32 1.442695, %v6641_v49  ;;  %v6701_v13 = vmul.f32 1.442695, %v6642_v27  ;;  %v4466_v12 = vmul.f32 %v9172_v8, %v16210_v6  ;;  %v8544_v43 = vld [vmem:[%s14652_s7 + $0x1b8] sm:$0xff]   ;;  %v16213_v49 = vld [vmem:[#allocation28_spill] sm:$0xff]  ;;  %8199 = vmatprep.subr.bf16.mxu1 %v8543_v42 }
 0x95b   : > { %v9176_v56 = vpop.eup %9175  ;;  %9187 = vpow2.f32 %v6697_v39  ;;  %6745 = vadd.xlane.f32.xlu0 %v6744_v62  ;;  %v4414_v20 = vpop.xlane.xlu0 %4413  ;;  %v4463_v22 = vmul.f32 %v9170_v55, %v16211_v38  ;;  %v4465_v46 = vmul.f32 %v9172_v8, %v16212_v29  ;;  %v5188_v27 = vmul.f32 %v9174_v36, %v16213_v49  ;;  %v16215_v62 = vld [vmem:[#allocation7_spill] sm:$0xff]  ;;  %v16216_v55 = vld [vmem:[#allocation8_spill] sm:$0xff]  ;;  %8136 = vmatpush3.bf16.msra.mxu0 %v8541_v7 }
 0x95c   : > { %9189 = vpow2.f32 %v6699_v40  ;;  %v4492_v34 = vpack.c.bf16 %v4466_v12, %v4464_v19  ;;  %v5190_v6 = vmul.f32 %v9176_v56, %v16214_v0  ;;  %v5187_v59 = vmul.f32 %v9174_v36, %v16215_v62 }
 0x95d   : > { %9191 = vpow2.f32 %v6701_v13  ;;  %v5135_v57 = vpop.xlane.xlu1 %5134  ;;  %v4491_v39 = vpack.c.bf16 %v4465_v46, %v4463_v22  ;;  %v5189_v38 = vmul.f32 %v9176_v56, %v16216_v55  ;;  %8200 = vmatpush3.bf16.msra.mxu1 %v8544_v43 }
 0x95e   : > { %9193 = vrcp.f32 %v4411_v53  ;;  %4680 = vmatprep.mubr.bf16.mxu0 %v4492_v34  ;;  %v5216_v29 = vpack.c.bf16 %v5190_v6, %v5188_v27 }
 0x95f   : > { %9195 = vrcp.f32 %v4414_v20  ;;  %4681 = vmatmul.mubr.bf16.gmra.mrb[72].mxu0 %v4491_v39  ;;  %v5138_v52 = vpop.xlane.xlu0 %5137  ;;  %v5215_v8 = vpack.c.bf16 %v5189_v38, %v5187_v59 }
 0x960   : > { %v14295_v19 = vpop.eup %9177  ;;  %9197 = vrcp.f32 %v5135_v57  ;;  %5404 = vmatprep.mubr.bf16.mxu1 %v5216_v29 }
 0x961   : > { %v14297_v0 = vpop.eup %9179  ;;  %9199 = vrcp.f32 %v5138_v52  ;;  %5405 = vmatmul.mubr.bf16.gmra.mrb[72].mxu1 %v5215_v8 }
 0x962   : > { %v14299_v36 = vpop.eup %9181  ;;  %v6023_v40 = vadd.f32 %v14297_v0, %v14295_v19 }
 0x963   : > { %v14305_v59 = vpop.eup %9183 }
 0x964   : > { %v5887_v42 = vpop.xlane.xlu1 %5886  ;;  %v14307_v12 = vpop.eup %9185  ;;  %6024 = vadd.xlane.f32.xlu1 %v6023_v40 }
 0x965   : > { %v5919_v53 = vsub.f32 %v13728_v4, %v5887_v42  ;;  %v5920_v7 = vsub.f32 %v13732_v26, %v5887_v42  ;;  %v5890_v13 = vpop.xlane.xlu0 %5889  ;;  %v14311_v43 = vpop.eup %9187  ;;  %v6026_v26 = vadd.f32 %v14305_v59, %v14299_v36  ;;  %v16217_v42 = vld [vmem:[#allocation90_spill] sm:$0xff] }
 0x966   : > { %v5921_v22 = vsub.f32 %v13813_v54, %v5890_v13  ;;  %v5922_v46 = vsub.f32 %v13817_v41, %v5890_v13  ;;  %v14315_v34 = vpop.eup %9189  ;;  %v6747_v41 = vadd.f32 %v14311_v43, %v14307_v12 }
 0x967   : > { %v5979_v56 = vmul.f32 1.442695, %v5919_v53  ;;  %v5981_v20 = vmul.f32 1.442695, %v5920_v7  ;;  %v14318_v57 = vpop.eup %9191  ;;  %6027 = vadd.xlane.f32.xlu0 %v6026_v26 }
 0x968   : > { %v6611_v4 = vpop.xlane.xlu1 %6610  ;;  %v5983_v49 = vmul.f32 1.442695, %v5921_v22  ;;  %v5985_v27 = vmul.f32 1.442695, %v5922_v46  ;;  %v9194_v62 = vpop.eup %9193  ;;  %6748 = vadd.xlane.f32.xlu1 %v6747_v41 }
 0x969   : > { %9201 = vpow2.f32 %v5979_v56  ;;  %v6643_v6 = vsub.f32 %v13823_v1, %v6611_v4  ;;  %v6644_v54 = vsub.f32 %v13834_v21, %v6611_v4  ;;  %v6614_v39 = vpop.xlane.xlu0 %6613  ;;  %v9196_v52 = vpop.eup %9195  ;;  %v6750_v21 = vadd.f32 %v14318_v57, %v14315_v34  ;;  %v16218_v56 = vld [vmem:[#allocation20_spill] sm:$0xff]  ;;  %v16220_v4 = vld [vmem:[#allocation130_spill] sm:$0xff] }
 0x96a   : > { %9203 = vpow2.f32 %v5981_v20  ;;  %v6645_v38 = vsub.f32 %v13838_v23, %v6614_v39  ;;  %v6646_v29 = vsub.f32 %v13851_v31, %v6614_v39  ;;  %v4468_v53 = vmul.f32 %v9194_v62, %v16217_v42  ;;  %v9198_v7 = vpop.eup %9197  ;;  %v16219_v31 = vld [vmem:[#allocation91_spill] sm:$0xff]  ;;  %v16221_v39 = vld [vmem:[#allocation92_spill] sm:$0xff] }
 0x96b   : > { %9205 = vpow2.f32 %v5983_v49  ;;  %v6703_v55 = vmul.f32 1.442695, %v6643_v6  ;;  %v6705_v1 = vmul.f32 1.442695, %v6644_v54  ;;  %v4470_v20 = vmul.f32 %v9196_v52, %v16218_v56  ;;  %v9200_v22 = vpop.eup %9199  ;;  %6751 = vadd.xlane.f32.xlu0 %v6750_v21 }
 0x96c   : > { %9207 = vpow2.f32 %v5985_v27  ;;  %v4417_v8 = vpop.xlane.xlu1 %4416  ;;  %v6707_v40 = vmul.f32 1.442695, %v6645_v38  ;;  %v6709_v13 = vmul.f32 1.442695, %v6646_v29  ;;  %v4467_v46 = vmul.f32 %v9194_v62, %v16219_v31 }
 0x96d   : > { %9209 = vpow2.f32 %v6703_v55  ;;  %v4420_v23 = vpop.xlane.xlu0 %4419  ;;  %v4469_v26 = vmul.f32 %v9196_v52, %v16220_v4  ;;  %v4494_v49 = vpack.c.bf16 %v4470_v20, %v4468_v53  ;;  %v5192_v27 = vmul.f32 %v9198_v7, %v13773_v35 }
 0x96e   : > { %9211 = vpow2.f32 %v6705_v1  ;;  %v5194_v6 = vmul.f32 %v9200_v22, %v13782_v25  ;;  %v5191_v55 = vmul.f32 %v9198_v7, %v16221_v39  ;;  %v5193_v38 = vmul.f32 %v9200_v22, %v13777_v51 }
 0x96f   : > { %9213 = vpow2.f32 %v6707_v40  ;;  %v4493_v41 = vpack.c.bf16 %v4469_v26, %v4467_v46  ;;  %4688 = vmatprep.mubr.bf16.mxu0 %v4494_v49 }
 0x970   : > { %9215 = vpow2.f32 %v6709_v13  ;;  %v5141_v54 = vpop.xlane.xlu1 %5140  ;;  %v5218_v29 = vpack.c.bf16 %v5194_v6, %v5192_v27  ;;  %v5217_v52 = vpack.c.bf16 %v5193_v38, %v5191_v55  ;;  %v16222_v6 = vld [vmem:[#allocation47_spill] sm:$0xff]  ;;  %v16224_v55 = vld [vmem:[#allocation53_spill] sm:$0xff] }
 0x971   : > { %9217 = vrcp.f32 %v4417_v8  ;;  %4689 = vmatmul.mubr.bf16.gmra.mrb[76].mxu0 %v4493_v41  ;;  %v5144_v62 = vpop.xlane.xlu0 %5143  ;;  %v16223_v41 = vld [vmem:[#allocation29_spill] sm:$0xff] }
 0x972   : > { %9219 = vrcp.f32 %v4420_v23  ;;  %5412 = vmatprep.mubr.bf16.mxu1 %v5218_v29 }
 0x973   : > { %v14335_v1 = vpop.eup %9201  ;;  %9221 = vrcp.f32 %v5141_v54  ;;  %5413 = vmatmul.mubr.bf16.gmra.mrb[76].mxu1 %v5217_v52 }
 0x974   : > { %v14337_v35 = vpop.eup %9203  ;;  %9223 = vrcp.f32 %v5144_v62  ;;  %v4423_v25 = vpop.xlane.xlu1 %4422 }
 0x975   : > { %v14339_v21 = vpop.eup %9205  ;;  %9225 = vrcp.f32 %v4423_v25  ;;  %v6029_v51 = vadd.f32 %v14337_v35, %v14335_v1  ;;  %v4426_v42 = vpop.xlane.xlu0 %4425 }
 0x976   : > { %v14343_v8 = vpop.eup %9207  ;;  %9227 = vrcp.f32 %v4426_v42 }
 0x977   : > { %v14345_v53 = vpop.eup %9209  ;;  %6030 = vadd.xlane.f32.xlu1 %v6029_v51  ;;  %v6032_v7 = vadd.f32 %v14343_v8, %v14339_v21 }
 0x978   : > { %v14349_v40 = vpop.eup %9211  ;;  %v5147_v13 = vpop.xlane.xlu1 %5146 }
 0x979   : > { %v14351_v56 = vpop.eup %9213  ;;  %9229 = vrcp.f32 %v5147_v13  ;;  %6033 = vadd.xlane.f32.xlu0 %v6032_v7  ;;  %v6753_v20 = vadd.f32 %v14349_v40, %v14345_v53  ;;  %v5150_v23 = vpop.xlane.xlu0 %5149  ;;  %v16225_v7 = vld [vmem:[#allocation73_spill] sm:$0xff] }
 0x97a   : > { %v14355_v22 = vpop.eup %9215  ;;  %9231 = vrcp.f32 %v5150_v23 }
 0x97b   : > { %v9218_v31 = vpop.eup %9217  ;;  %6754 = vadd.xlane.f32.xlu1 %v6753_v20  ;;  %v6756_v46 = vadd.f32 %v14355_v22, %v14351_v56  ;;  %v16226_v20 = vld [vmem:[#allocation30_spill] sm:$0xff] }
 0x97c   : > { %v9220_v4 = vpop.eup %9219  ;;  %v4429_v26 = vpop.xlane.xlu1 %4428  ;;  %v4472_v49 = vmul.f32 %v9218_v31, %v13860_v24  ;;  %v4471_v39 = vmul.f32 %v9218_v31, %v16223_v41 }
 0x97d   : > { %v9222_v27 = vpop.eup %9221  ;;  %9233 = vrcp.f32 %v4429_v26  ;;  %6757 = vadd.xlane.f32.xlu0 %v6756_v46  ;;  %v4474_v54 = vmul.f32 %v9220_v4, %v16222_v6  ;;  %v4473_v38 = vmul.f32 %v9220_v4, %v16224_v55  ;;  %v4432_v62 = vpop.xlane.xlu0 %4431  ;;  %v16227_v46 = vld [vmem:[#allocation93_spill] sm:$0xff] }
 0x97e   : > { %v9224_v29 = vpop.eup %9223  ;;  %v5196_v52 = vmul.f32 %v9222_v27, %v13875_v45  ;;  %9235 = vrcp.f32 %v4432_v62  ;;  %v5195_v23 = vmul.f32 %v9222_v27, %v16226_v20 }
 0x97f   : > { %v9226_v25 = vpop.eup %9225  ;;  %v4496_v51 = vpack.c.bf16 %v4474_v54, %v4472_v49  ;;  %v4495_v42 = vpack.c.bf16 %v4473_v38, %v4471_v39  ;;  %v5198_v13 = vmul.f32 %v9224_v29, %v16225_v7  ;;  %v5197_v26 = vmul.f32 %v9224_v29, %v16227_v46  ;;  %v16228_v39 = vld [vmem:[#allocation55_spill] sm:$0xff] }
 0x980   : > { %v5153_v24 = vpop.xlane.xlu1 %5152  ;;  %v9228_v6 = vpop.eup %9227  ;;  %v4476_v45 = vmul.f32 %v9226_v25, %v13896_v63  ;;  %v4475_v27 = vmul.f32 %v9226_v25, %v16228_v39 }
 0x981   : > { %4696 = vmatprep.mubr.bf16.mxu0 %v4496_v51  ;;  %9237 = vrcp.f32 %v5153_v24  ;;  %v5220_v31 = vpack.c.bf16 %v5198_v13, %v5196_v52  ;;  %v5156_v4 = vpop.xlane.xlu0 %5155  ;;  %v5219_v41 = vpack.c.bf16 %v5197_v26, %v5195_v23  ;;  %v4478_v55 = vmul.f32 %v9228_v6, %v13905_v18  ;;  %v16229_v18 = vld [vmem:[#allocation31_spill] sm:$0xff] }
 0x982   : > { %4697 = vmatmul.mubr.bf16.gmra.mrb[80].mxu0 %v4495_v42  ;;  %v4477_v49 = vmul.f32 %v9228_v6, %v13899_v10  ;;  %9239 = vrcp.f32 %v5156_v4  ;;  %v16230_v6 = vld [vmem:[#allocation116_spill] sm:$0xff]  ;;  %v16231_v4 = vld [vmem:[#allocation33_spill] sm:$0xff] }
 0x983   : > { %v9230_v54 = vpop.eup %9229  ;;  %5420 = vmatprep.mubr.bf16.mxu1 %v5220_v31  ;;  %v4498_v29 = vpack.c.bf16 %v4478_v55, %v4476_v45 }
 0x984   : > { %v4435_v38 = vpop.xlane.xlu1 %4434  ;;  %5421 = vmatmul.mubr.bf16.gmra.mrb[80].mxu1 %v5219_v41  ;;  %v9232_v62 = vpop.eup %9231  ;;  %v4497_v52 = vpack.c.bf16 %v4477_v49, %v4475_v27  ;;  %v5200_v42 = vmul.f32 %v9230_v54, %v13914_v61  ;;  %v5199_v7 = vmul.f32 %v9230_v54, %v16229_v18  ;;  %v9400_v49 = vld [vmem:[%s14653_s8] ss:$0 sm:$0xff]  ;;  %v16233_v54 = vld [vmem:[#allocation60_spill] sm:$0xff]  ;;  %v16234_v27 = vld [vmem:[#allocation77_spill] sm:$0xff] }
 0x985   : > { %9241 = vrcp.f32 %v4435_v38  ;;  %v4438_v51 = vpop.xlane.xlu0 %4437  ;;  %4704 = vmatprep.mubr.bf16.mxu0 %v4498_v29  ;;  %v5202_v63 = vmul.f32 %v9232_v62, %v13922_v16  ;;  %v5201_v10 = vmul.f32 %v9232_v62, %v13917_v9  ;;  %v16235_v29 = vld [vmem:[#allocation66_spill] sm:$0xff] }
 0x986   : > { %9243 = vrcp.f32 %v4438_v51  ;;  %v16236_v18 = vld [vmem:[#allocation94_spill] sm:$0xff] }
 0x987   : > { %v9234_v13 = vpop.eup %9233  ;;  %v5222_v25 = vpack.c.bf16 %v5202_v63, %v5200_v42  ;;  %v5221_v20 = vpack.c.bf16 %v5201_v10, %v5199_v7  ;;  %v16237_v10 = vld [vmem:[#allocation34_spill] sm:$0xff] }
 0x988   : > { %v5159_v24 = vpop.xlane.xlu1 %5158  ;;  %v9236_v23 = vpop.eup %9235  ;;  %v4480_v26 = vmul.f32 %v9234_v13, %v13929_v30  ;;  %v4479_v9 = vmul.f32 %v9234_v13, %v16231_v4  ;;  %v16232_v30 = vld [vmem:[#allocation83_spill] sm:$0xff]  ;;  %v16241_v4 = vld [vmem:[#allocation97_spill] sm:$0xff] }
 0x989   : > { %9245 = vrcp.f32 %v5159_v24  ;;  %v5162_v46 = vpop.xlane.xlu0 %5161  ;;  %5428 = vmatprep.mubr.bf16.mxu1 %v5222_v25  ;;  %v4482_v61 = vmul.f32 %v9236_v23, %v13936_v14  ;;  %v4481_v16 = vmul.f32 %v9236_v23, %v16230_v6  ;;  %v16238_v24 = vld [vmem:[#allocation95_spill] sm:$0xff]  ;;  %v16239_v23 = vld [vmem:[#allocation58_spill] sm:$0xff] }
 0x98a   : > { %4705 = vmatmul.mubr.bf16.gmra.mrb[84].mxu0 %v4497_v52  ;;  %9247 = vrcp.f32 %v5162_v46 }
 0x98b   : > { %v9238_v31 = vpop.eup %9237  ;;  %v4500_v41 = vpack.c.bf16 %v4482_v61, %v4480_v26  ;;  %v4499_v55 = vpack.c.bf16 %v4481_v16, %v4479_v9  ;;  %v16240_v16 = vld [vmem:[#allocation102_spill] sm:$0xff] }
 0x98c   : > { %5429 = vmatmul.mubr.bf16.gmra.mrb[84].mxu1 %v5221_v20  ;;  %v9240_v45 = vpop.eup %9239  ;;  %5501 = vrot.lane.b32.xlu1 %v9400_v49, %s9471_s28  ;;  %v5204_v14 = vmul.f32 %v9238_v31, %v16232_v30  ;;  %v5203_v38 = vmul.f32 %v9238_v31, %v16234_v27 }
 0x98d   : > { %4712 = vmatprep.mubr.bf16.mxu0 %v4500_v41  ;;  %v5206_v39 = vmul.f32 %v9240_v45, %v16233_v54  ;;  %v5205_v62 = vmul.f32 %v9240_v45, %v16235_v29  ;;  %v16242_v41 = vld [vmem:[#allocation35_spill] sm:$0xff] }
 0x98f   : > { %v9242_v52 = vpop.eup %9241  ;;  %v5224_v51 = vpack.c.bf16 %v5206_v39, %v5204_v14  ;;  %v5223_v42 = vpack.c.bf16 %v5205_v62, %v5203_v38  ;;  %v5989_v39 = vpop.xlane.xlu1 %5988 }
 0x990   : > { %v9244_v63 = vpop.eup %9243  ;;  %v4484_v7 = vmul.f32 %v9242_v52, %v16236_v18  ;;  %v4483_v46 = vmul.f32 %v9242_v52, %v16239_v23  ;;  %9249 = vrcp.f32 %v5989_v39 }
 0x991   : > { %5436 = vmatprep.mubr.bf16.mxu1 %v5224_v51  ;;  %v4486_v13 = vmul.f32 %v9244_v63, %v16237_v10  ;;  %v4485_v25 = vmul.f32 %v9244_v63, %v16238_v24  ;;  %v16244_v63 = vld [vmem:[#allocation96_spill] sm:$0xff] }
 0x992   : > { %4713 = vmatmul.mubr.bf16.gmra.mrb[88].mxu0 %v4499_v55  ;;  %v16243_v55 = vld [vmem:[#allocation72_spill] sm:$0xff] }
 0x993   : > { %v9246_v20 = vpop.eup %9245  ;;  %7097 = vrot.lane.b32.xlu0 %v9400_v49, %s9469_s21  ;;  %v4502_v26 = vpack.c.bf16 %v4486_v13, %v4484_v7  ;;  %v4501_v6 = vpack.c.bf16 %v4485_v25, %v4483_v46  ;;  %v6713_v49 = vpop.xlane.xlu1 %6712  ;;  %v16245_v13 = vld [vmem:[#allocation86_spill] sm:$0xff]  ;;  %s7211_s21 = sshll.u32 %s11550_s27, 4  ;;  %s14595_s21 = int_to_ptr.vmem [resolvable:$true] %s7211_s21 }
 0x994   : > { %5437 = vmatmul.mubr.bf16.gmra.mrb[88].mxu1 %v5223_v42  ;;  %v9248_v61 = vpop.eup %9247  ;;  %v5208_v31 = vmul.f32 %v9246_v20, %v16240_v16  ;;  %v5207_v45 = vmul.f32 %v9246_v20, %v16242_v41  ;;  %p9408_p3 = scmp.lt.s32.totalorder %s14595_s21, %s9406_s23 }
 0x995   : > { %4720 = vmatprep.mubr.bf16.mxu0 %v4502_v26  ;;  %v5210_v9 = vmul.f32 %v9248_v61, %v16241_v4  ;;  %v5209_v30 = vmul.f32 %v9248_v61, %v16243_v55 }
 0x997   : > { %v5226_v14 = vpack.c.bf16 %v5210_v9, %v5208_v31  ;;  %v5225_v54 = vpack.c.bf16 %v5209_v30, %v5207_v45  ;;  %v16247_v9 = vld [vmem:[#allocation41_spill] sm:$0xff] }
 0x999   : > { %5444 = vmatprep.mubr.bf16.mxu1 %v5226_v14 }
 0x99a   : > { %4721 = vmatmul.mubr.bf16.gmra.mrb[92].mxu0 %v4501_v6  ;;  %v9250_v52 = vpop.eup %9249  ;;  %v16246_v6 = vld [vmem:[#allocation38_spill] sm:$0xff] }
 0x99b   : > { %v6051_v18 = vmul.f32 %v9250_v52, %v16244_v63  ;;  %v6052_v24 = vmul.f32 %v9250_v52, %v16245_v13 }
 0x99c   : > { %5445 = vmatmul.mubr.bf16.gmra.mrb[92].mxu1 %v5225_v54 }
 0x9a2   : > { %v5992_v27 = vpop.xlane.xlu0 %5991 }
 0x9a3   : > { %9251 = vrcp.f32 %v5992_v27 }
 0x9a4   : > { %9253 = vrcp.f32 %v6713_v49 }
 0x9a8   : > { %v6716_v38 = vpop.xlane.xlu0 %6715 }
 0x9a9   : > { %9255 = vrcp.f32 %v6716_v38  ;;  %v5995_v29 = vpop.xlane.xlu1 %5994 }
 0x9aa   : > { %9257 = vrcp.f32 %v5995_v29 }
 0x9ad   : > { %v9252_v42 = vpop.eup %9251 }
 0x9ae   : > { %v5998_v62 = vpop.xlane.xlu0 %5997  ;;  %v6053_v7 = vmul.f32 %v9252_v42, %v14009_v3  ;;  %v6054_v25 = vmul.f32 %v9252_v42, %v14012_v32  ;;  %v9254_v20 = vpop.eup %9253  ;;  %v16248_v42 = vld [vmem:[#allocation44_spill] sm:$0xff] }
 0x9af   : > { %9259 = vrcp.f32 %v5998_v62  ;;  %v6775_v16 = vmul.f32 %v9254_v20, %v16246_v6  ;;  %v6776_v3 = vmul.f32 %v9254_v20, %v16247_v9 }
 0x9b0   : > { %v6719_v51 = vpop.xlane.xlu1 %6718  ;;  %v6084_v46 = vpack.c.bf16 %v6054_v25, %v6052_v24  ;;  %v6083_v26 = vpack.c.bf16 %v6053_v7, %v6051_v18  ;;  %v16249_v18 = vld [vmem:[#allocation40_spill] sm:$0xff] }
 0x9b1   : > { %9261 = vrcp.f32 %v6719_v51  ;;  %v16250_v7 = vld [vmem:[#allocation36_spill] sm:$0xff] }
 0x9b2   : > { %v6722_v10 = vpop.xlane.xlu0 %6721  ;;  %6260 = vmatprep.mubr.bf16.mxu0 %v6084_v46  ;;  %v16252_v46 = vld [vmem:[#allocation59_spill] sm:$0xff] }
 0x9b3   : > { %9263 = vrcp.f32 %v6722_v10  ;;  %v9256_v61 = vpop.eup %9255  ;;  %6261 = vmatmul.mubr.bf16.vlgmr.msra.gmra.mrb[96].mxu0 %v6083_v26  ;;  %v16251_v10 = vld [vmem:[#allocation76_spill] sm:$0xff] }
 0x9b4   : > { %v6001_v23 = vpop.xlane.xlu1 %6000  ;;  %v6777_v31 = vmul.f32 %v9256_v61, %v14019_v28  ;;  %v6778_v41 = vmul.f32 %v9256_v61, %v14022_v60  ;;  %v9258_v45 = vpop.eup %9257  ;;  %v16253_v61 = vld [vmem:[#allocation82_spill] sm:$0xff] }
 0x9b5   : > { %9265 = vrcp.f32 %v6001_v23  ;;  %v6056_v39 = vmul.f32 %v9258_v45, %v14029_v50  ;;  %v6055_v49 = vmul.f32 %v9258_v45, %v14025_v15 }
 0x9b6   : > { %v6004_v4 = vpop.xlane.xlu0 %6003  ;;  %v6808_v55 = vpack.c.bf16 %v6778_v41, %v6776_v3  ;;  %v6807_v30 = vpack.c.bf16 %v6777_v31, %v6775_v16  ;;  %v16254_v16 = vld [vmem:[#allocation32_spill] sm:$0xff] }
 0x9b7   : > { %9267 = vrcp.f32 %v6004_v4  ;;  %v16255_v4 = vld [vmem:[#allocation120_spill] sm:$0xff] }
 0x9b8   : > { %v6725_v32 = vpop.xlane.xlu1 %6724  ;;  %6984 = vmatprep.mubr.bf16.mxu1 %v6808_v55  ;;  %v16256_v55 = vld [vmem:[#allocation124_spill] sm:$0xff] }
 0x9b9   : > { %v9260_v14 = vpop.eup %9259  ;;  %9269 = vrcp.f32 %v6725_v32  ;;  %6985 = vmatmul.mubr.bf16.vlgmr.msra.gmra.mrb[96].mxu1 %v6807_v30 }
 0x9ba   : > { %v6728_v54 = vpop.xlane.xlu0 %6727  ;;  %v6058_v28 = vmul.f32 %v9260_v14, %v14036_v58  ;;  %v6057_v27 = vmul.f32 %v9260_v14, %v14033_v33  ;;  %v16257_v14 = vld [vmem:[#allocation84_spill] sm:$0xff] }
 0x9bb   : > { %v9262_v38 = vpop.eup %9261  ;;  %9271 = vrcp.f32 %v6728_v54 }
 0x9bc   : > { %v6007_v60 = vpop.xlane.xlu1 %6006  ;;  %v6086_v29 = vpack.c.bf16 %v6058_v28, %v6056_v39  ;;  %v6085_v62 = vpack.c.bf16 %v6057_v27, %v6055_v49  ;;  %v6780_v63 = vmul.f32 %v9262_v38, %v16248_v42  ;;  %v6779_v58 = vmul.f32 %v9262_v38, %v16250_v7  ;;  %v16258_v39 = vld [vmem:[#allocation39_spill] sm:$0xff]  ;;  %v16263_v7 = vld [vmem:[#allocation126_spill] sm:$0xff] }
 0x9bd   : > { %v9264_v52 = vpop.eup %9263  ;;  %9273 = vrcp.f32 %v6007_v60  ;;  %v16259_v49 = vld [vmem:[#allocation75_spill] sm:$0xff] }
 0x9be   : > { %v6010_v51 = vpop.xlane.xlu0 %6009  ;;  %6268 = vmatprep.mubr.bf16.mxu0 %v6086_v29  ;;  %v6782_v50 = vmul.f32 %v9264_v52, %v16249_v18  ;;  %v6781_v15 = vmul.f32 %v9264_v52, %v16251_v10  ;;  %v16260_v52 = vld [vmem:[#allocation45_spill] sm:$0xff]  ;;  %v16261_v42 = vld [vmem:[#allocation103_spill] sm:$0xff]  ;;  %v16262_v18 = vld [vmem:[#allocation42_spill] sm:$0xff] }
 0x9bf   : > { %v9266_v13 = vpop.eup %9265  ;;  %9275 = vrcp.f32 %v6010_v51  ;;  %6269 = vmatmul.mubr.bf16.gmra.mrb[100].mxu0 %v6085_v62 }
 0x9c0   : > { %v6810_v24 = vpack.c.bf16 %v6782_v50, %v6780_v63  ;;  %v6809_v25 = vpack.c.bf16 %v6781_v15, %v6779_v58  ;;  %v6060_v26 = vmul.f32 %v9266_v13, %v16252_v46  ;;  %v6059_v31 = vmul.f32 %v9266_v13, %v16254_v16  ;;  %v16265_v46 = vld [vmem:[#allocation101_spill] sm:$0xff]  ;;  %v16267_v16 = vld [vmem:[#allocation99_spill] sm:$0xff] }
 0x9c1   : > { %v6731_v33 = vpop.xlane.xlu1 %6730  ;;  %v9268_v20 = vpop.eup %9267 }
 0x9c2   : > { %9277 = vrcp.f32 %v6731_v33  ;;  %v6734_v23 = vpop.xlane.xlu0 %6733  ;;  %6992 = vmatprep.mubr.bf16.mxu1 %v6810_v24  ;;  %v6062_v6 = vmul.f32 %v9268_v20, %v16253_v61  ;;  %v6061_v9 = vmul.f32 %v9268_v20, %v16255_v4  ;;  %v16264_v20 = vld [vmem:[#allocation48_spill] sm:$0xff]  ;;  %v16266_v61 = vld [vmem:[#allocation98_spill] sm:$0xff] }
 0x9c3   : > { %v9270_v3 = vpop.eup %9269  ;;  %9279 = vrcp.f32 %v6734_v23  ;;  %6993 = vmatmul.mubr.bf16.gmra.mrb[100].mxu1 %v6809_v25 }
 0x9c4   : > { %v6088_v41 = vpack.c.bf16 %v6062_v6, %v6060_v26  ;;  %v6087_v45 = vpack.c.bf16 %v6061_v9, %v6059_v31  ;;  %v6784_v30 = vmul.f32 %v9270_v3, %v16256_v55  ;;  %v6783_v28 = vmul.f32 %v9270_v3, %v16258_v39 }
 0x9c5   : > { %v9272_v32 = vpop.eup %9271 }
 0x9c6   : > { %6276 = vmatprep.mubr.bf16.mxu0 %v6088_v41  ;;  %v6786_v54 = vmul.f32 %v9272_v32, %v16257_v14  ;;  %v6785_v27 = vmul.f32 %v9272_v32, %v16259_v49 }
 0x9c7   : > { %v9274_v38 = vpop.eup %9273  ;;  %6277 = vmatmul.mubr.bf16.gmra.mrb[104].mxu0 %v6087_v45 }
 0x9c8   : > { %v6812_v60 = vpack.c.bf16 %v6786_v54, %v6784_v30  ;;  %v6811_v29 = vpack.c.bf16 %v6785_v27, %v6783_v28  ;;  %v6064_v51 = vmul.f32 %v9274_v38, %v16260_v52  ;;  %v6063_v50 = vmul.f32 %v9274_v38, %v16262_v18  ;;  %v16268_v54 = vld [vmem:[#allocation106_spill] sm:$0xff]  ;;  %v16272_v18 = vld [vmem:[#allocation52_spill] sm:$0xff] }
 0x9c9   : > { %v9276_v62 = vpop.eup %9275 }
 0x9ca   : > { %7000 = vmatprep.mubr.bf16.mxu1 %v6812_v60  ;;  %v6066_v63 = vmul.f32 %v9276_v62, %v16261_v42  ;;  %v6065_v58 = vmul.f32 %v9276_v62, %v16263_v7  ;;  %v16269_v62 = vld [vmem:[#allocation100_spill] sm:$0xff] }
 0x9cb   : > { %v6013_v15 = vpop.xlane.xlu1 %6012  ;;  %7001 = vmatmul.mubr.bf16.gmra.mrb[104].mxu1 %v6811_v29 }
 0x9cc   : > { %v9278_v10 = vpop.eup %9277  ;;  %v6090_v13 = vpack.c.bf16 %v6066_v63, %v6064_v51  ;;  %v6089_v33 = vpack.c.bf16 %v6065_v58, %v6063_v50  ;;  %9281 = vrcp.f32 %v6013_v15  ;;  %v16270_v51 = vld [vmem:[#allocation74_spill] sm:$0xff]  ;;  %v16271_v63 = vld [vmem:[#allocation107_spill] sm:$0xff] }
 0x9cd   : > { %v9280_v24 = vpop.eup %9279  ;;  %v6788_v23 = vmul.f32 %v9278_v10, %v16264_v20  ;;  %v6787_v6 = vmul.f32 %v9278_v10, %v16266_v61 }
 0x9ce   : > { %6284 = vmatprep.mubr.bf16.mxu0 %v6090_v13  ;;  %v6790_v26 = vmul.f32 %v9280_v24, %v16265_v46  ;;  %v6789_v31 = vmul.f32 %v9280_v24, %v16267_v16 }
 0x9cf   : > { %6285 = vmatmul.mubr.bf16.gmra.mrb[108].mxu0 %v6089_v33 }
 0x9d0   : > { %v6016_v25 = vpop.xlane.xlu0 %6015  ;;  %v6814_v9 = vpack.c.bf16 %v6790_v26, %v6788_v23  ;;  %v6813_v3 = vpack.c.bf16 %v6789_v31, %v6787_v6  ;;  %v16273_v31 = vld [vmem:[#allocation110_spill] sm:$0xff] }
 0x9d1   : > { %9283 = vrcp.f32 %v6016_v25 }
 0x9d2   : > { %7008 = vmatprep.mubr.bf16.mxu1 %v6814_v9  ;;  %v16274_v9 = vld [vmem:[#allocation108_spill] sm:$0xff] }
 0x9d3   : > { %v6737_v4 = vpop.xlane.xlu1 %6736  ;;  %7009 = vmatmul.mubr.bf16.gmra.mrb[108].mxu1 %v6813_v3  ;;  %v16275_v3 = vld [vmem:[#allocation109_spill] sm:$0xff] }
 0x9d4   : > { %9285 = vrcp.f32 %v6737_v4 }
 0x9d5   : > { %v6740_v41 = vpop.xlane.xlu0 %6739 }
 0x9d6   : > { %9287 = vrcp.f32 %v6740_v41  ;;  %v9282_v45 = vpop.eup %9281 }
 0x9d7   : > { %v6068_v55 = vmul.f32 %v9282_v45, %v14139_v17  ;;  %v6067_v14 = vmul.f32 %v9282_v45, %v14134_v2 }
 0x9db   : > { %v9284_v32 = vpop.eup %9283 }
 0x9dc   : > { %v6070_v30 = vmul.f32 %v9284_v32, %v14153_v11  ;;  %v6069_v39 = vmul.f32 %v9284_v32, %v16268_v54 }
 0x9de   : > { %v9286_v28 = vpop.eup %9285  ;;  %v6092_v27 = vpack.c.bf16 %v6070_v30, %v6068_v55  ;;  %v6091_v38 = vpack.c.bf16 %v6069_v39, %v6067_v14 }
 0x9df   : > { %v6792_v52 = vmul.f32 %v9286_v28, %v16269_v62  ;;  %v6791_v17 = vmul.f32 %v9286_v28, %v16271_v63 }
 0x9e0   : > { %v9288_v60 = vpop.eup %9287  ;;  %6292 = vmatprep.mubr.bf16.mxu0 %v6092_v27 }
 0x9e1   : > { %v6019_v49 = vpop.xlane.xlu1 %6018  ;;  %v6794_v42 = vmul.f32 %v9288_v60, %v16270_v51  ;;  %v6793_v11 = vmul.f32 %v9288_v60, %v16272_v18  ;;  %6293 = vmatmul.mubr.bf16.gmra.mrb[112].mxu0 %v6091_v38 }
 0x9e2   : > { %9289 = vrcp.f32 %v6019_v49 }
 0x9e3   : > { %v6022_v29 = vpop.xlane.xlu0 %6021  ;;  %v6816_v50 = vpack.c.bf16 %v6794_v42, %v6792_v52  ;;  %v6815_v7 = vpack.c.bf16 %v6793_v11, %v6791_v17 }
 0x9e4   : > { %9291 = vrcp.f32 %v6022_v29 }
 0x9e5   : > { %v6743_v2 = vpop.xlane.xlu1 %6742  ;;  %7016 = vmatprep.mubr.bf16.mxu1 %v6816_v50 }
 0x9e6   : > { %9293 = vrcp.f32 %v6743_v2  ;;  %7017 = vmatmul.mubr.bf16.gmra.mrb[112].mxu1 %v6815_v7 }
 0x9e8   : > { %v6746_v58 = vpop.xlane.xlu0 %6745 }
 0x9e9   : > { %9295 = vrcp.f32 %v6746_v58 }
 0x9ec   : > { %v9290_v10 = vpop.eup %9289 }
 0x9ed   : > { %v6072_v13 = vmul.f32 %v9290_v10, %v14227_v5  ;;  %v6071_v24 = vmul.f32 %v9290_v10, %v14222_v48 }
 0x9ee   : > { %v9292_v15 = vpop.eup %9291 }
 0x9ef   : > { %v6074_v33 = vmul.f32 %v9292_v15, %v14241_v47  ;;  %v6073_v25 = vmul.f32 %v9292_v15, %v14232_v44 }
 0x9f0   : > { %v9294_v20 = vpop.eup %9293 }
 0x9f1   : > { %v6025_v23 = vpop.xlane.xlu1 %6024  ;;  %v6094_v46 = vpack.c.bf16 %v6074_v33, %v6072_v13  ;;  %v6093_v26 = vpack.c.bf16 %v6073_v25, %v6071_v24  ;;  %v6796_v16 = vmul.f32 %v9294_v20, %v14253_v37  ;;  %v6795_v5 = vmul.f32 %v9294_v20, %v16274_v9 }
 0x9f2   : > { %9297 = vrcp.f32 %v6025_v23 }
 0x9f3   : > { %v9296_v61 = vpop.eup %9295  ;;  %6300 = vmatprep.mubr.bf16.mxu0 %v6094_v46 }
 0x9f4   : > { %v6028_v6 = vpop.xlane.xlu0 %6027  ;;  %v6798_v4 = vmul.f32 %v9296_v61, %v16273_v31  ;;  %v6797_v47 = vmul.f32 %v9296_v61, %v16275_v3  ;;  %6301 = vmatmul.mubr.bf16.gmra.mrb[116].mxu0 %v6093_v26 }
 0x9f5   : > { %9299 = vrcp.f32 %v6028_v6  ;;  %v6749_v48 = vpop.xlane.xlu1 %6748 }
 0x9f6   : > { %v6818_v44 = vpack.c.bf16 %v6798_v4, %v6796_v16  ;;  %v6817_v41 = vpack.c.bf16 %v6797_v47, %v6795_v5  ;;  %9301 = vrcp.f32 %v6749_v48 }
 0x9f8   : > { %v6752_v45 = vpop.xlane.xlu0 %6751  ;;  %7024 = vmatprep.mubr.bf16.mxu1 %v6818_v44 }
 0x9f9   : > { %9303 = vrcp.f32 %v6752_v45  ;;  %7025 = vmatmul.mubr.bf16.gmra.mrb[116].mxu1 %v6817_v41 }
 0x9fc   : > { %v9298_v32 = vpop.eup %9297 }
 0x9fd   : > { %v6076_v37 = vmul.f32 %v9298_v32, %v14297_v0  ;;  %v6075_v14 = vmul.f32 %v9298_v32, %v14295_v19 }
 0x9ff   : > { %v9300_v55 = vpop.eup %9299 }
 0xa00   : > { %v6078_v30 = vmul.f32 %v9300_v55, %v14305_v59  ;;  %v6077_v54 = vmul.f32 %v9300_v55, %v14299_v36  ;;  %v9302_v39 = vpop.eup %9301 }
 0xa01   : > { %v6800_v29 = vmul.f32 %v9302_v39, %v14311_v43  ;;  %v6799_v0 = vmul.f32 %v9302_v39, %v14307_v12 }
 0xa02   : > { %v6096_v49 = vpack.c.bf16 %v6078_v30, %v6076_v37  ;;  %v6095_v27 = vpack.c.bf16 %v6077_v54, %v6075_v14 }
 0xa03   : > { %v9304_v38 = vpop.eup %9303 }
 0xa04   : > { %v6031_v28 = vpop.xlane.xlu1 %6030  ;;  %6308 = vmatprep.mubr.bf16.mxu0 %v6096_v49  ;;  %v6802_v62 = vmul.f32 %v9304_v38, %v14318_v57  ;;  %v6801_v59 = vmul.f32 %v9304_v38, %v14315_v34 }
 0xa05   : > { %9305 = vrcp.f32 %v6031_v28  ;;  %6309 = vmatmul.mubr.bf16.gmra.mrb[120].mxu0 %v6095_v27 }
 0xa06   : > { %v6034_v60 = vpop.xlane.xlu0 %6033  ;;  %v6820_v36 = vpack.c.bf16 %v6802_v62, %v6800_v29  ;;  %v6819_v52 = vpack.c.bf16 %v6801_v59, %v6799_v0 }
 0xa07   : > { %9307 = vrcp.f32 %v6034_v60 }
 0xa08   : > { %v6755_v19 = vpop.xlane.xlu1 %6754  ;;  %7032 = vmatprep.mubr.bf16.mxu1 %v6820_v36 }
 0xa09   : > { %9309 = vrcp.f32 %v6755_v19  ;;  %7033 = vmatmul.mubr.bf16.gmra.mrb[120].mxu1 %v6819_v52 }
 0xa0a   : > { %v6758_v51 = vpop.xlane.xlu0 %6757 }
 0xa0b   : > { %9311 = vrcp.f32 %v6758_v51 }
 0xa0c   : > { %v14460_v61 = vpop.permute.xlu1 %5501 }
 0xa0e   : > { %v8009_v50 = vpop.f32.mrb[64].mxu0 }
 0xa0f   : > { %v9306_v42 = vpop.eup %9305  ;;  %v8010_v15 = vpop.f32.mrb[65].mxu0 }
 0xa10   : > { %v6080_v43 = vmul.f32 %v9306_v42, %v14337_v35  ;;  %v6079_v57 = vmul.f32 %v9306_v42, %v14335_v1  ;;  %v8012_v1 = vpop.f32.mrb[66].mxu0 }
 0xa11   : > { %v9308_v63 = vpop.eup %9307  ;;  %v8073_v13 = vpop.f32.mrb[64].mxu1 }
 0xa12   : > { %v6082_v17 = vmul.f32 %v9308_v63, %v14343_v8  ;;  %v6081_v12 = vmul.f32 %v9308_v63, %v14339_v21  ;;  %v8011_v8 = vadd.f32 %v8010_v15, %v8009_v50  ;;  %v8013_v24 = vpop.f32.mrb[67].mxu0  ;;  %v8074_v25 = vpop.f32.mrb[65].mxu1 }
 0xa13   : > { %v9310_v34 = vpop.eup %9309  ;;  %v8014_v20 = vadd.f32 %v8013_v24, %v8012_v1  ;;  %v8075_v23 = vadd.f32 %v8074_v25, %v8073_v13  ;;  %v8076_v46 = vpop.f32.mrb[66].mxu1 }
 0xa14   : > { %v6098_v18 = vpack.c.bf16 %v6082_v17, %v6080_v43  ;;  %v6097_v11 = vpack.c.bf16 %v6081_v12, %v6079_v57  ;;  %v6804_v7 = vmul.f32 %v9310_v34, %v14349_v40  ;;  %v6803_v10 = vmul.f32 %v9310_v34, %v14345_v53  ;;  %v8077_v40 = vpop.f32.mrb[67].mxu1 }
 0xa15   : > { %v9312_v2 = vpop.eup %9311  ;;  %v5469_v26 = vmul.f32 0.6, %v8075_v23  ;;  %v8078_v53 = vadd.f32 %v8077_v40, %v8076_v46 }
 0xa16   : > { %6316 = vmatprep.mubr.bf16.mxu0 %v6098_v18  ;;  %v6806_v58 = vmul.f32 %v9312_v2, %v14355_v22  ;;  %v6805_v35 = vmul.f32 %v9312_v2, %v14351_v56  ;;  %v5453_v22 = vmul.f32 0.4, %v8011_v8  ;;  %v5454_v56 = vmul.f32 0.4, %v8014_v20 }
 0xa17   : > { %6317 = vmatmul.mubr.bf16.gmra.mrb[124].mxu0 %v6097_v11  ;;  %v5470_v16 = vmul.f32 0.6, %v8078_v53 }
 0xa18   : > { %v6822_v21 = vpack.c.bf16 %v6806_v58, %v6804_v7  ;;  %v6821_v33 = vpack.c.bf16 %v6805_v35, %v6803_v10  ;;  %v5485_v6 = vadd.f32 %v5469_v26, %v5453_v22 }
 0xa19   : > { %v5486_v31 = vadd.f32 %v5470_v16, %v5454_v56 }
 0xa1a   : > { %7040 = vmatprep.mubr.bf16.mxu1 %v6822_v21  ;;  %v5504_v4 = vadd.f32 %v14460_v61, %v5485_v6 }
 0xa1b   : > { %7041 = vmatmul.mubr.bf16.gmra.mrb[124].mxu1 %v6821_v33  ;;  %v5505_v9 = vadd.f32 %v14460_v61, %v5486_v31 }
 0xa1c   : > { %5536 = vrot.lane.b32.xlu1 %v5504_v4, %s9471_s28 }
 0xa20   : > { %5538 = vrot.lane.b32.xlu1 %v5505_v9, %s9471_s28 }
 0xa21   : > { %v8015_v5 = vpop.f32.mrb[68].mxu0 }
 0xa22   : > { %v8016_v3 = vpop.f32.mrb[69].mxu0 }
 0xa23   : > { %v8017_v47 = vadd.f32 %v8016_v3, %v8015_v5  ;;  %v8018_v48 = vpop.f32.mrb[70].mxu0 }
 0xa24   : > { %v8079_v44 = vpop.f32.mrb[68].mxu1  ;;  %v8019_v41 = vpop.f32.mrb[71].mxu0 }
 0xa25   : > { %v8080_v45 = vpop.f32.mrb[69].mxu1  ;;  %v8020_v32 = vadd.f32 %v8019_v41, %v8018_v48  ;;  %v5455_v14 = vmul.f32 0.4, %v8017_v47 }
 0xa26   : > { %v8081_v55 = vadd.f32 %v8080_v45, %v8079_v44  ;;  %v8082_v37 = vpop.f32.mrb[70].mxu1 }
 0xa27   : > { %v8083_v30 = vpop.f32.mrb[71].mxu1  ;;  %v5456_v28 = vmul.f32 0.4, %v8020_v32 }
 0xa28   : > { %v5471_v54 = vmul.f32 0.6, %v8081_v55  ;;  %v8084_v39 = vadd.f32 %v8083_v30, %v8082_v37 }
 0xa2a   : > { %v5487_v49 = vadd.f32 %v5471_v54, %v5455_v14  ;;  %v5472_v27 = vmul.f32 0.6, %v8084_v39 }
 0xa2c   : > { %v5506_v38 = vadd.f32 %v14460_v61, %v5487_v49  ;;  %v5488_v60 = vadd.f32 %v5472_v27, %v5456_v28 }
 0xa2e   : > { %v5507_v29 = vadd.f32 %v14460_v61, %v5488_v60  ;;  %5540 = vrot.lane.b32.xlu0 %v5506_v38, %s9471_s28 }
 0xa30   : > { %5542 = vrot.lane.b32.xlu1 %v5507_v29, %s9471_s28 }
 0xa32   : > { %v8021_v62 = vpop.f32.mrb[72].mxu0 }
 0xa33   : > { %v8022_v0 = vpop.f32.mrb[73].mxu0 }
 0xa34   : > { %v8023_v59 = vadd.f32 %v8022_v0, %v8021_v62  ;;  %v8024_v19 = vpop.f32.mrb[74].mxu0  ;;  %v8085_v36 = vpop.f32.mrb[72].mxu1 }
 0xa35   : > { %v8025_v52 = vpop.f32.mrb[75].mxu0  ;;  %v8086_v51 = vpop.f32.mrb[73].mxu1 }
 0xa36   : > { %v8026_v42 = vadd.f32 %v8025_v52, %v8024_v19  ;;  %v8087_v63 = vadd.f32 %v8086_v51, %v8085_v36  ;;  %v8088_v43 = vpop.f32.mrb[74].mxu1  ;;  %v5457_v57 = vmul.f32 0.4, %v8023_v59 }
 0xa37   : > { %v8089_v17 = vpop.f32.mrb[75].mxu1 }
 0xa38   : > { %v5473_v12 = vmul.f32 0.6, %v8087_v63  ;;  %v8090_v34 = vadd.f32 %v8089_v17, %v8088_v43  ;;  %v5458_v18 = vmul.f32 0.4, %v8026_v42 }
 0xa3a   : > { %v5489_v11 = vadd.f32 %v5473_v12, %v5457_v57  ;;  %v5474_v2 = vmul.f32 0.6, %v8090_v34 }
 0xa3c   : > { %v5508_v50 = vadd.f32 %v14460_v61, %v5489_v11  ;;  %v5490_v7 = vadd.f32 %v5474_v2, %v5458_v18 }
 0xa3e   : > { %v5509_v58 = vadd.f32 %v14460_v61, %v5490_v7  ;;  %5544 = vrot.lane.b32.xlu0 %v5508_v50, %s9471_s28 }
 0xa40   : > { %5546 = vrot.lane.b32.xlu1 %v5509_v58, %s9471_s28 }
 0xa44   : > { %v8027_v10 = vpop.f32.mrb[76].mxu0 }
 0xa45   : > { %v8028_v35 = vpop.f32.mrb[77].mxu0 }
 0xa46   : > { %v8029_v15 = vadd.f32 %v8028_v35, %v8027_v10  ;;  %v8030_v8 = vpop.f32.mrb[78].mxu0  ;;  %v8091_v1 = vpop.f32.mrb[76].mxu1 }
 0xa47   : > { %v8031_v13 = vpop.f32.mrb[79].mxu0  ;;  %v8092_v21 = vpop.f32.mrb[77].mxu1 }
 0xa48   : > { %v8032_v33 = vadd.f32 %v8031_v13, %v8030_v8  ;;  %v8093_v24 = vadd.f32 %v8092_v21, %v8091_v1  ;;  %v8094_v25 = vpop.f32.mrb[78].mxu1  ;;  %v5459_v23 = vmul.f32 0.4, %v8029_v15 }
 0xa49   : > { %v8095_v20 = vpop.f32.mrb[79].mxu1 }
 0xa4a   : > { %v5475_v46 = vmul.f32 0.6, %v8093_v24  ;;  %v8096_v40 = vadd.f32 %v8095_v20, %v8094_v25  ;;  %v5460_v22 = vmul.f32 0.4, %v8032_v33 }
 0xa4c   : > { %v5491_v26 = vadd.f32 %v5475_v46, %v5459_v23  ;;  %v5476_v53 = vmul.f32 0.6, %v8096_v40 }
 0xa4e   : > { %v5510_v56 = vadd.f32 %v14460_v61, %v5491_v26  ;;  %v5492_v6 = vadd.f32 %v5476_v53, %v5460_v22 }
 0xa50   : > { %v5511_v16 = vadd.f32 %v14460_v61, %v5492_v6  ;;  %5548 = vrot.lane.b32.xlu0 %v5510_v56, %s9471_s28 }
 0xa52   : > { %5550 = vrot.lane.b32.xlu1 %v5511_v16, %s9471_s28 }
 0xa55   : > { %v8033_v31 = vpop.f32.mrb[80].mxu0 }
 0xa56   : > { %v8034_v4 = vpop.f32.mrb[81].mxu0 }
 0xa57   : > { %v8035_v9 = vadd.f32 %v8034_v4, %v8033_v31  ;;  %v8036_v5 = vpop.f32.mrb[82].mxu0  ;;  %v8097_v3 = vpop.f32.mrb[80].mxu1 }
 0xa58   : > { %v8037_v47 = vpop.f32.mrb[83].mxu0  ;;  %v8098_v48 = vpop.f32.mrb[81].mxu1 }
 0xa59   : > { %v8038_v44 = vadd.f32 %v8037_v47, %v8036_v5  ;;  %v8099_v41 = vadd.f32 %v8098_v48, %v8097_v3  ;;  %v8100_v45 = vpop.f32.mrb[82].mxu1  ;;  %v5461_v55 = vmul.f32 0.4, %v8035_v9 }
 0xa5a   : > { %v8101_v32 = vpop.f32.mrb[83].mxu1 }
 0xa5b   : > { %v5477_v37 = vmul.f32 0.6, %v8099_v41  ;;  %v8102_v30 = vadd.f32 %v8101_v32, %v8100_v45  ;;  %v5462_v14 = vmul.f32 0.4, %v8038_v44 }
 0xa5d   : > { %v5493_v54 = vadd.f32 %v5477_v37, %v5461_v55  ;;  %v5478_v39 = vmul.f32 0.6, %v8102_v30  ;;  %v8039_v28 = vpop.f32.mrb[84].mxu0 }
 0xa5e   : > { %v8040_v49 = vpop.f32.mrb[85].mxu0 }
 0xa5f   : > { %v5512_v27 = vadd.f32 %v14460_v61, %v5493_v54  ;;  %v5494_v38 = vadd.f32 %v5478_v39, %v5462_v14  ;;  %v8041_v60 = vadd.f32 %v8040_v49, %v8039_v28  ;;  %v8042_v29 = vpop.f32.mrb[86].mxu0  ;;  %v8103_v62 = vpop.f32.mrb[84].mxu1 }
 0xa60   : > { %v8043_v0 = vpop.f32.mrb[87].mxu0  ;;  %v8104_v59 = vpop.f32.mrb[85].mxu1 }
 0xa61   : > { %v5513_v19 = vadd.f32 %v14460_v61, %v5494_v38  ;;  %v8044_v36 = vadd.f32 %v8043_v0, %v8042_v29  ;;  %v8105_v52 = vadd.f32 %v8104_v59, %v8103_v62  ;;  %v8106_v51 = vpop.f32.mrb[86].mxu1  ;;  %5552 = vrot.lane.b32.xlu0 %v5512_v27, %s9471_s28  ;;  %v5463_v63 = vmul.f32 0.4, %v8041_v60 }
 0xa62   : > { %v8107_v42 = vpop.f32.mrb[87].mxu1 }
 0xa63   : > { %v5479_v43 = vmul.f32 0.6, %v8105_v52  ;;  %v8108_v17 = vadd.f32 %v8107_v42, %v8106_v51  ;;  %5554 = vrot.lane.b32.xlu1 %v5513_v19, %s9471_s28  ;;  %v5464_v57 = vmul.f32 0.4, %v8044_v36 }
 0xa65   : > { %v5495_v12 = vadd.f32 %v5479_v43, %v5463_v63  ;;  %v5480_v34 = vmul.f32 0.6, %v8108_v17  ;;  %v8045_v18 = vpop.f32.mrb[88].mxu0 }
 0xa66   : > { %v8046_v11 = vpop.f32.mrb[89].mxu0 }
 0xa67   : > { %v5514_v2 = vadd.f32 %v14460_v61, %v5495_v12  ;;  %v5496_v50 = vadd.f32 %v5480_v34, %v5464_v57  ;;  %v8047_v7 = vadd.f32 %v8046_v11, %v8045_v18  ;;  %v8048_v58 = vpop.f32.mrb[90].mxu0  ;;  %v8109_v10 = vpop.f32.mrb[88].mxu1 }
 0xa68   : > { %v8049_v35 = vpop.f32.mrb[91].mxu0  ;;  %v8110_v15 = vpop.f32.mrb[89].mxu1 }
 0xa69   : > { %v5515_v8 = vadd.f32 %v14460_v61, %v5496_v50  ;;  %v8050_v1 = vadd.f32 %v8049_v35, %v8048_v58  ;;  %v8111_v13 = vadd.f32 %v8110_v15, %v8109_v10  ;;  %v8112_v21 = vpop.f32.mrb[90].mxu1  ;;  %5556 = vrot.lane.b32.xlu0 %v5514_v2, %s9471_s28  ;;  %v5465_v24 = vmul.f32 0.4, %v8047_v7  ;;  %v14498_v57 = vpop.permute.xlu0 %7097 }
 0xa6a   : > { %v8113_v33 = vpop.f32.mrb[91].mxu1 }
 0xa6b   : > { %v5481_v25 = vmul.f32 0.6, %v8111_v13  ;;  %v8114_v20 = vadd.f32 %v8113_v33, %v8112_v21  ;;  %5558 = vrot.lane.b32.xlu1 %v5515_v8, %s9471_s28  ;;  %v5466_v23 = vmul.f32 0.4, %v8050_v1 }
 0xa6d   : > { %v5497_v46 = vadd.f32 %v5481_v25, %v5465_v24  ;;  %v5482_v40 = vmul.f32 0.6, %v8114_v20  ;;  %v8051_v22 = vpop.f32.mrb[92].mxu0 }
 0xa6e   : > { %v8052_v26 = vpop.f32.mrb[93].mxu0 }
 0xa6f   : > { %v5516_v53 = vadd.f32 %v14460_v61, %v5497_v46  ;;  %v5498_v56 = vadd.f32 %v5482_v40, %v5466_v23  ;;  %v8053_v6 = vadd.f32 %v8052_v26, %v8051_v22  ;;  %v8054_v16 = vpop.f32.mrb[94].mxu0  ;;  %v8115_v31 = vpop.f32.mrb[92].mxu1 }
 0xa70   : > { %v8055_v4 = vpop.f32.mrb[95].mxu0  ;;  %v8116_v9 = vpop.f32.mrb[93].mxu1 }
 0xa71   : > { %v5517_v5 = vadd.f32 %v14460_v61, %v5498_v56  ;;  %v8056_v3 = vadd.f32 %v8055_v4, %v8054_v16  ;;  %v8117_v47 = vadd.f32 %v8116_v9, %v8115_v31  ;;  %v8118_v48 = vpop.f32.mrb[94].mxu1  ;;  %5560 = vrot.lane.b32.xlu0 %v5516_v53, %s9471_s28  ;;  %v5467_v41 = vmul.f32 0.4, %v8053_v6 }
 0xa72   : > { %v8119_v44 = vpop.f32.mrb[95].mxu1 }
 0xa73   : > { %v5483_v45 = vmul.f32 0.6, %v8117_v47  ;;  %v8120_v32 = vadd.f32 %v8119_v44, %v8118_v48  ;;  %5562 = vrot.lane.b32.xlu1 %v5517_v5, %s9471_s28  ;;  %v5468_v55 = vmul.f32 0.4, %v8056_v3 }
 0xa75   : > { %v5499_v37 = vadd.f32 %v5483_v45, %v5467_v41  ;;  %v5484_v30 = vmul.f32 0.6, %v8120_v32 }
 0xa77   : > { %v5518_v14 = vadd.f32 %v14460_v61, %v5499_v37  ;;  %v5500_v54 = vadd.f32 %v5484_v30, %v5468_v55 }
 0xa79   : > { %v5519_v39 = vadd.f32 %v14460_v61, %v5500_v54  ;;  %5564 = vrot.lane.b32.xlu0 %v5518_v14, %s9471_s28 }
 0xa7b   : > { %5566 = vrot.lane.b32.xlu1 %v5519_v39, %s9471_s28 }
 0xa86   : > { %v8137_v28 = vpop.f32.mrb[96].mxu0 }
 0xa87   : > { %v8138_v49 = vpop.f32.mrb[97].mxu0 }
 0xa88   : > { %v8139_v38 = vadd.f32 %v8138_v49, %v8137_v28  ;;  %v8140_v60 = vpop.f32.mrb[98].mxu0 }
 0xa89   : > { %v8141_v29 = vpop.f32.mrb[99].mxu0 }
 0xa8a   : > { %v8142_v62 = vadd.f32 %v8141_v29, %v8140_v60  ;;  %v7049_v51 = vmul.f32 0.4, %v8139_v38 }
 0xa8c   : > { %v8201_v0 = vpop.f32.mrb[96].mxu1  ;;  %v7050_v12 = vmul.f32 0.4, %v8142_v62 }
 0xa8d   : > { %v8202_v59 = vpop.f32.mrb[97].mxu1 }
 0xa8e   : > { %v5537_v27 = vpop.permute.xlu1 %5536  ;;  %v8203_v36 = vadd.f32 %v8202_v59, %v8201_v0  ;;  %v8204_v61 = vpop.f32.mrb[98].mxu1 }
 0xa8f   : > { %5585 = vst.msk [vmem:[%s11550_s27] sm:$0xff] %vm5584_vm6, %v5537_v27  ;;  %v8205_v52 = vpop.f32.mrb[99].mxu1 }
 0xa90   : > { %v7065_v42 = vmul.f32 0.6, %v8203_v36  ;;  %v8206_v63 = vadd.f32 %v8205_v52, %v8204_v61 }
 0xa92   : > { %v5539_v19 = vpop.permute.xlu1 %5538  ;;  %v8143_v43 = vpop.f32.mrb[100].mxu0  ;;  %v7081_v34 = vadd.f32 %v7065_v42, %v7049_v51  ;;  %v7066_v18 = vmul.f32 0.6, %v8206_v63 }
 0xa93   : > { %5586 = vst.msk [vmem:[%s11550_s27 + $0x8] sm:$0xff] %vm5584_vm6, %v5539_v19  ;;  %v8144_v17 = vpop.f32.mrb[101].mxu0 }
 0xa94   : > { %v8145_v11 = vadd.f32 %v8144_v17, %v8143_v43  ;;  %v8146_v2 = vpop.f32.mrb[102].mxu0  ;;  %v7082_v7 = vadd.f32 %v7066_v18, %v7050_v12  ;;  %v7100_v35 = vadd.f32 %v14498_v57, %v7081_v34 }
 0xa95   : > { %v8147_v50 = vpop.f32.mrb[103].mxu0 }
 0xa96   : > { %v8148_v58 = vadd.f32 %v8147_v50, %v8146_v2  ;;  %v8207_v10 = vpop.f32.mrb[100].mxu1  ;;  %7132 = vrot.lane.b32.xlu0 %v7100_v35, %s9468_s25  ;;  %v7101_v13 = vadd.f32 %v14498_v57, %v7082_v7  ;;  %v7051_v33 = vmul.f32 0.4, %v8145_v11 }
 0xa97   : > { %v8208_v15 = vpop.f32.mrb[101].mxu1 }
 0xa98   : > { %v8209_v8 = vadd.f32 %v8208_v15, %v8207_v10  ;;  %v8210_v1 = vpop.f32.mrb[102].mxu1  ;;  %7134 = vrot.lane.b32.xlu1 %v7101_v13, %s9468_s25  ;;  %v7052_v40 = vmul.f32 0.4, %v8148_v58 }
 0xa99   : > { %v8211_v21 = vpop.f32.mrb[103].mxu1 }
 0xa9a   : > { %v7067_v24 = vmul.f32 0.6, %v8209_v8  ;;  %v8212_v25 = vadd.f32 %v8211_v21, %v8210_v1  ;;  %v8149_v20 = vpop.f32.mrb[104].mxu0 }
 0xa9b   : > { %v8150_v46 = vpop.f32.mrb[105].mxu0 }
 0xa9c   : > { %v7083_v22 = vadd.f32 %v7067_v24, %v7051_v33  ;;  %v7068_v26 = vmul.f32 0.6, %v8212_v25  ;;  %v8151_v53 = vadd.f32 %v8150_v46, %v8149_v20  ;;  %v8152_v56 = vpop.f32.mrb[106].mxu0 }
 0xa9d   : > { %v8153_v16 = vpop.f32.mrb[107].mxu0 }
 0xa9e   : > { %v7102_v31 = vadd.f32 %v14498_v57, %v7083_v22  ;;  %v7084_v4 = vadd.f32 %v7068_v26, %v7052_v40  ;;  %v8154_v9 = vadd.f32 %v8153_v16, %v8152_v56  ;;  %v8213_v5 = vpop.f32.mrb[104].mxu1  ;;  %v7053_v45 = vmul.f32 0.4, %v8151_v53 }
 0xa9f   : > { %v8214_v3 = vpop.f32.mrb[105].mxu1 }
 0xaa0   : > { %v5541_v23 = vpop.permute.xlu0 %5540  ;;  %v7103_v47 = vadd.f32 %v14498_v57, %v7084_v4  ;;  %v8215_v48 = vadd.f32 %v8214_v3, %v8213_v5  ;;  %v8216_v44 = vpop.f32.mrb[106].mxu1  ;;  %7136 = vrot.lane.b32.xlu0 %v7102_v31, %s9468_s25  ;;  %v7054_v14 = vmul.f32 0.4, %v8154_v9 }
 0xaa1   : > { %5587 = vst.msk [vmem:[%s11550_s27 + $0x10] sm:$0xff] %vm5584_vm6, %v5541_v23  ;;  %v8217_v41 = vpop.f32.mrb[107].mxu1 }
 0xaa2   : > { %v5543_v6 = vpop.permute.xlu1 %5542  ;;  %v7069_v32 = vmul.f32 0.6, %v8215_v48  ;;  %v8218_v55 = vadd.f32 %v8217_v41, %v8216_v44  ;;  %v8155_v37 = vpop.f32.mrb[108].mxu0  ;;  %7138 = vrot.lane.b32.xlu1 %v7103_v47, %s9468_s25 }
 0xaa3   : > { %5588 = vst.msk [vmem:[%s11550_s27 + $0x18] sm:$0xff] %vm5584_vm6, %v5543_v6  ;;  %v8156_v30 = vpop.f32.mrb[109].mxu0 }
 0xaa4   : > { %v7085_v54 = vadd.f32 %v7069_v32, %v7053_v45  ;;  %v7070_v39 = vmul.f32 0.6, %v8218_v55  ;;  %v8157_v28 = vadd.f32 %v8156_v30, %v8155_v37  ;;  %v8158_v49 = vpop.f32.mrb[110].mxu0 }
 0xaa5   : > { %v8159_v27 = vpop.f32.mrb[111].mxu0 }
 0xaa6   : > { %v7104_v38 = vadd.f32 %v14498_v57, %v7085_v54  ;;  %v7086_v60 = vadd.f32 %v7070_v39, %v7054_v14  ;;  %v8160_v29 = vadd.f32 %v8159_v27, %v8158_v49  ;;  %v8219_v62 = vpop.f32.mrb[108].mxu1  ;;  %v7055_v52 = vmul.f32 0.4, %v8157_v28 }
 0xaa7   : > { %v8220_v0 = vpop.f32.mrb[109].mxu1 }
 0xaa8   : > { %v7105_v59 = vadd.f32 %v14498_v57, %v7086_v60  ;;  %v8221_v19 = vadd.f32 %v8220_v0, %v8219_v62  ;;  %v8222_v36 = vpop.f32.mrb[110].mxu1  ;;  %7140 = vrot.lane.b32.xlu0 %v7104_v38, %s9468_s25  ;;  %v7056_v43 = vmul.f32 0.4, %v8160_v29 }
 0xaa9   : > { %v8223_v61 = vpop.f32.mrb[111].mxu1 }
 0xaaa   : > { %v7071_v51 = vmul.f32 0.6, %v8221_v19  ;;  %v8224_v42 = vadd.f32 %v8223_v61, %v8222_v36  ;;  %7142 = vrot.lane.b32.xlu1 %v7105_v59, %s9468_s25 }
 0xaac   : > { %v7087_v17 = vadd.f32 %v7071_v51, %v7055_v52  ;;  %v7072_v12 = vmul.f32 0.6, %v8224_v42 }
 0xaae   : > { %v7106_v18 = vadd.f32 %v14498_v57, %v7087_v17  ;;  %v7088_v11 = vadd.f32 %v7072_v12, %v7056_v43 }
 0xab0   : > { %v5545_v63 = vpop.permute.xlu0 %5544  ;;  %v7107_v2 = vadd.f32 %v14498_v57, %v7088_v11  ;;  %7144 = vrot.lane.b32.xlu0 %v7106_v18, %s9468_s25 }
 0xab1   : > { %5589 = vst.msk [vmem:[%s11550_s27 + $0x20] sm:$0xff] %vm5584_vm6, %v5545_v63 }
 0xab2   : > { %v5547_v34 = vpop.permute.xlu1 %5546  ;;  %7146 = vrot.lane.b32.xlu1 %v7107_v2, %s9468_s25 }
 0xab3   : > { %5590 = vst.msk [vmem:[%s11550_s27 + $0x28] sm:$0xff] %vm5584_vm6, %v5547_v34 }
 0xab4   : > { %v8161_v50 = vpop.f32.mrb[112].mxu0 }
 0xab5   : > { %v8162_v7 = vpop.f32.mrb[113].mxu0 }
 0xab6   : > { %v8163_v58 = vadd.f32 %v8162_v7, %v8161_v50  ;;  %v8164_v10 = vpop.f32.mrb[114].mxu0 }
 0xab7   : > { %v8165_v35 = vpop.f32.mrb[115].mxu0 }
 0xab8   : > { %v8166_v15 = vadd.f32 %v8165_v35, %v8164_v10  ;;  %v7057_v24 = vmul.f32 0.4, %v8163_v58 }
 0xab9   : > { %v8225_v8 = vpop.f32.mrb[112].mxu1 }
 0xaba   : > { %v8226_v1 = vpop.f32.mrb[113].mxu1  ;;  %v7058_v46 = vmul.f32 0.4, %v8166_v15 }
 0xabb   : > { %v8227_v13 = vadd.f32 %v8226_v1, %v8225_v8  ;;  %v8228_v21 = vpop.f32.mrb[114].mxu1 }
 0xabc   : > { %v8229_v33 = vpop.f32.mrb[115].mxu1 }
 0xabd   : > { %v7073_v25 = vmul.f32 0.6, %v8227_v13  ;;  %v8230_v20 = vadd.f32 %v8229_v33, %v8228_v21 }
 0xabf   : > { %v7089_v40 = vadd.f32 %v7073_v25, %v7057_v24  ;;  %v7074_v22 = vmul.f32 0.6, %v8230_v20 }
 0xac1   : > { %v7108_v53 = vadd.f32 %v14498_v57, %v7089_v40  ;;  %v7090_v56 = vadd.f32 %v7074_v22, %v7058_v46 }
 0xac2   : > { %v5549_v23 = vpop.permute.xlu0 %5548 }
 0xac3   : > { %5591 = vst.msk [vmem:[%s11550_s27 + $0x30] sm:$0xff] %vm5584_vm6, %v5549_v23  ;;  %v7109_v6 = vadd.f32 %v14498_v57, %v7090_v56  ;;  %7148 = vrot.lane.b32.xlu0 %v7108_v53, %s9468_s25 }
 0xac4   : > { %v5551_v26 = vpop.permute.xlu1 %5550 }
 0xac5   : > { %5592 = vst.msk [vmem:[%s11550_s27 + $0x38] sm:$0xff] %vm5584_vm6, %v5551_v26  ;;  %7150 = vrot.lane.b32.xlu1 %v7109_v6, %s9468_s25 }
 0xac7   : > { %v8167_v16 = vpop.f32.mrb[116].mxu0 }
 0xac8   : > { %v8168_v31 = vpop.f32.mrb[117].mxu0 }
 0xac9   : > { %v8169_v4 = vadd.f32 %v8168_v31, %v8167_v16  ;;  %v8170_v9 = vpop.f32.mrb[118].mxu0 }
 0xaca   : > { %v8171_v5 = vpop.f32.mrb[119].mxu0 }
 0xacb   : > { %v8172_v3 = vadd.f32 %v8171_v5, %v8170_v9  ;;  %v7059_v32 = vmul.f32 0.4, %v8169_v4 }
 0xacc   : > { %v8231_v47 = vpop.f32.mrb[116].mxu1 }
 0xacd   : > { %v8232_v48 = vpop.f32.mrb[117].mxu1  ;;  %v7060_v14 = vmul.f32 0.4, %v8172_v3 }
 0xace   : > { %v8233_v44 = vadd.f32 %v8232_v48, %v8231_v47  ;;  %v8234_v41 = vpop.f32.mrb[118].mxu1 }
 0xacf   : > { %v8235_v45 = vpop.f32.mrb[119].mxu1 }
 0xad0   : > { %v7075_v55 = vmul.f32 0.6, %v8233_v44  ;;  %v8236_v37 = vadd.f32 %v8235_v45, %v8234_v41 }
 0xad2   : > { %v7091_v54 = vadd.f32 %v7075_v55, %v7059_v32  ;;  %v7076_v39 = vmul.f32 0.6, %v8236_v37 }
 0xad3   : > { %v5553_v30 = vpop.permute.xlu0 %5552 }
 0xad4   : > { %5593 = vst.msk [vmem:[%s11550_s27 + $0x40] sm:$0xff] %vm5584_vm6, %v5553_v30  ;;  %v7110_v49 = vadd.f32 %v14498_v57, %v7091_v54  ;;  %v7092_v27 = vadd.f32 %v7076_v39, %v7060_v14 }
 0xad5   : > { %v5555_v28 = vpop.permute.xlu1 %5554 }
 0xad6   : > { %5594 = vst.msk [vmem:[%s11550_s27 + $0x48] sm:$0xff] %vm5584_vm6, %v5555_v28  ;;  %v7111_v38 = vadd.f32 %v14498_v57, %v7092_v27  ;;  %7152 = vrot.lane.b32.xlu0 %v7110_v49, %s9468_s25 }
 0xad8   : > { %v8173_v60 = vpop.f32.mrb[120].mxu0  ;;  %7154 = vrot.lane.b32.xlu1 %v7111_v38, %s9468_s25 }
 0xad9   : > { %v8174_v62 = vpop.f32.mrb[121].mxu0 }
 0xada   : > { %v8175_v0 = vadd.f32 %v8174_v62, %v8173_v60  ;;  %v8176_v59 = vpop.f32.mrb[122].mxu0 }
 0xadb   : > { %v5557_v29 = vpop.permute.xlu0 %5556  ;;  %v8177_v36 = vpop.f32.mrb[123].mxu0 }
 0xadc   : > { %5595 = vst.msk [vmem:[%s11550_s27 + $0x50] sm:$0xff] %vm5584_vm6, %v5557_v29  ;;  %v8178_v61 = vadd.f32 %v8177_v36, %v8176_v59  ;;  %v8237_v52 = vpop.f32.mrb[120].mxu1  ;;  %v7061_v17 = vmul.f32 0.4, %v8175_v0 }
 0xadd   : > { %v5559_v19 = vpop.permute.xlu1 %5558  ;;  %v8238_v51 = vpop.f32.mrb[121].mxu1 }
 0xade   : > { %5596 = vst.msk [vmem:[%s11550_s27 + $0x58] sm:$0xff] %vm5584_vm6, %v5559_v19  ;;  %v8239_v42 = vadd.f32 %v8238_v51, %v8237_v52  ;;  %v8240_v63 = vpop.f32.mrb[122].mxu1  ;;  %v7062_v11 = vmul.f32 0.4, %v8178_v61 }
 0xadf   : > { %v8241_v43 = vpop.f32.mrb[123].mxu1 }
 0xae0   : > { %v7077_v12 = vmul.f32 0.6, %v8239_v42  ;;  %v8242_v34 = vadd.f32 %v8241_v43, %v8240_v63 }
 0xae2   : > { %v7093_v2 = vadd.f32 %v7077_v12, %v7061_v17  ;;  %v7078_v50 = vmul.f32 0.6, %v8242_v34 }
 0xae3   : > { %v5561_v18 = vpop.permute.xlu0 %5560 }
 0xae4   : > { %5597 = vst.msk [vmem:[%s11550_s27 + $0x60] sm:$0xff] %vm5584_vm6, %v5561_v18  ;;  %v7112_v58 = vadd.f32 %v14498_v57, %v7093_v2  ;;  %v7094_v10 = vadd.f32 %v7078_v50, %v7062_v11 }
 0xae5   : > { %v5563_v7 = vpop.permute.xlu1 %5562 }
 0xae6   : > { %5598 = vst.msk [vmem:[%s11550_s27 + $0x68] sm:$0xff] %vm5584_vm6, %v5563_v7  ;;  %v7113_v35 = vadd.f32 %v14498_v57, %v7094_v10  ;;  %7156 = vrot.lane.b32.xlu0 %v7112_v58, %s9468_s25 }
 0xae8   : > { %7158 = vrot.lane.b32.xlu1 %v7113_v35, %s9468_s25 }
 0xaea   : > { %v8179_v15 = vpop.f32.mrb[124].mxu0 }
 0xaeb   : > { %v8180_v8 = vpop.f32.mrb[125].mxu0  ;;  %v5565_v1 = vpop.permute.xlu0 %5564 }
 0xaec   : > { %v8181_v13 = vadd.f32 %v8180_v8, %v8179_v15  ;;  %5599 = vst.msk [vmem:[%s11550_s27 + $0x70] sm:$0xff] %vm5584_vm6, %v5565_v1  ;;  %v8182_v21 = vpop.f32.mrb[126].mxu0 }
 0xaed   : > { %v8183_v33 = vpop.f32.mrb[127].mxu0  ;;  %v5567_v24 = vpop.permute.xlu1 %5566 }
 0xaee   : > { %v8184_v25 = vadd.f32 %v8183_v33, %v8182_v21  ;;  %5600 = vst.msk [vmem:[%s11550_s27 + $0x78] sm:$0xff] %vm5584_vm6, %v5567_v24  ;;  %v8243_v20 = vpop.f32.mrb[124].mxu1  ;;  %v7063_v26 = vmul.f32 0.4, %v8181_v13 }
 0xaef   : > { %v8244_v23 = vpop.f32.mrb[125].mxu1 }
 0xaf0   : > { %v8245_v46 = vadd.f32 %v8244_v23, %v8243_v20  ;;  %v8246_v40 = vpop.f32.mrb[126].mxu1  ;;  %v7064_v6 = vmul.f32 0.4, %v8184_v25 }
 0xaf1   : > { %v8247_v22 = vpop.f32.mrb[127].mxu1 }
 0xaf2   : > { %v7079_v53 = vmul.f32 0.6, %v8245_v46  ;;  %v8248_v56 = vadd.f32 %v8247_v22, %v8246_v40 }
 0xaf4   : > { %v7095_v16 = vadd.f32 %v7079_v53, %v7063_v26  ;;  %v7080_v31 = vmul.f32 0.6, %v8248_v56 }
 0xaf6   : > { %v7114_v4 = vadd.f32 %v14498_v57, %v7095_v16  ;;  %v7096_v9 = vadd.f32 %v7080_v31, %v7064_v6 }
 0xaf8   : > { %v7115_v5 = vadd.f32 %v14498_v57, %v7096_v9  ;;  %7160 = vrot.lane.b32.xlu0 %v7114_v4, %s9468_s25 }
 0xafa   : > { %7162 = vrot.lane.b32.xlu1 %v7115_v5, %s9468_s25  ;;  %s7657_s25 = sshll.u32 %s9546_s13, 11  ;;  %s9401_s13 = scalar_lea.vmem %s14595_s21, 2048 }
 0xafb   : > { %s14593_s24 = scalar_lea.hbm %s14654_s9, %s7657_s25  ;;  %p9402_p0 = scmp.ne.s32.totalorder %s14595_s21, %s9401_s13 }
 0xafc   : > { %p9409_p4 = scmp.lt.s32.totalorder %s9407_s22, %s9401_s13 }
 0xafd   : > { %p9403_p1 = pnand %p9402_p0, %p9564_p6 }
 0xafe   : > { %p9410_p5 = por %p9409_p4, %p9408_p3 }
 0xaff   : > { %p9404_p2 = pneg %p9403_p1 }
 0xb01   : > { %p9411_p7 = pnand %p9410_p5, %p9404_p2 }
 0xb08   : > { %v7133_v3 = vpop.permute.xlu0 %7132 }
 0xb09   : > { %7181 = vst.msk [vmem:[%s11550_s27] sm:$0xff] %vm7180_vm0, %v7133_v3 }
 0xb0a   : > { %v7135_v47 = vpop.permute.xlu1 %7134 }
 0xb0b   : > { %7182 = vst.msk [vmem:[%s11550_s27 + $0x8] sm:$0xff] %vm7180_vm0, %v7135_v47 }
 0xb12   : > { %v7137_v48 = vpop.permute.xlu0 %7136 }
 0xb13   : > { %7183 = vst.msk [vmem:[%s11550_s27 + $0x10] sm:$0xff] %vm7180_vm0, %v7137_v48 }
 0xb14   : > { %v7139_v57 = vpop.permute.xlu1 %7138 }
 0xb15   : > { %7184 = vst.msk [vmem:[%s11550_s27 + $0x18] sm:$0xff] %vm7180_vm0, %v7139_v57 }
 0xb1a   : > { %v7141_v44 = vpop.permute.xlu0 %7140 }
 0xb1b   : > { %7185 = vst.msk [vmem:[%s11550_s27 + $0x20] sm:$0xff] %vm7180_vm0, %v7141_v44 }
 0xb1c   : > { %v7143_v41 = vpop.permute.xlu1 %7142 }
 0xb1d   : > { %7186 = vst.msk [vmem:[%s11550_s27 + $0x28] sm:$0xff] %vm7180_vm0, %v7143_v41 }
 0xb22   : > { %v7145_v45 = vpop.permute.xlu0 %7144 }
 0xb23   : > { %7187 = vst.msk [vmem:[%s11550_s27 + $0x30] sm:$0xff] %vm7180_vm0, %v7145_v45 }
 0xb24   : > { %v7147_v32 = vpop.permute.xlu1 %7146 }
 0xb25   : > { %7188 = vst.msk [vmem:[%s11550_s27 + $0x38] sm:$0xff] %vm7180_vm0, %v7147_v32 }
 0xb35   : > { %v7149_v55 = vpop.permute.xlu0 %7148 }
 0xb36   : > { %7189 = vst.msk [vmem:[%s11550_s27 + $0x40] sm:$0xff] %vm7180_vm0, %v7149_v55 }
 0xb37   : > { %v7151_v37 = vpop.permute.xlu1 %7150 }
 0xb38   : > { %7190 = vst.msk [vmem:[%s11550_s27 + $0x48] sm:$0xff] %vm7180_vm0, %v7151_v37 }
 0xb48   : > { %v7153_v30 = vpop.permute.xlu0 %7152 }
 0xb49   : > { %7191 = vst.msk [vmem:[%s11550_s27 + $0x50] sm:$0xff] %vm7180_vm0, %v7153_v30 }
 0xb4a   : > { %v7155_v14 = vpop.permute.xlu1 %7154 }
 0xb4b   : > { %7192 = vst.msk [vmem:[%s11550_s27 + $0x58] sm:$0xff] %vm7180_vm0, %v7155_v14 }
 0xb58   : > { %v7157_v54 = vpop.permute.xlu0 %7156 }
 0xb59   : > { %7193 = vst.msk [vmem:[%s11550_s27 + $0x60] sm:$0xff] %vm7180_vm0, %v7157_v54 }
 0xb5a   : > { %v7159_v39 = vpop.permute.xlu1 %7158 }
 0xb5b   : > { %7194 = vst.msk [vmem:[%s11550_s27 + $0x68] sm:$0xff] %vm7180_vm0, %v7159_v39 }
 0xb6a   : > { %v7161_v28 = vpop.permute.xlu0 %7160 }
 0xb6b   : > { %7195 = vst.msk [vmem:[%s11550_s27 + $0x70] sm:$0xff] %vm7180_vm0, %v7161_v28 }
 0xb6c   : > { %v7163_v49 = vpop.permute.xlu1 %7162 }
 0xb6d   : > { %7196 = vst.msk [vmem:[%s11550_s27 + $0x78] sm:$0xff] %vm7180_vm0, %v7163_v49 }
 0xb6e   : > { %9414 = shalt.err (!%p9411_p7)
}
 0xb6f   : > { %s9415_s29 = scalar_lea.hbm %s14593_s24, 2048  ;;  %s9419_s25 = scalar_lea.hbm %s14654_s9, 4096 }
 0xb70   : > { %p9416_p10 = scmp.ne.s32.totalorder %s14593_s24, %s9415_s29  ;;  %p9420_p13 = scmp.lt.u32.totalorder %s14593_s24, %s14654_s9 }
 0xb71   : > { %p9421_p0 = scmp.lt.u32.totalorder %s9419_s25, %s9415_s29  ;;  %p9423_p2 = scmp.lt.u32.totalorder %s9415_s29, %s14593_s24 }
 0xb72   : > { %p9417_p11 = pnand %p9416_p10, %p9564_p6 }
 0xb73   : > { %p9422_p1 = por %p9421_p0, %p9420_p13 }
 0xb74   : > { %p9418_p12 = pneg %p9417_p11 }
 0xb75   : > { %p9424_p3 = por %p9423_p2, %p9422_p1 }
 0xb77   : > { %p9425_p4 = pnand %p9424_p3, %p9418_p12 }
 0xb79   : > { %9428 = shalt.err (!%p9425_p4)
}
 0xb7a   : > { %s9473_s13 = smov 128   ;;  %s9474_s14 = smov 8  }
 0xb7b   : > { %8249 = dma.vmem_to_hbm [thread:$0]  (%p9564_p6), %s14595_s21, 2048, %s14593_s24, %s14603_s26, %s9473_s13, %s9473_s13, %s9474_s14  }
 0xb7c PF: > { %s7226_s23 = sand.u32 1, %s9451_s30   ;;  %p8252_p5 = pnand %p7317_p9, %p9568_p8 }
 0xb7d   : > { %s7227_s22 = scalar_lea.sflag [#allocation4], %s7226_s23 }
 0xb7e   : > { %9446 = dma.done.wait (!%p8252_p5), %s7227_s22, 2048  }
 0xb7f   : > { %9448 = vsyncadd (!%p8252_p5), %s7227_s22, 4294965248  ;;  %p19_p7 = scmp.ge.s32.totalorder %s9550_s15, 4   ;;  %s16276_s30 = smov %s9455_s10 }
 0xb80   : > { %s16277_s10 = smov %s9459_s11  ;;  %s16278_s11 = smov %s9562_s18 }
 0xb81   : > { %s16279_s12 = smov %s9550_s15  ;;  %21 = sbr.rel (!%p19_p7) target bundleno = 3 (0x3), region = 152 }
 0xb88   :  { %7232 = vsyncpa [#allocation4], 1 }
 0xb89   :  { %7234 = vsyncpa [#allocation4 + $0x1], 1 }

</bundles_post_ra>
